<compile_context>
chip_gen: v5e
topology: v5e:2x2
jax: 0.10.0
libtpu: 0.0.40
codegen_flags: <defaults>
</compile_context>

<pallas_src>
import math
import functools

import jax
import jax.numpy as jnp
from jax.experimental import pallas as pl
from jax.experimental.pallas import tpu as pltpu


_MM_DTYPE = jnp.bfloat16   # matmul-input / HBM-intermediate dtype (f32 accum)


def _mm(a, b):
    """MXU matmul with low-precision inputs and f32 accumulation."""
    return jnp.dot(a.astype(_MM_DTYPE), b.astype(_MM_DTYPE),
                   preferred_element_type=jnp.float32)


def _row_tile(n):
    # Full array if small, else 512-row tiles (multiple of 8 sublanes).
    return n if n <= 512 else 512


def _cparams(semantics, est_bytes):
    # Explicit scoped-VMEM limit: double-buffered estimate + slack, clamped to
    # [32 MiB, 64 MiB] so it is valid on v5e / v6e / v7x alike.
    limit = int(min(max(2 * int(est_bytes) + (4 << 20), 32 << 20), 64 << 20))
    return pltpu.CompilerParams(dimension_semantics=semantics,
                                vmem_limit_bytes=limit)


# ----------------------------------------------------------------------------
# Kernel 1: row-tiled linear (input projection)
# ----------------------------------------------------------------------------

def _linear_kernel(x_ref, w_ref, b_ref, o_ref):
    o_ref[...] = _mm(x_ref[...], w_ref[...]) + b_ref[...]


def linear_tiled(x, w, b):
    M, K = x.shape
    N = w.shape[1]
    TM = _row_tile(M)
    est = 4 * TM * (K + N) + 2 * K * N
    return pl.pallas_call(
        _linear_kernel,
        out_shape=jax.ShapeDtypeStruct((M, N), jnp.float32),
        grid=(pl.cdiv(M, TM),),
        in_specs=[pl.BlockSpec((TM, K), lambda i: (i, 0)),
                  pl.BlockSpec((K, N), lambda i: (0, 0)),
                  pl.BlockSpec((1, N), lambda i: (0, 0))],
        out_specs=pl.BlockSpec((TM, N), lambda i: (i, 0)),
        compiler_params=_cparams(("parallel",), est),
    )(x, w, b.reshape(1, N))


# ----------------------------------------------------------------------------
# Kernel 2: causal dilated conv + LayerNorm + GELU + per-head Q/K/V projection
# ----------------------------------------------------------------------------

def _conv_qkv_kernel(x_ref, wc_ref, bc_ref, g_ref, beta_ref,
                     wq_ref, bq_ref, wk_ref, bk_ref, wv_ref, bv_ref,
                     q_ref, k_ref, v_ref, *, K, dilation, heads):
    x = x_ref[...]                               # (S, Cin) f32
    S, Cin = x.shape
    Cout = wc_ref.shape[2]

    # Causal dilated conv as K accumulating matmuls on causally shifted rows
    # (in-kernel zero "padding"; taps fully in the pad region are skipped).
    acc = jnp.zeros((S, Cout), jnp.float32) + bc_ref[...]
    for kk in range(K):
        shift = (K - 1 - kk) * dilation          # static Python int
        if shift >= S:
            continue
        if shift == 0:
            xk = x
        else:
            xk = jnp.concatenate(
                [jnp.zeros((shift, Cin), x.dtype), x[:S - shift, :]], axis=0)
        acc = acc + jnp.dot(xk.astype(_MM_DTYPE), wc_ref[kk],
                            preferred_element_type=jnp.float32)

    # LayerNorm over channels (eps=1e-5, PyTorch default), f32.
    mean = jnp.mean(acc, axis=-1, keepdims=True)
    var = jnp.mean((acc - mean) ** 2, axis=-1, keepdims=True)
    y = (acc - mean) * jax.lax.rsqrt(var + 1e-5) * g_ref[...] + beta_ref[...]
    # Exact GELU (erf), matching nn.GELU(approximate='none').
    y = 0.5 * y * (1.0 + jax.lax.erf(y * (1.0 / math.sqrt(2.0))))
    yb = y.astype(_MM_DTYPE)

    # Per-head Q/K/V projections, written head-major (conv output never
    # leaves VMEM).  heads is small -> static loop; static first-axis stores.
    for hh in range(heads):
        q_ref[hh] = (jnp.dot(yb, wq_ref[hh], preferred_element_type=jnp.float32)
                     + bq_ref[hh]).astype(q_ref.dtype)
        k_ref[hh] = (jnp.dot(yb, wk_ref[hh], preferred_element_type=jnp.float32)
                     + bk_ref[hh]).astype(k_ref.dtype)
        v_ref[hh] = (jnp.dot(yb, wv_ref[hh], preferred_element_type=jnp.float32)
                     + bv_ref[hh]).astype(v_ref.dtype)


def conv_ln_gelu_qkv(x, conv_w, conv_b, ln_g, ln_b,
                     wq, bq, wk, bk, wv, bv,
                     *, K, dilation, heads, head_dim):
    B, S, Cin = x.shape
    Cout = conv_w.shape[2]
    hd = head_dim
    kern = functools.partial(_conv_qkv_kernel, K=K, dilation=dilation,
                             heads=heads)
    wconst = lambda shp: pl.BlockSpec(shp, lambda b: tuple(0 for _ in shp))
    qkv_sds = jax.ShapeDtypeStruct((B, heads, S, hd), _MM_DTYPE)
    est = (4 * S * Cin + 2 * (K * Cin * Cout + 3 * heads * Cout * hd)
           + 2 * 3 * heads * S * hd + 4 * S * Cout * 3)
    return pl.pallas_call(
        kern,
        out_shape=(qkv_sds, qkv_sds, qkv_sds),
        grid=(B,),
        in_specs=[
            pl.BlockSpec((None, S, Cin), lambda b: (b, 0, 0)),
            wconst((K, Cin, Cout)),
            wconst((1, Cout)), wconst((1, Cout)), wconst((1, Cout)),
            wconst((heads, Cout, hd)), wconst((heads, 1, hd)),
            wconst((heads, Cout, hd)), wconst((heads, 1, hd)),
            wconst((heads, Cout, hd)), wconst((heads, 1, hd)),
        ],
        out_specs=(pl.BlockSpec((None, heads, S, hd), lambda b: (b, 0, 0, 0)),
                   pl.BlockSpec((None, heads, S, hd), lambda b: (b, 0, 0, 0)),
                   pl.BlockSpec((None, heads, S, hd), lambda b: (b, 0, 0, 0))),
        compiler_params=_cparams(("parallel",), est),
    )(x, conv_w, conv_b.reshape(1, Cout), ln_g.reshape(1, Cout),
      ln_b.reshape(1, Cout), wq, bq, wk, bk, wv, bv)


# ----------------------------------------------------------------------------
# Kernel 3: MHA + out-proj + level transform + gate + residual + LN + level
#           projection, tiled over (batch, q-tiles); K/V resident.
# ----------------------------------------------------------------------------

def _attn_epilogue_kernel(q_ref, k_ref, v_ref, cur_ref,
                          wao_ref, bao_ref, wt_ref, bt_ref, wg_ref, bg_ref,
                          g_ref, beta_ref, wlp_ref, blp_ref,
                          newh_ref, lvl_ref, acc_ref, *, heads, head_dim):
    scale = 1.0 / math.sqrt(head_dim)
    acc_ref[...] = jnp.zeros_like(acc_ref)

    # fori_loop over heads bounds live ranges to ONE head's (TQ, S) temps;
    # per-head out-proj contribution is accumulated directly (no lane concat).
    def head_body(hh, carry):
        q = q_ref[hh]                            # (TQ, hd) bf16
        k = k_ref[hh]                            # (S,  hd) bf16
        v = v_ref[hh]                            # (S,  hd) bf16
        s = jax.lax.dot_general(                 # QK^T without explicit .T
            q, k, (((1,), (1,)), ((), ())),
            preferred_element_type=jnp.float32) * scale
        m = jnp.max(s, axis=-1, keepdims=True)
        p = jnp.exp(s - m)
        p = p * pl.reciprocal(jnp.sum(p, axis=-1, keepdims=True), approx=True)
        ctx = jnp.dot(p.astype(_MM_DTYPE), v,
                      preferred_element_type=jnp.float32)      # (TQ, hd)
        acc_ref[...] += jnp.dot(ctx.astype(_MM_DTYPE), wao_ref[hh],
                                preferred_element_type=jnp.float32)
        return carry

    jax.lax.fori_loop(0, heads, head_body, 0)

    h = cur_ref[...]                             # (TQ, H) f32
    attn_out = acc_ref[...] + bao_ref[...]
    f = _mm(attn_out, wt_ref[...]) + bt_ref[...]             # level transform
    # Gate fused into ONE matmul over the lane-concatenated [h | f].
    gate_in = jnp.concatenate([h, f], axis=-1)
    gate = jax.nn.sigmoid(_mm(gate_in, wg_ref[...]) + bg_ref[...])
    new_h = h + gate * f                                      # residual
    mean = jnp.mean(new_h, axis=-1, keepdims=True)
    var = jnp.mean((new_h - mean) ** 2, axis=-1, keepdims=True)
    ln_h = (new_h - mean) * jax.lax.rsqrt(var + 1e-5) * g_ref[...] \
        + beta_ref[...]
    newh_ref[...] = ln_h
    lvl_ref[...] = (_mm(ln_h, wlp_ref[...]) + blp_ref[...]).astype(lvl_ref.dtype)


def level_attn_epilogue(q, k, v, cur, wao, bao, wt, bt, wg, bg, ln_g, ln_b,
                        wlp, blp, *, heads, head_dim):
    B, _, S, hd = q.shape
    H = cur.shape[-1]
    TQ = _row_tile(S)
    nq = pl.cdiv(S, TQ)
    kern = functools.partial(_attn_epilogue_kernel, heads=heads,
                             head_dim=head_dim)
    wconst = lambda shp: pl.BlockSpec(shp, lambda b, t: tuple(0 for _ in shp))
    est = (2 * heads * (TQ + 2 * S) * hd + 4 * TQ * H * 6 + 4 * TQ * S * 3
           + 2 * (heads * hd * H + 3 * H * H + 2 * H * H))
    return pl.pallas_call(
        kern,
        out_shape=(jax.ShapeDtypeStruct((B, S, H), jnp.float32),
                   jax.ShapeDtypeStruct((B, S, H), _MM_DTYPE)),
        grid=(B, nq),
        in_specs=[
            pl.BlockSpec((None, heads, TQ, hd), lambda b, t: (b, 0, t, 0)),
            pl.BlockSpec((None, heads, S, hd), lambda b, t: (b, 0, 0, 0)),
            pl.BlockSpec((None, heads, S, hd), lambda b, t: (b, 0, 0, 0)),
            pl.BlockSpec((None, TQ, H), lambda b, t: (b, t, 0)),
            wconst((heads, hd, H)), wconst((1, H)),
            wconst((H, H)), wconst((1, H)),
            wconst((2 * H, H)), wconst((1, H)),
            wconst((1, H)), wconst((1, H)),
            wconst((H, H)), wconst((1, H)),
        ],
        out_specs=(pl.BlockSpec((None, TQ, H), lambda b, t: (b, t, 0)),
                   pl.BlockSpec((None, TQ, H), lambda b, t: (b, t, 0))),
        scratch_shapes=[pltpu.VMEM((TQ, H), jnp.float32)],
        compiler_params=_cparams(("parallel", "arbitrary"), est),
    )(q, k, v, cur, wao, bao.reshape(1, H), wt, bt.reshape(1, H),
      wg, bg.reshape(1, H), ln_g.reshape(1, H), ln_b.reshape(1, H),
      wlp, blp.reshape(1, H))


# ----------------------------------------------------------------------------
# Kernel 4: cross-level MHA + level mean + packed (backcast | output) proj.
# ----------------------------------------------------------------------------

def _cross_final_kernel(*refs, L, heads, H):
    lv_refs = refs[:L]
    wqkv_ref, bqkv_ref, wo_ref, bo_ref, wf_ref, bf_ref, out_ref = refs[L:]
    hd = H // heads
    scale = 1.0 / math.sqrt(hd)
    TM = lv_refs[0].shape[0]

    # One fused QKV matmul over all L level blocks (row concat is a cheap
    # in-VMEM sublane copy; levels sliced back by static row ranges).
    x_all = jnp.concatenate([r[...] for r in lv_refs], axis=0)    # (L*TM, H)
    qkv = jnp.dot(x_all.astype(_MM_DTYPE), wqkv_ref[...],
                  preferred_element_type=jnp.float32) + bqkv_ref[...]

    # MHA over the (tiny) level axis, batched over tokens with lane-local VPU
    # math (no transposes).  The mean over query levels commutes with the
    # linear out-proj, so only the mean context is projected.
    ctx_parts = []
    for hh in range(heads):
        ks = [qkv[j * TM:(j + 1) * TM, H + hh * hd:H + (hh + 1) * hd]
              for j in range(L)]
        vs = [qkv[j * TM:(j + 1) * TM, 2 * H + hh * hd:2 * H + (hh + 1) * hd]
              for j in range(L)]
        ch = jnp.zeros((TM, hd), jnp.float32)
        for i in range(L):                                    # query level
            qi = qkv[i * TM:(i + 1) * TM, hh * hd:(hh + 1) * hd]
            s = jnp.concatenate(
                [jnp.sum(qi * ks[j], axis=-1, keepdims=True) * scale
                 for j in range(L)], axis=-1)                 # (TM, L)
            m = jnp.max(s, axis=-1, keepdims=True)
            p = jnp.exp(s - m)
            p = p * pl.reciprocal(jnp.sum(p, axis=-1, keepdims=True),
                                  approx=True)
            c = jnp.zeros((TM, hd), jnp.float32)
            for j in range(L):
                c = c + p[:, j:j + 1] * vs[j]
            ch = ch + c
        ctx_parts.append(ch)
    ctx_mean = jnp.concatenate(ctx_parts, axis=-1) * (1.0 / L)    # (TM, H)
    final = _mm(ctx_mean, wo_ref[...]) + bo_ref[...]
    # Packed lane-dense (backcast | output) projection; split in the wrapper.
    out_ref[...] = _mm(final, wf_ref[...]) + bf_ref[...]


def cross_level_final(level_outs, wqkv, bqkv, wo, bo, wf, bf_, *, heads):
    L = len(level_outs)
    M, H = level_outs[0].shape
    DF = wf.shape[1]
    TM = _row_tile(M)
    kern = functools.partial(_cross_final_kernel, L=L, heads=heads, H=H)
    wconst = lambda shp: pl.BlockSpec(shp, lambda i: tuple(0 for _ in shp))
    est = (2 * L * TM * H + 2 * (3 * H * H + H * H + H * DF)
           + 4 * L * TM * 3 * H + 4 * TM * DF)
    return pl.pallas_call(
        kern,
        out_shape=jax.ShapeDtypeStruct((M, DF), jnp.float32),
        grid=(pl.cdiv(M, TM),),
        in_specs=([pl.BlockSpec((TM, H), lambda i: (i, 0)) for _ in range(L)]
                  + [wconst((H, 3 * H)), wconst((1, 3 * H)),
                     wconst((H, H)), wconst((1, H)),
                     wconst((H, DF)), wconst((1, DF))]),
        out_specs=pl.BlockSpec((TM, DF), lambda i: (i, 0)),
        compiler_params=_cparams(("parallel",), est),
    )(*level_outs, wqkv, bqkv.reshape(1, 3 * H), wo, bo.reshape(1, H),
      wf, bf_.reshape(1, DF))


def _final_only_kernel(x_ref, wf_ref, bf_ref, o_ref):
    o_ref[...] = _mm(x_ref[...], wf_ref[...]) + bf_ref[...]


def final_only(x, wf, bf_):
    # num_levels == 1 path (no cross-level attention in the reference module).
    M, H = x.shape
    DF = wf.shape[1]
    TM = _row_tile(M)
    est = 2 * TM * H + 2 * H * DF + 4 * TM * DF
    return pl.pallas_call(
        _final_only_kernel,
        out_shape=jax.ShapeDtypeStruct((M, DF), jnp.float32),
        grid=(pl.cdiv(M, TM),),
        in_specs=[pl.BlockSpec((TM, H), lambda i: (i, 0)),
                  pl.BlockSpec((H, DF), lambda i: (0, 0)),
                  pl.BlockSpec((1, DF), lambda i: (0, 0))],
        out_specs=pl.BlockSpec((TM, DF), lambda i: (i, 0)),
        compiler_params=_cparams(("parallel",), est),
    )(x, wf, bf_.reshape(1, DF))


# ----------------------------------------------------------------------------
# Parameter init (deterministic, PyTorch-Linear-style uniform bounds), with
# kernel-friendly prepacking done once:
#   * conv weight as [K, Cin, Cout],
#   * per-head Q/K/V weights as [heads, H, head_dim] (head-major),
#   * attention out-proj as [heads, head_dim, H],
#   * fused cross-level QKV weight [H, 3H],
#   * backcast|output weights packed into one lane-dense [H, Din+Dout],
#   * matmul weights stored in bf16 (biases / LN params stay f32).
# ----------------------------------------------------------------------------

def init_params(key, input_dim, hidden_dim, output_dim, num_levels,
                kernel_size, attention_heads):
    H = hidden_dim
    heads = attention_heads
    head_dim = H // 2                 # HierarchicalAttention per-head dim
    keys = iter(jax.random.split(key, 64 + 16 * num_levels))

    def uniform(shape, bound):
        return jax.random.uniform(next(keys), shape, jnp.float32, -bound, bound)

    def lin(din, dout, fan_in=None):
        b = 1.0 / math.sqrt(fan_in if fan_in is not None else din)
        return uniform((din, dout), b).astype(_MM_DTYPE), uniform((dout,), b)

    params = {"layer_norm": (jnp.ones((H,), jnp.float32),
                             jnp.zeros((H,), jnp.float32)),
              "levels": []}
    params["input_proj_w"], params["input_proj_b"] = lin(input_dim, H)

    # cross_level_attention (nn.MultiheadAttention): fused in_proj + out_proj.
    # TODO(synk): PyTorch uses xavier_uniform_ for in_proj; values differ here
    #             but the math is identical when importing a real checkpoint.
    params["cross_qkv_w"], params["cross_qkv_b"] = lin(H, 3 * H)
    params["cross_out_w"], params["cross_out_b"] = lin(H, H)

    # backcast / output projections packed into one lane-dense weight.
    wb, bb = lin(H, input_dim)
    wy, by = lin(H, output_dim)
    params["final_w"] = jnp.concatenate([wb, wy], axis=1)
    params["final_b"] = jnp.concatenate([bb, by], axis=0)

    for _ in range(num_levels):
        cbound = 1.0 / math.sqrt(H * kernel_size)
        # Conv weight prepacked as [K, Cin, Cout].
        # TODO(synk): importing a PyTorch Conv1d checkpoint [Cout, Cin, K]
        #             requires weight.permute(2, 1, 0).
        conv_w = uniform((kernel_size, H, H), cbound).astype(_MM_DTYPE)
        conv_b = uniform((H,), cbound)
        qb = 1.0 / math.sqrt(H)
        wq = uniform((heads, H, head_dim), qb).astype(_MM_DTYPE)
        bq = uniform((heads, 1, head_dim), qb)
        wk = uniform((heads, H, head_dim), qb).astype(_MM_DTYPE)
        bk = uniform((heads, 1, head_dim), qb)
        wv = uniform((heads, H, head_dim), qb).astype(_MM_DTYPE)
        bv = uniform((heads, 1, head_dim), qb)
        A = heads * head_dim
        ob = 1.0 / math.sqrt(A)
        wao = uniform((heads, head_dim, H), ob).astype(_MM_DTYPE)
        bao = uniform((H,), ob)
        wt, bt = lin(H, H)
        gbound = 1.0 / math.sqrt(2 * H)
        wg = uniform((2 * H, H), gbound).astype(_MM_DTYPE)  # rows [:H]->h,[H:]->f
        bg = uniform((H,), gbound)
        wlp, blp = lin(H, H)
        params["levels"].append({
            "conv_w": conv_w, "conv_b": conv_b,
            "conv_ln_g": jnp.ones((H,), jnp.float32),
            "conv_ln_b": jnp.zeros((H,), jnp.float32),
            "wq": wq, "bq": bq, "wk": wk, "bk": bk, "wv": wv, "bv": bv,
            "wao": wao, "bao": bao,
            "wt": wt, "bt": bt,
            "wg": wg, "bg": bg,
            "wlp": wlp, "blp": blp,
        })
    return params


# ----------------------------------------------------------------------------
# Forward pass (thin JAX glue, hot paths fused in Pallas)
# ----------------------------------------------------------------------------

def hierarchical_block_forward(params, x, *, hidden_dim, num_levels,
                               kernel_size, attention_heads):
    B, S, input_dim = x.shape
    H = hidden_dim
    M = B * S
    heads = attention_heads
    head_dim = H // 2            # per-head dim of HierarchicalAttention

    current = linear_tiled(x.reshape(M, input_dim), params["input_proj_w"],
                           params["input_proj_b"]).reshape(B, S, H)
    ln_g, ln_b = params["layer_norm"]

    level_outputs = []
    for i in range(num_levels):
        lvl = params["levels"][i]
        dilation = 2 ** i

        # conv + LN + GELU + head-major Q/K/V (causal pad built in-kernel).
        q, k, v = conv_ln_gelu_qkv(
            current, lvl["conv_w"], lvl["conv_b"],
            lvl["conv_ln_g"], lvl["conv_ln_b"],
            lvl["wq"], lvl["bq"], lvl["wk"], lvl["bk"], lvl["wv"], lvl["bv"],
            K=kernel_size, dilation=dilation, heads=heads, head_dim=head_dim)

        # MHA + out-proj + transform + gate + residual + shared LN + level-proj
        current, level_out = level_attn_epilogue(
            q, k, v, current,
            lvl["wao"], lvl["bao"], lvl["wt"], lvl["bt"],
            lvl["wg"], lvl["bg"], ln_g, ln_b, lvl["wlp"], lvl["blp"],
            heads=heads, head_dim=head_dim)
        level_outputs.append(level_out.reshape(M, H))      # bf16, no stack

    if num_levels > 1:
        packed = cross_level_final(
            level_outputs,
            params["cross_qkv_w"], params["cross_qkv_b"],
            params["cross_out_w"], params["cross_out_b"],
            params["final_w"], params["final_b"], heads=heads)
    else:
        packed = final_only(level_outputs[0], params["final_w"],
                            params["final_b"])

    backcast = packed[:, :input_dim].reshape(B, S, input_dim)
    out_emb = packed[:, input_dim:].reshape(B, S, -1)
    return backcast, out_emb


# ----------------------------------------------------------------------------
# Demo
# ----------------------------------------------------------------------------

if __name__ == "__main__":
    B, S = 2, 8
    input_dim, hidden_dim, output_dim = 8, 32, 16
    num_levels, kernel_size, attention_heads = 3, 3, 4

    key = jax.random.PRNGKey(0)
    pkey, xkey = jax.random.split(key)
    params = init_params(pkey, input_dim, hidden_dim, output_dim,
                         num_levels, kernel_size, attention_heads)
    x = jax.random.normal(xkey, (B, S, input_dim), jnp.float32)

    fwd = jax.jit(functools.partial(
        hierarchical_block_forward,
        hidden_dim=hidden_dim, num_levels=num_levels,
        kernel_size=kernel_size, attention_heads=attention_heads))

    backcast, out_emb = fwd(params, x)
    jax.block_until_ready((backcast, out_emb))

    assert backcast.shape == (B, S, input_dim)
    assert out_emb.shape == (B, S, output_dim)
    assert bool(jnp.all(jnp.isfinite(backcast)))
    assert bool(jnp.all(jnp.isfinite(out_emb)))
    print("KERNEL_OK")
</pallas_src>

<mosaic_0001>
module attributes {stable_mosaic.version = 11 : i64} {
  func.func @_conv_qkv_kernel(%arg0: i32, %arg1: memref<1x8x32xf32, #tpu.memory_space<vmem>>, %arg2: memref<3x32x32xbf16, #tpu.memory_space<vmem>>, %arg3: memref<1x32xf32, #tpu.memory_space<vmem>>, %arg4: memref<1x32xf32, #tpu.memory_space<vmem>>, %arg5: memref<1x32xf32, #tpu.memory_space<vmem>>, %arg6: memref<4x32x16xbf16, #tpu.memory_space<vmem>>, %arg7: memref<4x1x16xf32, #tpu.memory_space<vmem>>, %arg8: memref<4x32x16xbf16, #tpu.memory_space<vmem>>, %arg9: memref<4x1x16xf32, #tpu.memory_space<vmem>>, %arg10: memref<4x32x16xbf16, #tpu.memory_space<vmem>>, %arg11: memref<4x1x16xf32, #tpu.memory_space<vmem>>, %arg12: memref<1x4x8x16xbf16, #tpu.memory_space<vmem>>, %arg13: memref<1x4x8x16xbf16, #tpu.memory_space<vmem>>, %arg14: memref<1x4x8x16xbf16, #tpu.memory_space<vmem>>) attributes {dimension_semantics = [#tpu.dimension_semantics<parallel>], iteration_bounds = array<i64: 2>, scalar_prefetch = 0 : i64, scratch_operands = 0 : i64, tpu.core_type = #tpu.core_type<tc>, window_params = [{transform_indices = @transform_0, window_bounds = array<i64: 1, 8, 32>}, {pipeline_mode = #tpu.pipeline_mode<synchronous>, transform_indices = @transform_1, window_bounds = array<i64: 3, 32, 32>}, {pipeline_mode = #tpu.pipeline_mode<synchronous>, transform_indices = @transform_2, window_bounds = array<i64: 1, 32>}, {pipeline_mode = #tpu.pipeline_mode<synchronous>, transform_indices = @transform_3, window_bounds = array<i64: 1, 32>}, {pipeline_mode = #tpu.pipeline_mode<synchronous>, transform_indices = @transform_4, window_bounds = array<i64: 1, 32>}, {pipeline_mode = #tpu.pipeline_mode<synchronous>, transform_indices = @transform_5, window_bounds = array<i64: 4, 32, 16>}, {pipeline_mode = #tpu.pipeline_mode<synchronous>, transform_indices = @transform_6, window_bounds = array<i64: 4, 1, 16>}, {pipeline_mode = #tpu.pipeline_mode<synchronous>, transform_indices = @transform_7, window_bounds = array<i64: 4, 32, 16>}, {pipeline_mode = #tpu.pipeline_mode<synchronous>, transform_indices = @transform_8, window_bounds = array<i64: 4, 1, 16>}, {pipeline_mode = #tpu.pipeline_mode<synchronous>, transform_indices = @transform_9, window_bounds = array<i64: 4, 32, 16>}, {pipeline_mode = #tpu.pipeline_mode<synchronous>, transform_indices = @transform_10, window_bounds = array<i64: 4, 1, 16>}, {transform_indices = @transform_11, window_bounds = array<i64: 1, 4, 8, 16>}, {transform_indices = @transform_12, window_bounds = array<i64: 1, 4, 8, 16>}, {transform_indices = @transform_13, window_bounds = array<i64: 1, 4, 8, 16>}]} {
    %c0 = arith.constant 0 : index
    %c0_0 = arith.constant 0 : index
    %c0_1 = arith.constant 0 : index
    %0 = vector.load %arg1[%c0, %c0_0, %c0_1] : memref<1x8x32xf32, #tpu.memory_space<vmem>>, vector<1x8x32xf32>
    %1 = vector.shape_cast %0 : vector<1x8x32xf32> to vector<8x32xf32>
    %cst = arith.constant 0.000000e+00 : f32
    %2 = vector.broadcast %cst : f32 to vector<8x32xf32>
    %c0_2 = arith.constant 0 : index
    %c0_3 = arith.constant 0 : index
    %3 = vector.load %arg3[%c0_2, %c0_3] : memref<1x32xf32, #tpu.memory_space<vmem>>, vector<1x32xf32>
    %4 = vector.broadcast %3 : vector<1x32xf32> to vector<8x32xf32>
    %5 = arith.addf %2, %4 : vector<8x32xf32>
    %cst_4 = arith.constant 0.000000e+00 : f32
    %6 = vector.broadcast %cst_4 : f32 to vector<2x32xf32>
    %7 = vector.extract_strided_slice %1 {offsets = [0, 0], sizes = [6, 32], strides = [1, 1]} : vector<8x32xf32> to vector<6x32xf32>
    %8 = tpu.concatenate %6, %7 in 0 : vector<2x32xf32>, vector<6x32xf32> -> vector<8x32xf32>
    %9 = arith.truncf %8 : vector<8x32xf32> to vector<8x32xbf16>
    %c0_5 = arith.constant 0 : index
    %c0_6 = arith.constant 0 : index
    %c0_7 = arith.constant 0 : index
    %10 = vector.load %arg2[%c0_5, %c0_6, %c0_7] : memref<3x32x32xbf16, #tpu.memory_space<vmem>>, vector<1x32x32xbf16>
    %11 = vector.shape_cast %10 : vector<1x32x32xbf16> to vector<32x32xbf16>
    %cst_8 = arith.constant dense<0.000000e+00> : vector<8x32xf32>
    %12 = tpu.matmul %9, %11, %cst_8 {dimension_numbers = #tpu.dot_dimension_numbers<[1], [0], [0], [1], [0, 0, 1, 1], [], []>} : vector<8x32xbf16>, vector<32x32xbf16>, vector<8x32xf32> -> vector<8x32xf32>
    %13 = arith.addf %5, %12 : vector<8x32xf32>
    %cst_9 = arith.constant 0.000000e+00 : f32
    %14 = vector.broadcast %cst_9 : f32 to vector<1x32xf32>
    %15 = vector.extract_strided_slice %1 {offsets = [0, 0], sizes = [7, 32], strides = [1, 1]} : vector<8x32xf32> to vector<7x32xf32>
    %16 = tpu.concatenate %14, %15 in 0 : vector<1x32xf32>, vector<7x32xf32> -> vector<8x32xf32>
    %17 = arith.truncf %16 : vector<8x32xf32> to vector<8x32xbf16>
    %c1 = arith.constant 1 : index
    %c0_10 = arith.constant 0 : index
    %c0_11 = arith.constant 0 : index
    %18 = vector.load %arg2[%c1, %c0_10, %c0_11] : memref<3x32x32xbf16, #tpu.memory_space<vmem>>, vector<1x32x32xbf16>
    %19 = vector.shape_cast %18 : vector<1x32x32xbf16> to vector<32x32xbf16>
    %cst_12 = arith.constant dense<0.000000e+00> : vector<8x32xf32>
    %20 = tpu.matmul %17, %19, %cst_12 {dimension_numbers = #tpu.dot_dimension_numbers<[1], [0], [0], [1], [0, 0, 1, 1], [], []>} : vector<8x32xbf16>, vector<32x32xbf16>, vector<8x32xf32> -> vector<8x32xf32>
    %21 = arith.addf %13, %20 : vector<8x32xf32>
    %22 = arith.truncf %1 : vector<8x32xf32> to vector<8x32xbf16>
    %c2 = arith.constant 2 : index
    %c0_13 = arith.constant 0 : index
    %c0_14 = arith.constant 0 : index
    %23 = vector.load %arg2[%c2, %c0_13, %c0_14] : memref<3x32x32xbf16, #tpu.memory_space<vmem>>, vector<1x32x32xbf16>
    %24 = vector.shape_cast %23 : vector<1x32x32xbf16> to vector<32x32xbf16>
    %cst_15 = arith.constant dense<0.000000e+00> : vector<8x32xf32>
    %25 = tpu.matmul %22, %24, %cst_15 {dimension_numbers = #tpu.dot_dimension_numbers<[1], [0], [0], [1], [0, 0, 1, 1], [], []>} : vector<8x32xbf16>, vector<32x32xbf16>, vector<8x32xf32> -> vector<8x32xf32>
    %26 = arith.addf %21, %25 : vector<8x32xf32>
    %cst_16 = arith.constant dense<0.000000e+00> : vector<8xf32>
    %27 = vector.multi_reduction <add>, %26, %cst_16 [1] : vector<8x32xf32> to vector<8xf32>
    %28 = vector.shape_cast %27 : vector<8xf32> to vector<8x1xf32>
    %cst_17 = arith.constant 3.200000e+01 : f32
    %29 = vector.broadcast %cst_17 : f32 to vector<8x1xf32>
    %30 = arith.divf %28, %29 : vector<8x1xf32>
    %31 = vector.broadcast %30 : vector<8x1xf32> to vector<8x32xf32>
    %32 = arith.subf %26, %31 : vector<8x32xf32>
    %33 = arith.mulf %32, %32 : vector<8x32xf32>
    %cst_18 = arith.constant dense<0.000000e+00> : vector<8xf32>
    %34 = vector.multi_reduction <add>, %33, %cst_18 [1] : vector<8x32xf32> to vector<8xf32>
    %35 = vector.shape_cast %34 : vector<8xf32> to vector<8x1xf32>
    %cst_19 = arith.constant 3.200000e+01 : f32
    %36 = vector.broadcast %cst_19 : f32 to vector<8x1xf32>
    %37 = arith.divf %35, %36 : vector<8x1xf32>
    %38 = vector.broadcast %30 : vector<8x1xf32> to vector<8x32xf32>
    %39 = arith.subf %26, %38 : vector<8x32xf32>
    %cst_20 = arith.constant 9.99999974E-6 : f32
    %40 = vector.broadcast %cst_20 : f32 to vector<8x1xf32>
    %41 = arith.addf %37, %40 : vector<8x1xf32>
    %42 = math.rsqrt %41 : vector<8x1xf32>
    %43 = vector.broadcast %42 : vector<8x1xf32> to vector<8x32xf32>
    %44 = arith.mulf %39, %43 : vector<8x32xf32>
    %c0_21 = arith.constant 0 : index
    %c0_22 = arith.constant 0 : index
    %45 = vector.load %arg4[%c0_21, %c0_22] : memref<1x32xf32, #tpu.memory_space<vmem>>, vector<1x32xf32>
    %46 = vector.broadcast %45 : vector<1x32xf32> to vector<8x32xf32>
    %47 = arith.mulf %44, %46 : vector<8x32xf32>
    %c0_23 = arith.constant 0 : index
    %c0_24 = arith.constant 0 : index
    %48 = vector.load %arg5[%c0_23, %c0_24] : memref<1x32xf32, #tpu.memory_space<vmem>>, vector<1x32xf32>
    %49 = vector.broadcast %48 : vector<1x32xf32> to vector<8x32xf32>
    %50 = arith.addf %47, %49 : vector<8x32xf32>
    %cst_25 = arith.constant 5.000000e-01 : f32
    %51 = vector.broadcast %cst_25 : f32 to vector<8x32xf32>
    %52 = arith.mulf %51, %50 : vector<8x32xf32>
    %cst_26 = arith.constant 0.707106769 : f32
    %53 = vector.broadcast %cst_26 : f32 to vector<8x32xf32>
    %54 = arith.mulf %50, %53 : vector<8x32xf32>
    %55 = math.erf %54 : vector<8x32xf32>
    %cst_27 = arith.constant 1.000000e+00 : f32
    %56 = vector.broadcast %cst_27 : f32 to vector<8x32xf32>
    %57 = arith.addf %56, %55 : vector<8x32xf32>
    %58 = arith.mulf %52, %57 : vector<8x32xf32>
    %59 = arith.truncf %58 : vector<8x32xf32> to vector<8x32xbf16>
    %c0_28 = arith.constant 0 : index
    %c0_29 = arith.constant 0 : index
    %c0_30 = arith.constant 0 : index
    %60 = vector.load %arg6[%c0_28, %c0_29, %c0_30] : memref<4x32x16xbf16, #tpu.memory_space<vmem>>, vector<1x32x16xbf16>
    %61 = vector.shape_cast %60 : vector<1x32x16xbf16> to vector<32x16xbf16>
    %cst_31 = arith.constant dense<0.000000e+00> : vector<8x16xf32>
    %62 = tpu.matmul %59, %61, %cst_31 {dimension_numbers = #tpu.dot_dimension_numbers<[1], [0], [0], [1], [0, 0, 1, 1], [], []>} : vector<8x32xbf16>, vector<32x16xbf16>, vector<8x16xf32> -> vector<8x16xf32>
    %c0_32 = arith.constant 0 : index
    %c0_33 = arith.constant 0 : index
    %c0_34 = arith.constant 0 : index
    %63 = vector.load %arg7[%c0_32, %c0_33, %c0_34] : memref<4x1x16xf32, #tpu.memory_space<vmem>>, vector<1x1x16xf32>
    %64 = vector.shape_cast %63 : vector<1x1x16xf32> to vector<1x16xf32>
    %65 = vector.broadcast %64 : vector<1x16xf32> to vector<8x16xf32>
    %66 = arith.addf %62, %65 : vector<8x16xf32>
    %67 = arith.truncf %66 : vector<8x16xf32> to vector<8x16xbf16>
    %c0_35 = arith.constant 0 : index
    %c0_36 = arith.constant 0 : index
    %c0_37 = arith.constant 0 : index
    %c0_38 = arith.constant 0 : index
    %68 = vector.load %arg12[%c0_35, %c0_36, %c0_37, %c0_38] : memref<1x4x8x16xbf16, #tpu.memory_space<vmem>>, vector<1x1x8x16xbf16>
    %69 = vector.shape_cast %68 : vector<1x1x8x16xbf16> to vector<8x16xbf16>
    %70 = vector.shape_cast %67 : vector<8x16xbf16> to vector<1x1x8x16xbf16>
    tpu.vector_store %arg12[%c0_35, %c0_36, %c0_37, %c0_38], %70 {strides = array<i32>} : memref<1x4x8x16xbf16, #tpu.memory_space<vmem>>, vector<1x1x8x16xbf16>,
    %c0_39 = arith.constant 0 : index
    %c0_40 = arith.constant 0 : index
    %c0_41 = arith.constant 0 : index
    %71 = vector.load %arg8[%c0_39, %c0_40, %c0_41] : memref<4x32x16xbf16, #tpu.memory_space<vmem>>, vector<1x32x16xbf16>
    %72 = vector.shape_cast %71 : vector<1x32x16xbf16> to vector<32x16xbf16>
    %cst_42 = arith.constant dense<0.000000e+00> : vector<8x16xf32>
    %73 = tpu.matmul %59, %72, %cst_42 {dimension_numbers = #tpu.dot_dimension_numbers<[1], [0], [0], [1], [0, 0, 1, 1], [], []>} : vector<8x32xbf16>, vector<32x16xbf16>, vector<8x16xf32> -> vector<8x16xf32>
    %c0_43 = arith.constant 0 : index
    %c0_44 = arith.constant 0 : index
    %c0_45 = arith.constant 0 : index
    %74 = vector.load %arg9[%c0_43, %c0_44, %c0_45] : memref<4x1x16xf32, #tpu.memory_space<vmem>>, vector<1x1x16xf32>
    %75 = vector.shape_cast %74 : vector<1x1x16xf32> to vector<1x16xf32>
    %76 = vector.broadcast %75 : vector<1x16xf32> to vector<8x16xf32>
    %77 = arith.addf %73, %76 : vector<8x16xf32>
    %78 = arith.truncf %77 : vector<8x16xf32> to vector<8x16xbf16>
    %c0_46 = arith.constant 0 : index
    %c0_47 = arith.constant 0 : index
    %c0_48 = arith.constant 0 : index
    %c0_49 = arith.constant 0 : index
    %79 = vector.load %arg13[%c0_46, %c0_47, %c0_48, %c0_49] : memref<1x4x8x16xbf16, #tpu.memory_space<vmem>>, vector<1x1x8x16xbf16>
    %80 = vector.shape_cast %79 : vector<1x1x8x16xbf16> to vector<8x16xbf16>
    %81 = vector.shape_cast %78 : vector<8x16xbf16> to vector<1x1x8x16xbf16>
    tpu.vector_store %arg13[%c0_46, %c0_47, %c0_48, %c0_49], %81 {strides = array<i32>} : memref<1x4x8x16xbf16, #tpu.memory_space<vmem>>, vector<1x1x8x16xbf16>,
    %c0_50 = arith.constant 0 : index
    %c0_51 = arith.constant 0 : index
    %c0_52 = arith.constant 0 : index
    %82 = vector.load %arg10[%c0_50, %c0_51, %c0_52] : memref<4x32x16xbf16, #tpu.memory_space<vmem>>, vector<1x32x16xbf16>
    %83 = vector.shape_cast %82 : vector<1x32x16xbf16> to vector<32x16xbf16>
    %cst_53 = arith.constant dense<0.000000e+00> : vector<8x16xf32>
    %84 = tpu.matmul %59, %83, %cst_53 {dimension_numbers = #tpu.dot_dimension_numbers<[1], [0], [0], [1], [0, 0, 1, 1], [], []>} : vector<8x32xbf16>, vector<32x16xbf16>, vector<8x16xf32> -> vector<8x16xf32>
    %c0_54 = arith.constant 0 : index
    %c0_55 = arith.constant 0 : index
    %c0_56 = arith.constant 0 : index
    %85 = vector.load %arg11[%c0_54, %c0_55, %c0_56] : memref<4x1x16xf32, #tpu.memory_space<vmem>>, vector<1x1x16xf32>
    %86 = vector.shape_cast %85 : vector<1x1x16xf32> to vector<1x16xf32>
    %87 = vector.broadcast %86 : vector<1x16xf32> to vector<8x16xf32>
    %88 = arith.addf %84, %87 : vector<8x16xf32>
    %89 = arith.truncf %88 : vector<8x16xf32> to vector<8x16xbf16>
    %c0_57 = arith.constant 0 : index
    %c0_58 = arith.constant 0 : index
    %c0_59 = arith.constant 0 : index
    %c0_60 = arith.constant 0 : index
    %90 = vector.load %arg14[%c0_57, %c0_58, %c0_59, %c0_60] : memref<1x4x8x16xbf16, #tpu.memory_space<vmem>>, vector<1x1x8x16xbf16>
    %91 = vector.shape_cast %90 : vector<1x1x8x16xbf16> to vector<8x16xbf16>
    %92 = vector.shape_cast %89 : vector<8x16xbf16> to vector<1x1x8x16xbf16>
    tpu.vector_store %arg14[%c0_57, %c0_58, %c0_59, %c0_60], %92 {strides = array<i32>} : memref<1x4x8x16xbf16, #tpu.memory_space<vmem>>, vector<1x1x8x16xbf16>,
    %c1_61 = arith.constant 1 : index
    %c0_62 = arith.constant 0 : index
    %c0_63 = arith.constant 0 : index
    %93 = vector.load %arg6[%c1_61, %c0_62, %c0_63] : memref<4x32x16xbf16, #tpu.memory_space<vmem>>, vector<1x32x16xbf16>
    %94 = vector.shape_cast %93 : vector<1x32x16xbf16> to vector<32x16xbf16>
    %cst_64 = arith.constant dense<0.000000e+00> : vector<8x16xf32>
    %95 = tpu.matmul %59, %94, %cst_64 {dimension_numbers = #tpu.dot_dimension_numbers<[1], [0], [0], [1], [0, 0, 1, 1], [], []>} : vector<8x32xbf16>, vector<32x16xbf16>, vector<8x16xf32> -> vector<8x16xf32>
    %c1_65 = arith.constant 1 : index
    %c0_66 = arith.constant 0 : index
    %c0_67 = arith.constant 0 : index
    %96 = vector.load %arg7[%c1_65, %c0_66, %c0_67] : memref<4x1x16xf32, #tpu.memory_space<vmem>>, vector<1x1x16xf32>
    %97 = vector.shape_cast %96 : vector<1x1x16xf32> to vector<1x16xf32>
    %98 = vector.broadcast %97 : vector<1x16xf32> to vector<8x16xf32>
    %99 = arith.addf %95, %98 : vector<8x16xf32>
    %100 = arith.truncf %99 : vector<8x16xf32> to vector<8x16xbf16>
    %c0_68 = arith.constant 0 : index
    %c1_69 = arith.constant 1 : index
    %c0_70 = arith.constant 0 : index
    %c0_71 = arith.constant 0 : index
    %101 = vector.load %arg12[%c0_68, %c1_69, %c0_70, %c0_71] : memref<1x4x8x16xbf16, #tpu.memory_space<vmem>>, vector<1x1x8x16xbf16>
    %102 = vector.shape_cast %101 : vector<1x1x8x16xbf16> to vector<8x16xbf16>
    %103 = vector.shape_cast %100 : vector<8x16xbf16> to vector<1x1x8x16xbf16>
    tpu.vector_store %arg12[%c0_68, %c1_69, %c0_70, %c0_71], %103 {strides = array<i32>} : memref<1x4x8x16xbf16, #tpu.memory_space<vmem>>, vector<1x1x8x16xbf16>,
    %c1_72 = arith.constant 1 : index
    %c0_73 = arith.constant 0 : index
    %c0_74 = arith.constant 0 : index
    %104 = vector.load %arg8[%c1_72, %c0_73, %c0_74] : memref<4x32x16xbf16, #tpu.memory_space<vmem>>, vector<1x32x16xbf16>
    %105 = vector.shape_cast %104 : vector<1x32x16xbf16> to vector<32x16xbf16>
    %cst_75 = arith.constant dense<0.000000e+00> : vector<8x16xf32>
    %106 = tpu.matmul %59, %105, %cst_75 {dimension_numbers = #tpu.dot_dimension_numbers<[1], [0], [0], [1], [0, 0, 1, 1], [], []>} : vector<8x32xbf16>, vector<32x16xbf16>, vector<8x16xf32> -> vector<8x16xf32>
    %c1_76 = arith.constant 1 : index
    %c0_77 = arith.constant 0 : index
    %c0_78 = arith.constant 0 : index
    %107 = vector.load %arg9[%c1_76, %c0_77, %c0_78] : memref<4x1x16xf32, #tpu.memory_space<vmem>>, vector<1x1x16xf32>
    %108 = vector.shape_cast %107 : vector<1x1x16xf32> to vector<1x16xf32>
    %109 = vector.broadcast %108 : vector<1x16xf32> to vector<8x16xf32>
    %110 = arith.addf %106, %109 : vector<8x16xf32>
    %111 = arith.truncf %110 : vector<8x16xf32> to vector<8x16xbf16>
    %c0_79 = arith.constant 0 : index
    %c1_80 = arith.constant 1 : index
    %c0_81 = arith.constant 0 : index
    %c0_82 = arith.constant 0 : index
    %112 = vector.load %arg13[%c0_79, %c1_80, %c0_81, %c0_82] : memref<1x4x8x16xbf16, #tpu.memory_space<vmem>>, vector<1x1x8x16xbf16>
    %113 = vector.shape_cast %112 : vector<1x1x8x16xbf16> to vector<8x16xbf16>
    %114 = vector.shape_cast %111 : vector<8x16xbf16> to vector<1x1x8x16xbf16>
    tpu.vector_store %arg13[%c0_79, %c1_80, %c0_81, %c0_82], %114 {strides = array<i32>} : memref<1x4x8x16xbf16, #tpu.memory_space<vmem>>, vector<1x1x8x16xbf16>,
    %c1_83 = arith.constant 1 : index
    %c0_84 = arith.constant 0 : index
    %c0_85 = arith.constant 0 : index
    %115 = vector.load %arg10[%c1_83, %c0_84, %c0_85] : memref<4x32x16xbf16, #tpu.memory_space<vmem>>, vector<1x32x16xbf16>
    %116 = vector.shape_cast %115 : vector<1x32x16xbf16> to vector<32x16xbf16>
    %cst_86 = arith.constant dense<0.000000e+00> : vector<8x16xf32>
    %117 = tpu.matmul %59, %116, %cst_86 {dimension_numbers = #tpu.dot_dimension_numbers<[1], [0], [0], [1], [0, 0, 1, 1], [], []>} : vector<8x32xbf16>, vector<32x16xbf16>, vector<8x16xf32> -> vector<8x16xf32>
    %c1_87 = arith.constant 1 : index
    %c0_88 = arith.constant 0 : index
    %c0_89 = arith.constant 0 : index
    %118 = vector.load %arg11[%c1_87, %c0_88, %c0_89] : memref<4x1x16xf32, #tpu.memory_space<vmem>>, vector<1x1x16xf32>
    %119 = vector.shape_cast %118 : vector<1x1x16xf32> to vector<1x16xf32>
    %120 = vector.broadcast %119 : vector<1x16xf32> to vector<8x16xf32>
    %121 = arith.addf %117, %120 : vector<8x16xf32>
    %122 = arith.truncf %121 : vector<8x16xf32> to vector<8x16xbf16>
    %c0_90 = arith.constant 0 : index
    %c1_91 = arith.constant 1 : index
    %c0_92 = arith.constant 0 : index
    %c0_93 = arith.constant 0 : index
    %123 = vector.load %arg14[%c0_90, %c1_91, %c0_92, %c0_93] : memref<1x4x8x16xbf16, #tpu.memory_space<vmem>>, vector<1x1x8x16xbf16>
    %124 = vector.shape_cast %123 : vector<1x1x8x16xbf16> to vector<8x16xbf16>
    %125 = vector.shape_cast %122 : vector<8x16xbf16> to vector<1x1x8x16xbf16>
    tpu.vector_store %arg14[%c0_90, %c1_91, %c0_92, %c0_93], %125 {strides = array<i32>} : memref<1x4x8x16xbf16, #tpu.memory_space<vmem>>, vector<1x1x8x16xbf16>,
    %c2_94 = arith.constant 2 : index
    %c0_95 = arith.constant 0 : index
    %c0_96 = arith.constant 0 : index
    %126 = vector.load %arg6[%c2_94, %c0_95, %c0_96] : memref<4x32x16xbf16, #tpu.memory_space<vmem>>, vector<1x32x16xbf16>
    %127 = vector.shape_cast %126 : vector<1x32x16xbf16> to vector<32x16xbf16>
    %cst_97 = arith.constant dense<0.000000e+00> : vector<8x16xf32>
    %128 = tpu.matmul %59, %127, %cst_97 {dimension_numbers = #tpu.dot_dimension_numbers<[1], [0], [0], [1], [0, 0, 1, 1], [], []>} : vector<8x32xbf16>, vector<32x16xbf16>, vector<8x16xf32> -> vector<8x16xf32>
    %c2_98 = arith.constant 2 : index
    %c0_99 = arith.constant 0 : index
    %c0_100 = arith.constant 0 : index
    %129 = vector.load %arg7[%c2_98, %c0_99, %c0_100] : memref<4x1x16xf32, #tpu.memory_space<vmem>>, vector<1x1x16xf32>
    %130 = vector.shape_cast %129 : vector<1x1x16xf32> to vector<1x16xf32>
    %131 = vector.broadcast %130 : vector<1x16xf32> to vector<8x16xf32>
    %132 = arith.addf %128, %131 : vector<8x16xf32>
    %133 = arith.truncf %132 : vector<8x16xf32> to vector<8x16xbf16>
    %c0_101 = arith.constant 0 : index
    %c2_102 = arith.constant 2 : index
    %c0_103 = arith.constant 0 : index
    %c0_104 = arith.constant 0 : index
    %134 = vector.load %arg12[%c0_101, %c2_102, %c0_103, %c0_104] : memref<1x4x8x16xbf16, #tpu.memory_space<vmem>>, vector<1x1x8x16xbf16>
    %135 = vector.shape_cast %134 : vector<1x1x8x16xbf16> to vector<8x16xbf16>
    %136 = vector.shape_cast %133 : vector<8x16xbf16> to vector<1x1x8x16xbf16>
    tpu.vector_store %arg12[%c0_101, %c2_102, %c0_103, %c0_104], %136 {strides = array<i32>} : memref<1x4x8x16xbf16, #tpu.memory_space<vmem>>, vector<1x1x8x16xbf16>,
    %c2_105 = arith.constant 2 : index
    %c0_106 = arith.constant 0 : index
    %c0_107 = arith.constant 0 : index
    %137 = vector.load %arg8[%c2_105, %c0_106, %c0_107] : memref<4x32x16xbf16, #tpu.memory_space<vmem>>, vector<1x32x16xbf16>
    %138 = vector.shape_cast %137 : vector<1x32x16xbf16> to vector<32x16xbf16>
    %cst_108 = arith.constant dense<0.000000e+00> : vector<8x16xf32>
    %139 = tpu.matmul %59, %138, %cst_108 {dimension_numbers = #tpu.dot_dimension_numbers<[1], [0], [0], [1], [0, 0, 1, 1], [], []>} : vector<8x32xbf16>, vector<32x16xbf16>, vector<8x16xf32> -> vector<8x16xf32>
    %c2_109 = arith.constant 2 : index
    %c0_110 = arith.constant 0 : index
    %c0_111 = arith.constant 0 : index
    %140 = vector.load %arg9[%c2_109, %c0_110, %c0_111] : memref<4x1x16xf32, #tpu.memory_space<vmem>>, vector<1x1x16xf32>
    %141 = vector.shape_cast %140 : vector<1x1x16xf32> to vector<1x16xf32>
    %142 = vector.broadcast %141 : vector<1x16xf32> to vector<8x16xf32>
    %143 = arith.addf %139, %142 : vector<8x16xf32>
    %144 = arith.truncf %143 : vector<8x16xf32> to vector<8x16xbf16>
    %c0_112 = arith.constant 0 : index
    %c2_113 = arith.constant 2 : index
    %c0_114 = arith.constant 0 : index
    %c0_115 = arith.constant 0 : index
    %145 = vector.load %arg13[%c0_112, %c2_113, %c0_114, %c0_115] : memref<1x4x8x16xbf16, #tpu.memory_space<vmem>>, vector<1x1x8x16xbf16>
    %146 = vector.shape_cast %145 : vector<1x1x8x16xbf16> to vector<8x16xbf16>
    %147 = vector.shape_cast %144 : vector<8x16xbf16> to vector<1x1x8x16xbf16>
    tpu.vector_store %arg13[%c0_112, %c2_113, %c0_114, %c0_115], %147 {strides = array<i32>} : memref<1x4x8x16xbf16, #tpu.memory_space<vmem>>, vector<1x1x8x16xbf16>,
    %c2_116 = arith.constant 2 : index
    %c0_117 = arith.constant 0 : index
    %c0_118 = arith.constant 0 : index
    %148 = vector.load %arg10[%c2_116, %c0_117, %c0_118] : memref<4x32x16xbf16, #tpu.memory_space<vmem>>, vector<1x32x16xbf16>
    %149 = vector.shape_cast %148 : vector<1x32x16xbf16> to vector<32x16xbf16>
    %cst_119 = arith.constant dense<0.000000e+00> : vector<8x16xf32>
    %150 = tpu.matmul %59, %149, %cst_119 {dimension_numbers = #tpu.dot_dimension_numbers<[1], [0], [0], [1], [0, 0, 1, 1], [], []>} : vector<8x32xbf16>, vector<32x16xbf16>, vector<8x16xf32> -> vector<8x16xf32>
    %c2_120 = arith.constant 2 : index
    %c0_121 = arith.constant 0 : index
    %c0_122 = arith.constant 0 : index
    %151 = vector.load %arg11[%c2_120, %c0_121, %c0_122] : memref<4x1x16xf32, #tpu.memory_space<vmem>>, vector<1x1x16xf32>
    %152 = vector.shape_cast %151 : vector<1x1x16xf32> to vector<1x16xf32>
    %153 = vector.broadcast %152 : vector<1x16xf32> to vector<8x16xf32>
    %154 = arith.addf %150, %153 : vector<8x16xf32>
    %155 = arith.truncf %154 : vector<8x16xf32> to vector<8x16xbf16>
    %c0_123 = arith.constant 0 : index
    %c2_124 = arith.constant 2 : index
    %c0_125 = arith.constant 0 : index
    %c0_126 = arith.constant 0 : index
    %156 = vector.load %arg14[%c0_123, %c2_124, %c0_125, %c0_126] : memref<1x4x8x16xbf16, #tpu.memory_space<vmem>>, vector<1x1x8x16xbf16>
    %157 = vector.shape_cast %156 : vector<1x1x8x16xbf16> to vector<8x16xbf16>
    %158 = vector.shape_cast %155 : vector<8x16xbf16> to vector<1x1x8x16xbf16>
    tpu.vector_store %arg14[%c0_123, %c2_124, %c0_125, %c0_126], %158 {strides = array<i32>} : memref<1x4x8x16xbf16, #tpu.memory_space<vmem>>, vector<1x1x8x16xbf16>,
    %c3 = arith.constant 3 : index
    %c0_127 = arith.constant 0 : index
    %c0_128 = arith.constant 0 : index
    %159 = vector.load %arg6[%c3, %c0_127, %c0_128] : memref<4x32x16xbf16, #tpu.memory_space<vmem>>, vector<1x32x16xbf16>
    %160 = vector.shape_cast %159 : vector<1x32x16xbf16> to vector<32x16xbf16>
    %cst_129 = arith.constant dense<0.000000e+00> : vector<8x16xf32>
    %161 = tpu.matmul %59, %160, %cst_129 {dimension_numbers = #tpu.dot_dimension_numbers<[1], [0], [0], [1], [0, 0, 1, 1], [], []>} : vector<8x32xbf16>, vector<32x16xbf16>, vector<8x16xf32> -> vector<8x16xf32>
    %c3_130 = arith.constant 3 : index
    %c0_131 = arith.constant 0 : index
    %c0_132 = arith.constant 0 : index
    %162 = vector.load %arg7[%c3_130, %c0_131, %c0_132] : memref<4x1x16xf32, #tpu.memory_space<vmem>>, vector<1x1x16xf32>
    %163 = vector.shape_cast %162 : vector<1x1x16xf32> to vector<1x16xf32>
    %164 = vector.broadcast %163 : vector<1x16xf32> to vector<8x16xf32>
    %165 = arith.addf %161, %164 : vector<8x16xf32>
    %166 = arith.truncf %165 : vector<8x16xf32> to vector<8x16xbf16>
    %c0_133 = arith.constant 0 : index
    %c3_134 = arith.constant 3 : index
    %c0_135 = arith.constant 0 : index
    %c0_136 = arith.constant 0 : index
    %167 = vector.load %arg12[%c0_133, %c3_134, %c0_135, %c0_136] : memref<1x4x8x16xbf16, #tpu.memory_space<vmem>>, vector<1x1x8x16xbf16>
    %168 = vector.shape_cast %167 : vector<1x1x8x16xbf16> to vector<8x16xbf16>
    %169 = vector.shape_cast %166 : vector<8x16xbf16> to vector<1x1x8x16xbf16>
    tpu.vector_store %arg12[%c0_133, %c3_134, %c0_135, %c0_136], %169 {strides = array<i32>} : memref<1x4x8x16xbf16, #tpu.memory_space<vmem>>, vector<1x1x8x16xbf16>,
    %c3_137 = arith.constant 3 : index
    %c0_138 = arith.constant 0 : index
    %c0_139 = arith.constant 0 : index
    %170 = vector.load %arg8[%c3_137, %c0_138, %c0_139] : memref<4x32x16xbf16, #tpu.memory_space<vmem>>, vector<1x32x16xbf16>
    %171 = vector.shape_cast %170 : vector<1x32x16xbf16> to vector<32x16xbf16>
    %cst_140 = arith.constant dense<0.000000e+00> : vector<8x16xf32>
    %172 = tpu.matmul %59, %171, %cst_140 {dimension_numbers = #tpu.dot_dimension_numbers<[1], [0], [0], [1], [0, 0, 1, 1], [], []>} : vector<8x32xbf16>, vector<32x16xbf16>, vector<8x16xf32> -> vector<8x16xf32>
    %c3_141 = arith.constant 3 : index
    %c0_142 = arith.constant 0 : index
    %c0_143 = arith.constant 0 : index
    %173 = vector.load %arg9[%c3_141, %c0_142, %c0_143] : memref<4x1x16xf32, #tpu.memory_space<vmem>>, vector<1x1x16xf32>
    %174 = vector.shape_cast %173 : vector<1x1x16xf32> to vector<1x16xf32>
    %175 = vector.broadcast %174 : vector<1x16xf32> to vector<8x16xf32>
    %176 = arith.addf %172, %175 : vector<8x16xf32>
    %177 = arith.truncf %176 : vector<8x16xf32> to vector<8x16xbf16>
    %c0_144 = arith.constant 0 : index
    %c3_145 = arith.constant 3 : index
    %c0_146 = arith.constant 0 : index
    %c0_147 = arith.constant 0 : index
    %178 = vector.load %arg13[%c0_144, %c3_145, %c0_146, %c0_147] : memref<1x4x8x16xbf16, #tpu.memory_space<vmem>>, vector<1x1x8x16xbf16>
    %179 = vector.shape_cast %178 : vector<1x1x8x16xbf16> to vector<8x16xbf16>
    %180 = vector.shape_cast %177 : vector<8x16xbf16> to vector<1x1x8x16xbf16>
    tpu.vector_store %arg13[%c0_144, %c3_145, %c0_146, %c0_147], %180 {strides = array<i32>} : memref<1x4x8x16xbf16, #tpu.memory_space<vmem>>, vector<1x1x8x16xbf16>,
    %c3_148 = arith.constant 3 : index
    %c0_149 = arith.constant 0 : index
    %c0_150 = arith.constant 0 : index
    %181 = vector.load %arg10[%c3_148, %c0_149, %c0_150] : memref<4x32x16xbf16, #tpu.memory_space<vmem>>, vector<1x32x16xbf16>
    %182 = vector.shape_cast %181 : vector<1x32x16xbf16> to vector<32x16xbf16>
    %cst_151 = arith.constant dense<0.000000e+00> : vector<8x16xf32>
    %183 = tpu.matmul %59, %182, %cst_151 {dimension_numbers = #tpu.dot_dimension_numbers<[1], [0], [0], [1], [0, 0, 1, 1], [], []>} : vector<8x32xbf16>, vector<32x16xbf16>, vector<8x16xf32> -> vector<8x16xf32>
    %c3_152 = arith.constant 3 : index
    %c0_153 = arith.constant 0 : index
    %c0_154 = arith.constant 0 : index
    %184 = vector.load %arg11[%c3_152, %c0_153, %c0_154] : memref<4x1x16xf32, #tpu.memory_space<vmem>>, vector<1x1x16xf32>
    %185 = vector.shape_cast %184 : vector<1x1x16xf32> to vector<1x16xf32>
    %186 = vector.broadcast %185 : vector<1x16xf32> to vector<8x16xf32>
    %187 = arith.addf %183, %186 : vector<8x16xf32>
    %188 = arith.truncf %187 : vector<8x16xf32> to vector<8x16xbf16>
    %c0_155 = arith.constant 0 : index
    %c3_156 = arith.constant 3 : index
    %c0_157 = arith.constant 0 : index
    %c0_158 = arith.constant 0 : index
    %189 = vector.load %arg14[%c0_155, %c3_156, %c0_157, %c0_158] : memref<1x4x8x16xbf16, #tpu.memory_space<vmem>>, vector<1x1x8x16xbf16>
    %190 = vector.shape_cast %189 : vector<1x1x8x16xbf16> to vector<8x16xbf16>
    %191 = vector.shape_cast %188 : vector<8x16xbf16> to vector<1x1x8x16xbf16>
    tpu.vector_store %arg14[%c0_155, %c3_156, %c0_157, %c0_158], %191 {strides = array<i32>} : memref<1x4x8x16xbf16, #tpu.memory_space<vmem>>, vector<1x1x8x16xbf16>,
    return
  }
  func.func @transform_0(%arg0: i32) -> (i32, i32, i32) {
    %c0_i32 = arith.constant 0 : i32
    %c0_i32_0 = arith.constant 0 : i32
    %c0_i32_1 = arith.constant 0 : i32
    return %arg0, %c0_i32, %c0_i32_0 : i32, i32, i32
  }
  func.func @transform_1(%arg0: i32) -> (i32, i32, i32) {
    %c0_i32 = arith.constant 0 : i32
    %c0_i32_0 = arith.constant 0 : i32
    %c0_i32_1 = arith.constant 0 : i32
    %c0_i32_2 = arith.constant 0 : i32
    return %c0_i32, %c0_i32_0, %c0_i32_1 : i32, i32, i32
  }
  func.func @transform_2(%arg0: i32) -> (i32, i32) {
    %c0_i32 = arith.constant 0 : i32
    %c0_i32_0 = arith.constant 0 : i32
    %c0_i32_1 = arith.constant 0 : i32
    return %c0_i32, %c0_i32_0 : i32, i32
  }
  func.func @transform_3(%arg0: i32) -> (i32, i32) {
    %c0_i32 = arith.constant 0 : i32
    %c0_i32_0 = arith.constant 0 : i32
    %c0_i32_1 = arith.constant 0 : i32
    return %c0_i32, %c0_i32_0 : i32, i32
  }
  func.func @transform_4(%arg0: i32) -> (i32, i32) {
    %c0_i32 = arith.constant 0 : i32
    %c0_i32_0 = arith.constant 0 : i32
    %c0_i32_1 = arith.constant 0 : i32
    return %c0_i32, %c0_i32_0 : i32, i32
  }
  func.func @transform_5(%arg0: i32) -> (i32, i32, i32) {
    %c0_i32 = arith.constant 0 : i32
    %c0_i32_0 = arith.constant 0 : i32
    %c0_i32_1 = arith.constant 0 : i32
    %c0_i32_2 = arith.constant 0 : i32
    return %c0_i32, %c0_i32_0, %c0_i32_1 : i32, i32, i32
  }
  func.func @transform_6(%arg0: i32) -> (i32, i32, i32) {
    %c0_i32 = arith.constant 0 : i32
    %c0_i32_0 = arith.constant 0 : i32
    %c0_i32_1 = arith.constant 0 : i32
    %c0_i32_2 = arith.constant 0 : i32
    return %c0_i32, %c0_i32_0, %c0_i32_1 : i32, i32, i32
  }
  func.func @transform_7(%arg0: i32) -> (i32, i32, i32) {
    %c0_i32 = arith.constant 0 : i32
    %c0_i32_0 = arith.constant 0 : i32
    %c0_i32_1 = arith.constant 0 : i32
    %c0_i32_2 = arith.constant 0 : i32
    return %c0_i32, %c0_i32_0, %c0_i32_1 : i32, i32, i32
  }
  func.func @transform_8(%arg0: i32) -> (i32, i32, i32) {
    %c0_i32 = arith.constant 0 : i32
    %c0_i32_0 = arith.constant 0 : i32
    %c0_i32_1 = arith.constant 0 : i32
    %c0_i32_2 = arith.constant 0 : i32
    return %c0_i32, %c0_i32_0, %c0_i32_1 : i32, i32, i32
  }
  func.func @transform_9(%arg0: i32) -> (i32, i32, i32) {
    %c0_i32 = arith.constant 0 : i32
    %c0_i32_0 = arith.constant 0 : i32
    %c0_i32_1 = arith.constant 0 : i32
    %c0_i32_2 = arith.constant 0 : i32
    return %c0_i32, %c0_i32_0, %c0_i32_1 : i32, i32, i32
  }
  func.func @transform_10(%arg0: i32) -> (i32, i32, i32) {
    %c0_i32 = arith.constant 0 : i32
    %c0_i32_0 = arith.constant 0 : i32
    %c0_i32_1 = arith.constant 0 : i32
    %c0_i32_2 = arith.constant 0 : i32
    return %c0_i32, %c0_i32_0, %c0_i32_1 : i32, i32, i32
  }
  func.func @transform_11(%arg0: i32) -> (i32, i32, i32, i32) {
    %c0_i32 = arith.constant 0 : i32
    %c0_i32_0 = arith.constant 0 : i32
    %c0_i32_1 = arith.constant 0 : i32
    %c0_i32_2 = arith.constant 0 : i32
    return %arg0, %c0_i32, %c0_i32_0, %c0_i32_1 : i32, i32, i32, i32
  }
  func.func @transform_12(%arg0: i32) -> (i32, i32, i32, i32) {
    %c0_i32 = arith.constant 0 : i32
    %c0_i32_0 = arith.constant 0 : i32
    %c0_i32_1 = arith.constant 0 : i32
    %c0_i32_2 = arith.constant 0 : i32
    return %arg0, %c0_i32, %c0_i32_0, %c0_i32_1 : i32, i32, i32, i32
  }
  func.func @transform_13(%arg0: i32) -> (i32, i32, i32, i32) {
    %c0_i32 = arith.constant 0 : i32
    %c0_i32_0 = arith.constant 0 : i32
    %c0_i32_1 = arith.constant 0 : i32
    %c0_i32_2 = arith.constant 0 : i32
    return %arg0, %c0_i32, %c0_i32_0, %c0_i32_1 : i32, i32, i32, i32
  }
}

module attributes {stable_mosaic.version = 11 : i64} {
  func.func @_linear_kernel(%arg0: i32, %arg1: memref<16x8xf32, #tpu.memory_space<vmem>>, %arg2: memref<8x32xbf16, #tpu.memory_space<vmem>>, %arg3: memref<1x32xf32, #tpu.memory_space<vmem>>, %arg4: memref<16x32xf32, #tpu.memory_space<vmem>>) attributes {dimension_semantics = [#tpu.dimension_semantics<parallel>], iteration_bounds = array<i64: 1>, scalar_prefetch = 0 : i64, scratch_operands = 0 : i64, tpu.core_type = #tpu.core_type<tc>, window_params = [{transform_indices = @transform_0, window_bounds = array<i64: 16, 8>}, {pipeline_mode = #tpu.pipeline_mode<synchronous>, transform_indices = @transform_1, window_bounds = array<i64: 8, 32>}, {pipeline_mode = #tpu.pipeline_mode<synchronous>, transform_indices = @transform_2, window_bounds = array<i64: 1, 32>}, {transform_indices = @transform_3, window_bounds = array<i64: 16, 32>}]} {
    %c0 = arith.constant 0 : index
    %c0_0 = arith.constant 0 : index
    %0 = vector.load %arg1[%c0, %c0_0] : memref<16x8xf32, #tpu.memory_space<vmem>>, vector<16x8xf32>
    %c0_1 = arith.constant 0 : index
    %c0_2 = arith.constant 0 : index
    %1 = vector.load %arg2[%c0_1, %c0_2] : memref<8x32xbf16, #tpu.memory_space<vmem>>, vector<8x32xbf16>
    %2 = arith.truncf %0 : vector<16x8xf32> to vector<16x8xbf16>
    %cst = arith.constant dense<0.000000e+00> : vector<16x32xf32>
    %3 = tpu.matmul %2, %1, %cst {dimension_numbers = #tpu.dot_dimension_numbers<[1], [0], [0], [1], [0, 0, 1, 1], [], []>} : vector<16x8xbf16>, vector<8x32xbf16>, vector<16x32xf32> -> vector<16x32xf32>
    %c0_3 = arith.constant 0 : index
    %c0_4 = arith.constant 0 : index
    %4 = vector.load %arg3[%c0_3, %c0_4] : memref<1x32xf32, #tpu.memory_space<vmem>>, vector<1x32xf32>
    %5 = vector.broadcast %4 : vector<1x32xf32> to vector<16x32xf32>
    %6 = arith.addf %3, %5 : vector<16x32xf32>
    %c0_5 = arith.constant 0 : index
    %c0_6 = arith.constant 0 : index
    %7 = vector.load %arg4[%c0_5, %c0_6] : memref<16x32xf32, #tpu.memory_space<vmem>>, vector<16x32xf32>
    tpu.vector_store %arg4[%c0_5, %c0_6], %6 {strides = array<i32>} : memref<16x32xf32, #tpu.memory_space<vmem>>, vector<16x32xf32>,
    return
  }
  func.func @transform_0(%arg0: i32) -> (i32, i32) {
    %c0_i32 = arith.constant 0 : i32
    %c0_i32_0 = arith.constant 0 : i32
    return %arg0, %c0_i32 : i32, i32
  }
  func.func @transform_1(%arg0: i32) -> (i32, i32) {
    %c0_i32 = arith.constant 0 : i32
    %c0_i32_0 = arith.constant 0 : i32
    %c0_i32_1 = arith.constant 0 : i32
    return %c0_i32, %c0_i32_0 : i32, i32
  }
  func.func @transform_2(%arg0: i32) -> (i32, i32) {
    %c0_i32 = arith.constant 0 : i32
    %c0_i32_0 = arith.constant 0 : i32
    %c0_i32_1 = arith.constant 0 : i32
    return %c0_i32, %c0_i32_0 : i32, i32
  }
  func.func @transform_3(%arg0: i32) -> (i32, i32) {
    %c0_i32 = arith.constant 0 : i32
    %c0_i32_0 = arith.constant 0 : i32
    return %arg0, %c0_i32 : i32, i32
  }
}

module attributes {stable_mosaic.version = 11 : i64} {
  func.func @_attn_epilogue_kernel(%arg0: i32, %arg1: i32, %arg2: memref<1x4x8x16xbf16, #tpu.memory_space<vmem>>, %arg3: memref<1x4x8x16xbf16, #tpu.memory_space<vmem>>, %arg4: memref<1x4x8x16xbf16, #tpu.memory_space<vmem>>, %arg5: memref<1x8x32xf32, #tpu.memory_space<vmem>>, %arg6: memref<4x16x32xbf16, #tpu.memory_space<vmem>>, %arg7: memref<1x32xf32, #tpu.memory_space<vmem>>, %arg8: memref<32x32xbf16, #tpu.memory_space<vmem>>, %arg9: memref<1x32xf32, #tpu.memory_space<vmem>>, %arg10: memref<64x32xbf16, #tpu.memory_space<vmem>>, %arg11: memref<1x32xf32, #tpu.memory_space<vmem>>, %arg12: memref<1x32xf32, #tpu.memory_space<vmem>>, %arg13: memref<1x32xf32, #tpu.memory_space<vmem>>, %arg14: memref<32x32xbf16, #tpu.memory_space<vmem>>, %arg15: memref<1x32xf32, #tpu.memory_space<vmem>>, %arg16: memref<1x8x32xf32, #tpu.memory_space<vmem>>, %arg17: memref<1x8x32xbf16, #tpu.memory_space<vmem>>, %arg18: memref<8x32xf32, #tpu.memory_space<vmem>>) attributes {dimension_semantics = [#tpu.dimension_semantics<parallel>, #tpu.dimension_semantics<arbitrary>], iteration_bounds = array<i64: 2, 1>, scalar_prefetch = 0 : i64, scratch_operands = 1 : i64, tpu.core_type = #tpu.core_type<tc>, window_params = [{transform_indices = @transform_0, window_bounds = array<i64: 1, 4, 8, 16>}, {transform_indices = @transform_1, window_bounds = array<i64: 1, 4, 8, 16>}, {transform_indices = @transform_2, window_bounds = array<i64: 1, 4, 8, 16>}, {transform_indices = @transform_3, window_bounds = array<i64: 1, 8, 32>}, {pipeline_mode = #tpu.pipeline_mode<synchronous>, transform_indices = @transform_4, window_bounds = array<i64: 4, 16, 32>}, {pipeline_mode = #tpu.pipeline_mode<synchronous>, transform_indices = @transform_5, window_bounds = array<i64: 1, 32>}, {pipeline_mode = #tpu.pipeline_mode<synchronous>, transform_indices = @transform_6, window_bounds = array<i64: 32, 32>}, {pipeline_mode = #tpu.pipeline_mode<synchronous>, transform_indices = @transform_7, window_bounds = array<i64: 1, 32>}, {pipeline_mode = #tpu.pipeline_mode<synchronous>, transform_indices = @transform_8, window_bounds = array<i64: 64, 32>}, {pipeline_mode = #tpu.pipeline_mode<synchronous>, transform_indices = @transform_9, window_bounds = array<i64: 1, 32>}, {pipeline_mode = #tpu.pipeline_mode<synchronous>, transform_indices = @transform_10, window_bounds = array<i64: 1, 32>}, {pipeline_mode = #tpu.pipeline_mode<synchronous>, transform_indices = @transform_11, window_bounds = array<i64: 1, 32>}, {pipeline_mode = #tpu.pipeline_mode<synchronous>, transform_indices = @transform_12, window_bounds = array<i64: 32, 32>}, {pipeline_mode = #tpu.pipeline_mode<synchronous>, transform_indices = @transform_13, window_bounds = array<i64: 1, 32>}, {transform_indices = @transform_14, window_bounds = array<i64: 1, 8, 32>}, {transform_indices = @transform_15, window_bounds = array<i64: 1, 8, 32>}]} {
    %cst = arith.constant 0.000000e+00 : f32
    %0 = vector.broadcast %cst : f32 to vector<8x32xf32>
    %c0 = arith.constant 0 : index
    %c0_0 = arith.constant 0 : index
    %1 = vector.load %arg18[%c0, %c0_0] : memref<8x32xf32, #tpu.memory_space<vmem>>, vector<8x32xf32>
    tpu.vector_store %arg18[%c0, %c0_0], %0 {strides = array<i32>} : memref<8x32xf32, #tpu.memory_space<vmem>>, vector<8x32xf32>,
    %c0_i32 = arith.constant 0 : i32
    %c4_i32 = arith.constant 4 : i32
    %2 = arith.addi %c0_i32, %c4_i32 : i32
    %c1_i32 = arith.constant 1 : i32
    scf.for %arg19 = %c0_i32 to %2 step %c1_i32  : i32 {
      %c0_40 = arith.constant 0 : index
      %66 = arith.index_cast %arg19 : i32 to index
      %c0_41 = arith.constant 0 : index
      %c0_42 = arith.constant 0 : index
      %67 = vector.load %arg2[%c0_40, %66, %c0_41, %c0_42] : memref<1x4x8x16xbf16, #tpu.memory_space<vmem>>, vector<1x1x8x16xbf16>
      %68 = vector.shape_cast %67 : vector<1x1x8x16xbf16> to vector<8x16xbf16>
      %c0_43 = arith.constant 0 : index
      %69 = arith.index_cast %arg19 : i32 to index
      %c0_44 = arith.constant 0 : index
      %c0_45 = arith.constant 0 : index
      %70 = vector.load %arg3[%c0_43, %69, %c0_44, %c0_45] : memref<1x4x8x16xbf16, #tpu.memory_space<vmem>>, vector<1x1x8x16xbf16>
      %71 = vector.shape_cast %70 : vector<1x1x8x16xbf16> to vector<8x16xbf16>
      %c0_46 = arith.constant 0 : index
      %72 = arith.index_cast %arg19 : i32 to index
      %c0_47 = arith.constant 0 : index
      %c0_48 = arith.constant 0 : index
      %73 = vector.load %arg4[%c0_46, %72, %c0_47, %c0_48] : memref<1x4x8x16xbf16, #tpu.memory_space<vmem>>, vector<1x1x8x16xbf16>
      %74 = vector.shape_cast %73 : vector<1x1x8x16xbf16> to vector<8x16xbf16>
      %cst_49 = arith.constant dense<0.000000e+00> : vector<8x8xf32>
      %75 = tpu.matmul %68, %71, %cst_49 {dimension_numbers = #tpu.dot_dimension_numbers<[1], [1], [0], [0], [0, 0, 1, 0], [], []>} : vector<8x16xbf16>, vector<8x16xbf16>, vector<8x8xf32> -> vector<8x8xf32>
      %cst_50 = arith.constant 2.500000e-01 : f32
      %76 = vector.broadcast %cst_50 : f32 to vector<8x8xf32>
      %77 = arith.mulf %75, %76 : vector<8x8xf32>
      %cst_51 = arith.constant dense<0xFF800000> : vector<8xf32>
      %78 = vector.multi_reduction <maximumf>, %77, %cst_51 [1] : vector<8x8xf32> to vector<8xf32>
      %79 = vector.shape_cast %78 : vector<8xf32> to vector<8x1xf32>
      %80 = vector.broadcast %79 : vector<8x1xf32> to vector<8x8xf32>
      %81 = arith.subf %77, %80 : vector<8x8xf32>
      %82 = math.exp %81 : vector<8x8xf32>
      %cst_52 = arith.constant dense<0.000000e+00> : vector<8xf32>
      %83 = vector.multi_reduction <add>, %82, %cst_52 [1] : vector<8x8xf32> to vector<8xf32>
      %84 = vector.shape_cast %83 : vector<8xf32> to vector<8x1xf32>
      %85 = tpu.reciprocal %84 {approx = true} : vector<8x1xf32> -> vector<8x1xf32>
      %86 = vector.broadcast %85 : vector<8x1xf32> to vector<8x8xf32>
      %87 = arith.mulf %82, %86 : vector<8x8xf32>
      %88 = arith.truncf %87 : vector<8x8xf32> to vector<8x8xbf16>
      %cst_53 = arith.constant dense<0.000000e+00> : vector<8x16xf32>
      %89 = tpu.matmul %88, %74, %cst_53 {dimension_numbers = #tpu.dot_dimension_numbers<[1], [0], [0], [1], [0, 0, 1, 1], [], []>} : vector<8x8xbf16>, vector<8x16xbf16>, vector<8x16xf32> -> vector<8x16xf32>
      %c0_54 = arith.constant 0 : index
      %c0_55 = arith.constant 0 : index
      %90 = vector.load %arg18[%c0_54, %c0_55] : memref<8x32xf32, #tpu.memory_space<vmem>>, vector<8x32xf32>
      %91 = arith.truncf %89 : vector<8x16xf32> to vector<8x16xbf16>
      %92 = arith.index_cast %arg19 : i32 to index
      %c0_56 = arith.constant 0 : index
      %c0_57 = arith.constant 0 : index
      %93 = vector.load %arg6[%92, %c0_56, %c0_57] : memref<4x16x32xbf16, #tpu.memory_space<vmem>>, vector<1x16x32xbf16>
      %94 = vector.shape_cast %93 : vector<1x16x32xbf16> to vector<16x32xbf16>
      %cst_58 = arith.constant dense<0.000000e+00> : vector<8x32xf32>
      %95 = tpu.matmul %91, %94, %cst_58 {dimension_numbers = #tpu.dot_dimension_numbers<[1], [0], [0], [1], [0, 0, 1, 1], [], []>} : vector<8x16xbf16>, vector<16x32xbf16>, vector<8x32xf32> -> vector<8x32xf32>
      %96 = arith.addf %90, %95 : vector<8x32xf32>
      %c0_59 = arith.constant 0 : index
      %c0_60 = arith.constant 0 : index
      %97 = vector.load %arg18[%c0_59, %c0_60] : memref<8x32xf32, #tpu.memory_space<vmem>>, vector<8x32xf32>
      tpu.vector_store %arg18[%c0_59, %c0_60], %96 {strides = array<i32>} : memref<8x32xf32, #tpu.memory_space<vmem>>, vector<8x32xf32>,
    }
    %c4_i32_1 = arith.constant 4 : i32
    %c0_2 = arith.constant 0 : index
    %c0_3 = arith.constant 0 : index
    %c0_4 = arith.constant 0 : index
    %3 = vector.load %arg5[%c0_2, %c0_3, %c0_4] : memref<1x8x32xf32, #tpu.memory_space<vmem>>, vector<1x8x32xf32>
    %4 = vector.shape_cast %3 : vector<1x8x32xf32> to vector<8x32xf32>
    %c0_5 = arith.constant 0 : index
    %c0_6 = arith.constant 0 : index
    %5 = vector.load %arg18[%c0_5, %c0_6] : memref<8x32xf32, #tpu.memory_space<vmem>>, vector<8x32xf32>
    %c0_7 = arith.constant 0 : index
    %c0_8 = arith.constant 0 : index
    %6 = vector.load %arg7[%c0_7, %c0_8] : memref<1x32xf32, #tpu.memory_space<vmem>>, vector<1x32xf32>
    %7 = vector.broadcast %6 : vector<1x32xf32> to vector<8x32xf32>
    %8 = arith.addf %5, %7 : vector<8x32xf32>
    %c0_9 = arith.constant 0 : index
    %c0_10 = arith.constant 0 : index
    %9 = vector.load %arg8[%c0_9, %c0_10] : memref<32x32xbf16, #tpu.memory_space<vmem>>, vector<32x32xbf16>
    %10 = arith.truncf %8 : vector<8x32xf32> to vector<8x32xbf16>
    %cst_11 = arith.constant dense<0.000000e+00> : vector<8x32xf32>
    %11 = tpu.matmul %10, %9, %cst_11 {dimension_numbers = #tpu.dot_dimension_numbers<[1], [0], [0], [1], [0, 0, 1, 1], [], []>} : vector<8x32xbf16>, vector<32x32xbf16>, vector<8x32xf32> -> vector<8x32xf32>
    %c0_12 = arith.constant 0 : index
    %c0_13 = arith.constant 0 : index
    %12 = vector.load %arg9[%c0_12, %c0_13] : memref<1x32xf32, #tpu.memory_space<vmem>>, vector<1x32xf32>
    %13 = vector.broadcast %12 : vector<1x32xf32> to vector<8x32xf32>
    %14 = arith.addf %11, %13 : vector<8x32xf32>
    %15 = tpu.concatenate %4, %14 in 1 : vector<8x32xf32>, vector<8x32xf32> -> vector<8x64xf32>
    %c0_14 = arith.constant 0 : index
    %c0_15 = arith.constant 0 : index
    %16 = vector.load %arg10[%c0_14, %c0_15] : memref<64x32xbf16, #tpu.memory_space<vmem>>, vector<64x32xbf16>
    %17 = arith.truncf %15 : vector<8x64xf32> to vector<8x64xbf16>
    %cst_16 = arith.constant dense<0.000000e+00> : vector<8x32xf32>
    %18 = tpu.matmul %17, %16, %cst_16 {dimension_numbers = #tpu.dot_dimension_numbers<[1], [0], [0], [1], [0, 0, 1, 1], [], []>} : vector<8x64xbf16>, vector<64x32xbf16>, vector<8x32xf32> -> vector<8x32xf32>
    %c0_17 = arith.constant 0 : index
    %c0_18 = arith.constant 0 : index
    %19 = vector.load %arg11[%c0_17, %c0_18] : memref<1x32xf32, #tpu.memory_space<vmem>>, vector<1x32xf32>
    %20 = vector.broadcast %19 : vector<1x32xf32> to vector<8x32xf32>
    %21 = arith.addf %18, %20 : vector<8x32xf32>
    %22 = arith.negf %21 : vector<8x32xf32>
    %23 = math.exp %22 : vector<8x32xf32>
    %cst_19 = arith.constant 1.000000e+00 : f32
    %24 = vector.broadcast %cst_19 : f32 to vector<8x32xf32>
    %25 = arith.addf %24, %23 : vector<8x32xf32>
    %26 = arith.divf %24, %25 : vector<8x32xf32>
    %27 = arith.mulf %26, %14 : vector<8x32xf32>
    %28 = arith.addf %4, %27 : vector<8x32xf32>
    %cst_20 = arith.constant dense<0.000000e+00> : vector<8xf32>
    %29 = vector.multi_reduction <add>, %28, %cst_20 [1] : vector<8x32xf32> to vector<8xf32>
    %30 = vector.shape_cast %29 : vector<8xf32> to vector<8x1xf32>
    %cst_21 = arith.constant 3.200000e+01 : f32
    %31 = vector.broadcast %cst_21 : f32 to vector<8x1xf32>
    %32 = arith.divf %30, %31 : vector<8x1xf32>
    %33 = vector.broadcast %32 : vector<8x1xf32> to vector<8x32xf32>
    %34 = arith.subf %28, %33 : vector<8x32xf32>
    %35 = arith.mulf %34, %34 : vector<8x32xf32>
    %cst_22 = arith.constant dense<0.000000e+00> : vector<8xf32>
    %36 = vector.multi_reduction <add>, %35, %cst_22 [1] : vector<8x32xf32> to vector<8xf32>
    %37 = vector.shape_cast %36 : vector<8xf32> to vector<8x1xf32>
    %cst_23 = arith.constant 3.200000e+01 : f32
    %38 = vector.broadcast %cst_23 : f32 to vector<8x1xf32>
    %39 = arith.divf %37, %38 : vector<8x1xf32>
    %40 = vector.broadcast %32 : vector<8x1xf32> to vector<8x32xf32>
    %41 = arith.subf %28, %40 : vector<8x32xf32>
    %cst_24 = arith.constant 9.99999974E-6 : f32
    %42 = vector.broadcast %cst_24 : f32 to vector<8x1xf32>
    %43 = arith.addf %39, %42 : vector<8x1xf32>
    %44 = math.rsqrt %43 : vector<8x1xf32>
    %45 = vector.broadcast %44 : vector<8x1xf32> to vector<8x32xf32>
    %46 = arith.mulf %41, %45 : vector<8x32xf32>
    %c0_25 = arith.constant 0 : index
    %c0_26 = arith.constant 0 : index
    %47 = vector.load %arg12[%c0_25, %c0_26] : memref<1x32xf32, #tpu.memory_space<vmem>>, vector<1x32xf32>
    %48 = vector.broadcast %47 : vector<1x32xf32> to vector<8x32xf32>
    %49 = arith.mulf %46, %48 : vector<8x32xf32>
    %c0_27 = arith.constant 0 : index
    %c0_28 = arith.constant 0 : index
    %50 = vector.load %arg13[%c0_27, %c0_28] : memref<1x32xf32, #tpu.memory_space<vmem>>, vector<1x32xf32>
    %51 = vector.broadcast %50 : vector<1x32xf32> to vector<8x32xf32>
    %52 = arith.addf %49, %51 : vector<8x32xf32>
    %c0_29 = arith.constant 0 : index
    %c0_30 = arith.constant 0 : index
    %c0_31 = arith.constant 0 : index
    %53 = vector.load %arg16[%c0_29, %c0_30, %c0_31] : memref<1x8x32xf32, #tpu.memory_space<vmem>>, vector<1x8x32xf32>
    %54 = vector.shape_cast %53 : vector<1x8x32xf32> to vector<8x32xf32>
    %55 = vector.shape_cast %52 : vector<8x32xf32> to vector<1x8x32xf32>
    tpu.vector_store %arg16[%c0_29, %c0_30, %c0_31], %55 {strides = array<i32>} : memref<1x8x32xf32, #tpu.memory_space<vmem>>, vector<1x8x32xf32>,
    %c0_32 = arith.constant 0 : index
    %c0_33 = arith.constant 0 : index
    %56 = vector.load %arg14[%c0_32, %c0_33] : memref<32x32xbf16, #tpu.memory_space<vmem>>, vector<32x32xbf16>
    %57 = arith.truncf %52 : vector<8x32xf32> to vector<8x32xbf16>
    %cst_34 = arith.constant dense<0.000000e+00> : vector<8x32xf32>
    %58 = tpu.matmul %57, %56, %cst_34 {dimension_numbers = #tpu.dot_dimension_numbers<[1], [0], [0], [1], [0, 0, 1, 1], [], []>} : vector<8x32xbf16>, vector<32x32xbf16>, vector<8x32xf32> -> vector<8x32xf32>
    %c0_35 = arith.constant 0 : index
    %c0_36 = arith.constant 0 : index
    %59 = vector.load %arg15[%c0_35, %c0_36] : memref<1x32xf32, #tpu.memory_space<vmem>>, vector<1x32xf32>
    %60 = vector.broadcast %59 : vector<1x32xf32> to vector<8x32xf32>
    %61 = arith.addf %58, %60 : vector<8x32xf32>
    %62 = arith.truncf %61 : vector<8x32xf32> to vector<8x32xbf16>
    %c0_37 = arith.constant 0 : index
    %c0_38 = arith.constant 0 : index
    %c0_39 = arith.constant 0 : index
    %63 = vector.load %arg17[%c0_37, %c0_38, %c0_39] : memref<1x8x32xbf16, #tpu.memory_space<vmem>>, vector<1x8x32xbf16>
    %64 = vector.shape_cast %63 : vector<1x8x32xbf16> to vector<8x32xbf16>
    %65 = vector.shape_cast %62 : vector<8x32xbf16> to vector<1x8x32xbf16>
    tpu.vector_store %arg17[%c0_37, %c0_38, %c0_39], %65 {strides = array<i32>} : memref<1x8x32xbf16, #tpu.memory_space<vmem>>, vector<1x8x32xbf16>,
    return
  }
  func.func @transform_0(%arg0: i32, %arg1: i32) -> (i32, i32, i32, i32) {
    %c0_i32 = arith.constant 0 : i32
    %c0_i32_0 = arith.constant 0 : i32
    %c0_i32_1 = arith.constant 0 : i32
    return %arg0, %c0_i32, %arg1, %c0_i32_0 : i32, i32, i32, i32
  }
  func.func @transform_1(%arg0: i32, %arg1: i32) -> (i32, i32, i32, i32) {
    %c0_i32 = arith.constant 0 : i32
    %c0_i32_0 = arith.constant 0 : i32
    %c0_i32_1 = arith.constant 0 : i32
    %c0_i32_2 = arith.constant 0 : i32
    return %arg0, %c0_i32, %c0_i32_0, %c0_i32_1 : i32, i32, i32, i32
  }
  func.func @transform_2(%arg0: i32, %arg1: i32) -> (i32, i32, i32, i32) {
    %c0_i32 = arith.constant 0 : i32
    %c0_i32_0 = arith.constant 0 : i32
    %c0_i32_1 = arith.constant 0 : i32
    %c0_i32_2 = arith.constant 0 : i32
    return %arg0, %c0_i32, %c0_i32_0, %c0_i32_1 : i32, i32, i32, i32
  }
  func.func @transform_3(%arg0: i32, %arg1: i32) -> (i32, i32, i32) {
    %c0_i32 = arith.constant 0 : i32
    %c0_i32_0 = arith.constant 0 : i32
    return %arg0, %arg1, %c0_i32 : i32, i32, i32
  }
  func.func @transform_4(%arg0: i32, %arg1: i32) -> (i32, i32, i32) {
    %c0_i32 = arith.constant 0 : i32
    %c0_i32_0 = arith.constant 0 : i32
    %c0_i32_1 = arith.constant 0 : i32
    %c0_i32_2 = arith.constant 0 : i32
    return %c0_i32, %c0_i32_0, %c0_i32_1 : i32, i32, i32
  }
  func.func @transform_5(%arg0: i32, %arg1: i32) -> (i32, i32) {
    %c0_i32 = arith.constant 0 : i32
    %c0_i32_0 = arith.constant 0 : i32
    %c0_i32_1 = arith.constant 0 : i32
    return %c0_i32, %c0_i32_0 : i32, i32
  }
  func.func @transform_6(%arg0: i32, %arg1: i32) -> (i32, i32) {
    %c0_i32 = arith.constant 0 : i32
    %c0_i32_0 = arith.constant 0 : i32
    %c0_i32_1 = arith.constant 0 : i32
    return %c0_i32, %c0_i32_0 : i32, i32
  }
  func.func @transform_7(%arg0: i32, %arg1: i32) -> (i32, i32) {
    %c0_i32 = arith.constant 0 : i32
    %c0_i32_0 = arith.constant 0 : i32
    %c0_i32_1 = arith.constant 0 : i32
    return %c0_i32, %c0_i32_0 : i32, i32
  }
  func.func @transform_8(%arg0: i32, %arg1: i32) -> (i32, i32) {
    %c0_i32 = arith.constant 0 : i32
    %c0_i32_0 = arith.constant 0 : i32
    %c0_i32_1 = arith.constant 0 : i32
    return %c0_i32, %c0_i32_0 : i32, i32
  }
  func.func @transform_9(%arg0: i32, %arg1: i32) -> (i32, i32) {
    %c0_i32 = arith.constant 0 : i32
    %c0_i32_0 = arith.constant 0 : i32
    %c0_i32_1 = arith.constant 0 : i32
    return %c0_i32, %c0_i32_0 : i32, i32
  }
  func.func @transform_10(%arg0: i32, %arg1: i32) -> (i32, i32) {
    %c0_i32 = arith.constant 0 : i32
    %c0_i32_0 = arith.constant 0 : i32
    %c0_i32_1 = arith.constant 0 : i32
    return %c0_i32, %c0_i32_0 : i32, i32
  }
  func.func @transform_11(%arg0: i32, %arg1: i32) -> (i32, i32) {
    %c0_i32 = arith.constant 0 : i32
    %c0_i32_0 = arith.constant 0 : i32
    %c0_i32_1 = arith.constant 0 : i32
    return %c0_i32, %c0_i32_0 : i32, i32
  }
  func.func @transform_12(%arg0: i32, %arg1: i32) -> (i32, i32) {
    %c0_i32 = arith.constant 0 : i32
    %c0_i32_0 = arith.constant 0 : i32
    %c0_i32_1 = arith.constant 0 : i32
    return %c0_i32, %c0_i32_0 : i32, i32
  }
  func.func @transform_13(%arg0: i32, %arg1: i32) -> (i32, i32) {
    %c0_i32 = arith.constant 0 : i32
    %c0_i32_0 = arith.constant 0 : i32
    %c0_i32_1 = arith.constant 0 : i32
    return %c0_i32, %c0_i32_0 : i32, i32
  }
  func.func @transform_14(%arg0: i32, %arg1: i32) -> (i32, i32, i32) {
    %c0_i32 = arith.constant 0 : i32
    %c0_i32_0 = arith.constant 0 : i32
    return %arg0, %arg1, %c0_i32 : i32, i32, i32
  }
  func.func @transform_15(%arg0: i32, %arg1: i32) -> (i32, i32, i32) {
    %c0_i32 = arith.constant 0 : i32
    %c0_i32_0 = arith.constant 0 : i32
    return %arg0, %arg1, %c0_i32 : i32, i32, i32
  }
}

module attributes {stable_mosaic.version = 11 : i64} {
  func.func @_conv_qkv_kernel(%arg0: i32, %arg1: memref<1x8x32xf32, #tpu.memory_space<vmem>>, %arg2: memref<3x32x32xbf16, #tpu.memory_space<vmem>>, %arg3: memref<1x32xf32, #tpu.memory_space<vmem>>, %arg4: memref<1x32xf32, #tpu.memory_space<vmem>>, %arg5: memref<1x32xf32, #tpu.memory_space<vmem>>, %arg6: memref<4x32x16xbf16, #tpu.memory_space<vmem>>, %arg7: memref<4x1x16xf32, #tpu.memory_space<vmem>>, %arg8: memref<4x32x16xbf16, #tpu.memory_space<vmem>>, %arg9: memref<4x1x16xf32, #tpu.memory_space<vmem>>, %arg10: memref<4x32x16xbf16, #tpu.memory_space<vmem>>, %arg11: memref<4x1x16xf32, #tpu.memory_space<vmem>>, %arg12: memref<1x4x8x16xbf16, #tpu.memory_space<vmem>>, %arg13: memref<1x4x8x16xbf16, #tpu.memory_space<vmem>>, %arg14: memref<1x4x8x16xbf16, #tpu.memory_space<vmem>>) attributes {dimension_semantics = [#tpu.dimension_semantics<parallel>], iteration_bounds = array<i64: 2>, scalar_prefetch = 0 : i64, scratch_operands = 0 : i64, tpu.core_type = #tpu.core_type<tc>, window_params = [{transform_indices = @transform_0, window_bounds = array<i64: 1, 8, 32>}, {pipeline_mode = #tpu.pipeline_mode<synchronous>, transform_indices = @transform_1, window_bounds = array<i64: 3, 32, 32>}, {pipeline_mode = #tpu.pipeline_mode<synchronous>, transform_indices = @transform_2, window_bounds = array<i64: 1, 32>}, {pipeline_mode = #tpu.pipeline_mode<synchronous>, transform_indices = @transform_3, window_bounds = array<i64: 1, 32>}, {pipeline_mode = #tpu.pipeline_mode<synchronous>, transform_indices = @transform_4, window_bounds = array<i64: 1, 32>}, {pipeline_mode = #tpu.pipeline_mode<synchronous>, transform_indices = @transform_5, window_bounds = array<i64: 4, 32, 16>}, {pipeline_mode = #tpu.pipeline_mode<synchronous>, transform_indices = @transform_6, window_bounds = array<i64: 4, 1, 16>}, {pipeline_mode = #tpu.pipeline_mode<synchronous>, transform_indices = @transform_7, window_bounds = array<i64: 4, 32, 16>}, {pipeline_mode = #tpu.pipeline_mode<synchronous>, transform_indices = @transform_8, window_bounds = array<i64: 4, 1, 16>}, {pipeline_mode = #tpu.pipeline_mode<synchronous>, transform_indices = @transform_9, window_bounds = array<i64: 4, 32, 16>}, {pipeline_mode = #tpu.pipeline_mode<synchronous>, transform_indices = @transform_10, window_bounds = array<i64: 4, 1, 16>}, {transform_indices = @transform_11, window_bounds = array<i64: 1, 4, 8, 16>}, {transform_indices = @transform_12, window_bounds = array<i64: 1, 4, 8, 16>}, {transform_indices = @transform_13, window_bounds = array<i64: 1, 4, 8, 16>}]} {
    %c0 = arith.constant 0 : index
    %c0_0 = arith.constant 0 : index
    %c0_1 = arith.constant 0 : index
    %0 = vector.load %arg1[%c0, %c0_0, %c0_1] : memref<1x8x32xf32, #tpu.memory_space<vmem>>, vector<1x8x32xf32>
    %1 = vector.shape_cast %0 : vector<1x8x32xf32> to vector<8x32xf32>
    %cst = arith.constant 0.000000e+00 : f32
    %2 = vector.broadcast %cst : f32 to vector<8x32xf32>
    %c0_2 = arith.constant 0 : index
    %c0_3 = arith.constant 0 : index
    %3 = vector.load %arg3[%c0_2, %c0_3] : memref<1x32xf32, #tpu.memory_space<vmem>>, vector<1x32xf32>
    %4 = vector.broadcast %3 : vector<1x32xf32> to vector<8x32xf32>
    %5 = arith.addf %2, %4 : vector<8x32xf32>
    %cst_4 = arith.constant 0.000000e+00 : f32
    %6 = vector.broadcast %cst_4 : f32 to vector<4x32xf32>
    %7 = vector.extract_strided_slice %1 {offsets = [0, 0], sizes = [4, 32], strides = [1, 1]} : vector<8x32xf32> to vector<4x32xf32>
    %8 = tpu.concatenate %6, %7 in 0 : vector<4x32xf32>, vector<4x32xf32> -> vector<8x32xf32>
    %9 = arith.truncf %8 : vector<8x32xf32> to vector<8x32xbf16>
    %c0_5 = arith.constant 0 : index
    %c0_6 = arith.constant 0 : index
    %c0_7 = arith.constant 0 : index
    %10 = vector.load %arg2[%c0_5, %c0_6, %c0_7] : memref<3x32x32xbf16, #tpu.memory_space<vmem>>, vector<1x32x32xbf16>
    %11 = vector.shape_cast %10 : vector<1x32x32xbf16> to vector<32x32xbf16>
    %cst_8 = arith.constant dense<0.000000e+00> : vector<8x32xf32>
    %12 = tpu.matmul %9, %11, %cst_8 {dimension_numbers = #tpu.dot_dimension_numbers<[1], [0], [0], [1], [0, 0, 1, 1], [], []>} : vector<8x32xbf16>, vector<32x32xbf16>, vector<8x32xf32> -> vector<8x32xf32>
    %13 = arith.addf %5, %12 : vector<8x32xf32>
    %cst_9 = arith.constant 0.000000e+00 : f32
    %14 = vector.broadcast %cst_9 : f32 to vector<2x32xf32>
    %15 = vector.extract_strided_slice %1 {offsets = [0, 0], sizes = [6, 32], strides = [1, 1]} : vector<8x32xf32> to vector<6x32xf32>
    %16 = tpu.concatenate %14, %15 in 0 : vector<2x32xf32>, vector<6x32xf32> -> vector<8x32xf32>
    %17 = arith.truncf %16 : vector<8x32xf32> to vector<8x32xbf16>
    %c1 = arith.constant 1 : index
    %c0_10 = arith.constant 0 : index
    %c0_11 = arith.constant 0 : index
    %18 = vector.load %arg2[%c1, %c0_10, %c0_11] : memref<3x32x32xbf16, #tpu.memory_space<vmem>>, vector<1x32x32xbf16>
    %19 = vector.shape_cast %18 : vector<1x32x32xbf16> to vector<32x32xbf16>
    %cst_12 = arith.constant dense<0.000000e+00> : vector<8x32xf32>
    %20 = tpu.matmul %17, %19, %cst_12 {dimension_numbers = #tpu.dot_dimension_numbers<[1], [0], [0], [1], [0, 0, 1, 1], [], []>} : vector<8x32xbf16>, vector<32x32xbf16>, vector<8x32xf32> -> vector<8x32xf32>
    %21 = arith.addf %13, %20 : vector<8x32xf32>
    %22 = arith.truncf %1 : vector<8x32xf32> to vector<8x32xbf16>
    %c2 = arith.constant 2 : index
    %c0_13 = arith.constant 0 : index
    %c0_14 = arith.constant 0 : index
    %23 = vector.load %arg2[%c2, %c0_13, %c0_14] : memref<3x32x32xbf16, #tpu.memory_space<vmem>>, vector<1x32x32xbf16>
    %24 = vector.shape_cast %23 : vector<1x32x32xbf16> to vector<32x32xbf16>
    %cst_15 = arith.constant dense<0.000000e+00> : vector<8x32xf32>
    %25 = tpu.matmul %22, %24, %cst_15 {dimension_numbers = #tpu.dot_dimension_numbers<[1], [0], [0], [1], [0, 0, 1, 1], [], []>} : vector<8x32xbf16>, vector<32x32xbf16>, vector<8x32xf32> -> vector<8x32xf32>
    %26 = arith.addf %21, %25 : vector<8x32xf32>
    %cst_16 = arith.constant dense<0.000000e+00> : vector<8xf32>
    %27 = vector.multi_reduction <add>, %26, %cst_16 [1] : vector<8x32xf32> to vector<8xf32>
    %28 = vector.shape_cast %27 : vector<8xf32> to vector<8x1xf32>
    %cst_17 = arith.constant 3.200000e+01 : f32
    %29 = vector.broadcast %cst_17 : f32 to vector<8x1xf32>
    %30 = arith.divf %28, %29 : vector<8x1xf32>
    %31 = vector.broadcast %30 : vector<8x1xf32> to vector<8x32xf32>
    %32 = arith.subf %26, %31 : vector<8x32xf32>
    %33 = arith.mulf %32, %32 : vector<8x32xf32>
    %cst_18 = arith.constant dense<0.000000e+00> : vector<8xf32>
    %34 = vector.multi_reduction <add>, %33, %cst_18 [1] : vector<8x32xf32> to vector<8xf32>
    %35 = vector.shape_cast %34 : vector<8xf32> to vector<8x1xf32>
    %cst_19 = arith.constant 3.200000e+01 : f32
    %36 = vector.broadcast %cst_19 : f32 to vector<8x1xf32>
    %37 = arith.divf %35, %36 : vector<8x1xf32>
    %38 = vector.broadcast %30 : vector<8x1xf32> to vector<8x32xf32>
    %39 = arith.subf %26, %38 : vector<8x32xf32>
    %cst_20 = arith.constant 9.99999974E-6 : f32
    %40 = vector.broadcast %cst_20 : f32 to vector<8x1xf32>
    %41 = arith.addf %37, %40 : vector<8x1xf32>
    %42 = math.rsqrt %41 : vector<8x1xf32>
    %43 = vector.broadcast %42 : vector<8x1xf32> to vector<8x32xf32>
    %44 = arith.mulf %39, %43 : vector<8x32xf32>
    %c0_21 = arith.constant 0 : index
    %c0_22 = arith.constant 0 : index
    %45 = vector.load %arg4[%c0_21, %c0_22] : memref<1x32xf32, #tpu.memory_space<vmem>>, vector<1x32xf32>
    %46 = vector.broadcast %45 : vector<1x32xf32> to vector<8x32xf32>
    %47 = arith.mulf %44, %46 : vector<8x32xf32>
    %c0_23 = arith.constant 0 : index
    %c0_24 = arith.constant 0 : index
    %48 = vector.load %arg5[%c0_23, %c0_24] : memref<1x32xf32, #tpu.memory_space<vmem>>, vector<1x32xf32>
    %49 = vector.broadcast %48 : vector<1x32xf32> to vector<8x32xf32>
    %50 = arith.addf %47, %49 : vector<8x32xf32>
    %cst_25 = arith.constant 5.000000e-01 : f32
    %51 = vector.broadcast %cst_25 : f32 to vector<8x32xf32>
    %52 = arith.mulf %51, %50 : vector<8x32xf32>
    %cst_26 = arith.constant 0.707106769 : f32
    %53 = vector.broadcast %cst_26 : f32 to vector<8x32xf32>
    %54 = arith.mulf %50, %53 : vector<8x32xf32>
    %55 = math.erf %54 : vector<8x32xf32>
    %cst_27 = arith.constant 1.000000e+00 : f32
    %56 = vector.broadcast %cst_27 : f32 to vector<8x32xf32>
    %57 = arith.addf %56, %55 : vector<8x32xf32>
    %58 = arith.mulf %52, %57 : vector<8x32xf32>
    %59 = arith.truncf %58 : vector<8x32xf32> to vector<8x32xbf16>
    %c0_28 = arith.constant 0 : index
    %c0_29 = arith.constant 0 : index
    %c0_30 = arith.constant 0 : index
    %60 = vector.load %arg6[%c0_28, %c0_29, %c0_30] : memref<4x32x16xbf16, #tpu.memory_space<vmem>>, vector<1x32x16xbf16>
    %61 = vector.shape_cast %60 : vector<1x32x16xbf16> to vector<32x16xbf16>
    %cst_31 = arith.constant dense<0.000000e+00> : vector<8x16xf32>
    %62 = tpu.matmul %59, %61, %cst_31 {dimension_numbers = #tpu.dot_dimension_numbers<[1], [0], [0], [1], [0, 0, 1, 1], [], []>} : vector<8x32xbf16>, vector<32x16xbf16>, vector<8x16xf32> -> vector<8x16xf32>
    %c0_32 = arith.constant 0 : index
    %c0_33 = arith.constant 0 : index
    %c0_34 = arith.constant 0 : index
    %63 = vector.load %arg7[%c0_32, %c0_33, %c0_34] : memref<4x1x16xf32, #tpu.memory_space<vmem>>, vector<1x1x16xf32>
    %64 = vector.shape_cast %63 : vector<1x1x16xf32> to vector<1x16xf32>
    %65 = vector.broadcast %64 : vector<1x16xf32> to vector<8x16xf32>
    %66 = arith.addf %62, %65 : vector<8x16xf32>
    %67 = arith.truncf %66 : vector<8x16xf32> to vector<8x16xbf16>
    %c0_35 = arith.constant 0 : index
    %c0_36 = arith.constant 0 : index
    %c0_37 = arith.constant 0 : index
    %c0_38 = arith.constant 0 : index
    %68 = vector.load %arg12[%c0_35, %c0_36, %c0_37, %c0_38] : memref<1x4x8x16xbf16, #tpu.memory_space<vmem>>, vector<1x1x8x16xbf16>
    %69 = vector.shape_cast %68 : vector<1x1x8x16xbf16> to vector<8x16xbf16>
    %70 = vector.shape_cast %67 : vector<8x16xbf16> to vector<1x1x8x16xbf16>
    tpu.vector_store %arg12[%c0_35, %c0_36, %c0_37, %c0_38], %70 {strides = array<i32>} : memref<1x4x8x16xbf16, #tpu.memory_space<vmem>>, vector<1x1x8x16xbf16>,
    %c0_39 = arith.constant 0 : index
    %c0_40 = arith.constant 0 : index
    %c0_41 = arith.constant 0 : index
    %71 = vector.load %arg8[%c0_39, %c0_40, %c0_41] : memref<4x32x16xbf16, #tpu.memory_space<vmem>>, vector<1x32x16xbf16>
    %72 = vector.shape_cast %71 : vector<1x32x16xbf16> to vector<32x16xbf16>
    %cst_42 = arith.constant dense<0.000000e+00> : vector<8x16xf32>
    %73 = tpu.matmul %59, %72, %cst_42 {dimension_numbers = #tpu.dot_dimension_numbers<[1], [0], [0], [1], [0, 0, 1, 1], [], []>} : vector<8x32xbf16>, vector<32x16xbf16>, vector<8x16xf32> -> vector<8x16xf32>
    %c0_43 = arith.constant 0 : index
    %c0_44 = arith.constant 0 : index
    %c0_45 = arith.constant 0 : index
    %74 = vector.load %arg9[%c0_43, %c0_44, %c0_45] : memref<4x1x16xf32, #tpu.memory_space<vmem>>, vector<1x1x16xf32>
    %75 = vector.shape_cast %74 : vector<1x1x16xf32> to vector<1x16xf32>
    %76 = vector.broadcast %75 : vector<1x16xf32> to vector<8x16xf32>
    %77 = arith.addf %73, %76 : vector<8x16xf32>
    %78 = arith.truncf %77 : vector<8x16xf32> to vector<8x16xbf16>
    %c0_46 = arith.constant 0 : index
    %c0_47 = arith.constant 0 : index
    %c0_48 = arith.constant 0 : index
    %c0_49 = arith.constant 0 : index
    %79 = vector.load %arg13[%c0_46, %c0_47, %c0_48, %c0_49] : memref<1x4x8x16xbf16, #tpu.memory_space<vmem>>, vector<1x1x8x16xbf16>
    %80 = vector.shape_cast %79 : vector<1x1x8x16xbf16> to vector<8x16xbf16>
    %81 = vector.shape_cast %78 : vector<8x16xbf16> to vector<1x1x8x16xbf16>
    tpu.vector_store %arg13[%c0_46, %c0_47, %c0_48, %c0_49], %81 {strides = array<i32>} : memref<1x4x8x16xbf16, #tpu.memory_space<vmem>>, vector<1x1x8x16xbf16>,
    %c0_50 = arith.constant 0 : index
    %c0_51 = arith.constant 0 : index
    %c0_52 = arith.constant 0 : index
    %82 = vector.load %arg10[%c0_50, %c0_51, %c0_52] : memref<4x32x16xbf16, #tpu.memory_space<vmem>>, vector<1x32x16xbf16>
    %83 = vector.shape_cast %82 : vector<1x32x16xbf16> to vector<32x16xbf16>
    %cst_53 = arith.constant dense<0.000000e+00> : vector<8x16xf32>
    %84 = tpu.matmul %59, %83, %cst_53 {dimension_numbers = #tpu.dot_dimension_numbers<[1], [0], [0], [1], [0, 0, 1, 1], [], []>} : vector<8x32xbf16>, vector<32x16xbf16>, vector<8x16xf32> -> vector<8x16xf32>
    %c0_54 = arith.constant 0 : index
    %c0_55 = arith.constant 0 : index
    %c0_56 = arith.constant 0 : index
    %85 = vector.load %arg11[%c0_54, %c0_55, %c0_56] : memref<4x1x16xf32, #tpu.memory_space<vmem>>, vector<1x1x16xf32>
    %86 = vector.shape_cast %85 : vector<1x1x16xf32> to vector<1x16xf32>
    %87 = vector.broadcast %86 : vector<1x16xf32> to vector<8x16xf32>
    %88 = arith.addf %84, %87 : vector<8x16xf32>
    %89 = arith.truncf %88 : vector<8x16xf32> to vector<8x16xbf16>
    %c0_57 = arith.constant 0 : index
    %c0_58 = arith.constant 0 : index
    %c0_59 = arith.constant 0 : index
    %c0_60 = arith.constant 0 : index
    %90 = vector.load %arg14[%c0_57, %c0_58, %c0_59, %c0_60] : memref<1x4x8x16xbf16, #tpu.memory_space<vmem>>, vector<1x1x8x16xbf16>
    %91 = vector.shape_cast %90 : vector<1x1x8x16xbf16> to vector<8x16xbf16>
    %92 = vector.shape_cast %89 : vector<8x16xbf16> to vector<1x1x8x16xbf16>
    tpu.vector_store %arg14[%c0_57, %c0_58, %c0_59, %c0_60], %92 {strides = array<i32>} : memref<1x4x8x16xbf16, #tpu.memory_space<vmem>>, vector<1x1x8x16xbf16>,
    %c1_61 = arith.constant 1 : index
    %c0_62 = arith.constant 0 : index
    %c0_63 = arith.constant 0 : index
    %93 = vector.load %arg6[%c1_61, %c0_62, %c0_63] : memref<4x32x16xbf16, #tpu.memory_space<vmem>>, vector<1x32x16xbf16>
    %94 = vector.shape_cast %93 : vector<1x32x16xbf16> to vector<32x16xbf16>
    %cst_64 = arith.constant dense<0.000000e+00> : vector<8x16xf32>
    %95 = tpu.matmul %59, %94, %cst_64 {dimension_numbers = #tpu.dot_dimension_numbers<[1], [0], [0], [1], [0, 0, 1, 1], [], []>} : vector<8x32xbf16>, vector<32x16xbf16>, vector<8x16xf32> -> vector<8x16xf32>
    %c1_65 = arith.constant 1 : index
    %c0_66 = arith.constant 0 : index
    %c0_67 = arith.constant 0 : index
    %96 = vector.load %arg7[%c1_65, %c0_66, %c0_67] : memref<4x1x16xf32, #tpu.memory_space<vmem>>, vector<1x1x16xf32>
    %97 = vector.shape_cast %96 : vector<1x1x16xf32> to vector<1x16xf32>
    %98 = vector.broadcast %97 : vector<1x16xf32> to vector<8x16xf32>
    %99 = arith.addf %95, %98 : vector<8x16xf32>
    %100 = arith.truncf %99 : vector<8x16xf32> to vector<8x16xbf16>
    %c0_68 = arith.constant 0 : index
    %c1_69 = arith.constant 1 : index
    %c0_70 = arith.constant 0 : index
    %c0_71 = arith.constant 0 : index
    %101 = vector.load %arg12[%c0_68, %c1_69, %c0_70, %c0_71] : memref<1x4x8x16xbf16, #tpu.memory_space<vmem>>, vector<1x1x8x16xbf16>
    %102 = vector.shape_cast %101 : vector<1x1x8x16xbf16> to vector<8x16xbf16>
    %103 = vector.shape_cast %100 : vector<8x16xbf16> to vector<1x1x8x16xbf16>
    tpu.vector_store %arg12[%c0_68, %c1_69, %c0_70, %c0_71], %103 {strides = array<i32>} : memref<1x4x8x16xbf16, #tpu.memory_space<vmem>>, vector<1x1x8x16xbf16>,
    %c1_72 = arith.constant 1 : index
    %c0_73 = arith.constant 0 : index
    %c0_74 = arith.constant 0 : index
    %104 = vector.load %arg8[%c1_72, %c0_73, %c0_74] : memref<4x32x16xbf16, #tpu.memory_space<vmem>>, vector<1x32x16xbf16>
    %105 = vector.shape_cast %104 : vector<1x32x16xbf16> to vector<32x16xbf16>
    %cst_75 = arith.constant dense<0.000000e+00> : vector<8x16xf32>
    %106 = tpu.matmul %59, %105, %cst_75 {dimension_numbers = #tpu.dot_dimension_numbers<[1], [0], [0], [1], [0, 0, 1, 1], [], []>} : vector<8x32xbf16>, vector<32x16xbf16>, vector<8x16xf32> -> vector<8x16xf32>
    %c1_76 = arith.constant 1 : index
    %c0_77 = arith.constant 0 : index
    %c0_78 = arith.constant 0 : index
    %107 = vector.load %arg9[%c1_76, %c0_77, %c0_78] : memref<4x1x16xf32, #tpu.memory_space<vmem>>, vector<1x1x16xf32>
    %108 = vector.shape_cast %107 : vector<1x1x16xf32> to vector<1x16xf32>
    %109 = vector.broadcast %108 : vector<1x16xf32> to vector<8x16xf32>
    %110 = arith.addf %106, %109 : vector<8x16xf32>
    %111 = arith.truncf %110 : vector<8x16xf32> to vector<8x16xbf16>
    %c0_79 = arith.constant 0 : index
    %c1_80 = arith.constant 1 : index
    %c0_81 = arith.constant 0 : index
    %c0_82 = arith.constant 0 : index
    %112 = vector.load %arg13[%c0_79, %c1_80, %c0_81, %c0_82] : memref<1x4x8x16xbf16, #tpu.memory_space<vmem>>, vector<1x1x8x16xbf16>
    %113 = vector.shape_cast %112 : vector<1x1x8x16xbf16> to vector<8x16xbf16>
    %114 = vector.shape_cast %111 : vector<8x16xbf16> to vector<1x1x8x16xbf16>
    tpu.vector_store %arg13[%c0_79, %c1_80, %c0_81, %c0_82], %114 {strides = array<i32>} : memref<1x4x8x16xbf16, #tpu.memory_space<vmem>>, vector<1x1x8x16xbf16>,
    %c1_83 = arith.constant 1 : index
    %c0_84 = arith.constant 0 : index
    %c0_85 = arith.constant 0 : index
    %115 = vector.load %arg10[%c1_83, %c0_84, %c0_85] : memref<4x32x16xbf16, #tpu.memory_space<vmem>>, vector<1x32x16xbf16>
    %116 = vector.shape_cast %115 : vector<1x32x16xbf16> to vector<32x16xbf16>
    %cst_86 = arith.constant dense<0.000000e+00> : vector<8x16xf32>
    %117 = tpu.matmul %59, %116, %cst_86 {dimension_numbers = #tpu.dot_dimension_numbers<[1], [0], [0], [1], [0, 0, 1, 1], [], []>} : vector<8x32xbf16>, vector<32x16xbf16>, vector<8x16xf32> -> vector<8x16xf32>
    %c1_87 = arith.constant 1 : index
    %c0_88 = arith.constant 0 : index
    %c0_89 = arith.constant 0 : index
    %118 = vector.load %arg11[%c1_87, %c0_88, %c0_89] : memref<4x1x16xf32, #tpu.memory_space<vmem>>, vector<1x1x16xf32>
    %119 = vector.shape_cast %118 : vector<1x1x16xf32> to vector<1x16xf32>
    %120 = vector.broadcast %119 : vector<1x16xf32> to vector<8x16xf32>
    %121 = arith.addf %117, %120 : vector<8x16xf32>
    %122 = arith.truncf %121 : vector<8x16xf32> to vector<8x16xbf16>
    %c0_90 = arith.constant 0 : index
    %c1_91 = arith.constant 1 : index
    %c0_92 = arith.constant 0 : index
    %c0_93 = arith.constant 0 : index
    %123 = vector.load %arg14[%c0_90, %c1_91, %c0_92, %c0_93] : memref<1x4x8x16xbf16, #tpu.memory_space<vmem>>, vector<1x1x8x16xbf16>
    %124 = vector.shape_cast %123 : vector<1x1x8x16xbf16> to vector<8x16xbf16>
    %125 = vector.shape_cast %122 : vector<8x16xbf16> to vector<1x1x8x16xbf16>
    tpu.vector_store %arg14[%c0_90, %c1_91, %c0_92, %c0_93], %125 {strides = array<i32>} : memref<1x4x8x16xbf16, #tpu.memory_space<vmem>>, vector<1x1x8x16xbf16>,
    %c2_94 = arith.constant 2 : index
    %c0_95 = arith.constant 0 : index
    %c0_96 = arith.constant 0 : index
    %126 = vector.load %arg6[%c2_94, %c0_95, %c0_96] : memref<4x32x16xbf16, #tpu.memory_space<vmem>>, vector<1x32x16xbf16>
    %127 = vector.shape_cast %126 : vector<1x32x16xbf16> to vector<32x16xbf16>
    %cst_97 = arith.constant dense<0.000000e+00> : vector<8x16xf32>
    %128 = tpu.matmul %59, %127, %cst_97 {dimension_numbers = #tpu.dot_dimension_numbers<[1], [0], [0], [1], [0, 0, 1, 1], [], []>} : vector<8x32xbf16>, vector<32x16xbf16>, vector<8x16xf32> -> vector<8x16xf32>
    %c2_98 = arith.constant 2 : index
    %c0_99 = arith.constant 0 : index
    %c0_100 = arith.constant 0 : index
    %129 = vector.load %arg7[%c2_98, %c0_99, %c0_100] : memref<4x1x16xf32, #tpu.memory_space<vmem>>, vector<1x1x16xf32>
    %130 = vector.shape_cast %129 : vector<1x1x16xf32> to vector<1x16xf32>
    %131 = vector.broadcast %130 : vector<1x16xf32> to vector<8x16xf32>
    %132 = arith.addf %128, %131 : vector<8x16xf32>
    %133 = arith.truncf %132 : vector<8x16xf32> to vector<8x16xbf16>
    %c0_101 = arith.constant 0 : index
    %c2_102 = arith.constant 2 : index
    %c0_103 = arith.constant 0 : index
    %c0_104 = arith.constant 0 : index
    %134 = vector.load %arg12[%c0_101, %c2_102, %c0_103, %c0_104] : memref<1x4x8x16xbf16, #tpu.memory_space<vmem>>, vector<1x1x8x16xbf16>
    %135 = vector.shape_cast %134 : vector<1x1x8x16xbf16> to vector<8x16xbf16>
    %136 = vector.shape_cast %133 : vector<8x16xbf16> to vector<1x1x8x16xbf16>
    tpu.vector_store %arg12[%c0_101, %c2_102, %c0_103, %c0_104], %136 {strides = array<i32>} : memref<1x4x8x16xbf16, #tpu.memory_space<vmem>>, vector<1x1x8x16xbf16>,
    %c2_105 = arith.constant 2 : index
    %c0_106 = arith.constant 0 : index
    %c0_107 = arith.constant 0 : index
    %137 = vector.load %arg8[%c2_105, %c0_106, %c0_107] : memref<4x32x16xbf16, #tpu.memory_space<vmem>>, vector<1x32x16xbf16>
    %138 = vector.shape_cast %137 : vector<1x32x16xbf16> to vector<32x16xbf16>
    %cst_108 = arith.constant dense<0.000000e+00> : vector<8x16xf32>
    %139 = tpu.matmul %59, %138, %cst_108 {dimension_numbers = #tpu.dot_dimension_numbers<[1], [0], [0], [1], [0, 0, 1, 1], [], []>} : vector<8x32xbf16>, vector<32x16xbf16>, vector<8x16xf32> -> vector<8x16xf32>
    %c2_109 = arith.constant 2 : index
    %c0_110 = arith.constant 0 : index
    %c0_111 = arith.constant 0 : index
    %140 = vector.load %arg9[%c2_109, %c0_110, %c0_111] : memref<4x1x16xf32, #tpu.memory_space<vmem>>, vector<1x1x16xf32>
    %141 = vector.shape_cast %140 : vector<1x1x16xf32> to vector<1x16xf32>
    %142 = vector.broadcast %141 : vector<1x16xf32> to vector<8x16xf32>
    %143 = arith.addf %139, %142 : vector<8x16xf32>
    %144 = arith.truncf %143 : vector<8x16xf32> to vector<8x16xbf16>
    %c0_112 = arith.constant 0 : index
    %c2_113 = arith.constant 2 : index
    %c0_114 = arith.constant 0 : index
    %c0_115 = arith.constant 0 : index
    %145 = vector.load %arg13[%c0_112, %c2_113, %c0_114, %c0_115] : memref<1x4x8x16xbf16, #tpu.memory_space<vmem>>, vector<1x1x8x16xbf16>
    %146 = vector.shape_cast %145 : vector<1x1x8x16xbf16> to vector<8x16xbf16>
    %147 = vector.shape_cast %144 : vector<8x16xbf16> to vector<1x1x8x16xbf16>
    tpu.vector_store %arg13[%c0_112, %c2_113, %c0_114, %c0_115], %147 {strides = array<i32>} : memref<1x4x8x16xbf16, #tpu.memory_space<vmem>>, vector<1x1x8x16xbf16>,
    %c2_116 = arith.constant 2 : index
    %c0_117 = arith.constant 0 : index
    %c0_118 = arith.constant 0 : index
    %148 = vector.load %arg10[%c2_116, %c0_117, %c0_118] : memref<4x32x16xbf16, #tpu.memory_space<vmem>>, vector<1x32x16xbf16>
    %149 = vector.shape_cast %148 : vector<1x32x16xbf16> to vector<32x16xbf16>
    %cst_119 = arith.constant dense<0.000000e+00> : vector<8x16xf32>
    %150 = tpu.matmul %59, %149, %cst_119 {dimension_numbers = #tpu.dot_dimension_numbers<[1], [0], [0], [1], [0, 0, 1, 1], [], []>} : vector<8x32xbf16>, vector<32x16xbf16>, vector<8x16xf32> -> vector<8x16xf32>
    %c2_120 = arith.constant 2 : index
    %c0_121 = arith.constant 0 : index
    %c0_122 = arith.constant 0 : index
    %151 = vector.load %arg11[%c2_120, %c0_121, %c0_122] : memref<4x1x16xf32, #tpu.memory_space<vmem>>, vector<1x1x16xf32>
    %152 = vector.shape_cast %151 : vector<1x1x16xf32> to vector<1x16xf32>
    %153 = vector.broadcast %152 : vector<1x16xf32> to vector<8x16xf32>
    %154 = arith.addf %150, %153 : vector<8x16xf32>
    %155 = arith.truncf %154 : vector<8x16xf32> to vector<8x16xbf16>
    %c0_123 = arith.constant 0 : index
    %c2_124 = arith.constant 2 : index
    %c0_125 = arith.constant 0 : index
    %c0_126 = arith.constant 0 : index
    %156 = vector.load %arg14[%c0_123, %c2_124, %c0_125, %c0_126] : memref<1x4x8x16xbf16, #tpu.memory_space<vmem>>, vector<1x1x8x16xbf16>
    %157 = vector.shape_cast %156 : vector<1x1x8x16xbf16> to vector<8x16xbf16>
    %158 = vector.shape_cast %155 : vector<8x16xbf16> to vector<1x1x8x16xbf16>
    tpu.vector_store %arg14[%c0_123, %c2_124, %c0_125, %c0_126], %158 {strides = array<i32>} : memref<1x4x8x16xbf16, #tpu.memory_space<vmem>>, vector<1x1x8x16xbf16>,
    %c3 = arith.constant 3 : index
    %c0_127 = arith.constant 0 : index
    %c0_128 = arith.constant 0 : index
    %159 = vector.load %arg6[%c3, %c0_127, %c0_128] : memref<4x32x16xbf16, #tpu.memory_space<vmem>>, vector<1x32x16xbf16>
    %160 = vector.shape_cast %159 : vector<1x32x16xbf16> to vector<32x16xbf16>
    %cst_129 = arith.constant dense<0.000000e+00> : vector<8x16xf32>
    %161 = tpu.matmul %59, %160, %cst_129 {dimension_numbers = #tpu.dot_dimension_numbers<[1], [0], [0], [1], [0, 0, 1, 1], [], []>} : vector<8x32xbf16>, vector<32x16xbf16>, vector<8x16xf32> -> vector<8x16xf32>
    %c3_130 = arith.constant 3 : index
    %c0_131 = arith.constant 0 : index
    %c0_132 = arith.constant 0 : index
    %162 = vector.load %arg7[%c3_130, %c0_131, %c0_132] : memref<4x1x16xf32, #tpu.memory_space<vmem>>, vector<1x1x16xf32>
    %163 = vector.shape_cast %162 : vector<1x1x16xf32> to vector<1x16xf32>
    %164 = vector.broadcast %163 : vector<1x16xf32> to vector<8x16xf32>
    %165 = arith.addf %161, %164 : vector<8x16xf32>
    %166 = arith.truncf %165 : vector<8x16xf32> to vector<8x16xbf16>
    %c0_133 = arith.constant 0 : index
    %c3_134 = arith.constant 3 : index
    %c0_135 = arith.constant 0 : index
    %c0_136 = arith.constant 0 : index
    %167 = vector.load %arg12[%c0_133, %c3_134, %c0_135, %c0_136] : memref<1x4x8x16xbf16, #tpu.memory_space<vmem>>, vector<1x1x8x16xbf16>
    %168 = vector.shape_cast %167 : vector<1x1x8x16xbf16> to vector<8x16xbf16>
    %169 = vector.shape_cast %166 : vector<8x16xbf16> to vector<1x1x8x16xbf16>
    tpu.vector_store %arg12[%c0_133, %c3_134, %c0_135, %c0_136], %169 {strides = array<i32>} : memref<1x4x8x16xbf16, #tpu.memory_space<vmem>>, vector<1x1x8x16xbf16>,
    %c3_137 = arith.constant 3 : index
    %c0_138 = arith.constant 0 : index
    %c0_139 = arith.constant 0 : index
    %170 = vector.load %arg8[%c3_137, %c0_138, %c0_139] : memref<4x32x16xbf16, #tpu.memory_space<vmem>>, vector<1x32x16xbf16>
    %171 = vector.shape_cast %170 : vector<1x32x16xbf16> to vector<32x16xbf16>
    %cst_140 = arith.constant dense<0.000000e+00> : vector<8x16xf32>
    %172 = tpu.matmul %59, %171, %cst_140 {dimension_numbers = #tpu.dot_dimension_numbers<[1], [0], [0], [1], [0, 0, 1, 1], [], []>} : vector<8x32xbf16>, vector<32x16xbf16>, vector<8x16xf32> -> vector<8x16xf32>
    %c3_141 = arith.constant 3 : index
    %c0_142 = arith.constant 0 : index
    %c0_143 = arith.constant 0 : index
    %173 = vector.load %arg9[%c3_141, %c0_142, %c0_143] : memref<4x1x16xf32, #tpu.memory_space<vmem>>, vector<1x1x16xf32>
    %174 = vector.shape_cast %173 : vector<1x1x16xf32> to vector<1x16xf32>
    %175 = vector.broadcast %174 : vector<1x16xf32> to vector<8x16xf32>
    %176 = arith.addf %172, %175 : vector<8x16xf32>
    %177 = arith.truncf %176 : vector<8x16xf32> to vector<8x16xbf16>
    %c0_144 = arith.constant 0 : index
    %c3_145 = arith.constant 3 : index
    %c0_146 = arith.constant 0 : index
    %c0_147 = arith.constant 0 : index
    %178 = vector.load %arg13[%c0_144, %c3_145, %c0_146, %c0_147] : memref<1x4x8x16xbf16, #tpu.memory_space<vmem>>, vector<1x1x8x16xbf16>
    %179 = vector.shape_cast %178 : vector<1x1x8x16xbf16> to vector<8x16xbf16>
    %180 = vector.shape_cast %177 : vector<8x16xbf16> to vector<1x1x8x16xbf16>
    tpu.vector_store %arg13[%c0_144, %c3_145, %c0_146, %c0_147], %180 {strides = array<i32>} : memref<1x4x8x16xbf16, #tpu.memory_space<vmem>>, vector<1x1x8x16xbf16>,
    %c3_148 = arith.constant 3 : index
    %c0_149 = arith.constant 0 : index
    %c0_150 = arith.constant 0 : index
    %181 = vector.load %arg10[%c3_148, %c0_149, %c0_150] : memref<4x32x16xbf16, #tpu.memory_space<vmem>>, vector<1x32x16xbf16>
    %182 = vector.shape_cast %181 : vector<1x32x16xbf16> to vector<32x16xbf16>
    %cst_151 = arith.constant dense<0.000000e+00> : vector<8x16xf32>
    %183 = tpu.matmul %59, %182, %cst_151 {dimension_numbers = #tpu.dot_dimension_numbers<[1], [0], [0], [1], [0, 0, 1, 1], [], []>} : vector<8x32xbf16>, vector<32x16xbf16>, vector<8x16xf32> -> vector<8x16xf32>
    %c3_152 = arith.constant 3 : index
    %c0_153 = arith.constant 0 : index
    %c0_154 = arith.constant 0 : index
    %184 = vector.load %arg11[%c3_152, %c0_153, %c0_154] : memref<4x1x16xf32, #tpu.memory_space<vmem>>, vector<1x1x16xf32>
    %185 = vector.shape_cast %184 : vector<1x1x16xf32> to vector<1x16xf32>
    %186 = vector.broadcast %185 : vector<1x16xf32> to vector<8x16xf32>
    %187 = arith.addf %183, %186 : vector<8x16xf32>
    %188 = arith.truncf %187 : vector<8x16xf32> to vector<8x16xbf16>
    %c0_155 = arith.constant 0 : index
    %c3_156 = arith.constant 3 : index
    %c0_157 = arith.constant 0 : index
    %c0_158 = arith.constant 0 : index
    %189 = vector.load %arg14[%c0_155, %c3_156, %c0_157, %c0_158] : memref<1x4x8x16xbf16, #tpu.memory_space<vmem>>, vector<1x1x8x16xbf16>
    %190 = vector.shape_cast %189 : vector<1x1x8x16xbf16> to vector<8x16xbf16>
    %191 = vector.shape_cast %188 : vector<8x16xbf16> to vector<1x1x8x16xbf16>
    tpu.vector_store %arg14[%c0_155, %c3_156, %c0_157, %c0_158], %191 {strides = array<i32>} : memref<1x4x8x16xbf16, #tpu.memory_space<vmem>>, vector<1x1x8x16xbf16>,
    return
  }
  func.func @transform_0(%arg0: i32) -> (i32, i32, i32) {
    %c0_i32 = arith.constant 0 : i32
    %c0_i32_0 = arith.constant 0 : i32
    %c0_i32_1 = arith.constant 0 : i32
    return %arg0, %c0_i32, %c0_i32_0 : i32, i32, i32
  }
  func.func @transform_1(%arg0: i32) -> (i32, i32, i32) {
    %c0_i32 = arith.constant 0 : i32
    %c0_i32_0 = arith.constant 0 : i32
    %c0_i32_1 = arith.constant 0 : i32
    %c0_i32_2 = arith.constant 0 : i32
    return %c0_i32, %c0_i32_0, %c0_i32_1 : i32, i32, i32
  }
  func.func @transform_2(%arg0: i32) -> (i32, i32) {
    %c0_i32 = arith.constant 0 : i32
    %c0_i32_0 = arith.constant 0 : i32
    %c0_i32_1 = arith.constant 0 : i32
    return %c0_i32, %c0_i32_0 : i32, i32
  }
  func.func @transform_3(%arg0: i32) -> (i32, i32) {
    %c0_i32 = arith.constant 0 : i32
    %c0_i32_0 = arith.constant 0 : i32
    %c0_i32_1 = arith.constant 0 : i32
    return %c0_i32, %c0_i32_0 : i32, i32
  }
  func.func @transform_4(%arg0: i32) -> (i32, i32) {
    %c0_i32 = arith.constant 0 : i32
    %c0_i32_0 = arith.constant 0 : i32
    %c0_i32_1 = arith.constant 0 : i32
    return %c0_i32, %c0_i32_0 : i32, i32
  }
  func.func @transform_5(%arg0: i32) -> (i32, i32, i32) {
    %c0_i32 = arith.constant 0 : i32
    %c0_i32_0 = arith.constant 0 : i32
    %c0_i32_1 = arith.constant 0 : i32
    %c0_i32_2 = arith.constant 0 : i32
    return %c0_i32, %c0_i32_0, %c0_i32_1 : i32, i32, i32
  }
  func.func @transform_6(%arg0: i32) -> (i32, i32, i32) {
    %c0_i32 = arith.constant 0 : i32
    %c0_i32_0 = arith.constant 0 : i32
    %c0_i32_1 = arith.constant 0 : i32
    %c0_i32_2 = arith.constant 0 : i32
    return %c0_i32, %c0_i32_0, %c0_i32_1 : i32, i32, i32
  }
  func.func @transform_7(%arg0: i32) -> (i32, i32, i32) {
    %c0_i32 = arith.constant 0 : i32
    %c0_i32_0 = arith.constant 0 : i32
    %c0_i32_1 = arith.constant 0 : i32
    %c0_i32_2 = arith.constant 0 : i32
    return %c0_i32, %c0_i32_0, %c0_i32_1 : i32, i32, i32
  }
  func.func @transform_8(%arg0: i32) -> (i32, i32, i32) {
    %c0_i32 = arith.constant 0 : i32
    %c0_i32_0 = arith.constant 0 : i32
    %c0_i32_1 = arith.constant 0 : i32
    %c0_i32_2 = arith.constant 0 : i32
    return %c0_i32, %c0_i32_0, %c0_i32_1 : i32, i32, i32
  }
  func.func @transform_9(%arg0: i32) -> (i32, i32, i32) {
    %c0_i32 = arith.constant 0 : i32
    %c0_i32_0 = arith.constant 0 : i32
    %c0_i32_1 = arith.constant 0 : i32
    %c0_i32_2 = arith.constant 0 : i32
    return %c0_i32, %c0_i32_0, %c0_i32_1 : i32, i32, i32
  }
  func.func @transform_10(%arg0: i32) -> (i32, i32, i32) {
    %c0_i32 = arith.constant 0 : i32
    %c0_i32_0 = arith.constant 0 : i32
    %c0_i32_1 = arith.constant 0 : i32
    %c0_i32_2 = arith.constant 0 : i32
    return %c0_i32, %c0_i32_0, %c0_i32_1 : i32, i32, i32
  }
  func.func @transform_11(%arg0: i32) -> (i32, i32, i32, i32) {
    %c0_i32 = arith.constant 0 : i32
    %c0_i32_0 = arith.constant 0 : i32
    %c0_i32_1 = arith.constant 0 : i32
    %c0_i32_2 = arith.constant 0 : i32
    return %arg0, %c0_i32, %c0_i32_0, %c0_i32_1 : i32, i32, i32, i32
  }
  func.func @transform_12(%arg0: i32) -> (i32, i32, i32, i32) {
    %c0_i32 = arith.constant 0 : i32
    %c0_i32_0 = arith.constant 0 : i32
    %c0_i32_1 = arith.constant 0 : i32
    %c0_i32_2 = arith.constant 0 : i32
    return %arg0, %c0_i32, %c0_i32_0, %c0_i32_1 : i32, i32, i32, i32
  }
  func.func @transform_13(%arg0: i32) -> (i32, i32, i32, i32) {
    %c0_i32 = arith.constant 0 : i32
    %c0_i32_0 = arith.constant 0 : i32
    %c0_i32_1 = arith.constant 0 : i32
    %c0_i32_2 = arith.constant 0 : i32
    return %arg0, %c0_i32, %c0_i32_0, %c0_i32_1 : i32, i32, i32, i32
  }
}

module attributes {stable_mosaic.version = 11 : i64} {
  func.func @_conv_qkv_kernel(%arg0: i32, %arg1: memref<1x8x32xf32, #tpu.memory_space<vmem>>, %arg2: memref<3x32x32xbf16, #tpu.memory_space<vmem>>, %arg3: memref<1x32xf32, #tpu.memory_space<vmem>>, %arg4: memref<1x32xf32, #tpu.memory_space<vmem>>, %arg5: memref<1x32xf32, #tpu.memory_space<vmem>>, %arg6: memref<4x32x16xbf16, #tpu.memory_space<vmem>>, %arg7: memref<4x1x16xf32, #tpu.memory_space<vmem>>, %arg8: memref<4x32x16xbf16, #tpu.memory_space<vmem>>, %arg9: memref<4x1x16xf32, #tpu.memory_space<vmem>>, %arg10: memref<4x32x16xbf16, #tpu.memory_space<vmem>>, %arg11: memref<4x1x16xf32, #tpu.memory_space<vmem>>, %arg12: memref<1x4x8x16xbf16, #tpu.memory_space<vmem>>, %arg13: memref<1x4x8x16xbf16, #tpu.memory_space<vmem>>, %arg14: memref<1x4x8x16xbf16, #tpu.memory_space<vmem>>) attributes {dimension_semantics = [#tpu.dimension_semantics<parallel>], iteration_bounds = array<i64: 2>, scalar_prefetch = 0 : i64, scratch_operands = 0 : i64, tpu.core_type = #tpu.core_type<tc>, window_params = [{transform_indices = @transform_0, window_bounds = array<i64: 1, 8, 32>}, {pipeline_mode = #tpu.pipeline_mode<synchronous>, transform_indices = @transform_1, window_bounds = array<i64: 3, 32, 32>}, {pipeline_mode = #tpu.pipeline_mode<synchronous>, transform_indices = @transform_2, window_bounds = array<i64: 1, 32>}, {pipeline_mode = #tpu.pipeline_mode<synchronous>, transform_indices = @transform_3, window_bounds = array<i64: 1, 32>}, {pipeline_mode = #tpu.pipeline_mode<synchronous>, transform_indices = @transform_4, window_bounds = array<i64: 1, 32>}, {pipeline_mode = #tpu.pipeline_mode<synchronous>, transform_indices = @transform_5, window_bounds = array<i64: 4, 32, 16>}, {pipeline_mode = #tpu.pipeline_mode<synchronous>, transform_indices = @transform_6, window_bounds = array<i64: 4, 1, 16>}, {pipeline_mode = #tpu.pipeline_mode<synchronous>, transform_indices = @transform_7, window_bounds = array<i64: 4, 32, 16>}, {pipeline_mode = #tpu.pipeline_mode<synchronous>, transform_indices = @transform_8, window_bounds = array<i64: 4, 1, 16>}, {pipeline_mode = #tpu.pipeline_mode<synchronous>, transform_indices = @transform_9, window_bounds = array<i64: 4, 32, 16>}, {pipeline_mode = #tpu.pipeline_mode<synchronous>, transform_indices = @transform_10, window_bounds = array<i64: 4, 1, 16>}, {transform_indices = @transform_11, window_bounds = array<i64: 1, 4, 8, 16>}, {transform_indices = @transform_12, window_bounds = array<i64: 1, 4, 8, 16>}, {transform_indices = @transform_13, window_bounds = array<i64: 1, 4, 8, 16>}]} {
    %c0 = arith.constant 0 : index
    %c0_0 = arith.constant 0 : index
    %c0_1 = arith.constant 0 : index
    %0 = vector.load %arg1[%c0, %c0_0, %c0_1] : memref<1x8x32xf32, #tpu.memory_space<vmem>>, vector<1x8x32xf32>
    %1 = vector.shape_cast %0 : vector<1x8x32xf32> to vector<8x32xf32>
    %cst = arith.constant 0.000000e+00 : f32
    %2 = vector.broadcast %cst : f32 to vector<8x32xf32>
    %c0_2 = arith.constant 0 : index
    %c0_3 = arith.constant 0 : index
    %3 = vector.load %arg3[%c0_2, %c0_3] : memref<1x32xf32, #tpu.memory_space<vmem>>, vector<1x32xf32>
    %4 = vector.broadcast %3 : vector<1x32xf32> to vector<8x32xf32>
    %5 = arith.addf %2, %4 : vector<8x32xf32>
    %cst_4 = arith.constant 0.000000e+00 : f32
    %6 = vector.broadcast %cst_4 : f32 to vector<4x32xf32>
    %7 = vector.extract_strided_slice %1 {offsets = [0, 0], sizes = [4, 32], strides = [1, 1]} : vector<8x32xf32> to vector<4x32xf32>
    %8 = tpu.concatenate %6, %7 in 0 : vector<4x32xf32>, vector<4x32xf32> -> vector<8x32xf32>
    %9 = arith.truncf %8 : vector<8x32xf32> to vector<8x32xbf16>
    %c1 = arith.constant 1 : index
    %c0_5 = arith.constant 0 : index
    %c0_6 = arith.constant 0 : index
    %10 = vector.load %arg2[%c1, %c0_5, %c0_6] : memref<3x32x32xbf16, #tpu.memory_space<vmem>>, vector<1x32x32xbf16>
    %11 = vector.shape_cast %10 : vector<1x32x32xbf16> to vector<32x32xbf16>
    %cst_7 = arith.constant dense<0.000000e+00> : vector<8x32xf32>
    %12 = tpu.matmul %9, %11, %cst_7 {dimension_numbers = #tpu.dot_dimension_numbers<[1], [0], [0], [1], [0, 0, 1, 1], [], []>} : vector<8x32xbf16>, vector<32x32xbf16>, vector<8x32xf32> -> vector<8x32xf32>
    %13 = arith.addf %5, %12 : vector<8x32xf32>
    %14 = arith.truncf %1 : vector<8x32xf32> to vector<8x32xbf16>
    %c2 = arith.constant 2 : index
    %c0_8 = arith.constant 0 : index
    %c0_9 = arith.constant 0 : index
    %15 = vector.load %arg2[%c2, %c0_8, %c0_9] : memref<3x32x32xbf16, #tpu.memory_space<vmem>>, vector<1x32x32xbf16>
    %16 = vector.shape_cast %15 : vector<1x32x32xbf16> to vector<32x32xbf16>
    %cst_10 = arith.constant dense<0.000000e+00> : vector<8x32xf32>
    %17 = tpu.matmul %14, %16, %cst_10 {dimension_numbers = #tpu.dot_dimension_numbers<[1], [0], [0], [1], [0, 0, 1, 1], [], []>} : vector<8x32xbf16>, vector<32x32xbf16>, vector<8x32xf32> -> vector<8x32xf32>
    %18 = arith.addf %13, %17 : vector<8x32xf32>
    %cst_11 = arith.constant dense<0.000000e+00> : vector<8xf32>
    %19 = vector.multi_reduction <add>, %18, %cst_11 [1] : vector<8x32xf32> to vector<8xf32>
    %20 = vector.shape_cast %19 : vector<8xf32> to vector<8x1xf32>
    %cst_12 = arith.constant 3.200000e+01 : f32
    %21 = vector.broadcast %cst_12 : f32 to vector<8x1xf32>
    %22 = arith.divf %20, %21 : vector<8x1xf32>
    %23 = vector.broadcast %22 : vector<8x1xf32> to vector<8x32xf32>
    %24 = arith.subf %18, %23 : vector<8x32xf32>
    %25 = arith.mulf %24, %24 : vector<8x32xf32>
    %cst_13 = arith.constant dense<0.000000e+00> : vector<8xf32>
    %26 = vector.multi_reduction <add>, %25, %cst_13 [1] : vector<8x32xf32> to vector<8xf32>
    %27 = vector.shape_cast %26 : vector<8xf32> to vector<8x1xf32>
    %cst_14 = arith.constant 3.200000e+01 : f32
    %28 = vector.broadcast %cst_14 : f32 to vector<8x1xf32>
    %29 = arith.divf %27, %28 : vector<8x1xf32>
    %30 = vector.broadcast %22 : vector<8x1xf32> to vector<8x32xf32>
    %31 = arith.subf %18, %30 : vector<8x32xf32>
    %cst_15 = arith.constant 9.99999974E-6 : f32
    %32 = vector.broadcast %cst_15 : f32 to vector<8x1xf32>
    %33 = arith.addf %29, %32 : vector<8x1xf32>
    %34 = math.rsqrt %33 : vector<8x1xf32>
    %35 = vector.broadcast %34 : vector<8x1xf32> to vector<8x32xf32>
    %36 = arith.mulf %31, %35 : vector<8x32xf32>
    %c0_16 = arith.constant 0 : index
    %c0_17 = arith.constant 0 : index
    %37 = vector.load %arg4[%c0_16, %c0_17] : memref<1x32xf32, #tpu.memory_space<vmem>>, vector<1x32xf32>
    %38 = vector.broadcast %37 : vector<1x32xf32> to vector<8x32xf32>
    %39 = arith.mulf %36, %38 : vector<8x32xf32>
    %c0_18 = arith.constant 0 : index
    %c0_19 = arith.constant 0 : index
    %40 = vector.load %arg5[%c0_18, %c0_19] : memref<1x32xf32, #tpu.memory_space<vmem>>, vector<1x32xf32>
    %41 = vector.broadcast %40 : vector<1x32xf32> to vector<8x32xf32>
    %42 = arith.addf %39, %41 : vector<8x32xf32>
    %cst_20 = arith.constant 5.000000e-01 : f32
    %43 = vector.broadcast %cst_20 : f32 to vector<8x32xf32>
    %44 = arith.mulf %43, %42 : vector<8x32xf32>
    %cst_21 = arith.constant 0.707106769 : f32
    %45 = vector.broadcast %cst_21 : f32 to vector<8x32xf32>
    %46 = arith.mulf %42, %45 : vector<8x32xf32>
    %47 = math.erf %46 : vector<8x32xf32>
    %cst_22 = arith.constant 1.000000e+00 : f32
    %48 = vector.broadcast %cst_22 : f32 to vector<8x32xf32>
    %49 = arith.addf %48, %47 : vector<8x32xf32>
    %50 = arith.mulf %44, %49 : vector<8x32xf32>
    %51 = arith.truncf %50 : vector<8x32xf32> to vector<8x32xbf16>
    %c0_23 = arith.constant 0 : index
    %c0_24 = arith.constant 0 : index
    %c0_25 = arith.constant 0 : index
    %52 = vector.load %arg6[%c0_23, %c0_24, %c0_25] : memref<4x32x16xbf16, #tpu.memory_space<vmem>>, vector<1x32x16xbf16>
    %53 = vector.shape_cast %52 : vector<1x32x16xbf16> to vector<32x16xbf16>
    %cst_26 = arith.constant dense<0.000000e+00> : vector<8x16xf32>
    %54 = tpu.matmul %51, %53, %cst_26 {dimension_numbers = #tpu.dot_dimension_numbers<[1], [0], [0], [1], [0, 0, 1, 1], [], []>} : vector<8x32xbf16>, vector<32x16xbf16>, vector<8x16xf32> -> vector<8x16xf32>
    %c0_27 = arith.constant 0 : index
    %c0_28 = arith.constant 0 : index
    %c0_29 = arith.constant 0 : index
    %55 = vector.load %arg7[%c0_27, %c0_28, %c0_29] : memref<4x1x16xf32, #tpu.memory_space<vmem>>, vector<1x1x16xf32>
    %56 = vector.shape_cast %55 : vector<1x1x16xf32> to vector<1x16xf32>
    %57 = vector.broadcast %56 : vector<1x16xf32> to vector<8x16xf32>
    %58 = arith.addf %54, %57 : vector<8x16xf32>
    %59 = arith.truncf %58 : vector<8x16xf32> to vector<8x16xbf16>
    %c0_30 = arith.constant 0 : index
    %c0_31 = arith.constant 0 : index
    %c0_32 = arith.constant 0 : index
    %c0_33 = arith.constant 0 : index
    %60 = vector.load %arg12[%c0_30, %c0_31, %c0_32, %c0_33] : memref<1x4x8x16xbf16, #tpu.memory_space<vmem>>, vector<1x1x8x16xbf16>
    %61 = vector.shape_cast %60 : vector<1x1x8x16xbf16> to vector<8x16xbf16>
    %62 = vector.shape_cast %59 : vector<8x16xbf16> to vector<1x1x8x16xbf16>
    tpu.vector_store %arg12[%c0_30, %c0_31, %c0_32, %c0_33], %62 {strides = array<i32>} : memref<1x4x8x16xbf16, #tpu.memory_space<vmem>>, vector<1x1x8x16xbf16>,
    %c0_34 = arith.constant 0 : index
    %c0_35 = arith.constant 0 : index
    %c0_36 = arith.constant 0 : index
    %63 = vector.load %arg8[%c0_34, %c0_35, %c0_36] : memref<4x32x16xbf16, #tpu.memory_space<vmem>>, vector<1x32x16xbf16>
    %64 = vector.shape_cast %63 : vector<1x32x16xbf16> to vector<32x16xbf16>
    %cst_37 = arith.constant dense<0.000000e+00> : vector<8x16xf32>
    %65 = tpu.matmul %51, %64, %cst_37 {dimension_numbers = #tpu.dot_dimension_numbers<[1], [0], [0], [1], [0, 0, 1, 1], [], []>} : vector<8x32xbf16>, vector<32x16xbf16>, vector<8x16xf32> -> vector<8x16xf32>
    %c0_38 = arith.constant 0 : index
    %c0_39 = arith.constant 0 : index
    %c0_40 = arith.constant 0 : index
    %66 = vector.load %arg9[%c0_38, %c0_39, %c0_40] : memref<4x1x16xf32, #tpu.memory_space<vmem>>, vector<1x1x16xf32>
    %67 = vector.shape_cast %66 : vector<1x1x16xf32> to vector<1x16xf32>
    %68 = vector.broadcast %67 : vector<1x16xf32> to vector<8x16xf32>
    %69 = arith.addf %65, %68 : vector<8x16xf32>
    %70 = arith.truncf %69 : vector<8x16xf32> to vector<8x16xbf16>
    %c0_41 = arith.constant 0 : index
    %c0_42 = arith.constant 0 : index
    %c0_43 = arith.constant 0 : index
    %c0_44 = arith.constant 0 : index
    %71 = vector.load %arg13[%c0_41, %c0_42, %c0_43, %c0_44] : memref<1x4x8x16xbf16, #tpu.memory_space<vmem>>, vector<1x1x8x16xbf16>
    %72 = vector.shape_cast %71 : vector<1x1x8x16xbf16> to vector<8x16xbf16>
    %73 = vector.shape_cast %70 : vector<8x16xbf16> to vector<1x1x8x16xbf16>
    tpu.vector_store %arg13[%c0_41, %c0_42, %c0_43, %c0_44], %73 {strides = array<i32>} : memref<1x4x8x16xbf16, #tpu.memory_space<vmem>>, vector<1x1x8x16xbf16>,
    %c0_45 = arith.constant 0 : index
    %c0_46 = arith.constant 0 : index
    %c0_47 = arith.constant 0 : index
    %74 = vector.load %arg10[%c0_45, %c0_46, %c0_47] : memref<4x32x16xbf16, #tpu.memory_space<vmem>>, vector<1x32x16xbf16>
    %75 = vector.shape_cast %74 : vector<1x32x16xbf16> to vector<32x16xbf16>
    %cst_48 = arith.constant dense<0.000000e+00> : vector<8x16xf32>
    %76 = tpu.matmul %51, %75, %cst_48 {dimension_numbers = #tpu.dot_dimension_numbers<[1], [0], [0], [1], [0, 0, 1, 1], [], []>} : vector<8x32xbf16>, vector<32x16xbf16>, vector<8x16xf32> -> vector<8x16xf32>
    %c0_49 = arith.constant 0 : index
    %c0_50 = arith.constant 0 : index
    %c0_51 = arith.constant 0 : index
    %77 = vector.load %arg11[%c0_49, %c0_50, %c0_51] : memref<4x1x16xf32, #tpu.memory_space<vmem>>, vector<1x1x16xf32>
    %78 = vector.shape_cast %77 : vector<1x1x16xf32> to vector<1x16xf32>
    %79 = vector.broadcast %78 : vector<1x16xf32> to vector<8x16xf32>
    %80 = arith.addf %76, %79 : vector<8x16xf32>
    %81 = arith.truncf %80 : vector<8x16xf32> to vector<8x16xbf16>
    %c0_52 = arith.constant 0 : index
    %c0_53 = arith.constant 0 : index
    %c0_54 = arith.constant 0 : index
    %c0_55 = arith.constant 0 : index
    %82 = vector.load %arg14[%c0_52, %c0_53, %c0_54, %c0_55] : memref<1x4x8x16xbf16, #tpu.memory_space<vmem>>, vector<1x1x8x16xbf16>
    %83 = vector.shape_cast %82 : vector<1x1x8x16xbf16> to vector<8x16xbf16>
    %84 = vector.shape_cast %81 : vector<8x16xbf16> to vector<1x1x8x16xbf16>
    tpu.vector_store %arg14[%c0_52, %c0_53, %c0_54, %c0_55], %84 {strides = array<i32>} : memref<1x4x8x16xbf16, #tpu.memory_space<vmem>>, vector<1x1x8x16xbf16>,
    %c1_56 = arith.constant 1 : index
    %c0_57 = arith.constant 0 : index
    %c0_58 = arith.constant 0 : index
    %85 = vector.load %arg6[%c1_56, %c0_57, %c0_58] : memref<4x32x16xbf16, #tpu.memory_space<vmem>>, vector<1x32x16xbf16>
    %86 = vector.shape_cast %85 : vector<1x32x16xbf16> to vector<32x16xbf16>
    %cst_59 = arith.constant dense<0.000000e+00> : vector<8x16xf32>
    %87 = tpu.matmul %51, %86, %cst_59 {dimension_numbers = #tpu.dot_dimension_numbers<[1], [0], [0], [1], [0, 0, 1, 1], [], []>} : vector<8x32xbf16>, vector<32x16xbf16>, vector<8x16xf32> -> vector<8x16xf32>
    %c1_60 = arith.constant 1 : index
    %c0_61 = arith.constant 0 : index
    %c0_62 = arith.constant 0 : index
    %88 = vector.load %arg7[%c1_60, %c0_61, %c0_62] : memref<4x1x16xf32, #tpu.memory_space<vmem>>, vector<1x1x16xf32>
    %89 = vector.shape_cast %88 : vector<1x1x16xf32> to vector<1x16xf32>
    %90 = vector.broadcast %89 : vector<1x16xf32> to vector<8x16xf32>
    %91 = arith.addf %87, %90 : vector<8x16xf32>
    %92 = arith.truncf %91 : vector<8x16xf32> to vector<8x16xbf16>
    %c0_63 = arith.constant 0 : index
    %c1_64 = arith.constant 1 : index
    %c0_65 = arith.constant 0 : index
    %c0_66 = arith.constant 0 : index
    %93 = vector.load %arg12[%c0_63, %c1_64, %c0_65, %c0_66] : memref<1x4x8x16xbf16, #tpu.memory_space<vmem>>, vector<1x1x8x16xbf16>
    %94 = vector.shape_cast %93 : vector<1x1x8x16xbf16> to vector<8x16xbf16>
    %95 = vector.shape_cast %92 : vector<8x16xbf16> to vector<1x1x8x16xbf16>
    tpu.vector_store %arg12[%c0_63, %c1_64, %c0_65, %c0_66], %95 {strides = array<i32>} : memref<1x4x8x16xbf16, #tpu.memory_space<vmem>>, vector<1x1x8x16xbf16>,
    %c1_67 = arith.constant 1 : index
    %c0_68 = arith.constant 0 : index
    %c0_69 = arith.constant 0 : index
    %96 = vector.load %arg8[%c1_67, %c0_68, %c0_69] : memref<4x32x16xbf16, #tpu.memory_space<vmem>>, vector<1x32x16xbf16>
    %97 = vector.shape_cast %96 : vector<1x32x16xbf16> to vector<32x16xbf16>
    %cst_70 = arith.constant dense<0.000000e+00> : vector<8x16xf32>
    %98 = tpu.matmul %51, %97, %cst_70 {dimension_numbers = #tpu.dot_dimension_numbers<[1], [0], [0], [1], [0, 0, 1, 1], [], []>} : vector<8x32xbf16>, vector<32x16xbf16>, vector<8x16xf32> -> vector<8x16xf32>
    %c1_71 = arith.constant 1 : index
    %c0_72 = arith.constant 0 : index
    %c0_73 = arith.constant 0 : index
    %99 = vector.load %arg9[%c1_71, %c0_72, %c0_73] : memref<4x1x16xf32, #tpu.memory_space<vmem>>, vector<1x1x16xf32>
    %100 = vector.shape_cast %99 : vector<1x1x16xf32> to vector<1x16xf32>
    %101 = vector.broadcast %100 : vector<1x16xf32> to vector<8x16xf32>
    %102 = arith.addf %98, %101 : vector<8x16xf32>
    %103 = arith.truncf %102 : vector<8x16xf32> to vector<8x16xbf16>
    %c0_74 = arith.constant 0 : index
    %c1_75 = arith.constant 1 : index
    %c0_76 = arith.constant 0 : index
    %c0_77 = arith.constant 0 : index
    %104 = vector.load %arg13[%c0_74, %c1_75, %c0_76, %c0_77] : memref<1x4x8x16xbf16, #tpu.memory_space<vmem>>, vector<1x1x8x16xbf16>
    %105 = vector.shape_cast %104 : vector<1x1x8x16xbf16> to vector<8x16xbf16>
    %106 = vector.shape_cast %103 : vector<8x16xbf16> to vector<1x1x8x16xbf16>
    tpu.vector_store %arg13[%c0_74, %c1_75, %c0_76, %c0_77], %106 {strides = array<i32>} : memref<1x4x8x16xbf16, #tpu.memory_space<vmem>>, vector<1x1x8x16xbf16>,
    %c1_78 = arith.constant 1 : index
    %c0_79 = arith.constant 0 : index
    %c0_80 = arith.constant 0 : index
    %107 = vector.load %arg10[%c1_78, %c0_79, %c0_80] : memref<4x32x16xbf16, #tpu.memory_space<vmem>>, vector<1x32x16xbf16>
    %108 = vector.shape_cast %107 : vector<1x32x16xbf16> to vector<32x16xbf16>
    %cst_81 = arith.constant dense<0.000000e+00> : vector<8x16xf32>
    %109 = tpu.matmul %51, %108, %cst_81 {dimension_numbers = #tpu.dot_dimension_numbers<[1], [0], [0], [1], [0, 0, 1, 1], [], []>} : vector<8x32xbf16>, vector<32x16xbf16>, vector<8x16xf32> -> vector<8x16xf32>
    %c1_82 = arith.constant 1 : index
    %c0_83 = arith.constant 0 : index
    %c0_84 = arith.constant 0 : index
    %110 = vector.load %arg11[%c1_82, %c0_83, %c0_84] : memref<4x1x16xf32, #tpu.memory_space<vmem>>, vector<1x1x16xf32>
    %111 = vector.shape_cast %110 : vector<1x1x16xf32> to vector<1x16xf32>
    %112 = vector.broadcast %111 : vector<1x16xf32> to vector<8x16xf32>
    %113 = arith.addf %109, %112 : vector<8x16xf32>
    %114 = arith.truncf %113 : vector<8x16xf32> to vector<8x16xbf16>
    %c0_85 = arith.constant 0 : index
    %c1_86 = arith.constant 1 : index
    %c0_87 = arith.constant 0 : index
    %c0_88 = arith.constant 0 : index
    %115 = vector.load %arg14[%c0_85, %c1_86, %c0_87, %c0_88] : memref<1x4x8x16xbf16, #tpu.memory_space<vmem>>, vector<1x1x8x16xbf16>
    %116 = vector.shape_cast %115 : vector<1x1x8x16xbf16> to vector<8x16xbf16>
    %117 = vector.shape_cast %114 : vector<8x16xbf16> to vector<1x1x8x16xbf16>
    tpu.vector_store %arg14[%c0_85, %c1_86, %c0_87, %c0_88], %117 {strides = array<i32>} : memref<1x4x8x16xbf16, #tpu.memory_space<vmem>>, vector<1x1x8x16xbf16>,
    %c2_89 = arith.constant 2 : index
    %c0_90 = arith.constant 0 : index
    %c0_91 = arith.constant 0 : index
    %118 = vector.load %arg6[%c2_89, %c0_90, %c0_91] : memref<4x32x16xbf16, #tpu.memory_space<vmem>>, vector<1x32x16xbf16>
    %119 = vector.shape_cast %118 : vector<1x32x16xbf16> to vector<32x16xbf16>
    %cst_92 = arith.constant dense<0.000000e+00> : vector<8x16xf32>
    %120 = tpu.matmul %51, %119, %cst_92 {dimension_numbers = #tpu.dot_dimension_numbers<[1], [0], [0], [1], [0, 0, 1, 1], [], []>} : vector<8x32xbf16>, vector<32x16xbf16>, vector<8x16xf32> -> vector<8x16xf32>
    %c2_93 = arith.constant 2 : index
    %c0_94 = arith.constant 0 : index
    %c0_95 = arith.constant 0 : index
    %121 = vector.load %arg7[%c2_93, %c0_94, %c0_95] : memref<4x1x16xf32, #tpu.memory_space<vmem>>, vector<1x1x16xf32>
    %122 = vector.shape_cast %121 : vector<1x1x16xf32> to vector<1x16xf32>
    %123 = vector.broadcast %122 : vector<1x16xf32> to vector<8x16xf32>
    %124 = arith.addf %120, %123 : vector<8x16xf32>
    %125 = arith.truncf %124 : vector<8x16xf32> to vector<8x16xbf16>
    %c0_96 = arith.constant 0 : index
    %c2_97 = arith.constant 2 : index
    %c0_98 = arith.constant 0 : index
    %c0_99 = arith.constant 0 : index
    %126 = vector.load %arg12[%c0_96, %c2_97, %c0_98, %c0_99] : memref<1x4x8x16xbf16, #tpu.memory_space<vmem>>, vector<1x1x8x16xbf16>
    %127 = vector.shape_cast %126 : vector<1x1x8x16xbf16> to vector<8x16xbf16>
    %128 = vector.shape_cast %125 : vector<8x16xbf16> to vector<1x1x8x16xbf16>
    tpu.vector_store %arg12[%c0_96, %c2_97, %c0_98, %c0_99], %128 {strides = array<i32>} : memref<1x4x8x16xbf16, #tpu.memory_space<vmem>>, vector<1x1x8x16xbf16>,
    %c2_100 = arith.constant 2 : index
    %c0_101 = arith.constant 0 : index
    %c0_102 = arith.constant 0 : index
    %129 = vector.load %arg8[%c2_100, %c0_101, %c0_102] : memref<4x32x16xbf16, #tpu.memory_space<vmem>>, vector<1x32x16xbf16>
    %130 = vector.shape_cast %129 : vector<1x32x16xbf16> to vector<32x16xbf16>
    %cst_103 = arith.constant dense<0.000000e+00> : vector<8x16xf32>
    %131 = tpu.matmul %51, %130, %cst_103 {dimension_numbers = #tpu.dot_dimension_numbers<[1], [0], [0], [1], [0, 0, 1, 1], [], []>} : vector<8x32xbf16>, vector<32x16xbf16>, vector<8x16xf32> -> vector<8x16xf32>
    %c2_104 = arith.constant 2 : index
    %c0_105 = arith.constant 0 : index
    %c0_106 = arith.constant 0 : index
    %132 = vector.load %arg9[%c2_104, %c0_105, %c0_106] : memref<4x1x16xf32, #tpu.memory_space<vmem>>, vector<1x1x16xf32>
    %133 = vector.shape_cast %132 : vector<1x1x16xf32> to vector<1x16xf32>
    %134 = vector.broadcast %133 : vector<1x16xf32> to vector<8x16xf32>
    %135 = arith.addf %131, %134 : vector<8x16xf32>
    %136 = arith.truncf %135 : vector<8x16xf32> to vector<8x16xbf16>
    %c0_107 = arith.constant 0 : index
    %c2_108 = arith.constant 2 : index
    %c0_109 = arith.constant 0 : index
    %c0_110 = arith.constant 0 : index
    %137 = vector.load %arg13[%c0_107, %c2_108, %c0_109, %c0_110] : memref<1x4x8x16xbf16, #tpu.memory_space<vmem>>, vector<1x1x8x16xbf16>
    %138 = vector.shape_cast %137 : vector<1x1x8x16xbf16> to vector<8x16xbf16>
    %139 = vector.shape_cast %136 : vector<8x16xbf16> to vector<1x1x8x16xbf16>
    tpu.vector_store %arg13[%c0_107, %c2_108, %c0_109, %c0_110], %139 {strides = array<i32>} : memref<1x4x8x16xbf16, #tpu.memory_space<vmem>>, vector<1x1x8x16xbf16>,
    %c2_111 = arith.constant 2 : index
    %c0_112 = arith.constant 0 : index
    %c0_113 = arith.constant 0 : index
    %140 = vector.load %arg10[%c2_111, %c0_112, %c0_113] : memref<4x32x16xbf16, #tpu.memory_space<vmem>>, vector<1x32x16xbf16>
    %141 = vector.shape_cast %140 : vector<1x32x16xbf16> to vector<32x16xbf16>
    %cst_114 = arith.constant dense<0.000000e+00> : vector<8x16xf32>
    %142 = tpu.matmul %51, %141, %cst_114 {dimension_numbers = #tpu.dot_dimension_numbers<[1], [0], [0], [1], [0, 0, 1, 1], [], []>} : vector<8x32xbf16>, vector<32x16xbf16>, vector<8x16xf32> -> vector<8x16xf32>
    %c2_115 = arith.constant 2 : index
    %c0_116 = arith.constant 0 : index
    %c0_117 = arith.constant 0 : index
    %143 = vector.load %arg11[%c2_115, %c0_116, %c0_117] : memref<4x1x16xf32, #tpu.memory_space<vmem>>, vector<1x1x16xf32>
    %144 = vector.shape_cast %143 : vector<1x1x16xf32> to vector<1x16xf32>
    %145 = vector.broadcast %144 : vector<1x16xf32> to vector<8x16xf32>
    %146 = arith.addf %142, %145 : vector<8x16xf32>
    %147 = arith.truncf %146 : vector<8x16xf32> to vector<8x16xbf16>
    %c0_118 = arith.constant 0 : index
    %c2_119 = arith.constant 2 : index
    %c0_120 = arith.constant 0 : index
    %c0_121 = arith.constant 0 : index
    %148 = vector.load %arg14[%c0_118, %c2_119, %c0_120, %c0_121] : memref<1x4x8x16xbf16, #tpu.memory_space<vmem>>, vector<1x1x8x16xbf16>
    %149 = vector.shape_cast %148 : vector<1x1x8x16xbf16> to vector<8x16xbf16>
    %150 = vector.shape_cast %147 : vector<8x16xbf16> to vector<1x1x8x16xbf16>
    tpu.vector_store %arg14[%c0_118, %c2_119, %c0_120, %c0_121], %150 {strides = array<i32>} : memref<1x4x8x16xbf16, #tpu.memory_space<vmem>>, vector<1x1x8x16xbf16>,
    %c3 = arith.constant 3 : index
    %c0_122 = arith.constant 0 : index
    %c0_123 = arith.constant 0 : index
    %151 = vector.load %arg6[%c3, %c0_122, %c0_123] : memref<4x32x16xbf16, #tpu.memory_space<vmem>>, vector<1x32x16xbf16>
    %152 = vector.shape_cast %151 : vector<1x32x16xbf16> to vector<32x16xbf16>
    %cst_124 = arith.constant dense<0.000000e+00> : vector<8x16xf32>
    %153 = tpu.matmul %51, %152, %cst_124 {dimension_numbers = #tpu.dot_dimension_numbers<[1], [0], [0], [1], [0, 0, 1, 1], [], []>} : vector<8x32xbf16>, vector<32x16xbf16>, vector<8x16xf32> -> vector<8x16xf32>
    %c3_125 = arith.constant 3 : index
    %c0_126 = arith.constant 0 : index
    %c0_127 = arith.constant 0 : index
    %154 = vector.load %arg7[%c3_125, %c0_126, %c0_127] : memref<4x1x16xf32, #tpu.memory_space<vmem>>, vector<1x1x16xf32>
    %155 = vector.shape_cast %154 : vector<1x1x16xf32> to vector<1x16xf32>
    %156 = vector.broadcast %155 : vector<1x16xf32> to vector<8x16xf32>
    %157 = arith.addf %153, %156 : vector<8x16xf32>
    %158 = arith.truncf %157 : vector<8x16xf32> to vector<8x16xbf16>
    %c0_128 = arith.constant 0 : index
    %c3_129 = arith.constant 3 : index
    %c0_130 = arith.constant 0 : index
    %c0_131 = arith.constant 0 : index
    %159 = vector.load %arg12[%c0_128, %c3_129, %c0_130, %c0_131] : memref<1x4x8x16xbf16, #tpu.memory_space<vmem>>, vector<1x1x8x16xbf16>
    %160 = vector.shape_cast %159 : vector<1x1x8x16xbf16> to vector<8x16xbf16>
    %161 = vector.shape_cast %158 : vector<8x16xbf16> to vector<1x1x8x16xbf16>
    tpu.vector_store %arg12[%c0_128, %c3_129, %c0_130, %c0_131], %161 {strides = array<i32>} : memref<1x4x8x16xbf16, #tpu.memory_space<vmem>>, vector<1x1x8x16xbf16>,
    %c3_132 = arith.constant 3 : index
    %c0_133 = arith.constant 0 : index
    %c0_134 = arith.constant 0 : index
    %162 = vector.load %arg8[%c3_132, %c0_133, %c0_134] : memref<4x32x16xbf16, #tpu.memory_space<vmem>>, vector<1x32x16xbf16>
    %163 = vector.shape_cast %162 : vector<1x32x16xbf16> to vector<32x16xbf16>
    %cst_135 = arith.constant dense<0.000000e+00> : vector<8x16xf32>
    %164 = tpu.matmul %51, %163, %cst_135 {dimension_numbers = #tpu.dot_dimension_numbers<[1], [0], [0], [1], [0, 0, 1, 1], [], []>} : vector<8x32xbf16>, vector<32x16xbf16>, vector<8x16xf32> -> vector<8x16xf32>
    %c3_136 = arith.constant 3 : index
    %c0_137 = arith.constant 0 : index
    %c0_138 = arith.constant 0 : index
    %165 = vector.load %arg9[%c3_136, %c0_137, %c0_138] : memref<4x1x16xf32, #tpu.memory_space<vmem>>, vector<1x1x16xf32>
    %166 = vector.shape_cast %165 : vector<1x1x16xf32> to vector<1x16xf32>
    %167 = vector.broadcast %166 : vector<1x16xf32> to vector<8x16xf32>
    %168 = arith.addf %164, %167 : vector<8x16xf32>
    %169 = arith.truncf %168 : vector<8x16xf32> to vector<8x16xbf16>
    %c0_139 = arith.constant 0 : index
    %c3_140 = arith.constant 3 : index
    %c0_141 = arith.constant 0 : index
    %c0_142 = arith.constant 0 : index
    %170 = vector.load %arg13[%c0_139, %c3_140, %c0_141, %c0_142] : memref<1x4x8x16xbf16, #tpu.memory_space<vmem>>, vector<1x1x8x16xbf16>
    %171 = vector.shape_cast %170 : vector<1x1x8x16xbf16> to vector<8x16xbf16>
    %172 = vector.shape_cast %169 : vector<8x16xbf16> to vector<1x1x8x16xbf16>
    tpu.vector_store %arg13[%c0_139, %c3_140, %c0_141, %c0_142], %172 {strides = array<i32>} : memref<1x4x8x16xbf16, #tpu.memory_space<vmem>>, vector<1x1x8x16xbf16>,
    %c3_143 = arith.constant 3 : index
    %c0_144 = arith.constant 0 : index
    %c0_145 = arith.constant 0 : index
    %173 = vector.load %arg10[%c3_143, %c0_144, %c0_145] : memref<4x32x16xbf16, #tpu.memory_space<vmem>>, vector<1x32x16xbf16>
    %174 = vector.shape_cast %173 : vector<1x32x16xbf16> to vector<32x16xbf16>
    %cst_146 = arith.constant dense<0.000000e+00> : vector<8x16xf32>
    %175 = tpu.matmul %51, %174, %cst_146 {dimension_numbers = #tpu.dot_dimension_numbers<[1], [0], [0], [1], [0, 0, 1, 1], [], []>} : vector<8x32xbf16>, vector<32x16xbf16>, vector<8x16xf32> -> vector<8x16xf32>
    %c3_147 = arith.constant 3 : index
    %c0_148 = arith.constant 0 : index
    %c0_149 = arith.constant 0 : index
    %176 = vector.load %arg11[%c3_147, %c0_148, %c0_149] : memref<4x1x16xf32, #tpu.memory_space<vmem>>, vector<1x1x16xf32>
    %177 = vector.shape_cast %176 : vector<1x1x16xf32> to vector<1x16xf32>
    %178 = vector.broadcast %177 : vector<1x16xf32> to vector<8x16xf32>
    %179 = arith.addf %175, %178 : vector<8x16xf32>
    %180 = arith.truncf %179 : vector<8x16xf32> to vector<8x16xbf16>
    %c0_150 = arith.constant 0 : index
    %c3_151 = arith.constant 3 : index
    %c0_152 = arith.constant 0 : index
    %c0_153 = arith.constant 0 : index
    %181 = vector.load %arg14[%c0_150, %c3_151, %c0_152, %c0_153] : memref<1x4x8x16xbf16, #tpu.memory_space<vmem>>, vector<1x1x8x16xbf16>
    %182 = vector.shape_cast %181 : vector<1x1x8x16xbf16> to vector<8x16xbf16>
    %183 = vector.shape_cast %180 : vector<8x16xbf16> to vector<1x1x8x16xbf16>
    tpu.vector_store %arg14[%c0_150, %c3_151, %c0_152, %c0_153], %183 {strides = array<i32>} : memref<1x4x8x16xbf16, #tpu.memory_space<vmem>>, vector<1x1x8x16xbf16>,
    return
  }
  func.func @transform_0(%arg0: i32) -> (i32, i32, i32) {
    %c0_i32 = arith.constant 0 : i32
    %c0_i32_0 = arith.constant 0 : i32
    %c0_i32_1 = arith.constant 0 : i32
    return %arg0, %c0_i32, %c0_i32_0 : i32, i32, i32
  }
  func.func @transform_1(%arg0: i32) -> (i32, i32, i32) {
    %c0_i32 = arith.constant 0 : i32
    %c0_i32_0 = arith.constant 0 : i32
    %c0_i32_1 = arith.constant 0 : i32
    %c0_i32_2 = arith.constant 0 : i32
    return %c0_i32, %c0_i32_0, %c0_i32_1 : i32, i32, i32
  }
  func.func @transform_2(%arg0: i32) -> (i32, i32) {
    %c0_i32 = arith.constant 0 : i32
    %c0_i32_0 = arith.constant 0 : i32
    %c0_i32_1 = arith.constant 0 : i32
    return %c0_i32, %c0_i32_0 : i32, i32
  }
  func.func @transform_3(%arg0: i32) -> (i32, i32) {
    %c0_i32 = arith.constant 0 : i32
    %c0_i32_0 = arith.constant 0 : i32
    %c0_i32_1 = arith.constant 0 : i32
    return %c0_i32, %c0_i32_0 : i32, i32
  }
  func.func @transform_4(%arg0: i32) -> (i32, i32) {
    %c0_i32 = arith.constant 0 : i32
    %c0_i32_0 = arith.constant 0 : i32
    %c0_i32_1 = arith.constant 0 : i32
    return %c0_i32, %c0_i32_0 : i32, i32
  }
  func.func @transform_5(%arg0: i32) -> (i32, i32, i32) {
    %c0_i32 = arith.constant 0 : i32
    %c0_i32_0 = arith.constant 0 : i32
    %c0_i32_1 = arith.constant 0 : i32
    %c0_i32_2 = arith.constant 0 : i32
    return %c0_i32, %c0_i32_0, %c0_i32_1 : i32, i32, i32
  }
  func.func @transform_6(%arg0: i32) -> (i32, i32, i32) {
    %c0_i32 = arith.constant 0 : i32
    %c0_i32_0 = arith.constant 0 : i32
    %c0_i32_1 = arith.constant 0 : i32
    %c0_i32_2 = arith.constant 0 : i32
    return %c0_i32, %c0_i32_0, %c0_i32_1 : i32, i32, i32
  }
  func.func @transform_7(%arg0: i32) -> (i32, i32, i32) {
    %c0_i32 = arith.constant 0 : i32
    %c0_i32_0 = arith.constant 0 : i32
    %c0_i32_1 = arith.constant 0 : i32
    %c0_i32_2 = arith.constant 0 : i32
    return %c0_i32, %c0_i32_0, %c0_i32_1 : i32, i32, i32
  }
  func.func @transform_8(%arg0: i32) -> (i32, i32, i32) {
    %c0_i32 = arith.constant 0 : i32
    %c0_i32_0 = arith.constant 0 : i32
    %c0_i32_1 = arith.constant 0 : i32
    %c0_i32_2 = arith.constant 0 : i32
    return %c0_i32, %c0_i32_0, %c0_i32_1 : i32, i32, i32
  }
  func.func @transform_9(%arg0: i32) -> (i32, i32, i32) {
    %c0_i32 = arith.constant 0 : i32
    %c0_i32_0 = arith.constant 0 : i32
    %c0_i32_1 = arith.constant 0 : i32
    %c0_i32_2 = arith.constant 0 : i32
    return %c0_i32, %c0_i32_0, %c0_i32_1 : i32, i32, i32
  }
  func.func @transform_10(%arg0: i32) -> (i32, i32, i32) {
    %c0_i32 = arith.constant 0 : i32
    %c0_i32_0 = arith.constant 0 : i32
    %c0_i32_1 = arith.constant 0 : i32
    %c0_i32_2 = arith.constant 0 : i32
    return %c0_i32, %c0_i32_0, %c0_i32_1 : i32, i32, i32
  }
  func.func @transform_11(%arg0: i32) -> (i32, i32, i32, i32) {
    %c0_i32 = arith.constant 0 : i32
    %c0_i32_0 = arith.constant 0 : i32
    %c0_i32_1 = arith.constant 0 : i32
    %c0_i32_2 = arith.constant 0 : i32
    return %arg0, %c0_i32, %c0_i32_0, %c0_i32_1 : i32, i32, i32, i32
  }
  func.func @transform_12(%arg0: i32) -> (i32, i32, i32, i32) {
    %c0_i32 = arith.constant 0 : i32
    %c0_i32_0 = arith.constant 0 : i32
    %c0_i32_1 = arith.constant 0 : i32
    %c0_i32_2 = arith.constant 0 : i32
    return %arg0, %c0_i32, %c0_i32_0, %c0_i32_1 : i32, i32, i32, i32
  }
  func.func @transform_13(%arg0: i32) -> (i32, i32, i32, i32) {
    %c0_i32 = arith.constant 0 : i32
    %c0_i32_0 = arith.constant 0 : i32
    %c0_i32_1 = arith.constant 0 : i32
    %c0_i32_2 = arith.constant 0 : i32
    return %arg0, %c0_i32, %c0_i32_0, %c0_i32_1 : i32, i32, i32, i32
  }
}

module attributes {stable_mosaic.version = 11 : i64} {
  func.func @_attn_epilogue_kernel(%arg0: i32, %arg1: i32, %arg2: memref<1x4x8x16xbf16, #tpu.memory_space<vmem>>, %arg3: memref<1x4x8x16xbf16, #tpu.memory_space<vmem>>, %arg4: memref<1x4x8x16xbf16, #tpu.memory_space<vmem>>, %arg5: memref<1x8x32xf32, #tpu.memory_space<vmem>>, %arg6: memref<4x16x32xbf16, #tpu.memory_space<vmem>>, %arg7: memref<1x32xf32, #tpu.memory_space<vmem>>, %arg8: memref<32x32xbf16, #tpu.memory_space<vmem>>, %arg9: memref<1x32xf32, #tpu.memory_space<vmem>>, %arg10: memref<64x32xbf16, #tpu.memory_space<vmem>>, %arg11: memref<1x32xf32, #tpu.memory_space<vmem>>, %arg12: memref<1x32xf32, #tpu.memory_space<vmem>>, %arg13: memref<1x32xf32, #tpu.memory_space<vmem>>, %arg14: memref<32x32xbf16, #tpu.memory_space<vmem>>, %arg15: memref<1x32xf32, #tpu.memory_space<vmem>>, %arg16: memref<1x8x32xf32, #tpu.memory_space<vmem>>, %arg17: memref<1x8x32xbf16, #tpu.memory_space<vmem>>, %arg18: memref<8x32xf32, #tpu.memory_space<vmem>>) attributes {dimension_semantics = [#tpu.dimension_semantics<parallel>, #tpu.dimension_semantics<arbitrary>], iteration_bounds = array<i64: 2, 1>, scalar_prefetch = 0 : i64, scratch_operands = 1 : i64, tpu.core_type = #tpu.core_type<tc>, window_params = [{transform_indices = @transform_0, window_bounds = array<i64: 1, 4, 8, 16>}, {transform_indices = @transform_1, window_bounds = array<i64: 1, 4, 8, 16>}, {transform_indices = @transform_2, window_bounds = array<i64: 1, 4, 8, 16>}, {transform_indices = @transform_3, window_bounds = array<i64: 1, 8, 32>}, {pipeline_mode = #tpu.pipeline_mode<synchronous>, transform_indices = @transform_4, window_bounds = array<i64: 4, 16, 32>}, {pipeline_mode = #tpu.pipeline_mode<synchronous>, transform_indices = @transform_5, window_bounds = array<i64: 1, 32>}, {pipeline_mode = #tpu.pipeline_mode<synchronous>, transform_indices = @transform_6, window_bounds = array<i64: 32, 32>}, {pipeline_mode = #tpu.pipeline_mode<synchronous>, transform_indices = @transform_7, window_bounds = array<i64: 1, 32>}, {pipeline_mode = #tpu.pipeline_mode<synchronous>, transform_indices = @transform_8, window_bounds = array<i64: 64, 32>}, {pipeline_mode = #tpu.pipeline_mode<synchronous>, transform_indices = @transform_9, window_bounds = array<i64: 1, 32>}, {pipeline_mode = #tpu.pipeline_mode<synchronous>, transform_indices = @transform_10, window_bounds = array<i64: 1, 32>}, {pipeline_mode = #tpu.pipeline_mode<synchronous>, transform_indices = @transform_11, window_bounds = array<i64: 1, 32>}, {pipeline_mode = #tpu.pipeline_mode<synchronous>, transform_indices = @transform_12, window_bounds = array<i64: 32, 32>}, {pipeline_mode = #tpu.pipeline_mode<synchronous>, transform_indices = @transform_13, window_bounds = array<i64: 1, 32>}, {transform_indices = @transform_14, window_bounds = array<i64: 1, 8, 32>}, {transform_indices = @transform_15, window_bounds = array<i64: 1, 8, 32>}]} {
    %cst = arith.constant 0.000000e+00 : f32
    %0 = vector.broadcast %cst : f32 to vector<8x32xf32>
    %c0 = arith.constant 0 : index
    %c0_0 = arith.constant 0 : index
    %1 = vector.load %arg18[%c0, %c0_0] : memref<8x32xf32, #tpu.memory_space<vmem>>, vector<8x32xf32>
    tpu.vector_store %arg18[%c0, %c0_0], %0 {strides = array<i32>} : memref<8x32xf32, #tpu.memory_space<vmem>>, vector<8x32xf32>,
    %c0_i32 = arith.constant 0 : i32
    %c4_i32 = arith.constant 4 : i32
    %2 = arith.addi %c0_i32, %c4_i32 : i32
    %c1_i32 = arith.constant 1 : i32
    scf.for %arg19 = %c0_i32 to %2 step %c1_i32  : i32 {
      %c0_40 = arith.constant 0 : index
      %66 = arith.index_cast %arg19 : i32 to index
      %c0_41 = arith.constant 0 : index
      %c0_42 = arith.constant 0 : index
      %67 = vector.load %arg2[%c0_40, %66, %c0_41, %c0_42] : memref<1x4x8x16xbf16, #tpu.memory_space<vmem>>, vector<1x1x8x16xbf16>
      %68 = vector.shape_cast %67 : vector<1x1x8x16xbf16> to vector<8x16xbf16>
      %c0_43 = arith.constant 0 : index
      %69 = arith.index_cast %arg19 : i32 to index
      %c0_44 = arith.constant 0 : index
      %c0_45 = arith.constant 0 : index
      %70 = vector.load %arg3[%c0_43, %69, %c0_44, %c0_45] : memref<1x4x8x16xbf16, #tpu.memory_space<vmem>>, vector<1x1x8x16xbf16>
      %71 = vector.shape_cast %70 : vector<1x1x8x16xbf16> to vector<8x16xbf16>
      %c0_46 = arith.constant 0 : index
      %72 = arith.index_cast %arg19 : i32 to index
      %c0_47 = arith.constant 0 : index
      %c0_48 = arith.constant 0 : index
      %73 = vector.load %arg4[%c0_46, %72, %c0_47, %c0_48] : memref<1x4x8x16xbf16, #tpu.memory_space<vmem>>, vector<1x1x8x16xbf16>
      %74 = vector.shape_cast %73 : vector<1x1x8x16xbf16> to vector<8x16xbf16>
      %cst_49 = arith.constant dense<0.000000e+00> : vector<8x8xf32>
      %75 = tpu.matmul %68, %71, %cst_49 {dimension_numbers = #tpu.dot_dimension_numbers<[1], [1], [0], [0], [0, 0, 1, 0], [], []>} : vector<8x16xbf16>, vector<8x16xbf16>, vector<8x8xf32> -> vector<8x8xf32>
      %cst_50 = arith.constant 2.500000e-01 : f32
      %76 = vector.broadcast %cst_50 : f32 to vector<8x8xf32>
      %77 = arith.mulf %75, %76 : vector<8x8xf32>
      %cst_51 = arith.constant dense<0xFF800000> : vector<8xf32>
      %78 = vector.multi_reduction <maximumf>, %77, %cst_51 [1] : vector<8x8xf32> to vector<8xf32>
      %79 = vector.shape_cast %78 : vector<8xf32> to vector<8x1xf32>
      %80 = vector.broadcast %79 : vector<8x1xf32> to vector<8x8xf32>
      %81 = arith.subf %77, %80 : vector<8x8xf32>
      %82 = math.exp %81 : vector<8x8xf32>
      %cst_52 = arith.constant dense<0.000000e+00> : vector<8xf32>
      %83 = vector.multi_reduction <add>, %82, %cst_52 [1] : vector<8x8xf32> to vector<8xf32>
      %84 = vector.shape_cast %83 : vector<8xf32> to vector<8x1xf32>
      %85 = tpu.reciprocal %84 {approx = true} : vector<8x1xf32> -> vector<8x1xf32>
      %86 = vector.broadcast %85 : vector<8x1xf32> to vector<8x8xf32>
      %87 = arith.mulf %82, %86 : vector<8x8xf32>
      %88 = arith.truncf %87 : vector<8x8xf32> to vector<8x8xbf16>
      %cst_53 = arith.constant dense<0.000000e+00> : vector<8x16xf32>
      %89 = tpu.matmul %88, %74, %cst_53 {dimension_numbers = #tpu.dot_dimension_numbers<[1], [0], [0], [1], [0, 0, 1, 1], [], []>} : vector<8x8xbf16>, vector<8x16xbf16>, vector<8x16xf32> -> vector<8x16xf32>
      %c0_54 = arith.constant 0 : index
      %c0_55 = arith.constant 0 : index
      %90 = vector.load %arg18[%c0_54, %c0_55] : memref<8x32xf32, #tpu.memory_space<vmem>>, vector<8x32xf32>
      %91 = arith.truncf %89 : vector<8x16xf32> to vector<8x16xbf16>
      %92 = arith.index_cast %arg19 : i32 to index
      %c0_56 = arith.constant 0 : index
      %c0_57 = arith.constant 0 : index
      %93 = vector.load %arg6[%92, %c0_56, %c0_57] : memref<4x16x32xbf16, #tpu.memory_space<vmem>>, vector<1x16x32xbf16>
      %94 = vector.shape_cast %93 : vector<1x16x32xbf16> to vector<16x32xbf16>
      %cst_58 = arith.constant dense<0.000000e+00> : vector<8x32xf32>
      %95 = tpu.matmul %91, %94, %cst_58 {dimension_numbers = #tpu.dot_dimension_numbers<[1], [0], [0], [1], [0, 0, 1, 1], [], []>} : vector<8x16xbf16>, vector<16x32xbf16>, vector<8x32xf32> -> vector<8x32xf32>
      %96 = arith.addf %90, %95 : vector<8x32xf32>
      %c0_59 = arith.constant 0 : index
      %c0_60 = arith.constant 0 : index
      %97 = vector.load %arg18[%c0_59, %c0_60] : memref<8x32xf32, #tpu.memory_space<vmem>>, vector<8x32xf32>
      tpu.vector_store %arg18[%c0_59, %c0_60], %96 {strides = array<i32>} : memref<8x32xf32, #tpu.memory_space<vmem>>, vector<8x32xf32>,
    }
    %c4_i32_1 = arith.constant 4 : i32
    %c0_2 = arith.constant 0 : index
    %c0_3 = arith.constant 0 : index
    %c0_4 = arith.constant 0 : index
    %3 = vector.load %arg5[%c0_2, %c0_3, %c0_4] : memref<1x8x32xf32, #tpu.memory_space<vmem>>, vector<1x8x32xf32>
    %4 = vector.shape_cast %3 : vector<1x8x32xf32> to vector<8x32xf32>
    %c0_5 = arith.constant 0 : index
    %c0_6 = arith.constant 0 : index
    %5 = vector.load %arg18[%c0_5, %c0_6] : memref<8x32xf32, #tpu.memory_space<vmem>>, vector<8x32xf32>
    %c0_7 = arith.constant 0 : index
    %c0_8 = arith.constant 0 : index
    %6 = vector.load %arg7[%c0_7, %c0_8] : memref<1x32xf32, #tpu.memory_space<vmem>>, vector<1x32xf32>
    %7 = vector.broadcast %6 : vector<1x32xf32> to vector<8x32xf32>
    %8 = arith.addf %5, %7 : vector<8x32xf32>
    %c0_9 = arith.constant 0 : index
    %c0_10 = arith.constant 0 : index
    %9 = vector.load %arg8[%c0_9, %c0_10] : memref<32x32xbf16, #tpu.memory_space<vmem>>, vector<32x32xbf16>
    %10 = arith.truncf %8 : vector<8x32xf32> to vector<8x32xbf16>
    %cst_11 = arith.constant dense<0.000000e+00> : vector<8x32xf32>
    %11 = tpu.matmul %10, %9, %cst_11 {dimension_numbers = #tpu.dot_dimension_numbers<[1], [0], [0], [1], [0, 0, 1, 1], [], []>} : vector<8x32xbf16>, vector<32x32xbf16>, vector<8x32xf32> -> vector<8x32xf32>
    %c0_12 = arith.constant 0 : index
    %c0_13 = arith.constant 0 : index
    %12 = vector.load %arg9[%c0_12, %c0_13] : memref<1x32xf32, #tpu.memory_space<vmem>>, vector<1x32xf32>
    %13 = vector.broadcast %12 : vector<1x32xf32> to vector<8x32xf32>
    %14 = arith.addf %11, %13 : vector<8x32xf32>
    %15 = tpu.concatenate %4, %14 in 1 : vector<8x32xf32>, vector<8x32xf32> -> vector<8x64xf32>
    %c0_14 = arith.constant 0 : index
    %c0_15 = arith.constant 0 : index
    %16 = vector.load %arg10[%c0_14, %c0_15] : memref<64x32xbf16, #tpu.memory_space<vmem>>, vector<64x32xbf16>
    %17 = arith.truncf %15 : vector<8x64xf32> to vector<8x64xbf16>
    %cst_16 = arith.constant dense<0.000000e+00> : vector<8x32xf32>
    %18 = tpu.matmul %17, %16, %cst_16 {dimension_numbers = #tpu.dot_dimension_numbers<[1], [0], [0], [1], [0, 0, 1, 1], [], []>} : vector<8x64xbf16>, vector<64x32xbf16>, vector<8x32xf32> -> vector<8x32xf32>
    %c0_17 = arith.constant 0 : index
    %c0_18 = arith.constant 0 : index
    %19 = vector.load %arg11[%c0_17, %c0_18] : memref<1x32xf32, #tpu.memory_space<vmem>>, vector<1x32xf32>
    %20 = vector.broadcast %19 : vector<1x32xf32> to vector<8x32xf32>
    %21 = arith.addf %18, %20 : vector<8x32xf32>
    %22 = arith.negf %21 : vector<8x32xf32>
    %23 = math.exp %22 : vector<8x32xf32>
    %cst_19 = arith.constant 1.000000e+00 : f32
    %24 = vector.broadcast %cst_19 : f32 to vector<8x32xf32>
    %25 = arith.addf %24, %23 : vector<8x32xf32>
    %26 = arith.divf %24, %25 : vector<8x32xf32>
    %27 = arith.mulf %26, %14 : vector<8x32xf32>
    %28 = arith.addf %4, %27 : vector<8x32xf32>
    %cst_20 = arith.constant dense<0.000000e+00> : vector<8xf32>
    %29 = vector.multi_reduction <add>, %28, %cst_20 [1] : vector<8x32xf32> to vector<8xf32>
    %30 = vector.shape_cast %29 : vector<8xf32> to vector<8x1xf32>
    %cst_21 = arith.constant 3.200000e+01 : f32
    %31 = vector.broadcast %cst_21 : f32 to vector<8x1xf32>
    %32 = arith.divf %30, %31 : vector<8x1xf32>
    %33 = vector.broadcast %32 : vector<8x1xf32> to vector<8x32xf32>
    %34 = arith.subf %28, %33 : vector<8x32xf32>
    %35 = arith.mulf %34, %34 : vector<8x32xf32>
    %cst_22 = arith.constant dense<0.000000e+00> : vector<8xf32>
    %36 = vector.multi_reduction <add>, %35, %cst_22 [1] : vector<8x32xf32> to vector<8xf32>
    %37 = vector.shape_cast %36 : vector<8xf32> to vector<8x1xf32>
    %cst_23 = arith.constant 3.200000e+01 : f32
    %38 = vector.broadcast %cst_23 : f32 to vector<8x1xf32>
    %39 = arith.divf %37, %38 : vector<8x1xf32>
    %40 = vector.broadcast %32 : vector<8x1xf32> to vector<8x32xf32>
    %41 = arith.subf %28, %40 : vector<8x32xf32>
    %cst_24 = arith.constant 9.99999974E-6 : f32
    %42 = vector.broadcast %cst_24 : f32 to vector<8x1xf32>
    %43 = arith.addf %39, %42 : vector<8x1xf32>
    %44 = math.rsqrt %43 : vector<8x1xf32>
    %45 = vector.broadcast %44 : vector<8x1xf32> to vector<8x32xf32>
    %46 = arith.mulf %41, %45 : vector<8x32xf32>
    %c0_25 = arith.constant 0 : index
    %c0_26 = arith.constant 0 : index
    %47 = vector.load %arg12[%c0_25, %c0_26] : memref<1x32xf32, #tpu.memory_space<vmem>>, vector<1x32xf32>
    %48 = vector.broadcast %47 : vector<1x32xf32> to vector<8x32xf32>
    %49 = arith.mulf %46, %48 : vector<8x32xf32>
    %c0_27 = arith.constant 0 : index
    %c0_28 = arith.constant 0 : index
    %50 = vector.load %arg13[%c0_27, %c0_28] : memref<1x32xf32, #tpu.memory_space<vmem>>, vector<1x32xf32>
    %51 = vector.broadcast %50 : vector<1x32xf32> to vector<8x32xf32>
    %52 = arith.addf %49, %51 : vector<8x32xf32>
    %c0_29 = arith.constant 0 : index
    %c0_30 = arith.constant 0 : index
    %c0_31 = arith.constant 0 : index
    %53 = vector.load %arg16[%c0_29, %c0_30, %c0_31] : memref<1x8x32xf32, #tpu.memory_space<vmem>>, vector<1x8x32xf32>
    %54 = vector.shape_cast %53 : vector<1x8x32xf32> to vector<8x32xf32>
    %55 = vector.shape_cast %52 : vector<8x32xf32> to vector<1x8x32xf32>
    tpu.vector_store %arg16[%c0_29, %c0_30, %c0_31], %55 {strides = array<i32>} : memref<1x8x32xf32, #tpu.memory_space<vmem>>, vector<1x8x32xf32>,
    %c0_32 = arith.constant 0 : index
    %c0_33 = arith.constant 0 : index
    %56 = vector.load %arg14[%c0_32, %c0_33] : memref<32x32xbf16, #tpu.memory_space<vmem>>, vector<32x32xbf16>
    %57 = arith.truncf %52 : vector<8x32xf32> to vector<8x32xbf16>
    %cst_34 = arith.constant dense<0.000000e+00> : vector<8x32xf32>
    %58 = tpu.matmul %57, %56, %cst_34 {dimension_numbers = #tpu.dot_dimension_numbers<[1], [0], [0], [1], [0, 0, 1, 1], [], []>} : vector<8x32xbf16>, vector<32x32xbf16>, vector<8x32xf32> -> vector<8x32xf32>
    %c0_35 = arith.constant 0 : index
    %c0_36 = arith.constant 0 : index
    %59 = vector.load %arg15[%c0_35, %c0_36] : memref<1x32xf32, #tpu.memory_space<vmem>>, vector<1x32xf32>
    %60 = vector.broadcast %59 : vector<1x32xf32> to vector<8x32xf32>
    %61 = arith.addf %58, %60 : vector<8x32xf32>
    %62 = arith.truncf %61 : vector<8x32xf32> to vector<8x32xbf16>
    %c0_37 = arith.constant 0 : index
    %c0_38 = arith.constant 0 : index
    %c0_39 = arith.constant 0 : index
    %63 = vector.load %arg17[%c0_37, %c0_38, %c0_39] : memref<1x8x32xbf16, #tpu.memory_space<vmem>>, vector<1x8x32xbf16>
    %64 = vector.shape_cast %63 : vector<1x8x32xbf16> to vector<8x32xbf16>
    %65 = vector.shape_cast %62 : vector<8x32xbf16> to vector<1x8x32xbf16>
    tpu.vector_store %arg17[%c0_37, %c0_38, %c0_39], %65 {strides = array<i32>} : memref<1x8x32xbf16, #tpu.memory_space<vmem>>, vector<1x8x32xbf16>,
    return
  }
  func.func @transform_0(%arg0: i32, %arg1: i32) -> (i32, i32, i32, i32) {
    %c0_i32 = arith.constant 0 : i32
    %c0_i32_0 = arith.constant 0 : i32
    %c0_i32_1 = arith.constant 0 : i32
    return %arg0, %c0_i32, %arg1, %c0_i32_0 : i32, i32, i32, i32
  }
  func.func @transform_1(%arg0: i32, %arg1: i32) -> (i32, i32, i32, i32) {
    %c0_i32 = arith.constant 0 : i32
    %c0_i32_0 = arith.constant 0 : i32
    %c0_i32_1 = arith.constant 0 : i32
    %c0_i32_2 = arith.constant 0 : i32
    return %arg0, %c0_i32, %c0_i32_0, %c0_i32_1 : i32, i32, i32, i32
  }
  func.func @transform_2(%arg0: i32, %arg1: i32) -> (i32, i32, i32, i32) {
    %c0_i32 = arith.constant 0 : i32
    %c0_i32_0 = arith.constant 0 : i32
    %c0_i32_1 = arith.constant 0 : i32
    %c0_i32_2 = arith.constant 0 : i32
    return %arg0, %c0_i32, %c0_i32_0, %c0_i32_1 : i32, i32, i32, i32
  }
  func.func @transform_3(%arg0: i32, %arg1: i32) -> (i32, i32, i32) {
    %c0_i32 = arith.constant 0 : i32
    %c0_i32_0 = arith.constant 0 : i32
    return %arg0, %arg1, %c0_i32 : i32, i32, i32
  }
  func.func @transform_4(%arg0: i32, %arg1: i32) -> (i32, i32, i32) {
    %c0_i32 = arith.constant 0 : i32
    %c0_i32_0 = arith.constant 0 : i32
    %c0_i32_1 = arith.constant 0 : i32
    %c0_i32_2 = arith.constant 0 : i32
    return %c0_i32, %c0_i32_0, %c0_i32_1 : i32, i32, i32
  }
  func.func @transform_5(%arg0: i32, %arg1: i32) -> (i32, i32) {
    %c0_i32 = arith.constant 0 : i32
    %c0_i32_0 = arith.constant 0 : i32
    %c0_i32_1 = arith.constant 0 : i32
    return %c0_i32, %c0_i32_0 : i32, i32
  }
  func.func @transform_6(%arg0: i32, %arg1: i32) -> (i32, i32) {
    %c0_i32 = arith.constant 0 : i32
    %c0_i32_0 = arith.constant 0 : i32
    %c0_i32_1 = arith.constant 0 : i32
    return %c0_i32, %c0_i32_0 : i32, i32
  }
  func.func @transform_7(%arg0: i32, %arg1: i32) -> (i32, i32) {
    %c0_i32 = arith.constant 0 : i32
    %c0_i32_0 = arith.constant 0 : i32
    %c0_i32_1 = arith.constant 0 : i32
    return %c0_i32, %c0_i32_0 : i32, i32
  }
  func.func @transform_8(%arg0: i32, %arg1: i32) -> (i32, i32) {
    %c0_i32 = arith.constant 0 : i32
    %c0_i32_0 = arith.constant 0 : i32
    %c0_i32_1 = arith.constant 0 : i32
    return %c0_i32, %c0_i32_0 : i32, i32
  }
  func.func @transform_9(%arg0: i32, %arg1: i32) -> (i32, i32) {
    %c0_i32 = arith.constant 0 : i32
    %c0_i32_0 = arith.constant 0 : i32
    %c0_i32_1 = arith.constant 0 : i32
    return %c0_i32, %c0_i32_0 : i32, i32
  }
  func.func @transform_10(%arg0: i32, %arg1: i32) -> (i32, i32) {
    %c0_i32 = arith.constant 0 : i32
    %c0_i32_0 = arith.constant 0 : i32
    %c0_i32_1 = arith.constant 0 : i32
    return %c0_i32, %c0_i32_0 : i32, i32
  }
  func.func @transform_11(%arg0: i32, %arg1: i32) -> (i32, i32) {
    %c0_i32 = arith.constant 0 : i32
    %c0_i32_0 = arith.constant 0 : i32
    %c0_i32_1 = arith.constant 0 : i32
    return %c0_i32, %c0_i32_0 : i32, i32
  }
  func.func @transform_12(%arg0: i32, %arg1: i32) -> (i32, i32) {
    %c0_i32 = arith.constant 0 : i32
    %c0_i32_0 = arith.constant 0 : i32
    %c0_i32_1 = arith.constant 0 : i32
    return %c0_i32, %c0_i32_0 : i32, i32
  }
  func.func @transform_13(%arg0: i32, %arg1: i32) -> (i32, i32) {
    %c0_i32 = arith.constant 0 : i32
    %c0_i32_0 = arith.constant 0 : i32
    %c0_i32_1 = arith.constant 0 : i32
    return %c0_i32, %c0_i32_0 : i32, i32
  }
  func.func @transform_14(%arg0: i32, %arg1: i32) -> (i32, i32, i32) {
    %c0_i32 = arith.constant 0 : i32
    %c0_i32_0 = arith.constant 0 : i32
    return %arg0, %arg1, %c0_i32 : i32, i32, i32
  }
  func.func @transform_15(%arg0: i32, %arg1: i32) -> (i32, i32, i32) {
    %c0_i32 = arith.constant 0 : i32
    %c0_i32_0 = arith.constant 0 : i32
    return %arg0, %arg1, %c0_i32 : i32, i32, i32
  }
}

module attributes {stable_mosaic.version = 11 : i64} {
  func.func @_cross_final_kernel(%arg0: i32, %arg1: memref<16x32xbf16, #tpu.memory_space<vmem>>, %arg2: memref<16x32xbf16, #tpu.memory_space<vmem>>, %arg3: memref<16x32xbf16, #tpu.memory_space<vmem>>, %arg4: memref<32x96xbf16, #tpu.memory_space<vmem>>, %arg5: memref<1x96xf32, #tpu.memory_space<vmem>>, %arg6: memref<32x32xbf16, #tpu.memory_space<vmem>>, %arg7: memref<1x32xf32, #tpu.memory_space<vmem>>, %arg8: memref<32x24xbf16, #tpu.memory_space<vmem>>, %arg9: memref<1x24xf32, #tpu.memory_space<vmem>>, %arg10: memref<16x24xf32, #tpu.memory_space<vmem>>) attributes {dimension_semantics = [#tpu.dimension_semantics<parallel>], iteration_bounds = array<i64: 1>, scalar_prefetch = 0 : i64, scratch_operands = 0 : i64, tpu.core_type = #tpu.core_type<tc>, window_params = [{transform_indices = @transform_0, window_bounds = array<i64: 16, 32>}, {transform_indices = @transform_1, window_bounds = array<i64: 16, 32>}, {transform_indices = @transform_2, window_bounds = array<i64: 16, 32>}, {pipeline_mode = #tpu.pipeline_mode<synchronous>, transform_indices = @transform_3, window_bounds = array<i64: 32, 96>}, {pipeline_mode = #tpu.pipeline_mode<synchronous>, transform_indices = @transform_4, window_bounds = array<i64: 1, 96>}, {pipeline_mode = #tpu.pipeline_mode<synchronous>, transform_indices = @transform_5, window_bounds = array<i64: 32, 32>}, {pipeline_mode = #tpu.pipeline_mode<synchronous>, transform_indices = @transform_6, window_bounds = array<i64: 1, 32>}, {pipeline_mode = #tpu.pipeline_mode<synchronous>, transform_indices = @transform_7, window_bounds = array<i64: 32, 24>}, {pipeline_mode = #tpu.pipeline_mode<synchronous>, transform_indices = @transform_8, window_bounds = array<i64: 1, 24>}, {transform_indices = @transform_9, window_bounds = array<i64: 16, 24>}]} {
    %c0 = arith.constant 0 : index
    %c0_0 = arith.constant 0 : index
    %0 = vector.load %arg1[%c0, %c0_0] : memref<16x32xbf16, #tpu.memory_space<vmem>>, vector<16x32xbf16>
    %c0_1 = arith.constant 0 : index
    %c0_2 = arith.constant 0 : index
    %1 = vector.load %arg2[%c0_1, %c0_2] : memref<16x32xbf16, #tpu.memory_space<vmem>>, vector<16x32xbf16>
    %c0_3 = arith.constant 0 : index
    %c0_4 = arith.constant 0 : index
    %2 = vector.load %arg3[%c0_3, %c0_4] : memref<16x32xbf16, #tpu.memory_space<vmem>>, vector<16x32xbf16>
    %3 = tpu.concatenate %0, %1, %2 in 0 : vector<16x32xbf16>, vector<16x32xbf16>, vector<16x32xbf16> -> vector<48x32xbf16>
    %c0_5 = arith.constant 0 : index
    %c0_6 = arith.constant 0 : index
    %4 = vector.load %arg4[%c0_5, %c0_6] : memref<32x96xbf16, #tpu.memory_space<vmem>>, vector<32x96xbf16>
    %cst = arith.constant dense<0.000000e+00> : vector<48x96xf32>
    %5 = tpu.matmul %3, %4, %cst {dimension_numbers = #tpu.dot_dimension_numbers<[1], [0], [0], [1], [0, 0, 1, 1], [], []>} : vector<48x32xbf16>, vector<32x96xbf16>, vector<48x96xf32> -> vector<48x96xf32>
    %c0_7 = arith.constant 0 : index
    %c0_8 = arith.constant 0 : index
    %6 = vector.load %arg5[%c0_7, %c0_8] : memref<1x96xf32, #tpu.memory_space<vmem>>, vector<1x96xf32>
    %7 = vector.broadcast %6 : vector<1x96xf32> to vector<48x96xf32>
    %8 = arith.addf %5, %7 : vector<48x96xf32>
    %9 = vector.extract_strided_slice %8 {offsets = [0, 32], sizes = [16, 8], strides = [1, 1]} : vector<48x96xf32> to vector<16x8xf32>
    %10 = vector.extract_strided_slice %8 {offsets = [16, 32], sizes = [16, 8], strides = [1, 1]} : vector<48x96xf32> to vector<16x8xf32>
    %11 = vector.extract_strided_slice %8 {offsets = [32, 32], sizes = [16, 8], strides = [1, 1]} : vector<48x96xf32> to vector<16x8xf32>
    %12 = vector.extract_strided_slice %8 {offsets = [0, 64], sizes = [16, 8], strides = [1, 1]} : vector<48x96xf32> to vector<16x8xf32>
    %13 = vector.extract_strided_slice %8 {offsets = [16, 64], sizes = [16, 8], strides = [1, 1]} : vector<48x96xf32> to vector<16x8xf32>
    %14 = vector.extract_strided_slice %8 {offsets = [32, 64], sizes = [16, 8], strides = [1, 1]} : vector<48x96xf32> to vector<16x8xf32>
    %cst_9 = arith.constant 0.000000e+00 : f32
    %15 = vector.broadcast %cst_9 : f32 to vector<16x8xf32>
    %16 = vector.extract_strided_slice %8 {offsets = [0, 0], sizes = [16, 8], strides = [1, 1]} : vector<48x96xf32> to vector<16x8xf32>
    %17 = arith.mulf %16, %9 : vector<16x8xf32>
    %cst_10 = arith.constant dense<0.000000e+00> : vector<16xf32>
    %18 = vector.multi_reduction <add>, %17, %cst_10 [1] : vector<16x8xf32> to vector<16xf32>
    %19 = vector.shape_cast %18 : vector<16xf32> to vector<16x1xf32>
    %cst_11 = arith.constant 0.353553385 : f32
    %20 = vector.broadcast %cst_11 : f32 to vector<16x1xf32>
    %21 = arith.mulf %19, %20 : vector<16x1xf32>
    %22 = arith.mulf %16, %10 : vector<16x8xf32>
    %cst_12 = arith.constant dense<0.000000e+00> : vector<16xf32>
    %23 = vector.multi_reduction <add>, %22, %cst_12 [1] : vector<16x8xf32> to vector<16xf32>
    %24 = vector.shape_cast %23 : vector<16xf32> to vector<16x1xf32>
    %cst_13 = arith.constant 0.353553385 : f32
    %25 = vector.broadcast %cst_13 : f32 to vector<16x1xf32>
    %26 = arith.mulf %24, %25 : vector<16x1xf32>
    %27 = arith.mulf %16, %11 : vector<16x8xf32>
    %cst_14 = arith.constant dense<0.000000e+00> : vector<16xf32>
    %28 = vector.multi_reduction <add>, %27, %cst_14 [1] : vector<16x8xf32> to vector<16xf32>
    %29 = vector.shape_cast %28 : vector<16xf32> to vector<16x1xf32>
    %cst_15 = arith.constant 0.353553385 : f32
    %30 = vector.broadcast %cst_15 : f32 to vector<16x1xf32>
    %31 = arith.mulf %29, %30 : vector<16x1xf32>
    %32 = tpu.concatenate %21, %26, %31 in 1 : vector<16x1xf32>, vector<16x1xf32>, vector<16x1xf32> -> vector<16x3xf32>
    %cst_16 = arith.constant dense<0xFF800000> : vector<16xf32>
    %33 = vector.multi_reduction <maximumf>, %32, %cst_16 [1] : vector<16x3xf32> to vector<16xf32>
    %34 = vector.shape_cast %33 : vector<16xf32> to vector<16x1xf32>
    %35 = vector.broadcast %34 : vector<16x1xf32> to vector<16x3xf32>
    %36 = arith.subf %32, %35 : vector<16x3xf32>
    %37 = math.exp %36 : vector<16x3xf32>
    %cst_17 = arith.constant dense<0.000000e+00> : vector<16xf32>
    %38 = vector.multi_reduction <add>, %37, %cst_17 [1] : vector<16x3xf32> to vector<16xf32>
    %39 = vector.shape_cast %38 : vector<16xf32> to vector<16x1xf32>
    %40 = tpu.reciprocal %39 {approx = true} : vector<16x1xf32> -> vector<16x1xf32>
    %41 = vector.broadcast %40 : vector<16x1xf32> to vector<16x3xf32>
    %42 = arith.mulf %37, %41 : vector<16x3xf32>
    %cst_18 = arith.constant 0.000000e+00 : f32
    %43 = vector.broadcast %cst_18 : f32 to vector<16x8xf32>
    %44 = vector.extract_strided_slice %42 {offsets = [0, 0], sizes = [16, 1], strides = [1, 1]} : vector<16x3xf32> to vector<16x1xf32>
    %45 = vector.broadcast %44 : vector<16x1xf32> to vector<16x8xf32>
    %46 = arith.mulf %45, %12 : vector<16x8xf32>
    %47 = arith.addf %43, %46 : vector<16x8xf32>
    %48 = vector.extract_strided_slice %42 {offsets = [0, 1], sizes = [16, 1], strides = [1, 1]} : vector<16x3xf32> to vector<16x1xf32>
    %49 = vector.broadcast %48 : vector<16x1xf32> to vector<16x8xf32>
    %50 = arith.mulf %49, %13 : vector<16x8xf32>
    %51 = arith.addf %47, %50 : vector<16x8xf32>
    %52 = vector.extract_strided_slice %42 {offsets = [0, 2], sizes = [16, 1], strides = [1, 1]} : vector<16x3xf32> to vector<16x1xf32>
    %53 = vector.broadcast %52 : vector<16x1xf32> to vector<16x8xf32>
    %54 = arith.mulf %53, %14 : vector<16x8xf32>
    %55 = arith.addf %51, %54 : vector<16x8xf32>
    %56 = arith.addf %15, %55 : vector<16x8xf32>
    %57 = vector.extract_strided_slice %8 {offsets = [16, 0], sizes = [16, 8], strides = [1, 1]} : vector<48x96xf32> to vector<16x8xf32>
    %58 = arith.mulf %57, %9 : vector<16x8xf32>
    %cst_19 = arith.constant dense<0.000000e+00> : vector<16xf32>
    %59 = vector.multi_reduction <add>, %58, %cst_19 [1] : vector<16x8xf32> to vector<16xf32>
    %60 = vector.shape_cast %59 : vector<16xf32> to vector<16x1xf32>
    %cst_20 = arith.constant 0.353553385 : f32
    %61 = vector.broadcast %cst_20 : f32 to vector<16x1xf32>
    %62 = arith.mulf %60, %61 : vector<16x1xf32>
    %63 = arith.mulf %57, %10 : vector<16x8xf32>
    %cst_21 = arith.constant dense<0.000000e+00> : vector<16xf32>
    %64 = vector.multi_reduction <add>, %63, %cst_21 [1] : vector<16x8xf32> to vector<16xf32>
    %65 = vector.shape_cast %64 : vector<16xf32> to vector<16x1xf32>
    %cst_22 = arith.constant 0.353553385 : f32
    %66 = vector.broadcast %cst_22 : f32 to vector<16x1xf32>
    %67 = arith.mulf %65, %66 : vector<16x1xf32>
    %68 = arith.mulf %57, %11 : vector<16x8xf32>
    %cst_23 = arith.constant dense<0.000000e+00> : vector<16xf32>
    %69 = vector.multi_reduction <add>, %68, %cst_23 [1] : vector<16x8xf32> to vector<16xf32>
    %70 = vector.shape_cast %69 : vector<16xf32> to vector<16x1xf32>
    %cst_24 = arith.constant 0.353553385 : f32
    %71 = vector.broadcast %cst_24 : f32 to vector<16x1xf32>
    %72 = arith.mulf %70, %71 : vector<16x1xf32>
    %73 = tpu.concatenate %62, %67, %72 in 1 : vector<16x1xf32>, vector<16x1xf32>, vector<16x1xf32> -> vector<16x3xf32>
    %cst_25 = arith.constant dense<0xFF800000> : vector<16xf32>
    %74 = vector.multi_reduction <maximumf>, %73, %cst_25 [1] : vector<16x3xf32> to vector<16xf32>
    %75 = vector.shape_cast %74 : vector<16xf32> to vector<16x1xf32>
    %76 = vector.broadcast %75 : vector<16x1xf32> to vector<16x3xf32>
    %77 = arith.subf %73, %76 : vector<16x3xf32>
    %78 = math.exp %77 : vector<16x3xf32>
    %cst_26 = arith.constant dense<0.000000e+00> : vector<16xf32>
    %79 = vector.multi_reduction <add>, %78, %cst_26 [1] : vector<16x3xf32> to vector<16xf32>
    %80 = vector.shape_cast %79 : vector<16xf32> to vector<16x1xf32>
    %81 = tpu.reciprocal %80 {approx = true} : vector<16x1xf32> -> vector<16x1xf32>
    %82 = vector.broadcast %81 : vector<16x1xf32> to vector<16x3xf32>
    %83 = arith.mulf %78, %82 : vector<16x3xf32>
    %cst_27 = arith.constant 0.000000e+00 : f32
    %84 = vector.broadcast %cst_27 : f32 to vector<16x8xf32>
    %85 = vector.extract_strided_slice %83 {offsets = [0, 0], sizes = [16, 1], strides = [1, 1]} : vector<16x3xf32> to vector<16x1xf32>
    %86 = vector.broadcast %85 : vector<16x1xf32> to vector<16x8xf32>
    %87 = arith.mulf %86, %12 : vector<16x8xf32>
    %88 = arith.addf %84, %87 : vector<16x8xf32>
    %89 = vector.extract_strided_slice %83 {offsets = [0, 1], sizes = [16, 1], strides = [1, 1]} : vector<16x3xf32> to vector<16x1xf32>
    %90 = vector.broadcast %89 : vector<16x1xf32> to vector<16x8xf32>
    %91 = arith.mulf %90, %13 : vector<16x8xf32>
    %92 = arith.addf %88, %91 : vector<16x8xf32>
    %93 = vector.extract_strided_slice %83 {offsets = [0, 2], sizes = [16, 1], strides = [1, 1]} : vector<16x3xf32> to vector<16x1xf32>
    %94 = vector.broadcast %93 : vector<16x1xf32> to vector<16x8xf32>
    %95 = arith.mulf %94, %14 : vector<16x8xf32>
    %96 = arith.addf %92, %95 : vector<16x8xf32>
    %97 = arith.addf %56, %96 : vector<16x8xf32>
    %98 = vector.extract_strided_slice %8 {offsets = [32, 0], sizes = [16, 8], strides = [1, 1]} : vector<48x96xf32> to vector<16x8xf32>
    %99 = arith.mulf %98, %9 : vector<16x8xf32>
    %cst_28 = arith.constant dense<0.000000e+00> : vector<16xf32>
    %100 = vector.multi_reduction <add>, %99, %cst_28 [1] : vector<16x8xf32> to vector<16xf32>
    %101 = vector.shape_cast %100 : vector<16xf32> to vector<16x1xf32>
    %cst_29 = arith.constant 0.353553385 : f32
    %102 = vector.broadcast %cst_29 : f32 to vector<16x1xf32>
    %103 = arith.mulf %101, %102 : vector<16x1xf32>
    %104 = arith.mulf %98, %10 : vector<16x8xf32>
    %cst_30 = arith.constant dense<0.000000e+00> : vector<16xf32>
    %105 = vector.multi_reduction <add>, %104, %cst_30 [1] : vector<16x8xf32> to vector<16xf32>
    %106 = vector.shape_cast %105 : vector<16xf32> to vector<16x1xf32>
    %cst_31 = arith.constant 0.353553385 : f32
    %107 = vector.broadcast %cst_31 : f32 to vector<16x1xf32>
    %108 = arith.mulf %106, %107 : vector<16x1xf32>
    %109 = arith.mulf %98, %11 : vector<16x8xf32>
    %cst_32 = arith.constant dense<0.000000e+00> : vector<16xf32>
    %110 = vector.multi_reduction <add>, %109, %cst_32 [1] : vector<16x8xf32> to vector<16xf32>
    %111 = vector.shape_cast %110 : vector<16xf32> to vector<16x1xf32>
    %cst_33 = arith.constant 0.353553385 : f32
    %112 = vector.broadcast %cst_33 : f32 to vector<16x1xf32>
    %113 = arith.mulf %111, %112 : vector<16x1xf32>
    %114 = tpu.concatenate %103, %108, %113 in 1 : vector<16x1xf32>, vector<16x1xf32>, vector<16x1xf32> -> vector<16x3xf32>
    %cst_34 = arith.constant dense<0xFF800000> : vector<16xf32>
    %115 = vector.multi_reduction <maximumf>, %114, %cst_34 [1] : vector<16x3xf32> to vector<16xf32>
    %116 = vector.shape_cast %115 : vector<16xf32> to vector<16x1xf32>
    %117 = vector.broadcast %116 : vector<16x1xf32> to vector<16x3xf32>
    %118 = arith.subf %114, %117 : vector<16x3xf32>
    %119 = math.exp %118 : vector<16x3xf32>
    %cst_35 = arith.constant dense<0.000000e+00> : vector<16xf32>
    %120 = vector.multi_reduction <add>, %119, %cst_35 [1] : vector<16x3xf32> to vector<16xf32>
    %121 = vector.shape_cast %120 : vector<16xf32> to vector<16x1xf32>
    %122 = tpu.reciprocal %121 {approx = true} : vector<16x1xf32> -> vector<16x1xf32>
    %123 = vector.broadcast %122 : vector<16x1xf32> to vector<16x3xf32>
    %124 = arith.mulf %119, %123 : vector<16x3xf32>
    %cst_36 = arith.constant 0.000000e+00 : f32
    %125 = vector.broadcast %cst_36 : f32 to vector<16x8xf32>
    %126 = vector.extract_strided_slice %124 {offsets = [0, 0], sizes = [16, 1], strides = [1, 1]} : vector<16x3xf32> to vector<16x1xf32>
    %127 = vector.broadcast %126 : vector<16x1xf32> to vector<16x8xf32>
    %128 = arith.mulf %127, %12 : vector<16x8xf32>
    %129 = arith.addf %125, %128 : vector<16x8xf32>
    %130 = vector.extract_strided_slice %124 {offsets = [0, 1], sizes = [16, 1], strides = [1, 1]} : vector<16x3xf32> to vector<16x1xf32>
    %131 = vector.broadcast %130 : vector<16x1xf32> to vector<16x8xf32>
    %132 = arith.mulf %131, %13 : vector<16x8xf32>
    %133 = arith.addf %129, %132 : vector<16x8xf32>
    %134 = vector.extract_strided_slice %124 {offsets = [0, 2], sizes = [16, 1], strides = [1, 1]} : vector<16x3xf32> to vector<16x1xf32>
    %135 = vector.broadcast %134 : vector<16x1xf32> to vector<16x8xf32>
    %136 = arith.mulf %135, %14 : vector<16x8xf32>
    %137 = arith.addf %133, %136 : vector<16x8xf32>
    %138 = arith.addf %97, %137 : vector<16x8xf32>
    %139 = vector.extract_strided_slice %8 {offsets = [0, 40], sizes = [16, 8], strides = [1, 1]} : vector<48x96xf32> to vector<16x8xf32>
    %140 = vector.extract_strided_slice %8 {offsets = [16, 40], sizes = [16, 8], strides = [1, 1]} : vector<48x96xf32> to vector<16x8xf32>
    %141 = vector.extract_strided_slice %8 {offsets = [32, 40], sizes = [16, 8], strides = [1, 1]} : vector<48x96xf32> to vector<16x8xf32>
    %142 = vector.extract_strided_slice %8 {offsets = [0, 72], sizes = [16, 8], strides = [1, 1]} : vector<48x96xf32> to vector<16x8xf32>
    %143 = vector.extract_strided_slice %8 {offsets = [16, 72], sizes = [16, 8], strides = [1, 1]} : vector<48x96xf32> to vector<16x8xf32>
    %144 = vector.extract_strided_slice %8 {offsets = [32, 72], sizes = [16, 8], strides = [1, 1]} : vector<48x96xf32> to vector<16x8xf32>
    %cst_37 = arith.constant 0.000000e+00 : f32
    %145 = vector.broadcast %cst_37 : f32 to vector<16x8xf32>
    %146 = vector.extract_strided_slice %8 {offsets = [0, 8], sizes = [16, 8], strides = [1, 1]} : vector<48x96xf32> to vector<16x8xf32>
    %147 = arith.mulf %146, %139 : vector<16x8xf32>
    %cst_38 = arith.constant dense<0.000000e+00> : vector<16xf32>
    %148 = vector.multi_reduction <add>, %147, %cst_38 [1] : vector<16x8xf32> to vector<16xf32>
    %149 = vector.shape_cast %148 : vector<16xf32> to vector<16x1xf32>
    %cst_39 = arith.constant 0.353553385 : f32
    %150 = vector.broadcast %cst_39 : f32 to vector<16x1xf32>
    %151 = arith.mulf %149, %150 : vector<16x1xf32>
    %152 = arith.mulf %146, %140 : vector<16x8xf32>
    %cst_40 = arith.constant dense<0.000000e+00> : vector<16xf32>
    %153 = vector.multi_reduction <add>, %152, %cst_40 [1] : vector<16x8xf32> to vector<16xf32>
    %154 = vector.shape_cast %153 : vector<16xf32> to vector<16x1xf32>
    %cst_41 = arith.constant 0.353553385 : f32
    %155 = vector.broadcast %cst_41 : f32 to vector<16x1xf32>
    %156 = arith.mulf %154, %155 : vector<16x1xf32>
    %157 = arith.mulf %146, %141 : vector<16x8xf32>
    %cst_42 = arith.constant dense<0.000000e+00> : vector<16xf32>
    %158 = vector.multi_reduction <add>, %157, %cst_42 [1] : vector<16x8xf32> to vector<16xf32>
    %159 = vector.shape_cast %158 : vector<16xf32> to vector<16x1xf32>
    %cst_43 = arith.constant 0.353553385 : f32
    %160 = vector.broadcast %cst_43 : f32 to vector<16x1xf32>
    %161 = arith.mulf %159, %160 : vector<16x1xf32>
    %162 = tpu.concatenate %151, %156, %161 in 1 : vector<16x1xf32>, vector<16x1xf32>, vector<16x1xf32> -> vector<16x3xf32>
    %cst_44 = arith.constant dense<0xFF800000> : vector<16xf32>
    %163 = vector.multi_reduction <maximumf>, %162, %cst_44 [1] : vector<16x3xf32> to vector<16xf32>
    %164 = vector.shape_cast %163 : vector<16xf32> to vector<16x1xf32>
    %165 = vector.broadcast %164 : vector<16x1xf32> to vector<16x3xf32>
    %166 = arith.subf %162, %165 : vector<16x3xf32>
    %167 = math.exp %166 : vector<16x3xf32>
    %cst_45 = arith.constant dense<0.000000e+00> : vector<16xf32>
    %168 = vector.multi_reduction <add>, %167, %cst_45 [1] : vector<16x3xf32> to vector<16xf32>
    %169 = vector.shape_cast %168 : vector<16xf32> to vector<16x1xf32>
    %170 = tpu.reciprocal %169 {approx = true} : vector<16x1xf32> -> vector<16x1xf32>
    %171 = vector.broadcast %170 : vector<16x1xf32> to vector<16x3xf32>
    %172 = arith.mulf %167, %171 : vector<16x3xf32>
    %cst_46 = arith.constant 0.000000e+00 : f32
    %173 = vector.broadcast %cst_46 : f32 to vector<16x8xf32>
    %174 = vector.extract_strided_slice %172 {offsets = [0, 0], sizes = [16, 1], strides = [1, 1]} : vector<16x3xf32> to vector<16x1xf32>
    %175 = vector.broadcast %174 : vector<16x1xf32> to vector<16x8xf32>
    %176 = arith.mulf %175, %142 : vector<16x8xf32>
    %177 = arith.addf %173, %176 : vector<16x8xf32>
    %178 = vector.extract_strided_slice %172 {offsets = [0, 1], sizes = [16, 1], strides = [1, 1]} : vector<16x3xf32> to vector<16x1xf32>
    %179 = vector.broadcast %178 : vector<16x1xf32> to vector<16x8xf32>
    %180 = arith.mulf %179, %143 : vector<16x8xf32>
    %181 = arith.addf %177, %180 : vector<16x8xf32>
    %182 = vector.extract_strided_slice %172 {offsets = [0, 2], sizes = [16, 1], strides = [1, 1]} : vector<16x3xf32> to vector<16x1xf32>
    %183 = vector.broadcast %182 : vector<16x1xf32> to vector<16x8xf32>
    %184 = arith.mulf %183, %144 : vector<16x8xf32>
    %185 = arith.addf %181, %184 : vector<16x8xf32>
    %186 = arith.addf %145, %185 : vector<16x8xf32>
    %187 = vector.extract_strided_slice %8 {offsets = [16, 8], sizes = [16, 8], strides = [1, 1]} : vector<48x96xf32> to vector<16x8xf32>
    %188 = arith.mulf %187, %139 : vector<16x8xf32>
    %cst_47 = arith.constant dense<0.000000e+00> : vector<16xf32>
    %189 = vector.multi_reduction <add>, %188, %cst_47 [1] : vector<16x8xf32> to vector<16xf32>
    %190 = vector.shape_cast %189 : vector<16xf32> to vector<16x1xf32>
    %cst_48 = arith.constant 0.353553385 : f32
    %191 = vector.broadcast %cst_48 : f32 to vector<16x1xf32>
    %192 = arith.mulf %190, %191 : vector<16x1xf32>
    %193 = arith.mulf %187, %140 : vector<16x8xf32>
    %cst_49 = arith.constant dense<0.000000e+00> : vector<16xf32>
    %194 = vector.multi_reduction <add>, %193, %cst_49 [1] : vector<16x8xf32> to vector<16xf32>
    %195 = vector.shape_cast %194 : vector<16xf32> to vector<16x1xf32>
    %cst_50 = arith.constant 0.353553385 : f32
    %196 = vector.broadcast %cst_50 : f32 to vector<16x1xf32>
    %197 = arith.mulf %195, %196 : vector<16x1xf32>
    %198 = arith.mulf %187, %141 : vector<16x8xf32>
    %cst_51 = arith.constant dense<0.000000e+00> : vector<16xf32>
    %199 = vector.multi_reduction <add>, %198, %cst_51 [1] : vector<16x8xf32> to vector<16xf32>
    %200 = vector.shape_cast %199 : vector<16xf32> to vector<16x1xf32>
    %cst_52 = arith.constant 0.353553385 : f32
    %201 = vector.broadcast %cst_52 : f32 to vector<16x1xf32>
    %202 = arith.mulf %200, %201 : vector<16x1xf32>
    %203 = tpu.concatenate %192, %197, %202 in 1 : vector<16x1xf32>, vector<16x1xf32>, vector<16x1xf32> -> vector<16x3xf32>
    %cst_53 = arith.constant dense<0xFF800000> : vector<16xf32>
    %204 = vector.multi_reduction <maximumf>, %203, %cst_53 [1] : vector<16x3xf32> to vector<16xf32>
    %205 = vector.shape_cast %204 : vector<16xf32> to vector<16x1xf32>
    %206 = vector.broadcast %205 : vector<16x1xf32> to vector<16x3xf32>
    %207 = arith.subf %203, %206 : vector<16x3xf32>
    %208 = math.exp %207 : vector<16x3xf32>
    %cst_54 = arith.constant dense<0.000000e+00> : vector<16xf32>
    %209 = vector.multi_reduction <add>, %208, %cst_54 [1] : vector<16x3xf32> to vector<16xf32>
    %210 = vector.shape_cast %209 : vector<16xf32> to vector<16x1xf32>
    %211 = tpu.reciprocal %210 {approx = true} : vector<16x1xf32> -> vector<16x1xf32>
    %212 = vector.broadcast %211 : vector<16x1xf32> to vector<16x3xf32>
    %213 = arith.mulf %208, %212 : vector<16x3xf32>
    %cst_55 = arith.constant 0.000000e+00 : f32
    %214 = vector.broadcast %cst_55 : f32 to vector<16x8xf32>
    %215 = vector.extract_strided_slice %213 {offsets = [0, 0], sizes = [16, 1], strides = [1, 1]} : vector<16x3xf32> to vector<16x1xf32>
    %216 = vector.broadcast %215 : vector<16x1xf32> to vector<16x8xf32>
    %217 = arith.mulf %216, %142 : vector<16x8xf32>
    %218 = arith.addf %214, %217 : vector<16x8xf32>
    %219 = vector.extract_strided_slice %213 {offsets = [0, 1], sizes = [16, 1], strides = [1, 1]} : vector<16x3xf32> to vector<16x1xf32>
    %220 = vector.broadcast %219 : vector<16x1xf32> to vector<16x8xf32>
    %221 = arith.mulf %220, %143 : vector<16x8xf32>
    %222 = arith.addf %218, %221 : vector<16x8xf32>
    %223 = vector.extract_strided_slice %213 {offsets = [0, 2], sizes = [16, 1], strides = [1, 1]} : vector<16x3xf32> to vector<16x1xf32>
    %224 = vector.broadcast %223 : vector<16x1xf32> to vector<16x8xf32>
    %225 = arith.mulf %224, %144 : vector<16x8xf32>
    %226 = arith.addf %222, %225 : vector<16x8xf32>
    %227 = arith.addf %186, %226 : vector<16x8xf32>
    %228 = vector.extract_strided_slice %8 {offsets = [32, 8], sizes = [16, 8], strides = [1, 1]} : vector<48x96xf32> to vector<16x8xf32>
    %229 = arith.mulf %228, %139 : vector<16x8xf32>
    %cst_56 = arith.constant dense<0.000000e+00> : vector<16xf32>
    %230 = vector.multi_reduction <add>, %229, %cst_56 [1] : vector<16x8xf32> to vector<16xf32>
    %231 = vector.shape_cast %230 : vector<16xf32> to vector<16x1xf32>
    %cst_57 = arith.constant 0.353553385 : f32
    %232 = vector.broadcast %cst_57 : f32 to vector<16x1xf32>
    %233 = arith.mulf %231, %232 : vector<16x1xf32>
    %234 = arith.mulf %228, %140 : vector<16x8xf32>
    %cst_58 = arith.constant dense<0.000000e+00> : vector<16xf32>
    %235 = vector.multi_reduction <add>, %234, %cst_58 [1] : vector<16x8xf32> to vector<16xf32>
    %236 = vector.shape_cast %235 : vector<16xf32> to vector<16x1xf32>
    %cst_59 = arith.constant 0.353553385 : f32
    %237 = vector.broadcast %cst_59 : f32 to vector<16x1xf32>
    %238 = arith.mulf %236, %237 : vector<16x1xf32>
    %239 = arith.mulf %228, %141 : vector<16x8xf32>
    %cst_60 = arith.constant dense<0.000000e+00> : vector<16xf32>
    %240 = vector.multi_reduction <add>, %239, %cst_60 [1] : vector<16x8xf32> to vector<16xf32>
    %241 = vector.shape_cast %240 : vector<16xf32> to vector<16x1xf32>
    %cst_61 = arith.constant 0.353553385 : f32
    %242 = vector.broadcast %cst_61 : f32 to vector<16x1xf32>
    %243 = arith.mulf %241, %242 : vector<16x1xf32>
    %244 = tpu.concatenate %233, %238, %243 in 1 : vector<16x1xf32>, vector<16x1xf32>, vector<16x1xf32> -> vector<16x3xf32>
    %cst_62 = arith.constant dense<0xFF800000> : vector<16xf32>
    %245 = vector.multi_reduction <maximumf>, %244, %cst_62 [1] : vector<16x3xf32> to vector<16xf32>
    %246 = vector.shape_cast %245 : vector<16xf32> to vector<16x1xf32>
    %247 = vector.broadcast %246 : vector<16x1xf32> to vector<16x3xf32>
    %248 = arith.subf %244, %247 : vector<16x3xf32>
    %249 = math.exp %248 : vector<16x3xf32>
    %cst_63 = arith.constant dense<0.000000e+00> : vector<16xf32>
    %250 = vector.multi_reduction <add>, %249, %cst_63 [1] : vector<16x3xf32> to vector<16xf32>
    %251 = vector.shape_cast %250 : vector<16xf32> to vector<16x1xf32>
    %252 = tpu.reciprocal %251 {approx = true} : vector<16x1xf32> -> vector<16x1xf32>
    %253 = vector.broadcast %252 : vector<16x1xf32> to vector<16x3xf32>
    %254 = arith.mulf %249, %253 : vector<16x3xf32>
    %cst_64 = arith.constant 0.000000e+00 : f32
    %255 = vector.broadcast %cst_64 : f32 to vector<16x8xf32>
    %256 = vector.extract_strided_slice %254 {offsets = [0, 0], sizes = [16, 1], strides = [1, 1]} : vector<16x3xf32> to vector<16x1xf32>
    %257 = vector.broadcast %256 : vector<16x1xf32> to vector<16x8xf32>
    %258 = arith.mulf %257, %142 : vector<16x8xf32>
    %259 = arith.addf %255, %258 : vector<16x8xf32>
    %260 = vector.extract_strided_slice %254 {offsets = [0, 1], sizes = [16, 1], strides = [1, 1]} : vector<16x3xf32> to vector<16x1xf32>
    %261 = vector.broadcast %260 : vector<16x1xf32> to vector<16x8xf32>
    %262 = arith.mulf %261, %143 : vector<16x8xf32>
    %263 = arith.addf %259, %262 : vector<16x8xf32>
    %264 = vector.extract_strided_slice %254 {offsets = [0, 2], sizes = [16, 1], strides = [1, 1]} : vector<16x3xf32> to vector<16x1xf32>
    %265 = vector.broadcast %264 : vector<16x1xf32> to vector<16x8xf32>
    %266 = arith.mulf %265, %144 : vector<16x8xf32>
    %267 = arith.addf %263, %266 : vector<16x8xf32>
    %268 = arith.addf %227, %267 : vector<16x8xf32>
    %269 = vector.extract_strided_slice %8 {offsets = [0, 48], sizes = [16, 8], strides = [1, 1]} : vector<48x96xf32> to vector<16x8xf32>
    %270 = vector.extract_strided_slice %8 {offsets = [16, 48], sizes = [16, 8], strides = [1, 1]} : vector<48x96xf32> to vector<16x8xf32>
    %271 = vector.extract_strided_slice %8 {offsets = [32, 48], sizes = [16, 8], strides = [1, 1]} : vector<48x96xf32> to vector<16x8xf32>
    %272 = vector.extract_strided_slice %8 {offsets = [0, 80], sizes = [16, 8], strides = [1, 1]} : vector<48x96xf32> to vector<16x8xf32>
    %273 = vector.extract_strided_slice %8 {offsets = [16, 80], sizes = [16, 8], strides = [1, 1]} : vector<48x96xf32> to vector<16x8xf32>
    %274 = vector.extract_strided_slice %8 {offsets = [32, 80], sizes = [16, 8], strides = [1, 1]} : vector<48x96xf32> to vector<16x8xf32>
    %cst_65 = arith.constant 0.000000e+00 : f32
    %275 = vector.broadcast %cst_65 : f32 to vector<16x8xf32>
    %276 = vector.extract_strided_slice %8 {offsets = [0, 16], sizes = [16, 8], strides = [1, 1]} : vector<48x96xf32> to vector<16x8xf32>
    %277 = arith.mulf %276, %269 : vector<16x8xf32>
    %cst_66 = arith.constant dense<0.000000e+00> : vector<16xf32>
    %278 = vector.multi_reduction <add>, %277, %cst_66 [1] : vector<16x8xf32> to vector<16xf32>
    %279 = vector.shape_cast %278 : vector<16xf32> to vector<16x1xf32>
    %cst_67 = arith.constant 0.353553385 : f32
    %280 = vector.broadcast %cst_67 : f32 to vector<16x1xf32>
    %281 = arith.mulf %279, %280 : vector<16x1xf32>
    %282 = arith.mulf %276, %270 : vector<16x8xf32>
    %cst_68 = arith.constant dense<0.000000e+00> : vector<16xf32>
    %283 = vector.multi_reduction <add>, %282, %cst_68 [1] : vector<16x8xf32> to vector<16xf32>
    %284 = vector.shape_cast %283 : vector<16xf32> to vector<16x1xf32>
    %cst_69 = arith.constant 0.353553385 : f32
    %285 = vector.broadcast %cst_69 : f32 to vector<16x1xf32>
    %286 = arith.mulf %284, %285 : vector<16x1xf32>
    %287 = arith.mulf %276, %271 : vector<16x8xf32>
    %cst_70 = arith.constant dense<0.000000e+00> : vector<16xf32>
    %288 = vector.multi_reduction <add>, %287, %cst_70 [1] : vector<16x8xf32> to vector<16xf32>
    %289 = vector.shape_cast %288 : vector<16xf32> to vector<16x1xf32>
    %cst_71 = arith.constant 0.353553385 : f32
    %290 = vector.broadcast %cst_71 : f32 to vector<16x1xf32>
    %291 = arith.mulf %289, %290 : vector<16x1xf32>
    %292 = tpu.concatenate %281, %286, %291 in 1 : vector<16x1xf32>, vector<16x1xf32>, vector<16x1xf32> -> vector<16x3xf32>
    %cst_72 = arith.constant dense<0xFF800000> : vector<16xf32>
    %293 = vector.multi_reduction <maximumf>, %292, %cst_72 [1] : vector<16x3xf32> to vector<16xf32>
    %294 = vector.shape_cast %293 : vector<16xf32> to vector<16x1xf32>
    %295 = vector.broadcast %294 : vector<16x1xf32> to vector<16x3xf32>
    %296 = arith.subf %292, %295 : vector<16x3xf32>
    %297 = math.exp %296 : vector<16x3xf32>
    %cst_73 = arith.constant dense<0.000000e+00> : vector<16xf32>
    %298 = vector.multi_reduction <add>, %297, %cst_73 [1] : vector<16x3xf32> to vector<16xf32>
    %299 = vector.shape_cast %298 : vector<16xf32> to vector<16x1xf32>
    %300 = tpu.reciprocal %299 {approx = true} : vector<16x1xf32> -> vector<16x1xf32>
    %301 = vector.broadcast %300 : vector<16x1xf32> to vector<16x3xf32>
    %302 = arith.mulf %297, %301 : vector<16x3xf32>
    %cst_74 = arith.constant 0.000000e+00 : f32
    %303 = vector.broadcast %cst_74 : f32 to vector<16x8xf32>
    %304 = vector.extract_strided_slice %302 {offsets = [0, 0], sizes = [16, 1], strides = [1, 1]} : vector<16x3xf32> to vector<16x1xf32>
    %305 = vector.broadcast %304 : vector<16x1xf32> to vector<16x8xf32>
    %306 = arith.mulf %305, %272 : vector<16x8xf32>
    %307 = arith.addf %303, %306 : vector<16x8xf32>
    %308 = vector.extract_strided_slice %302 {offsets = [0, 1], sizes = [16, 1], strides = [1, 1]} : vector<16x3xf32> to vector<16x1xf32>
    %309 = vector.broadcast %308 : vector<16x1xf32> to vector<16x8xf32>
    %310 = arith.mulf %309, %273 : vector<16x8xf32>
    %311 = arith.addf %307, %310 : vector<16x8xf32>
    %312 = vector.extract_strided_slice %302 {offsets = [0, 2], sizes = [16, 1], strides = [1, 1]} : vector<16x3xf32> to vector<16x1xf32>
    %313 = vector.broadcast %312 : vector<16x1xf32> to vector<16x8xf32>
    %314 = arith.mulf %313, %274 : vector<16x8xf32>
    %315 = arith.addf %311, %314 : vector<16x8xf32>
    %316 = arith.addf %275, %315 : vector<16x8xf32>
    %317 = vector.extract_strided_slice %8 {offsets = [16, 16], sizes = [16, 8], strides = [1, 1]} : vector<48x96xf32> to vector<16x8xf32>
    %318 = arith.mulf %317, %269 : vector<16x8xf32>
    %cst_75 = arith.constant dense<0.000000e+00> : vector<16xf32>
    %319 = vector.multi_reduction <add>, %318, %cst_75 [1] : vector<16x8xf32> to vector<16xf32>
    %320 = vector.shape_cast %319 : vector<16xf32> to vector<16x1xf32>
    %cst_76 = arith.constant 0.353553385 : f32
    %321 = vector.broadcast %cst_76 : f32 to vector<16x1xf32>
    %322 = arith.mulf %320, %321 : vector<16x1xf32>
    %323 = arith.mulf %317, %270 : vector<16x8xf32>
    %cst_77 = arith.constant dense<0.000000e+00> : vector<16xf32>
    %324 = vector.multi_reduction <add>, %323, %cst_77 [1] : vector<16x8xf32> to vector<16xf32>
    %325 = vector.shape_cast %324 : vector<16xf32> to vector<16x1xf32>
    %cst_78 = arith.constant 0.353553385 : f32
    %326 = vector.broadcast %cst_78 : f32 to vector<16x1xf32>
    %327 = arith.mulf %325, %326 : vector<16x1xf32>
    %328 = arith.mulf %317, %271 : vector<16x8xf32>
    %cst_79 = arith.constant dense<0.000000e+00> : vector<16xf32>
    %329 = vector.multi_reduction <add>, %328, %cst_79 [1] : vector<16x8xf32> to vector<16xf32>
    %330 = vector.shape_cast %329 : vector<16xf32> to vector<16x1xf32>
    %cst_80 = arith.constant 0.353553385 : f32
    %331 = vector.broadcast %cst_80 : f32 to vector<16x1xf32>
    %332 = arith.mulf %330, %331 : vector<16x1xf32>
    %333 = tpu.concatenate %322, %327, %332 in 1 : vector<16x1xf32>, vector<16x1xf32>, vector<16x1xf32> -> vector<16x3xf32>
    %cst_81 = arith.constant dense<0xFF800000> : vector<16xf32>
    %334 = vector.multi_reduction <maximumf>, %333, %cst_81 [1] : vector<16x3xf32> to vector<16xf32>
    %335 = vector.shape_cast %334 : vector<16xf32> to vector<16x1xf32>
    %336 = vector.broadcast %335 : vector<16x1xf32> to vector<16x3xf32>
    %337 = arith.subf %333, %336 : vector<16x3xf32>
    %338 = math.exp %337 : vector<16x3xf32>
    %cst_82 = arith.constant dense<0.000000e+00> : vector<16xf32>
    %339 = vector.multi_reduction <add>, %338, %cst_82 [1] : vector<16x3xf32> to vector<16xf32>
    %340 = vector.shape_cast %339 : vector<16xf32> to vector<16x1xf32>
    %341 = tpu.reciprocal %340 {approx = true} : vector<16x1xf32> -> vector<16x1xf32>
    %342 = vector.broadcast %341 : vector<16x1xf32> to vector<16x3xf32>
    %343 = arith.mulf %338, %342 : vector<16x3xf32>
    %cst_83 = arith.constant 0.000000e+00 : f32
    %344 = vector.broadcast %cst_83 : f32 to vector<16x8xf32>
    %345 = vector.extract_strided_slice %343 {offsets = [0, 0], sizes = [16, 1], strides = [1, 1]} : vector<16x3xf32> to vector<16x1xf32>
    %346 = vector.broadcast %345 : vector<16x1xf32> to vector<16x8xf32>
    %347 = arith.mulf %346, %272 : vector<16x8xf32>
    %348 = arith.addf %344, %347 : vector<16x8xf32>
    %349 = vector.extract_strided_slice %343 {offsets = [0, 1], sizes = [16, 1], strides = [1, 1]} : vector<16x3xf32> to vector<16x1xf32>
    %350 = vector.broadcast %349 : vector<16x1xf32> to vector<16x8xf32>
    %351 = arith.mulf %350, %273 : vector<16x8xf32>
    %352 = arith.addf %348, %351 : vector<16x8xf32>
    %353 = vector.extract_strided_slice %343 {offsets = [0, 2], sizes = [16, 1], strides = [1, 1]} : vector<16x3xf32> to vector<16x1xf32>
    %354 = vector.broadcast %353 : vector<16x1xf32> to vector<16x8xf32>
    %355 = arith.mulf %354, %274 : vector<16x8xf32>
    %356 = arith.addf %352, %355 : vector<16x8xf32>
    %357 = arith.addf %316, %356 : vector<16x8xf32>
    %358 = vector.extract_strided_slice %8 {offsets = [32, 16], sizes = [16, 8], strides = [1, 1]} : vector<48x96xf32> to vector<16x8xf32>
    %359 = arith.mulf %358, %269 : vector<16x8xf32>
    %cst_84 = arith.constant dense<0.000000e+00> : vector<16xf32>
    %360 = vector.multi_reduction <add>, %359, %cst_84 [1] : vector<16x8xf32> to vector<16xf32>
    %361 = vector.shape_cast %360 : vector<16xf32> to vector<16x1xf32>
    %cst_85 = arith.constant 0.353553385 : f32
    %362 = vector.broadcast %cst_85 : f32 to vector<16x1xf32>
    %363 = arith.mulf %361, %362 : vector<16x1xf32>
    %364 = arith.mulf %358, %270 : vector<16x8xf32>
    %cst_86 = arith.constant dense<0.000000e+00> : vector<16xf32>
    %365 = vector.multi_reduction <add>, %364, %cst_86 [1] : vector<16x8xf32> to vector<16xf32>
    %366 = vector.shape_cast %365 : vector<16xf32> to vector<16x1xf32>
    %cst_87 = arith.constant 0.353553385 : f32
    %367 = vector.broadcast %cst_87 : f32 to vector<16x1xf32>
    %368 = arith.mulf %366, %367 : vector<16x1xf32>
    %369 = arith.mulf %358, %271 : vector<16x8xf32>
    %cst_88 = arith.constant dense<0.000000e+00> : vector<16xf32>
    %370 = vector.multi_reduction <add>, %369, %cst_88 [1] : vector<16x8xf32> to vector<16xf32>
    %371 = vector.shape_cast %370 : vector<16xf32> to vector<16x1xf32>
    %cst_89 = arith.constant 0.353553385 : f32
    %372 = vector.broadcast %cst_89 : f32 to vector<16x1xf32>
    %373 = arith.mulf %371, %372 : vector<16x1xf32>
    %374 = tpu.concatenate %363, %368, %373 in 1 : vector<16x1xf32>, vector<16x1xf32>, vector<16x1xf32> -> vector<16x3xf32>
    %cst_90 = arith.constant dense<0xFF800000> : vector<16xf32>
    %375 = vector.multi_reduction <maximumf>, %374, %cst_90 [1] : vector<16x3xf32> to vector<16xf32>
    %376 = vector.shape_cast %375 : vector<16xf32> to vector<16x1xf32>
    %377 = vector.broadcast %376 : vector<16x1xf32> to vector<16x3xf32>
    %378 = arith.subf %374, %377 : vector<16x3xf32>
    %379 = math.exp %378 : vector<16x3xf32>
    %cst_91 = arith.constant dense<0.000000e+00> : vector<16xf32>
    %380 = vector.multi_reduction <add>, %379, %cst_91 [1] : vector<16x3xf32> to vector<16xf32>
    %381 = vector.shape_cast %380 : vector<16xf32> to vector<16x1xf32>
    %382 = tpu.reciprocal %381 {approx = true} : vector<16x1xf32> -> vector<16x1xf32>
    %383 = vector.broadcast %382 : vector<16x1xf32> to vector<16x3xf32>
    %384 = arith.mulf %379, %383 : vector<16x3xf32>
    %cst_92 = arith.constant 0.000000e+00 : f32
    %385 = vector.broadcast %cst_92 : f32 to vector<16x8xf32>
    %386 = vector.extract_strided_slice %384 {offsets = [0, 0], sizes = [16, 1], strides = [1, 1]} : vector<16x3xf32> to vector<16x1xf32>
    %387 = vector.broadcast %386 : vector<16x1xf32> to vector<16x8xf32>
    %388 = arith.mulf %387, %272 : vector<16x8xf32>
    %389 = arith.addf %385, %388 : vector<16x8xf32>
    %390 = vector.extract_strided_slice %384 {offsets = [0, 1], sizes = [16, 1], strides = [1, 1]} : vector<16x3xf32> to vector<16x1xf32>
    %391 = vector.broadcast %390 : vector<16x1xf32> to vector<16x8xf32>
    %392 = arith.mulf %391, %273 : vector<16x8xf32>
    %393 = arith.addf %389, %392 : vector<16x8xf32>
    %394 = vector.extract_strided_slice %384 {offsets = [0, 2], sizes = [16, 1], strides = [1, 1]} : vector<16x3xf32> to vector<16x1xf32>
    %395 = vector.broadcast %394 : vector<16x1xf32> to vector<16x8xf32>
    %396 = arith.mulf %395, %274 : vector<16x8xf32>
    %397 = arith.addf %393, %396 : vector<16x8xf32>
    %398 = arith.addf %357, %397 : vector<16x8xf32>
    %399 = vector.extract_strided_slice %8 {offsets = [0, 56], sizes = [16, 8], strides = [1, 1]} : vector<48x96xf32> to vector<16x8xf32>
    %400 = vector.extract_strided_slice %8 {offsets = [16, 56], sizes = [16, 8], strides = [1, 1]} : vector<48x96xf32> to vector<16x8xf32>
    %401 = vector.extract_strided_slice %8 {offsets = [32, 56], sizes = [16, 8], strides = [1, 1]} : vector<48x96xf32> to vector<16x8xf32>
    %402 = vector.extract_strided_slice %8 {offsets = [0, 88], sizes = [16, 8], strides = [1, 1]} : vector<48x96xf32> to vector<16x8xf32>
    %403 = vector.extract_strided_slice %8 {offsets = [16, 88], sizes = [16, 8], strides = [1, 1]} : vector<48x96xf32> to vector<16x8xf32>
    %404 = vector.extract_strided_slice %8 {offsets = [32, 88], sizes = [16, 8], strides = [1, 1]} : vector<48x96xf32> to vector<16x8xf32>
    %cst_93 = arith.constant 0.000000e+00 : f32
    %405 = vector.broadcast %cst_93 : f32 to vector<16x8xf32>
    %406 = vector.extract_strided_slice %8 {offsets = [0, 24], sizes = [16, 8], strides = [1, 1]} : vector<48x96xf32> to vector<16x8xf32>
    %407 = arith.mulf %406, %399 : vector<16x8xf32>
    %cst_94 = arith.constant dense<0.000000e+00> : vector<16xf32>
    %408 = vector.multi_reduction <add>, %407, %cst_94 [1] : vector<16x8xf32> to vector<16xf32>
    %409 = vector.shape_cast %408 : vector<16xf32> to vector<16x1xf32>
    %cst_95 = arith.constant 0.353553385 : f32
    %410 = vector.broadcast %cst_95 : f32 to vector<16x1xf32>
    %411 = arith.mulf %409, %410 : vector<16x1xf32>
    %412 = arith.mulf %406, %400 : vector<16x8xf32>
    %cst_96 = arith.constant dense<0.000000e+00> : vector<16xf32>
    %413 = vector.multi_reduction <add>, %412, %cst_96 [1] : vector<16x8xf32> to vector<16xf32>
    %414 = vector.shape_cast %413 : vector<16xf32> to vector<16x1xf32>
    %cst_97 = arith.constant 0.353553385 : f32
    %415 = vector.broadcast %cst_97 : f32 to vector<16x1xf32>
    %416 = arith.mulf %414, %415 : vector<16x1xf32>
    %417 = arith.mulf %406, %401 : vector<16x8xf32>
    %cst_98 = arith.constant dense<0.000000e+00> : vector<16xf32>
    %418 = vector.multi_reduction <add>, %417, %cst_98 [1] : vector<16x8xf32> to vector<16xf32>
    %419 = vector.shape_cast %418 : vector<16xf32> to vector<16x1xf32>
    %cst_99 = arith.constant 0.353553385 : f32
    %420 = vector.broadcast %cst_99 : f32 to vector<16x1xf32>
    %421 = arith.mulf %419, %420 : vector<16x1xf32>
    %422 = tpu.concatenate %411, %416, %421 in 1 : vector<16x1xf32>, vector<16x1xf32>, vector<16x1xf32> -> vector<16x3xf32>
    %cst_100 = arith.constant dense<0xFF800000> : vector<16xf32>
    %423 = vector.multi_reduction <maximumf>, %422, %cst_100 [1] : vector<16x3xf32> to vector<16xf32>
    %424 = vector.shape_cast %423 : vector<16xf32> to vector<16x1xf32>
    %425 = vector.broadcast %424 : vector<16x1xf32> to vector<16x3xf32>
    %426 = arith.subf %422, %425 : vector<16x3xf32>
    %427 = math.exp %426 : vector<16x3xf32>
    %cst_101 = arith.constant dense<0.000000e+00> : vector<16xf32>
    %428 = vector.multi_reduction <add>, %427, %cst_101 [1] : vector<16x3xf32> to vector<16xf32>
    %429 = vector.shape_cast %428 : vector<16xf32> to vector<16x1xf32>
    %430 = tpu.reciprocal %429 {approx = true} : vector<16x1xf32> -> vector<16x1xf32>
    %431 = vector.broadcast %430 : vector<16x1xf32> to vector<16x3xf32>
    %432 = arith.mulf %427, %431 : vector<16x3xf32>
    %cst_102 = arith.constant 0.000000e+00 : f32
    %433 = vector.broadcast %cst_102 : f32 to vector<16x8xf32>
    %434 = vector.extract_strided_slice %432 {offsets = [0, 0], sizes = [16, 1], strides = [1, 1]} : vector<16x3xf32> to vector<16x1xf32>
    %435 = vector.broadcast %434 : vector<16x1xf32> to vector<16x8xf32>
    %436 = arith.mulf %435, %402 : vector<16x8xf32>
    %437 = arith.addf %433, %436 : vector<16x8xf32>
    %438 = vector.extract_strided_slice %432 {offsets = [0, 1], sizes = [16, 1], strides = [1, 1]} : vector<16x3xf32> to vector<16x1xf32>
    %439 = vector.broadcast %438 : vector<16x1xf32> to vector<16x8xf32>
    %440 = arith.mulf %439, %403 : vector<16x8xf32>
    %441 = arith.addf %437, %440 : vector<16x8xf32>
    %442 = vector.extract_strided_slice %432 {offsets = [0, 2], sizes = [16, 1], strides = [1, 1]} : vector<16x3xf32> to vector<16x1xf32>
    %443 = vector.broadcast %442 : vector<16x1xf32> to vector<16x8xf32>
    %444 = arith.mulf %443, %404 : vector<16x8xf32>
    %445 = arith.addf %441, %444 : vector<16x8xf32>
    %446 = arith.addf %405, %445 : vector<16x8xf32>
    %447 = vector.extract_strided_slice %8 {offsets = [16, 24], sizes = [16, 8], strides = [1, 1]} : vector<48x96xf32> to vector<16x8xf32>
    %448 = arith.mulf %447, %399 : vector<16x8xf32>
    %cst_103 = arith.constant dense<0.000000e+00> : vector<16xf32>
    %449 = vector.multi_reduction <add>, %448, %cst_103 [1] : vector<16x8xf32> to vector<16xf32>
    %450 = vector.shape_cast %449 : vector<16xf32> to vector<16x1xf32>
    %cst_104 = arith.constant 0.353553385 : f32
    %451 = vector.broadcast %cst_104 : f32 to vector<16x1xf32>
    %452 = arith.mulf %450, %451 : vector<16x1xf32>
    %453 = arith.mulf %447, %400 : vector<16x8xf32>
    %cst_105 = arith.constant dense<0.000000e+00> : vector<16xf32>
    %454 = vector.multi_reduction <add>, %453, %cst_105 [1] : vector<16x8xf32> to vector<16xf32>
    %455 = vector.shape_cast %454 : vector<16xf32> to vector<16x1xf32>
    %cst_106 = arith.constant 0.353553385 : f32
    %456 = vector.broadcast %cst_106 : f32 to vector<16x1xf32>
    %457 = arith.mulf %455, %456 : vector<16x1xf32>
    %458 = arith.mulf %447, %401 : vector<16x8xf32>
    %cst_107 = arith.constant dense<0.000000e+00> : vector<16xf32>
    %459 = vector.multi_reduction <add>, %458, %cst_107 [1] : vector<16x8xf32> to vector<16xf32>
    %460 = vector.shape_cast %459 : vector<16xf32> to vector<16x1xf32>
    %cst_108 = arith.constant 0.353553385 : f32
    %461 = vector.broadcast %cst_108 : f32 to vector<16x1xf32>
    %462 = arith.mulf %460, %461 : vector<16x1xf32>
    %463 = tpu.concatenate %452, %457, %462 in 1 : vector<16x1xf32>, vector<16x1xf32>, vector<16x1xf32> -> vector<16x3xf32>
    %cst_109 = arith.constant dense<0xFF800000> : vector<16xf32>
    %464 = vector.multi_reduction <maximumf>, %463, %cst_109 [1] : vector<16x3xf32> to vector<16xf32>
    %465 = vector.shape_cast %464 : vector<16xf32> to vector<16x1xf32>
    %466 = vector.broadcast %465 : vector<16x1xf32> to vector<16x3xf32>
    %467 = arith.subf %463, %466 : vector<16x3xf32>
    %468 = math.exp %467 : vector<16x3xf32>
    %cst_110 = arith.constant dense<0.000000e+00> : vector<16xf32>
    %469 = vector.multi_reduction <add>, %468, %cst_110 [1] : vector<16x3xf32> to vector<16xf32>
    %470 = vector.shape_cast %469 : vector<16xf32> to vector<16x1xf32>
    %471 = tpu.reciprocal %470 {approx = true} : vector<16x1xf32> -> vector<16x1xf32>
    %472 = vector.broadcast %471 : vector<16x1xf32> to vector<16x3xf32>
    %473 = arith.mulf %468, %472 : vector<16x3xf32>
    %cst_111 = arith.constant 0.000000e+00 : f32
    %474 = vector.broadcast %cst_111 : f32 to vector<16x8xf32>
    %475 = vector.extract_strided_slice %473 {offsets = [0, 0], sizes = [16, 1], strides = [1, 1]} : vector<16x3xf32> to vector<16x1xf32>
    %476 = vector.broadcast %475 : vector<16x1xf32> to vector<16x8xf32>
    %477 = arith.mulf %476, %402 : vector<16x8xf32>
    %478 = arith.addf %474, %477 : vector<16x8xf32>
    %479 = vector.extract_strided_slice %473 {offsets = [0, 1], sizes = [16, 1], strides = [1, 1]} : vector<16x3xf32> to vector<16x1xf32>
    %480 = vector.broadcast %479 : vector<16x1xf32> to vector<16x8xf32>
    %481 = arith.mulf %480, %403 : vector<16x8xf32>
    %482 = arith.addf %478, %481 : vector<16x8xf32>
    %483 = vector.extract_strided_slice %473 {offsets = [0, 2], sizes = [16, 1], strides = [1, 1]} : vector<16x3xf32> to vector<16x1xf32>
    %484 = vector.broadcast %483 : vector<16x1xf32> to vector<16x8xf32>
    %485 = arith.mulf %484, %404 : vector<16x8xf32>
    %486 = arith.addf %482, %485 : vector<16x8xf32>
    %487 = arith.addf %446, %486 : vector<16x8xf32>
    %488 = vector.extract_strided_slice %8 {offsets = [32, 24], sizes = [16, 8], strides = [1, 1]} : vector<48x96xf32> to vector<16x8xf32>
    %489 = arith.mulf %488, %399 : vector<16x8xf32>
    %cst_112 = arith.constant dense<0.000000e+00> : vector<16xf32>
    %490 = vector.multi_reduction <add>, %489, %cst_112 [1] : vector<16x8xf32> to vector<16xf32>
    %491 = vector.shape_cast %490 : vector<16xf32> to vector<16x1xf32>
    %cst_113 = arith.constant 0.353553385 : f32
    %492 = vector.broadcast %cst_113 : f32 to vector<16x1xf32>
    %493 = arith.mulf %491, %492 : vector<16x1xf32>
    %494 = arith.mulf %488, %400 : vector<16x8xf32>
    %cst_114 = arith.constant dense<0.000000e+00> : vector<16xf32>
    %495 = vector.multi_reduction <add>, %494, %cst_114 [1] : vector<16x8xf32> to vector<16xf32>
    %496 = vector.shape_cast %495 : vector<16xf32> to vector<16x1xf32>
    %cst_115 = arith.constant 0.353553385 : f32
    %497 = vector.broadcast %cst_115 : f32 to vector<16x1xf32>
    %498 = arith.mulf %496, %497 : vector<16x1xf32>
    %499 = arith.mulf %488, %401 : vector<16x8xf32>
    %cst_116 = arith.constant dense<0.000000e+00> : vector<16xf32>
    %500 = vector.multi_reduction <add>, %499, %cst_116 [1] : vector<16x8xf32> to vector<16xf32>
    %501 = vector.shape_cast %500 : vector<16xf32> to vector<16x1xf32>
    %cst_117 = arith.constant 0.353553385 : f32
    %502 = vector.broadcast %cst_117 : f32 to vector<16x1xf32>
    %503 = arith.mulf %501, %502 : vector<16x1xf32>
    %504 = tpu.concatenate %493, %498, %503 in 1 : vector<16x1xf32>, vector<16x1xf32>, vector<16x1xf32> -> vector<16x3xf32>
    %cst_118 = arith.constant dense<0xFF800000> : vector<16xf32>
    %505 = vector.multi_reduction <maximumf>, %504, %cst_118 [1] : vector<16x3xf32> to vector<16xf32>
    %506 = vector.shape_cast %505 : vector<16xf32> to vector<16x1xf32>
    %507 = vector.broadcast %506 : vector<16x1xf32> to vector<16x3xf32>
    %508 = arith.subf %504, %507 : vector<16x3xf32>
    %509 = math.exp %508 : vector<16x3xf32>
    %cst_119 = arith.constant dense<0.000000e+00> : vector<16xf32>
    %510 = vector.multi_reduction <add>, %509, %cst_119 [1] : vector<16x3xf32> to vector<16xf32>
    %511 = vector.shape_cast %510 : vector<16xf32> to vector<16x1xf32>
    %512 = tpu.reciprocal %511 {approx = true} : vector<16x1xf32> -> vector<16x1xf32>
    %513 = vector.broadcast %512 : vector<16x1xf32> to vector<16x3xf32>
    %514 = arith.mulf %509, %513 : vector<16x3xf32>
    %cst_120 = arith.constant 0.000000e+00 : f32
    %515 = vector.broadcast %cst_120 : f32 to vector<16x8xf32>
    %516 = vector.extract_strided_slice %514 {offsets = [0, 0], sizes = [16, 1], strides = [1, 1]} : vector<16x3xf32> to vector<16x1xf32>
    %517 = vector.broadcast %516 : vector<16x1xf32> to vector<16x8xf32>
    %518 = arith.mulf %517, %402 : vector<16x8xf32>
    %519 = arith.addf %515, %518 : vector<16x8xf32>
    %520 = vector.extract_strided_slice %514 {offsets = [0, 1], sizes = [16, 1], strides = [1, 1]} : vector<16x3xf32> to vector<16x1xf32>
    %521 = vector.broadcast %520 : vector<16x1xf32> to vector<16x8xf32>
    %522 = arith.mulf %521, %403 : vector<16x8xf32>
    %523 = arith.addf %519, %522 : vector<16x8xf32>
    %524 = vector.extract_strided_slice %514 {offsets = [0, 2], sizes = [16, 1], strides = [1, 1]} : vector<16x3xf32> to vector<16x1xf32>
    %525 = vector.broadcast %524 : vector<16x1xf32> to vector<16x8xf32>
    %526 = arith.mulf %525, %404 : vector<16x8xf32>
    %527 = arith.addf %523, %526 : vector<16x8xf32>
    %528 = arith.addf %487, %527 : vector<16x8xf32>
    %529 = tpu.concatenate %138, %268, %398, %528 in 1 : vector<16x8xf32>, vector<16x8xf32>, vector<16x8xf32>, vector<16x8xf32> -> vector<16x32xf32>
    %cst_121 = arith.constant 0.333333343 : f32
    %530 = vector.broadcast %cst_121 : f32 to vector<16x32xf32>
    %531 = arith.mulf %529, %530 : vector<16x32xf32>
    %c0_122 = arith.constant 0 : index
    %c0_123 = arith.constant 0 : index
    %532 = vector.load %arg6[%c0_122, %c0_123] : memref<32x32xbf16, #tpu.memory_space<vmem>>, vector<32x32xbf16>
    %533 = arith.truncf %531 : vector<16x32xf32> to vector<16x32xbf16>
    %cst_124 = arith.constant dense<0.000000e+00> : vector<16x32xf32>
    %534 = tpu.matmul %533, %532, %cst_124 {dimension_numbers = #tpu.dot_dimension_numbers<[1], [0], [0], [1], [0, 0, 1, 1], [], []>} : vector<16x32xbf16>, vector<32x32xbf16>, vector<16x32xf32> -> vector<16x32xf32>
    %c0_125 = arith.constant 0 : index
    %c0_126 = arith.constant 0 : index
    %535 = vector.load %arg7[%c0_125, %c0_126] : memref<1x32xf32, #tpu.memory_space<vmem>>, vector<1x32xf32>
    %536 = vector.broadcast %535 : vector<1x32xf32> to vector<16x32xf32>
    %537 = arith.addf %534, %536 : vector<16x32xf32>
    %c0_127 = arith.constant 0 : index
    %c0_128 = arith.constant 0 : index
    %538 = vector.load %arg8[%c0_127, %c0_128] : memref<32x24xbf16, #tpu.memory_space<vmem>>, vector<32x24xbf16>
    %539 = arith.truncf %537 : vector<16x32xf32> to vector<16x32xbf16>
    %cst_129 = arith.constant dense<0.000000e+00> : vector<16x24xf32>
    %540 = tpu.matmul %539, %538, %cst_129 {dimension_numbers = #tpu.dot_dimension_numbers<[1], [0], [0], [1], [0, 0, 1, 1], [], []>} : vector<16x32xbf16>, vector<32x24xbf16>, vector<16x24xf32> -> vector<16x24xf32>
    %c0_130 = arith.constant 0 : index
    %c0_131 = arith.constant 0 : index
    %541 = vector.load %arg9[%c0_130, %c0_131] : memref<1x24xf32, #tpu.memory_space<vmem>>, vector<1x24xf32>
    %542 = vector.broadcast %541 : vector<1x24xf32> to vector<16x24xf32>
    %543 = arith.addf %540, %542 : vector<16x24xf32>
    %c0_132 = arith.constant 0 : index
    %c0_133 = arith.constant 0 : index
    %544 = vector.load %arg10[%c0_132, %c0_133] : memref<16x24xf32, #tpu.memory_space<vmem>>, vector<16x24xf32>
    tpu.vector_store %arg10[%c0_132, %c0_133], %543 {strides = array<i32>} : memref<16x24xf32, #tpu.memory_space<vmem>>, vector<16x24xf32>,
    return
  }
  func.func @transform_0(%arg0: i32) -> (i32, i32) {
    %c0_i32 = arith.constant 0 : i32
    %c0_i32_0 = arith.constant 0 : i32
    return %arg0, %c0_i32 : i32, i32
  }
  func.func @transform_1(%arg0: i32) -> (i32, i32) {
    %c0_i32 = arith.constant 0 : i32
    %c0_i32_0 = arith.constant 0 : i32
    return %arg0, %c0_i32 : i32, i32
  }
  func.func @transform_2(%arg0: i32) -> (i32, i32) {
    %c0_i32 = arith.constant 0 : i32
    %c0_i32_0 = arith.constant 0 : i32
    return %arg0, %c0_i32 : i32, i32
  }
  func.func @transform_3(%arg0: i32) -> (i32, i32) {
    %c0_i32 = arith.constant 0 : i32
    %c0_i32_0 = arith.constant 0 : i32
    %c0_i32_1 = arith.constant 0 : i32
    return %c0_i32, %c0_i32_0 : i32, i32
  }
  func.func @transform_4(%arg0: i32) -> (i32, i32) {
    %c0_i32 = arith.constant 0 : i32
    %c0_i32_0 = arith.constant 0 : i32
    %c0_i32_1 = arith.constant 0 : i32
    return %c0_i32, %c0_i32_0 : i32, i32
  }
  func.func @transform_5(%arg0: i32) -> (i32, i32) {
    %c0_i32 = arith.constant 0 : i32
    %c0_i32_0 = arith.constant 0 : i32
    %c0_i32_1 = arith.constant 0 : i32
    return %c0_i32, %c0_i32_0 : i32, i32
  }
  func.func @transform_6(%arg0: i32) -> (i32, i32) {
    %c0_i32 = arith.constant 0 : i32
    %c0_i32_0 = arith.constant 0 : i32
    %c0_i32_1 = arith.constant 0 : i32
    return %c0_i32, %c0_i32_0 : i32, i32
  }
  func.func @transform_7(%arg0: i32) -> (i32, i32) {
    %c0_i32 = arith.constant 0 : i32
    %c0_i32_0 = arith.constant 0 : i32
    %c0_i32_1 = arith.constant 0 : i32
    return %c0_i32, %c0_i32_0 : i32, i32
  }
  func.func @transform_8(%arg0: i32) -> (i32, i32) {
    %c0_i32 = arith.constant 0 : i32
    %c0_i32_0 = arith.constant 0 : i32
    %c0_i32_1 = arith.constant 0 : i32
    return %c0_i32, %c0_i32_0 : i32, i32
  }
  func.func @transform_9(%arg0: i32) -> (i32, i32) {
    %c0_i32 = arith.constant 0 : i32
    %c0_i32_0 = arith.constant 0 : i32
    return %arg0, %c0_i32 : i32, i32
  }
}

</mosaic_0001>

<bundles_post_ra>
// kernel: hierarchical_block_forward.8
= control target key start
LH: loop header
LB: loop body
LE: loop exit
PB: predicated region body
PF: predicated region fallthrough
CT: control target
= control target key end

     0   :  { %vm27_vm0 = vcmask 1043456   ;;  %vm23_vm1 = vcmask 64512   ;;  %vm45_vm2 = vcmask 261120   ;;  %s92_s1 = inlined_call_operand.vmem [shape: bf16[8,32], index: 1, kind: input, shape index: {}]   ;;  %s93_s0 = inlined_call_operand.vmem [shape: f32[16,8], index: 0, kind: input, shape index: {}]   ;;  %s94_s2 = inlined_call_operand.vmem [shape: f32[1,32], index: 2, kind: input, shape index: {}]   ;;  %s95_s3 = inlined_call_operand.vmem [shape: f32[16,32], index: 3, kind: output, shape index: {}]  }
   0x1   :  { %v17_v0 = vld [vmem:[%s92_s1] sm:$0xf]  ;;  %v16_v2 = vld [vmem:[%s93_s0 + $0x8] sm:$0xff] }
   0x2   :  { %v15_v1 = vld [vmem:[%s93_s0] sm:$0xff]  ;;  %v29_v3 = vsel %vm27_vm0, %v17_v0, 0 }
   0x3   :  { %v18_v4 = vpack.c.bf16 %v16_v2, %v15_v1  ;;  %38 = vmatpush.bf16.msra.mxu0 %v29_v3  ;;  %v53_v5 = vld [vmem:[%s94_s2] ss:$0 sm:$0xff] }
   0x6   :  { %52 = vmatmul.msk.bf16.vlgmr.msra.gmra.mxu0 %vm23_vm1, %v18_v4 }
  0x83   :  { %v40_v6 = vpop.f32.mrf.mxu0 }
  0x84   :  { %v41_v7 = vadd.f32 %v53_v5, %v40_v6 }
  0x86   :  { %46 = vst.msk [vmem:[%s95_s3] sm:$0xff] %vm45_vm2, %v41_v7 }
  0x8b   :  { %v42_v8 = vpop.f32.mrf.mxu0 }
  0x8c   :  { %v43_v9 = vadd.f32 %v53_v5, %v42_v8 }
  0x8e   :  { %47 = vst.msk [vmem:[%s95_s3 + $0x8] sm:$0xff] %vm45_vm2, %v43_v9 }

// kernel: hierarchical_block_forward.9
= control target key start
LH: loop header
LB: loop body
LE: loop exit
PB: predicated region body
PF: predicated region fallthrough
CT: control target
= control target key end

     0   :  { %s1594_s25 = smov 0   ;;  %s1812_s0 = inlined_call_operand.vmem [shape: f32[2,8,32], index: 0, kind: input, shape index: {}]   ;;  %s1813_s1 = inlined_call_operand.vmem [shape: bf16[3,32,32], index: 1, kind: input, shape index: {}]   ;;  %s1814_s2 = inlined_call_operand.vmem [shape: f32[1,32], index: 2, kind: input, shape index: {}]   ;;  %s1815_s3 = inlined_call_operand.vmem [shape: f32[1,32], index: 3, kind: input, shape index: {}]   ;;  %s1816_s4 = inlined_call_operand.vmem [shape: f32[1,32], index: 4, kind: input, shape index: {}]   ;;  %s1817_s5 = inlined_call_operand.vmem [shape: bf16[4,32,16], index: 5, kind: input, shape index: {}]   ;;  %s1818_s6 = inlined_call_operand.vmem [shape: f32[4,1,16], index: 6, kind: input, shape index: {}]   ;;  %s1819_s7 = inlined_call_operand.vmem [shape: bf16[4,32,16], index: 7, kind: input, shape index: {}]   ;;  %s1820_s8 = inlined_call_operand.vmem [shape: f32[4,1,16], index: 8, kind: input, shape index: {}]   ;;  %s1821_s9 = inlined_call_operand.vmem [shape: bf16[4,32,16], index: 9, kind: input, shape index: {}]   ;;  %s1822_s10 = inlined_call_operand.vmem [shape: f32[4,1,16], index: 10, kind: input, shape index: {}]   ;;  %s1823_s11 = inlined_call_operand.vmem [shape: bf16[2,4,8,16], index: 11, kind: output, shape index: {0}]   ;;  %s1824_s12 = inlined_call_operand.vmem [shape: bf16[2,4,8,16], index: 12, kind: output, shape index: {1}]   ;;  %s1825_s13 = inlined_call_operand.vmem [shape: bf16[2,4,8,16], index: 13, kind: output, shape index: {2}]  }
   0x1 LB: > { %s1240_s26 = sadd.s32 4294967295, %s1521_s25   ;;  %p1244_p0 = scmp.ge.s32.totalorder %s1521_s25, 1  ;;  %s1521_s25 = sphi %s1594_s25, %s24_s25  }
   0x2   : > { %p391_p1 = scmp.lt.s32.totalorder %s1521_s25, 3 }
   0x4   : > { %p392_p2 = pnand %p1244_p0, %p391_p1 }
   0x5   : > { %p444_p3 = scmp.lt.s32.totalorder (!%p392_p2), %s1240_s26, 1 }
   0x6   : > { %395 = sbr.rel (%p392_p2) target bundleno = 647 (0x287), region = 64 }
   0xb   : > { %v1460_v0 = vld [vmem:[%s1813_s1 + $0x28] sm:$0xff]  ;;  %v1458_v2 = vld [vmem:[%s1813_s1 + $0x18] sm:$0xff]  ;;  %v1459_v3 = vld [vmem:[%s1813_s1 + $0x20] sm:$0xff]  ;;  %s1827_s26 = smov (!%p444_p3, %s1240_s26), 1  ;;  %vm492_vm0 = vcmask 261120   ;;  %vm473_vm1 = vcmask 1041408  }
   0xc   : > { %v1456_v1 = vld [vmem:[%s1813_s1 + $0x8] sm:$0xff]  ;;  %576 = vmatpush.bf16.msra.mxu2 %v1460_v0  ;;  %v1455_v4 = vld [vmem:[%s1813_s1] sm:$0xff]  ;;  %v1457_v5 = vld [vmem:[%s1813_s1 + $0x10] sm:$0xff]  ;;  %541 = vmatpush.bf16.msra.mxu1 %v1458_v2  ;;  %s1245_s22 = sshll.u32 %s1827_s26, 3  ;;  %vm512_vm2 = vcmask 1040384   ;;  %v1523_v25 = vmov 32.0  }
   0xd   : > { %502 = vmatpush.bf16.msra.mxu0 %v1456_v1  ;;  %s447_s27 = scalar_lea.vmem %s1812_s0, %s1245_s22  ;;  %v1494_v14 = vld [vmem:[%s1814_s2] ss:$0 sm:$0xff]  ;;  %1509 = vrcp.f32 %v1523_v25  ;;  %v1468_v63 = vld [vmem:[%s1817_s5 + $0x18] sm:$0xff]  ;;  %v1464_v0 = vld [vmem:[%s1819_s7 + $0x8] sm:$0xff]  ;;  %s1452_s24 = sshll.u32 %s1827_s26, 4  ;;  %vm705_vm11 = vcmask 125952  }
   0xe   : > { %v464_v6 = vld [vmem:[%s447_s27] sm:$0xff]  ;;  %v1466_v1 = vld [vmem:[%s1821_s9 + $0x8] sm:$0xff]  ;;  %s1743_s29 = scalar_lea.vmem %s1824_s12, %s1452_s24  ;;  %s1748_s15 = scalar_lea.vmem %s1825_s13, %s1452_s24 }
   0xf   : > { %v549_v7 = vpack.c.bf16 %v464_v6, %v464_v6  ;;  %v471_v8 = vrot.slane %v464_v6, 6  ;;  %v510_v9 = vrot.slane %v464_v6, 7  ;;  %v1495_v46 = vld [vmem:[%s1815_s3] ss:$0 sm:$0xff]  ;;  %v1467_v6 = vld [vmem:[%s1817_s5 + $0x10] sm:$0xff]  ;;  %s1763_s21 = scalar_lea.vmem %s1823_s11, %s1452_s24 }
  0x10   : > { %577 = vmatpush.bf16.msra.mxu2 %v1459_v3  ;;  %542 = vmatpush.bf16.msra.mxu1 %v1457_v5  ;;  %v1496_v48 = vld [vmem:[%s1816_s4] ss:$0 sm:$0xff]  ;;  %v1462_v3 = vld [vmem:[%s1817_s5 + $0x8] sm:$0xff] }
  0x11   : > { %503 = vmatpush.bf16.msra.mxu0 %v1455_v4  ;;  %v474_v10 = vsel %vm473_vm1, 0.0, %v471_v8  ;;  %v513_v11 = vsel %vm512_vm2, 0.0, %v510_v9  ;;  %697 = vmatpush.bf16.msra.mxu3 %v1462_v3  ;;  %v1463_v8 = vld [vmem:[%s1819_s7] sm:$0xff] }
  0x12   : > { %v475_v12 = vpack.c.bf16 %v474_v10, %v474_v10  ;;  %v514_v13 = vpack.c.bf16 %v513_v11, %v513_v11  ;;  %v1465_v10 = vld [vmem:[%s1821_s9] sm:$0xff] }
  0x13   : > { %1286 = vmatmul.msk.bf16.vlgmr.msra.gmra.mxu2 %vm492_vm0, %v549_v7  ;;  %v1510_v26 = vpop.eup %1509  ;;  %v1461_v7 = vld [vmem:[%s1817_s5] sm:$0xff] }
  0x14   : > { %1260 = vmatmul.msk.bf16.vlgmr.msra.gmra.mxu0 %vm492_vm0, %v475_v12  ;;  %1273 = vmatmul.msk.bf16.vlgmr.msra.gmra.mxu1 %vm492_vm0, %v514_v13  ;;  %v588_v27 = vmul.f32 32.0, %v1510_v26  ;;  %vm592_vm3 = vweird.f32 %v1510_v26 }
  0x15   : > { %805 = vmatpush.bf16.msrb.mxu2 %v1468_v63  ;;  %733 = vmatpush.bf16.msrb.mxu0 %v1464_v0 }
  0x16   : > { %v589_v28 = vsub.f32 1.0, %v588_v27  ;;  %768 = vmatpush.bf16.msrb.mxu1 %v1466_v1  ;;  %698 = vmatpush.bf16.msra.mxu3 %v1461_v7 }
  0x18   : > { %v590_v29 = vmul.f32 %v1510_v26, %v589_v28 }
  0x19   : > { %806 = vmatpush.bf16.msrb.mxu2 %v1467_v6  ;;  %734 = vmatpush.bf16.msrb.mxu0 %v1463_v8  ;;  %v1501_v6 = vld [vmem:[%s1822_s10 + $0x1] ss:$0 sm:$0xff]  ;;  %v1502_v8 = vld [vmem:[%s1818_s6 + $0x2] ss:$0 sm:$0xff] }
  0x1a   : > { %v591_v30 = vadd.f32 %v1510_v26, %v590_v29  ;;  %769 = vmatpush.bf16.msrb.mxu1 %v1465_v10 }
  0x1c   : > { %v593_v31 = vsel %vm592_vm3, %v1510_v26, %v591_v30 }
  0x91   : > { %v505_v15 = vpop.f32.mrf.mxu0  ;;  %v544_v16 = vpop.f32.mrf.mxu1 }
  0x92   : > { %v509_v17 = vadd.f32 %v1494_v14, %v505_v15  ;;  %v1470_v14 = vld [vmem:[%s1819_s7 + $0x18] sm:$0xff]  ;;  %v1476_v15 = vld [vmem:[%s1819_s7 + $0x28] sm:$0xff] }
  0x93   : > { %843 = vmatpush.bf16.msrb.mxu3 %v1470_v14  ;;  %957 = vmatpush.bf16.msra.mxu2 %v1476_v15  ;;  %v1503_v15 = vld [vmem:[%s1820_s8 + $0x1] ss:$0 sm:$0xff] }
  0x94   : > { %v548_v18 = vadd.f32 %v544_v16, %v509_v17  ;;  %v1472_v16 = vld [vmem:[%s1821_s9 + $0x18] sm:$0xff]  ;;  %v1474_v17 = vld [vmem:[%s1817_s5 + $0x28] sm:$0xff] }
  0x95   : > { %881 = vmatpush.bf16.msra.mxu0 %v1472_v16  ;;  %919 = vmatpush.bf16.msra.mxu1 %v1474_v17  ;;  %v1504_v17 = vld [vmem:[%s1820_s8 + $0x2] ss:$0 sm:$0xff] }
  0x96   : > { %v579_v19 = vpop.f32.mrf.mxu2 }
  0x97   : > { %v583_v20 = vadd.f32 %v579_v19, %v548_v18  ;;  %v1469_v19 = vld [vmem:[%s1819_s7 + $0x10] sm:$0xff] }
  0x98   : > { %844 = vmatpush.bf16.msrb.mxu3 %v1469_v19 }
  0x99   : > { %v584_v21 = vsel %vm492_vm0, %v583_v20, 0.0  ;;  %v546_v22 = vpop.f32.mrf.mxu1  ;;  %v507_v23 = vpop.f32.mrf.mxu0 }
  0x9a   : > { %585 = vadd.xlane.f32.xlu0 %v584_v21  ;;  %v1471_v22 = vld [vmem:[%s1821_s9 + $0x10] sm:$0xff]  ;;  %v1473_v23 = vld [vmem:[%s1817_s5 + $0x20] sm:$0xff] }
  0x9b   : > { %882 = vmatpush.bf16.msra.mxu0 %v1471_v22  ;;  %920 = vmatpush.bf16.msra.mxu1 %v1473_v23 }
  0x9e   : > { %v581_v24 = vpop.f32.mrf.mxu2 }
 0x10d   : > { %v586_v32 = vpop.xlane.xlu0 %585 }
 0x10e   : > { %v594_v33 = vmul.f32 %v593_v31, %v586_v32 }
 0x110   : > { %v595_v34 = vsub.f32 %v583_v20, %v594_v33  ;;  %v1475_v20 = vld [vmem:[%s1819_s7 + $0x20] sm:$0xff] }
 0x111   : > { %958 = vmatpush.bf16.msra.mxu2 %v1475_v20 }
 0x112   : > { %v596_v35 = vmul.f32 %v595_v34, %v595_v34 }
 0x114   : > { %v597_v36 = vsel %vm492_vm0, %v596_v35, 0.0 }
 0x115   : > { %598 = vadd.xlane.f32.xlu0 %v597_v36 }
 0x188   : > { %v599_v37 = vpop.xlane.xlu0 %598 }
 0x189   : > { %v600_v38 = vmul.f32 %v599_v37, %v593_v31 }
 0x18b   : > { %v601_v39 = vadd.f32 1e-05, %v600_v38 }
 0x18d   : > { %1511 = vrsqrt.f32 %v601_v39  ;;  %vm608_vm5 = vweird.f32 %v601_v39 }
 0x193   : > { %v1512_v40 = vpop.eup %1511 }
 0x194   : > { %v603_v41 = vmul.f32 %v1512_v40, %v601_v39  ;;  %vm609_vm4 = vweird.f32 %v1512_v40 }
 0x195   : > { %vm610_vm6 = vmor %vm608_vm5, %vm609_vm4 }
 0x196   : > { %v604_v42 = vmul.f32 %v1512_v40, %v603_v41 }
 0x198   : > { %v605_v43 = vmul.f32 0.5, %v604_v42 }
 0x19a   : > { %v606_v44 = vsub.f32 1.5, %v605_v43 }
 0x19c   : > { %v607_v45 = vmul.f32 %v1512_v40, %v606_v44  ;;  %v1478_v44 = vld [vmem:[%s1821_s9 + $0x28] sm:$0xff] }
 0x19e   : > { %v611_v47 = vsel %vm610_vm6, %v1512_v40, %v607_v45  ;;  %v1484_v45 = vld [vmem:[%s1821_s9 + $0x38] sm:$0xff] }
 0x19f   : > { %v612_v49 = vmul.f32 %v611_v47, %v595_v34  ;;  %v1482_v47 = vld [vmem:[%s1819_s7 + $0x38] sm:$0xff] }
 0x1a1   : > { %v617_v50 = vmul.f32 %v1495_v46, %v612_v49  ;;  %v1480_v46 = vld [vmem:[%s1817_s5 + $0x38] sm:$0xff]  ;;  %v1483_v49 = vld [vmem:[%s1821_s9 + $0x30] sm:$0xff] }
 0x1a3   : > { %v1640_v51 = vadd.f32 %v1496_v48, %v617_v50  ;;  %v1477_v48 = vld [vmem:[%s1821_s9 + $0x20] sm:$0xff]  ;;  %v1479_v50 = vld [vmem:[%s1817_s5 + $0x30] sm:$0xff] }
 0x1a5   : > { %v1643_v52 = vmul.f32 0.70710677, %v1640_v51  ;;  %v623_v40 = vmul.f32 0.5, %v1640_v51  ;;  %v1481_v51 = vld [vmem:[%s1819_s7 + $0x30] sm:$0xff] }
 0x1a7   : > { %v625_v53 = vmul.f32 %v1643_v52, %v1643_v52 }
 0x1a9   : > { %v626_v54 = vmin.f32 %v625_v53, 16.0  ;;  %v1498_v53 = vld [vmem:[%s1822_s10] ss:$0 sm:$0xff] }
 0x1ab   : > { %v627_v55 = vmul.f32 2.1237322e-06, %v626_v54  ;;  %v638_v56 = vmul.f32 3.8918573e-05, %v626_v54 }
 0x1ad   : > { %v628_v57 = vadd.f32 0.00028619796, %v627_v55  ;;  %v639_v58 = vadd.f32 0.001143296, %v638_v56 }
 0x1af   : > { %v629_v59 = vmul.f32 %v628_v57, %v626_v54  ;;  %v640_v60 = vmul.f32 %v639_v58, %v626_v54 }
 0x1b1   : > { %v641_v61 = vadd.f32 0.014752088, %v640_v60  ;;  %v630_v62 = vadd.f32 0.0036580483, %v629_v59  ;;  %v1499_v59 = vld [vmem:[%s1818_s6] ss:$0 sm:$0xff] }
 0x1b3   : > { %v642_v2 = vmul.f32 %v641_v61, %v626_v54  ;;  %v631_v5 = vmul.f32 %v630_v62, %v626_v54  ;;  %v1500_v61 = vld [vmem:[%s1818_s6 + $0x1] ss:$0 sm:$0xff] }
 0x1b5   : > { %v643_v4 = vadd.f32 0.112945676, %v642_v2  ;;  %v632_v12 = vadd.f32 0.05243302, %v631_v5 }
 0x1b7   : > { %v644_v9 = vmul.f32 %v643_v4, %v626_v54  ;;  %v633_v21 = vmul.f32 %v632_v12, %v626_v54 }
 0x1b9   : > { %v645_v11 = vadd.f32 0.4994258, %v644_v9  ;;  %v634_v24 = vadd.f32 0.18741608, %v633_v21 }
 0x1bb   : > { %v646_v13 = vmul.f32 %v645_v11, %v626_v54  ;;  %v635_v26 = vmul.f32 %v634_v24, %v626_v54 }
 0x1bd   : > { %v647_v18 = vadd.f32 1.0, %v646_v13  ;;  %v636_v30 = vadd.f32 1.1283791, %v635_v26  ;;  %v1505_v26 = vld [vmem:[%s1818_s6 + $0x3] ss:$0 sm:$0xff] }
 0x1bf   : > { %1513 = vrcp.f32 %v647_v18  ;;  %v659_v29 = vand.u32 2147483648, %v647_v18  ;;  %v657_v32 = vand.u32 2147483647, %v647_v18  ;;  %vm653_vm8 = vweird.f32 %v647_v18 }
 0x1c0   : > { %v637_v35 = vmul.f32 %v636_v30, %v1643_v52  ;;  %v1497_v52 = vld [vmem:[%s1820_s8] ss:$0 sm:$0xff] }
 0x1c1   : > { %v660_v34 = vor.u32 1.1754944e-38, %v659_v29  ;;  %vm658_vm10 = vcmp.eq.f32.partialorder %v657_v32, 8.507059e+37 }
 0x1c5   : > { %v1514_v25 = vpop.eup %1513 }
 0x1c6   : > { %v649_v27 = vmul.f32 %v1514_v25, %v647_v18  ;;  %vm654_vm7 = vweird.f32 %v1514_v25 }
 0x1c7   : > { %vm655_vm9 = vmor %vm653_vm8, %vm654_vm7 }
 0x1c8   : > { %v650_v28 = vsub.f32 1.0, %v649_v27 }
 0x1ca   : > { %v651_v31 = vmul.f32 %v1514_v25, %v650_v28  ;;  %v1506_v28 = vld [vmem:[%s1820_s8 + $0x3] ss:$0 sm:$0xff] }
 0x1cc   : > { %v652_v33 = vadd.f32 %v1514_v25, %v651_v31 }
 0x1ce   : > { %v656_v36 = vsel %vm655_vm9, %v1514_v25, %v652_v33 }
 0x1cf   : > { %v661_v37 = vsel %vm658_vm10, %v660_v34, %v656_v36 }
 0x1d0   : > { %v662_v38 = vmul.f32 %v661_v37, %v637_v35  ;;  %v1507_v35 = vld [vmem:[%s1822_s10 + $0x2] ss:$0 sm:$0xff]  ;;  %v1508_v37 = vld [vmem:[%s1822_s10 + $0x3] ss:$0 sm:$0xff] }
 0x1d2   : > { %v1287_v39 = vclamps-f32 %v662_v38, 1.0 }
 0x1d4   : > { %v665_v41 = vadd.f32 1.0, %v1287_v39 }
 0x1d6   : > { %v666_v42 = vmul.f32 %v665_v41, %v623_v40 }
 0x1d8   : > { %v667_v43 = vpack.c.bf16 %v666_v42, %v666_v42 }
 0x1da   : > { %1296 = vmatmul.msk.bf16.vlgmr.msra.gmra.mxu3 %vm492_vm0, %v667_v43  ;;  %1305 = vmatmul.msk.bf16.vlgmr.msrb.gmra.mxu0 %vm492_vm0, %v667_v43 }
 0x1db   : > { %1314 = vmatmul.msk.bf16.vlgmr.msrb.gmra.mxu1 %vm492_vm0, %v667_v43  ;;  %1328 = vmatmul.msk.bf16.vlgmr.msrb.gmra.mxu2 %vm492_vm0, %v667_v43 }
 0x1dc   : > { %995 = vmatpush.bf16.msra.mxu3 %v1478_v44  ;;  %1109 = vmatpush.bf16.msrb.mxu2 %v1484_v45 }
 0x1dd   : > { %1033 = vmatpush.bf16.msrb.mxu0 %v1480_v46  ;;  %1071 = vmatpush.bf16.msrb.mxu1 %v1482_v47 }
 0x1e0   : > { %996 = vmatpush.bf16.msra.mxu3 %v1477_v48  ;;  %1110 = vmatpush.bf16.msrb.mxu2 %v1483_v49 }
 0x1e1   : > { %1034 = vmatpush.bf16.msrb.mxu0 %v1479_v50  ;;  %1072 = vmatpush.bf16.msrb.mxu1 %v1481_v51 }
 0x1ea   : > { %1343 = vmatmul.msk.bf16.vlgmr.msrb.gmra.mxu3 %vm492_vm0, %v667_v43  ;;  %1358 = vmatmul.msk.bf16.vlgmr.msra.gmra.mxu0 %vm492_vm0, %v667_v43 }
 0x1eb   : > { %1373 = vmatmul.msk.bf16.vlgmr.msra.gmra.mxu1 %vm492_vm0, %v667_v43  ;;  %1388 = vmatmul.msk.bf16.vlgmr.msra.gmra.mxu2 %vm492_vm0, %v667_v43 }
 0x1fa   : > { %1403 = vmatmul.msk.bf16.vlgmr.msra.gmra.mxu3 %vm492_vm0, %v667_v43  ;;  %1418 = vmatmul.msk.bf16.vlgmr.msrb.gmra.mxu0 %vm492_vm0, %v667_v43 }
 0x1fb   : > { %1433 = vmatmul.msk.bf16.vlgmr.msrb.gmra.mxu1 %vm492_vm0, %v667_v43  ;;  %1448 = vmatmul.msk.bf16.vlgmr.msrb.gmra.mxu2 %vm492_vm0, %v667_v43 }
 0x257   : > { %v736_v54 = vpop.f32.mrf.mxu0 }
 0x258   : > { %v737_v55 = vadd.f32 %v1497_v52, %v736_v54  ;;  %v771_v56 = vpop.f32.mrf.mxu1 }
 0x259   : > { %v772_v57 = vadd.f32 %v1498_v53, %v771_v56 }
 0x25a   : > { %v740_v58 = vpack.c.bf16 %v737_v55, %v737_v55 }
 0x25b   : > { %v775_v60 = vpack.c.bf16 %v772_v57, %v772_v57 }
 0x25c   : > { %741 = vst.msk [vmem:[%s1743_s29] sm:$0xf] %vm705_vm11, %v740_v58 }
 0x25d   : > { %776 = vst.msk [vmem:[%s1748_s15] sm:$0xf] %vm705_vm11, %v775_v60  ;;  %v700_v62 = vpop.f32.mrf.mxu3 }
 0x25e   : > { %v701_v63 = vadd.f32 %v1499_v59, %v700_v62  ;;  %v808_v0 = vpop.f32.mrf.mxu2 }
 0x25f   : > { %v809_v1 = vadd.f32 %v1500_v61, %v808_v0  ;;  %v738_v2 = vpop.f32.mrf.mxu0 }
 0x260   : > { %v704_v3 = vpack.c.bf16 %v701_v63, %v701_v63  ;;  %v773_v4 = vpop.f32.mrf.mxu1 }
 0x261   : > { %v812_v5 = vpack.c.bf16 %v809_v1, %v809_v1 }
 0x262   : > { %706 = vst.msk [vmem:[%s1763_s21] sm:$0xf] %vm705_vm11, %v704_v3 }
 0x263   : > { %1329 = vst.msk [vmem:[%s1763_s21 + $0x4] sm:$0xf] %vm705_vm11, %v812_v5 }
 0x265   : > { %v702_v7 = vpop.f32.mrf.mxu3 }
 0x266   : > { %v810_v9 = vpop.f32.mrf.mxu2 }
 0x267   : > { %v884_v10 = vpop.f32.mrf.mxu0 }
 0x268   : > { %v885_v11 = vadd.f32 %v1501_v6, %v884_v10  ;;  %v922_v12 = vpop.f32.mrf.mxu1 }
 0x269   : > { %v923_v13 = vadd.f32 %v1502_v8, %v922_v12 }
 0x26a   : > { %v888_v14 = vpack.c.bf16 %v885_v11, %v885_v11 }
 0x26b   : > { %v926_v16 = vpack.c.bf16 %v923_v13, %v923_v13 }
 0x26c   : > { %1359 = vst.msk [vmem:[%s1748_s15 + $0x4] sm:$0xf] %vm705_vm11, %v888_v14 }
 0x26d   : > { %1374 = vst.msk [vmem:[%s1763_s21 + $0x8] sm:$0xf] %vm705_vm11, %v926_v16  ;;  %v846_v18 = vpop.f32.mrf.mxu3 }
 0x26e   : > { %v847_v19 = vadd.f32 %v1503_v15, %v846_v18  ;;  %v960_v20 = vpop.f32.mrf.mxu2 }
 0x26f   : > { %v961_v21 = vadd.f32 %v1504_v17, %v960_v20  ;;  %v886_v22 = vpop.f32.mrf.mxu0 }
 0x270   : > { %v850_v23 = vpack.c.bf16 %v847_v19, %v847_v19  ;;  %v924_v24 = vpop.f32.mrf.mxu1 }
 0x271   : > { %v964_v25 = vpack.c.bf16 %v961_v21, %v961_v21 }
 0x272   : > { %1344 = vst.msk [vmem:[%s1743_s29 + $0x4] sm:$0xf] %vm705_vm11, %v850_v23 }
 0x273   : > { %1389 = vst.msk [vmem:[%s1743_s29 + $0x8] sm:$0xf] %vm705_vm11, %v964_v25 }
 0x275   : > { %v848_v27 = vpop.f32.mrf.mxu3 }
 0x276   : > { %v962_v29 = vpop.f32.mrf.mxu2 }
 0x277   : > { %v1036_v30 = vpop.f32.mrf.mxu0 }
 0x278   : > { %v1037_v31 = vadd.f32 %v1505_v26, %v1036_v30  ;;  %v1074_v32 = vpop.f32.mrf.mxu1 }
 0x279   : > { %v1075_v33 = vadd.f32 %v1506_v28, %v1074_v32 }
 0x27a   : > { %v1040_v34 = vpack.c.bf16 %v1037_v31, %v1037_v31 }
 0x27b   : > { %v1078_v36 = vpack.c.bf16 %v1075_v33, %v1075_v33 }
 0x27c   : > { %1419 = vst.msk [vmem:[%s1763_s21 + $0xc] sm:$0xf] %vm705_vm11, %v1040_v34 }
 0x27d   : > { %1434 = vst.msk [vmem:[%s1743_s29 + $0xc] sm:$0xf] %vm705_vm11, %v1078_v36  ;;  %v998_v38 = vpop.f32.mrf.mxu3 }
 0x27e   : > { %v999_v39 = vadd.f32 %v1507_v35, %v998_v38  ;;  %v1112_v40 = vpop.f32.mrf.mxu2 }
 0x27f   : > { %v1113_v41 = vadd.f32 %v1508_v37, %v1112_v40  ;;  %v1038_v42 = vpop.f32.mrf.mxu0 }
 0x280   : > { %v1002_v43 = vpack.c.bf16 %v999_v39, %v999_v39  ;;  %v1076_v44 = vpop.f32.mrf.mxu1 }
 0x281   : > { %v1116_v45 = vpack.c.bf16 %v1113_v41, %v1113_v41 }
 0x282   : > { %1404 = vst.msk [vmem:[%s1748_s15 + $0x8] sm:$0xf] %vm705_vm11, %v1002_v43 }
 0x283   : > { %1449 = vst.msk [vmem:[%s1748_s15 + $0xc] sm:$0xf] %vm705_vm11, %v1116_v45 }
 0x285   : > { %v1000_v46 = vpop.f32.mrf.mxu3 }
 0x286   : > { %v1114_v47 = vpop.f32.mrf.mxu2 }
 0x287 PF: > { %s24_s25 = sadd.s32 1, %s1521_s25  }
 0x288   : > { %p21_p4 = scmp.ge.s32.totalorder %s24_s25, 4  }
 0x28a   :  { %23 = sbr.rel (!%p21_p4) target bundleno = 1 (0x1), region = 147 }

// kernel: hierarchical_block_forward.10
= control target key start
LH: loop header
LB: loop body
LE: loop exit
PB: predicated region body
PF: predicated region fallthrough
CT: control target
= control target key end

     0   :  { %s1333_s18 = smov 0   ;;  %s1335_s19 = smov 0   ;;  %s1476_s0 = inlined_call_operand.vmem [shape: bf16[2,4,8,16], index: 0, kind: input, shape index: {}]   ;;  %s1477_s1 = inlined_call_operand.vmem [shape: bf16[2,4,8,16], index: 1, kind: input, shape index: {}]   ;;  %s1478_s2 = inlined_call_operand.vmem [shape: bf16[2,4,8,16], index: 2, kind: input, shape index: {}]   ;;  %s1479_s3 = inlined_call_operand.vmem [shape: f32[2,8,32], index: 3, kind: input, shape index: {}]   ;;  %s1480_s4 = inlined_call_operand.vmem [shape: bf16[4,16,32], index: 4, kind: input, shape index: {}]   ;;  %s1481_s5 = inlined_call_operand.vmem [shape: f32[1,32], index: 5, kind: input, shape index: {}]   ;;  %s1482_s6 = inlined_call_operand.vmem [shape: bf16[32,32], index: 6, kind: input, shape index: {}]   ;;  %s1483_s7 = inlined_call_operand.vmem [shape: f32[1,32], index: 7, kind: input, shape index: {}]   ;;  %s1484_s8 = inlined_call_operand.vmem [shape: bf16[64,32], index: 8, kind: input, shape index: {}]   ;;  %s1485_s9 = inlined_call_operand.vmem [shape: f32[1,32], index: 9, kind: input, shape index: {}]   ;;  %s1486_s10 = inlined_call_operand.vmem [shape: f32[1,32], index: 10, kind: input, shape index: {}]   ;;  %s1487_s11 = inlined_call_operand.vmem [shape: f32[1,32], index: 11, kind: input, shape index: {}]   ;;  %s1488_s12 = inlined_call_operand.vmem [shape: bf16[32,32], index: 12, kind: input, shape index: {}]   ;;  %s1489_s13 = inlined_call_operand.vmem [shape: f32[1,32], index: 13, kind: input, shape index: {}]   ;;  %s1490_s14 = inlined_call_operand.vmem [shape: f32[2,8,32], index: 14, kind: output, shape index: {0}]   ;;  %s1491_s15 = inlined_call_operand.vmem [shape: bf16[2,8,32], index: 15, kind: output, shape index: {1}]  }
   0x1   :  { %1494 = sst [smem:[#allocation6_spill]] %s1486_s10  ;;  %s1337_s20 = smov 0  }
   0x2   :  { %1495 = sst [smem:[#allocation7_spill]] %s1487_s11 }
   0x3   :  { %1496 = sst [smem:[#allocation8_spill]] %s1489_s13 }
   0x4 LB: > { %1497 = sst [smem:[#allocation3_spill]] %s1240_s19  ;;  %s38_s21 = sadd.s32 1, %s1240_s19  ;;  %s1244_s20 = sphi %s1337_s20, %s26_s20   ;;  %s1240_s19 = sphi %s1335_s19, %s1506_s19   ;;  %s1236_s18 = sphi %s1333_s18, %s1505_s18  }
   0x5   : > { %1498 = sst [smem:[#allocation4_spill]] %s1244_s20  ;;  %p1092_p0 = scmp.ge.s32.totalorder %s1244_s20, 1 }
   0x6   : > { %p40_p1 = scmp.ge.s32.totalorder %s38_s21, 2  ;;  %p495_p2 = scmp.lt.s32.totalorder %s1244_s20, 3 }
   0x8   : > { %s1508_s21 = smov (%p40_p1, %s38_s21), 0  ;;  %p496_p3 = pnand %p1092_p0, %p495_p2 }
   0x9   : > { %1499 = sst [smem:[#allocation5_spill]] %s1508_s21  ;;  %p572_p4 = scmp.lt.s32.totalorder (!%p496_p3), %s1236_s18, 1 }
   0xa   : > { %499 = sbr.rel (%p496_p3) target bundleno = 1506 (0x5e2), region = 76  ;;  %s1381_s28 = smov (!%p496_p3), 0  }
   0xf   : > { %vm612_vm0 = vcmask 261120   ;;  %v1250_v0 = vmov 0.0   ;;  %s1510_s18 = smov (!%p572_p4, %s1236_s18), 1 }
  0x10   : > { %613 = vst.msk [vmem:[#allocation2] sm:$0xff] %vm612_vm0, %v1250_v0  ;;  %s1352_s22 = sshll.u32 %s1510_s18, 4  ;;  %s1099_s23 = sshll.u32 %s1510_s18, 3 }
  0x11   : > { %s584_s29 = scalar_lea.vmem %s1477_s1, %s1352_s22  ;;  %s589_s17 = scalar_lea.vmem %s1478_s2, %s1352_s22 }
  0x12   : > { %s1369_s20 = scalar_lea.vmem %s1479_s3, %s1099_s23  ;;  %s1374_s10 = scalar_lea.vmem %s1490_s14, %s1099_s23 }
  0x13   : > { %s1101_s24 = sshll.u32 %s1510_s18, 2 }
  0x14   : > { %s1379_s27 = scalar_lea.vmem %s1491_s15, %s1101_s24 }
  0x15 LB: >> { %s1102_s19 = sshll.u32 %s1248_s28, 2  ;;  %vm629_vm1 = vcmask 130048   ;;  %s1500_s26 = scalar_lea.vmem %s1476_s0, %s1352_s22  ;;  %vm650_vm2 = vcmask 64512   ;;  %vm666_vm3 = vcmask 1043456   ;;  %s1248_s28 = sphi %s1381_s28, %s619_s28  }
  0x16   : >> { %s624_s18 = scalar_lea.vmem %s584_s29, %s1102_s19  ;;  %s621_s30 = scalar_lea.vmem %s1500_s26, %s1102_s19 }
  0x17   : >> { %v625_v1 = vld [vmem:[%s624_s18] sm:$0xf]  ;;  %s627_s25 = scalar_lea.vmem %s589_s17, %s1102_s19  ;;  %s1155_s11 = sshll.u32 %s1248_s28, 3 }
  0x18   : >> { %v634_v2 = vsel %vm629_vm1, %v625_v1, 0  ;;  %v622_v3 = vld [vmem:[%s621_s30] sm:$0xf]  ;;  %s687_s21 = scalar_lea.vmem %s1480_s4, %s1155_s11  ;;  %s619_s28 = sadd.s32 1, %s1248_s28  }
  0x19   : >> { %643 = vmatpush.bf16.xpose.msra.mxu0 %v634_v2  ;;  %v628_v13 = vld [vmem:[%s627_s25] sm:$0xf]  ;;  %p616_p5 = scmp.ge.s32.totalorder %s619_s28, 4  }
  0x1a   : >> { %v668_v14 = vsel %vm666_vm3, %v628_v13, 0  ;;  %v1156_v19 = vld [vmem:[%s687_s21] sm:$0xff]  ;;  %v1158_v27 = vld [vmem:[%s1482_s6 + $0x8] sm:$0xff] (%p616_p5)  ;;  %v1162_v33 = vld [vmem:[%s1484_s8 + $0x18] sm:$0xff] (%p616_p5)  ;;  %s1251_s21 = smov (%p616_p5), 32   ;;  %vm800_vm4 = vcmask (%p616_p5), 523264  }
  0x1b   : >> { %677 = vmatpush.bf16.msra.mxu1 %v668_v14  ;;  %706 = vmatpush.bf16.msra.mxu2 %v1156_v19  ;;  %v683_v23 = vld [vmem:[#allocation2] sm:$0xff]  ;;  %v1161_v34 = vld [vmem:[%s1484_s8 + $0x10] sm:$0xff] (%p616_p5)  ;;  %v1160_v35 = vld [vmem:[%s1484_s8 + $0x8] sm:$0xff] (%p616_p5)  ;;  %v1252_v1 = vmov (%p616_p5), 32.0   ;;  %s1501_s28 = sld [smem:[#allocation6_spill]] (%p616_p5)  ;;  %vm916_vm13 = vcmask (%p616_p5), 257024  }
  0x1c   : > { %v1204_v29 = vld [vmem:[%s1481_s5] ss:$0 sm:$0xff] (%p616_p5)  ;;  %v1164_v13 = vld [vmem:[%s1488_s12 + $0x8] sm:$0xff] (%p616_p5)  ;;  %s1502_s13 = sld [smem:[#allocation7_spill]] (%p616_p5) }
  0x1d   : > { %v1157_v30 = vld [vmem:[%s1482_s6] sm:$0xff] (%p616_p5)  ;;  %s1503_s19 = sld [smem:[#allocation8_spill]] (%p616_p5) }
  0x1e   : > { %v1205_v36 = vld [vmem:[%s1483_s7] ss:$0 sm:$0xff] (%p616_p5) }
  0x1f   : > { %v1159_v40 = vld [vmem:[%s1484_s8] sm:$0xff] (%p616_p5) }
  0x20   : >> { %1105 = vmatmul.msk.bf16.vlgmr.msra.gmra.mxu0 %vm629_vm1, %v622_v3  ;;  %v714_v41 = vld [vmem:[%s1369_s20] sm:$0xff] (%p616_p5) }
  0x21   : > { %751 = vmatpush.bf16.msra.mxu0 (%p616_p5), %v1158_v27  ;;  %v1206_v45 = vld [vmem:[%s1485_s9] ss:$0 sm:$0xff] (%p616_p5) }
  0x22   : > { %v1163_v14 = vld [vmem:[%s1488_s12] sm:$0xff] (%p616_p5) }
  0x23   : > { %v1208_v27 = vld [vmem:[%s1502_s13] ss:$0 sm:$0xff] (%p616_p5) }
  0x25   : > { %752 = vmatpush.bf16.msra.mxu0 (%p616_p5), %v1157_v30 }
  0x9d   : >> { %v645_v4 = vpop.f32.mrf.mxu0 }
  0x9e   : >> { %v649_v5 = vmul.f32 0.25, %v645_v4 }
  0xa0   : >> { %v651_v6 = vsel %vm650_vm2, %v649_v5, -inf }
  0xa1   : >> { %652 = vmax.xlane.f32.xlu0 %v651_v6 }
  0xa5   : >> { %v647_v7 = vpop.f32.mrf.mxu0 }
 0x114   : >> { %v653_v8 = vpop.xlane.xlu0 %652 }
 0x115   : >> { %v654_v9 = vsub.f32 %v649_v5, %v653_v8 }
 0x117   : >> { %v655_v10 = vmul.f32 1.442695, %v654_v9 }
 0x119   : >> { %1200 = vpow2.f32 %v655_v10 }
 0x11f   : >> { %v1201_v11 = vpop.eup %1200 }
 0x120   : >> { %v657_v12 = vsel %vm650_vm2, %v1201_v11, 0.0 }
 0x121   : >> { %658 = vadd.xlane.f32.xlu0 %v657_v12 }
 0x194   : >> { %v659_v15 = vpop.xlane.xlu0 %658 }
 0x195   : >> { %1202 = vrcp.f32 %v659_v15 }
 0x19b   : >> { %v1203_v16 = vpop.eup %1202 }
 0x19c   : >> { %v661_v17 = vmul.f32 %v1203_v16, %v1201_v11 }
 0x19e   : >> { %v662_v18 = vpack.c.bf16 %v661_v17, %v661_v17 }
 0x1a0   : >> { %1106 = vmatmul.msk.bf16.vlgmr.msra.gmra.mxu1 %vm650_vm2, %v662_v18 }
 0x1a1   : > { %808 = vmatpush.bf16.msra.mxu1 (%p616_p5), %v1162_v33 }
 0x1a5   : > { %809 = vmatpush.bf16.msra.mxu1 (%p616_p5), %v1161_v34 }
 0x1a9   : > { %810 = vmatpush.bf16.msra.mxu1 (%p616_p5), %v1160_v35 }
 0x1ad   : > { %811 = vmatpush.bf16.msra.mxu1 (%p616_p5), %v1159_v40 }
 0x21d   : >> { %v679_v20 = vpop.f32.mrf.mxu1 }
 0x21e   : >> { %v684_v21 = vpack.c.bf16 %v679_v20, %v679_v20 }
 0x220   : >> { %1113 = vmatmul.msk.bf16.vlgmr.msra.gmra.mxu2 %vm629_vm1, %v684_v21 }
 0x221   : > { %908 = vmatpush.bf16.msra.mxu2 (%p616_p5), %v1164_v13 }
 0x225   : >> { %v681_v22 = vpop.f32.mrf.mxu1  ;;  %909 = vmatpush.bf16.msra.mxu2 (%p616_p5), %v1163_v14 }
 0x2a3   : >> { %v708_v24 = vpop.f32.mrf.mxu2 }
 0x2a4   : >> { %v712_v25 = vadd.f32 %v708_v24, %v683_v23  ;;  %v1207_v24 = vld [vmem:[%s1501_s28] ss:$0 sm:$0xff] (%p616_p5) }
 0x2a6   : >> { %713 = vst.msk [vmem:[#allocation2] sm:$0xff] %vm612_vm0, %v712_v25 }
 0x2a7   : > { %618 = sbr.rel (!%p616_p5) target bundleno = 21 (0x15), region = 138 }
 0x2ab   : >> { %v710_v26 = vpop.f32.mrf.mxu2 }
 0x2ad   : > { %v715_v28 = vld [vmem:[#allocation2] sm:$0xff] }
 0x2ae   : > { %v720_v31 = vadd.f32 %v1204_v29, %v715_v28 }
 0x2b0   : > { %v725_v32 = vpack.c.bf16 %v720_v31, %v720_v31  ;;  %v1209_v31 = vld [vmem:[%s1503_s19] ss:$0 sm:$0xff] }
 0x2b2   : > { %1122 = vmatmul.msk.bf16.vlgmr.msra.gmra.mxu0 %vm612_vm0, %v725_v32 }
 0x32f   : > { %v754_v37 = vpop.f32.mrf.mxu0 }
 0x330   : > { %v755_v38 = vadd.f32 %v1205_v36, %v754_v37 }
 0x332   : > { %759 = vrot.lane.b32.xlu0 %v755_v38, %s1251_s21 }
 0x337   : > { %v756_v39 = vpop.f32.mrf.mxu0 }
 0x3a4   : > { %v760_v42 = vpop.permute.xlu0 %759 }
 0x3a5   : > { %v762_v43 = vsel %vm612_vm0, %v714_v41, %v760_v42 }
 0x3a6   : > { %v771_v44 = vpack.c.bf16 %v762_v43, %v762_v43 }
 0x3a8   : > { %1139 = vmatmul.msk.bf16.vlgmr.msra.gmra.mxu1 %vm800_vm4, %v771_v44 }
 0x425   : > { %v813_v46 = vpop.f32.mrf.mxu1 }
 0x426   : > { %v814_v47 = vadd.f32 %v1206_v45, %v813_v46 }
 0x428   : > { %v1140_v48 = vmul.f32 -1.442695, %v814_v47 }
 0x42a   : > { %1210 = vpow2.f32 %v1140_v48 }
 0x42d   : > { %v815_v49 = vpop.f32.mrf.mxu1 }
 0x430   : > { %v1211_v50 = vpop.eup %1210 }
 0x431   : > { %v820_v51 = vadd.f32 1.0, %v1211_v50 }
 0x433   : > { %1212 = vrcp.f32 %v820_v51  ;;  %v832_v55 = vand.u32 2147483648, %v820_v51  ;;  %v830_v57 = vand.u32 2147483647, %v820_v51  ;;  %vm826_vm6 = vweird.f32 %v820_v51 }
 0x434   : > { %1214 = vrcp.f32 %v1252_v1 }
 0x435   : > { %v833_v59 = vor.u32 1.1754944e-38, %v832_v55  ;;  %vm831_vm8 = vcmp.eq.f32.partialorder %v830_v57, 8.507059e+37 }
 0x439   : > { %v1213_v52 = vpop.eup %1212 }
 0x43a   : > { %v822_v53 = vmul.f32 %v1213_v52, %v820_v51  ;;  %vm827_vm5 = vweird.f32 %v1213_v52  ;;  %v1215_v2 = vpop.eup %1214 }
 0x43b   : > { %vm828_vm7 = vmor %vm826_vm6, %vm827_vm5  ;;  %v842_v3 = vmul.f32 32.0, %v1215_v2  ;;  %vm846_vm9 = vweird.f32 %v1215_v2 }
 0x43c   : > { %v823_v54 = vsub.f32 1.0, %v822_v53 }
 0x43d   : > { %v843_v4 = vsub.f32 1.0, %v842_v3 }
 0x43e   : > { %v824_v56 = vmul.f32 %v1213_v52, %v823_v54 }
 0x43f   : > { %v844_v5 = vmul.f32 %v1215_v2, %v843_v4 }
 0x440   : > { %v825_v58 = vadd.f32 %v1213_v52, %v824_v56 }
 0x441   : > { %v845_v6 = vadd.f32 %v1215_v2, %v844_v5 }
 0x442   : > { %v829_v60 = vsel %vm828_vm7, %v1213_v52, %v825_v58 }
 0x443   : > { %v834_v61 = vsel %vm831_vm8, %v833_v59, %v829_v60  ;;  %v847_v7 = vsel %vm846_vm9, %v1215_v2, %v845_v6 }
 0x444   : > { %v836_v62 = vmul.f32 %v834_v61, %v755_v38 }
 0x446   : > { %v837_v63 = vadd.f32 %v836_v62, %v714_v41 }
 0x448   : > { %v838_v0 = vsel %vm612_vm0, %v837_v63, 0.0 }
 0x449   : > { %839 = vadd.xlane.f32.xlu0 %v838_v0 }
 0x4bc   : > { %v840_v8 = vpop.xlane.xlu0 %839 }
 0x4bd   : > { %v848_v9 = vmul.f32 %v847_v7, %v840_v8 }
 0x4bf   : > { %v849_v10 = vsub.f32 %v837_v63, %v848_v9 }
 0x4c1   : > { %v850_v11 = vmul.f32 %v849_v10, %v849_v10 }
 0x4c3   : > { %v851_v12 = vsel %vm612_vm0, %v850_v11, 0.0 }
 0x4c4   : > { %852 = vadd.xlane.f32.xlu1 %v851_v12 }
 0x537   : > { %v853_v15 = vpop.xlane.xlu1 %852 }
 0x538   : > { %v854_v16 = vmul.f32 %v853_v15, %v847_v7 }
 0x53a   : > { %v855_v17 = vadd.f32 1e-05, %v854_v16 }
 0x53c   : > { %1216 = vrsqrt.f32 %v855_v17  ;;  %vm862_vm11 = vweird.f32 %v855_v17 }
 0x542   : > { %v1217_v18 = vpop.eup %1216 }
 0x543   : > { %v857_v19 = vmul.f32 %v1217_v18, %v855_v17  ;;  %vm863_vm10 = vweird.f32 %v1217_v18 }
 0x544   : > { %vm864_vm12 = vmor %vm862_vm11, %vm863_vm10 }
 0x545   : > { %v858_v20 = vmul.f32 %v1217_v18, %v857_v19 }
 0x547   : > { %v859_v21 = vmul.f32 0.5, %v858_v20 }
 0x549   : > { %v860_v22 = vsub.f32 1.5, %v859_v21 }
 0x54b   : > { %v861_v23 = vmul.f32 %v1217_v18, %v860_v22 }
 0x54d   : > { %v865_v25 = vsel %vm864_vm12, %v1217_v18, %v861_v23 }
 0x54e   : > { %v866_v26 = vmul.f32 %v865_v25, %v849_v10 }
 0x550   : > { %v871_v28 = vmul.f32 %v1207_v24, %v866_v26 }
 0x552   : > { %v876_v29 = vadd.f32 %v1208_v27, %v871_v28 }
 0x554   : > { %877 = vst.msk [vmem:[%s1374_s10] sm:$0xff] %vm612_vm0, %v876_v29  ;;  %v882_v30 = vpack.c.bf16 %v876_v29, %v876_v29 }
 0x556   : > { %1149 = vmatmul.msk.bf16.vlgmr.msra.gmra.mxu2 %vm612_vm0, %v882_v30 }
 0x5d9   : > { %v911_v32 = vpop.f32.mrf.mxu2 }
 0x5da   : > { %v912_v33 = vadd.f32 %v1209_v31, %v911_v32 }
 0x5dc   : > { %v915_v34 = vpack.c.bf16 %v912_v33, %v912_v33 }
 0x5de   : > { %917 = vst.msk [vmem:[%s1379_s27] sm:$0xf] %vm916_vm13, %v915_v34 }
 0x5e1   : > { %v913_v35 = vpop.f32.mrf.mxu2 }
 0x5e2 PF: > { %s1504_s23 = sld [smem:[#allocation4_spill]] }
 0x5e3   : > { %s1505_s18 = sld [smem:[#allocation3_spill]] }
 0x5e4   : > { %s1506_s19 = sld [smem:[#allocation5_spill]] }
 0x5e8   : > { %s26_s20 = sadd.s32 1, %s1504_s23  }
 0x5e9   : > { %p23_p6 = scmp.ge.s32.totalorder %s26_s20, 4  }
 0x5eb   :  { %25 = sbr.rel (!%p23_p6) target bundleno = 4 (0x4), region = 149 }

// kernel: hierarchical_block_forward.11
= control target key start
LH: loop header
LB: loop body
LE: loop exit
PB: predicated region body
PF: predicated region fallthrough
CT: control target
= control target key end

     0   :  { %s1594_s25 = smov 0   ;;  %s1812_s0 = inlined_call_operand.vmem [shape: f32[2,8,32], index: 0, kind: input, shape index: {}]   ;;  %s1813_s1 = inlined_call_operand.vmem [shape: bf16[3,32,32], index: 1, kind: input, shape index: {}]   ;;  %s1814_s2 = inlined_call_operand.vmem [shape: f32[1,32], index: 2, kind: input, shape index: {}]   ;;  %s1815_s3 = inlined_call_operand.vmem [shape: f32[1,32], index: 3, kind: input, shape index: {}]   ;;  %s1816_s4 = inlined_call_operand.vmem [shape: f32[1,32], index: 4, kind: input, shape index: {}]   ;;  %s1817_s5 = inlined_call_operand.vmem [shape: bf16[4,32,16], index: 5, kind: input, shape index: {}]   ;;  %s1818_s6 = inlined_call_operand.vmem [shape: f32[4,1,16], index: 6, kind: input, shape index: {}]   ;;  %s1819_s7 = inlined_call_operand.vmem [shape: bf16[4,32,16], index: 7, kind: input, shape index: {}]   ;;  %s1820_s8 = inlined_call_operand.vmem [shape: f32[4,1,16], index: 8, kind: input, shape index: {}]   ;;  %s1821_s9 = inlined_call_operand.vmem [shape: bf16[4,32,16], index: 9, kind: input, shape index: {}]   ;;  %s1822_s10 = inlined_call_operand.vmem [shape: f32[4,1,16], index: 10, kind: input, shape index: {}]   ;;  %s1823_s11 = inlined_call_operand.vmem [shape: bf16[2,4,8,16], index: 11, kind: output, shape index: {0}]   ;;  %s1824_s12 = inlined_call_operand.vmem [shape: bf16[2,4,8,16], index: 12, kind: output, shape index: {1}]   ;;  %s1825_s13 = inlined_call_operand.vmem [shape: bf16[2,4,8,16], index: 13, kind: output, shape index: {2}]  }
   0x1 LB: > { %s1240_s26 = sadd.s32 4294967295, %s1521_s25   ;;  %p1244_p0 = scmp.ge.s32.totalorder %s1521_s25, 1  ;;  %s1521_s25 = sphi %s1594_s25, %s24_s25  }
   0x2   : > { %p391_p1 = scmp.lt.s32.totalorder %s1521_s25, 3 }
   0x4   : > { %p392_p2 = pnand %p1244_p0, %p391_p1 }
   0x5   : > { %p444_p3 = scmp.lt.s32.totalorder (!%p392_p2), %s1240_s26, 1 }
   0x6   : > { %395 = sbr.rel (%p392_p2) target bundleno = 647 (0x287), region = 64 }
   0xb   : > { %v1460_v0 = vld [vmem:[%s1813_s1 + $0x28] sm:$0xff]  ;;  %v1458_v2 = vld [vmem:[%s1813_s1 + $0x18] sm:$0xff]  ;;  %v1459_v3 = vld [vmem:[%s1813_s1 + $0x20] sm:$0xff]  ;;  %s1827_s26 = smov (!%p444_p3, %s1240_s26), 1  ;;  %vm492_vm0 = vcmask 261120   ;;  %vm473_vm1 = vcmask 1043456  }
   0xc   : > { %v1456_v1 = vld [vmem:[%s1813_s1 + $0x8] sm:$0xff]  ;;  %576 = vmatpush.bf16.msra.mxu2 %v1460_v0  ;;  %v1455_v4 = vld [vmem:[%s1813_s1] sm:$0xff]  ;;  %v1457_v5 = vld [vmem:[%s1813_s1 + $0x10] sm:$0xff]  ;;  %541 = vmatpush.bf16.msra.mxu1 %v1458_v2  ;;  %s1245_s22 = sshll.u32 %s1827_s26, 3  ;;  %vm512_vm2 = vcmask 1041408   ;;  %v1523_v25 = vmov 32.0  }
   0xd   : > { %502 = vmatpush.bf16.msra.mxu0 %v1456_v1  ;;  %s447_s27 = scalar_lea.vmem %s1812_s0, %s1245_s22  ;;  %v1494_v14 = vld [vmem:[%s1814_s2] ss:$0 sm:$0xff]  ;;  %1509 = vrcp.f32 %v1523_v25  ;;  %v1468_v63 = vld [vmem:[%s1817_s5 + $0x18] sm:$0xff]  ;;  %v1464_v0 = vld [vmem:[%s1819_s7 + $0x8] sm:$0xff]  ;;  %s1452_s24 = sshll.u32 %s1827_s26, 4  ;;  %vm705_vm11 = vcmask 125952  }
   0xe   : > { %v464_v6 = vld [vmem:[%s447_s27] sm:$0xff]  ;;  %v1466_v1 = vld [vmem:[%s1821_s9 + $0x8] sm:$0xff]  ;;  %s1743_s29 = scalar_lea.vmem %s1824_s12, %s1452_s24  ;;  %s1748_s15 = scalar_lea.vmem %s1825_s13, %s1452_s24 }
   0xf   : > { %v549_v7 = vpack.c.bf16 %v464_v6, %v464_v6  ;;  %v471_v8 = vrot.slane %v464_v6, 4  ;;  %v510_v9 = vrot.slane %v464_v6, 6  ;;  %v1495_v46 = vld [vmem:[%s1815_s3] ss:$0 sm:$0xff]  ;;  %v1467_v6 = vld [vmem:[%s1817_s5 + $0x10] sm:$0xff]  ;;  %s1763_s21 = scalar_lea.vmem %s1823_s11, %s1452_s24 }
  0x10   : > { %577 = vmatpush.bf16.msra.mxu2 %v1459_v3  ;;  %542 = vmatpush.bf16.msra.mxu1 %v1457_v5  ;;  %v1496_v48 = vld [vmem:[%s1816_s4] ss:$0 sm:$0xff]  ;;  %v1462_v3 = vld [vmem:[%s1817_s5 + $0x8] sm:$0xff] }
  0x11   : > { %503 = vmatpush.bf16.msra.mxu0 %v1455_v4  ;;  %v474_v10 = vsel %vm473_vm1, 0.0, %v471_v8  ;;  %v513_v11 = vsel %vm512_vm2, 0.0, %v510_v9  ;;  %697 = vmatpush.bf16.msra.mxu3 %v1462_v3  ;;  %v1463_v8 = vld [vmem:[%s1819_s7] sm:$0xff] }
  0x12   : > { %v475_v12 = vpack.c.bf16 %v474_v10, %v474_v10  ;;  %v514_v13 = vpack.c.bf16 %v513_v11, %v513_v11  ;;  %v1465_v10 = vld [vmem:[%s1821_s9] sm:$0xff] }
  0x13   : > { %1286 = vmatmul.msk.bf16.vlgmr.msra.gmra.mxu2 %vm492_vm0, %v549_v7  ;;  %v1510_v26 = vpop.eup %1509  ;;  %v1461_v7 = vld [vmem:[%s1817_s5] sm:$0xff] }
  0x14   : > { %1260 = vmatmul.msk.bf16.vlgmr.msra.gmra.mxu0 %vm492_vm0, %v475_v12  ;;  %1273 = vmatmul.msk.bf16.vlgmr.msra.gmra.mxu1 %vm492_vm0, %v514_v13  ;;  %v588_v27 = vmul.f32 32.0, %v1510_v26  ;;  %vm592_vm3 = vweird.f32 %v1510_v26 }
  0x15   : > { %805 = vmatpush.bf16.msrb.mxu2 %v1468_v63  ;;  %733 = vmatpush.bf16.msrb.mxu0 %v1464_v0 }
  0x16   : > { %v589_v28 = vsub.f32 1.0, %v588_v27  ;;  %768 = vmatpush.bf16.msrb.mxu1 %v1466_v1  ;;  %698 = vmatpush.bf16.msra.mxu3 %v1461_v7 }
  0x18   : > { %v590_v29 = vmul.f32 %v1510_v26, %v589_v28 }
  0x19   : > { %806 = vmatpush.bf16.msrb.mxu2 %v1467_v6  ;;  %734 = vmatpush.bf16.msrb.mxu0 %v1463_v8  ;;  %v1501_v6 = vld [vmem:[%s1822_s10 + $0x1] ss:$0 sm:$0xff]  ;;  %v1502_v8 = vld [vmem:[%s1818_s6 + $0x2] ss:$0 sm:$0xff] }
  0x1a   : > { %v591_v30 = vadd.f32 %v1510_v26, %v590_v29  ;;  %769 = vmatpush.bf16.msrb.mxu1 %v1465_v10 }
  0x1c   : > { %v593_v31 = vsel %vm592_vm3, %v1510_v26, %v591_v30 }
  0x91   : > { %v505_v15 = vpop.f32.mrf.mxu0  ;;  %v544_v16 = vpop.f32.mrf.mxu1 }
  0x92   : > { %v509_v17 = vadd.f32 %v1494_v14, %v505_v15  ;;  %v1470_v14 = vld [vmem:[%s1819_s7 + $0x18] sm:$0xff]  ;;  %v1476_v15 = vld [vmem:[%s1819_s7 + $0x28] sm:$0xff] }
  0x93   : > { %843 = vmatpush.bf16.msrb.mxu3 %v1470_v14  ;;  %957 = vmatpush.bf16.msra.mxu2 %v1476_v15  ;;  %v1503_v15 = vld [vmem:[%s1820_s8 + $0x1] ss:$0 sm:$0xff] }
  0x94   : > { %v548_v18 = vadd.f32 %v544_v16, %v509_v17  ;;  %v1472_v16 = vld [vmem:[%s1821_s9 + $0x18] sm:$0xff]  ;;  %v1474_v17 = vld [vmem:[%s1817_s5 + $0x28] sm:$0xff] }
  0x95   : > { %881 = vmatpush.bf16.msra.mxu0 %v1472_v16  ;;  %919 = vmatpush.bf16.msra.mxu1 %v1474_v17  ;;  %v1504_v17 = vld [vmem:[%s1820_s8 + $0x2] ss:$0 sm:$0xff] }
  0x96   : > { %v579_v19 = vpop.f32.mrf.mxu2 }
  0x97   : > { %v583_v20 = vadd.f32 %v579_v19, %v548_v18  ;;  %v1469_v19 = vld [vmem:[%s1819_s7 + $0x10] sm:$0xff] }
  0x98   : > { %844 = vmatpush.bf16.msrb.mxu3 %v1469_v19 }
  0x99   : > { %v584_v21 = vsel %vm492_vm0, %v583_v20, 0.0  ;;  %v546_v22 = vpop.f32.mrf.mxu1  ;;  %v507_v23 = vpop.f32.mrf.mxu0 }
  0x9a   : > { %585 = vadd.xlane.f32.xlu0 %v584_v21  ;;  %v1471_v22 = vld [vmem:[%s1821_s9 + $0x10] sm:$0xff]  ;;  %v1473_v23 = vld [vmem:[%s1817_s5 + $0x20] sm:$0xff] }
  0x9b   : > { %882 = vmatpush.bf16.msra.mxu0 %v1471_v22  ;;  %920 = vmatpush.bf16.msra.mxu1 %v1473_v23 }
  0x9e   : > { %v581_v24 = vpop.f32.mrf.mxu2 }
 0x10d   : > { %v586_v32 = vpop.xlane.xlu0 %585 }
 0x10e   : > { %v594_v33 = vmul.f32 %v593_v31, %v586_v32 }
 0x110   : > { %v595_v34 = vsub.f32 %v583_v20, %v594_v33  ;;  %v1475_v20 = vld [vmem:[%s1819_s7 + $0x20] sm:$0xff] }
 0x111   : > { %958 = vmatpush.bf16.msra.mxu2 %v1475_v20 }
 0x112   : > { %v596_v35 = vmul.f32 %v595_v34, %v595_v34 }
 0x114   : > { %v597_v36 = vsel %vm492_vm0, %v596_v35, 0.0 }
 0x115   : > { %598 = vadd.xlane.f32.xlu0 %v597_v36 }
 0x188   : > { %v599_v37 = vpop.xlane.xlu0 %598 }
 0x189   : > { %v600_v38 = vmul.f32 %v599_v37, %v593_v31 }
 0x18b   : > { %v601_v39 = vadd.f32 1e-05, %v600_v38 }
 0x18d   : > { %1511 = vrsqrt.f32 %v601_v39  ;;  %vm608_vm5 = vweird.f32 %v601_v39 }
 0x193   : > { %v1512_v40 = vpop.eup %1511 }
 0x194   : > { %v603_v41 = vmul.f32 %v1512_v40, %v601_v39  ;;  %vm609_vm4 = vweird.f32 %v1512_v40 }
 0x195   : > { %vm610_vm6 = vmor %vm608_vm5, %vm609_vm4 }
 0x196   : > { %v604_v42 = vmul.f32 %v1512_v40, %v603_v41 }
 0x198   : > { %v605_v43 = vmul.f32 0.5, %v604_v42 }
 0x19a   : > { %v606_v44 = vsub.f32 1.5, %v605_v43 }
 0x19c   : > { %v607_v45 = vmul.f32 %v1512_v40, %v606_v44  ;;  %v1478_v44 = vld [vmem:[%s1821_s9 + $0x28] sm:$0xff] }
 0x19e   : > { %v611_v47 = vsel %vm610_vm6, %v1512_v40, %v607_v45  ;;  %v1484_v45 = vld [vmem:[%s1821_s9 + $0x38] sm:$0xff] }
 0x19f   : > { %v612_v49 = vmul.f32 %v611_v47, %v595_v34  ;;  %v1482_v47 = vld [vmem:[%s1819_s7 + $0x38] sm:$0xff] }
 0x1a1   : > { %v617_v50 = vmul.f32 %v1495_v46, %v612_v49  ;;  %v1480_v46 = vld [vmem:[%s1817_s5 + $0x38] sm:$0xff]  ;;  %v1483_v49 = vld [vmem:[%s1821_s9 + $0x30] sm:$0xff] }
 0x1a3   : > { %v1640_v51 = vadd.f32 %v1496_v48, %v617_v50  ;;  %v1477_v48 = vld [vmem:[%s1821_s9 + $0x20] sm:$0xff]  ;;  %v1479_v50 = vld [vmem:[%s1817_s5 + $0x30] sm:$0xff] }
 0x1a5   : > { %v1643_v52 = vmul.f32 0.70710677, %v1640_v51  ;;  %v623_v40 = vmul.f32 0.5, %v1640_v51  ;;  %v1481_v51 = vld [vmem:[%s1819_s7 + $0x30] sm:$0xff] }
 0x1a7   : > { %v625_v53 = vmul.f32 %v1643_v52, %v1643_v52 }
 0x1a9   : > { %v626_v54 = vmin.f32 %v625_v53, 16.0  ;;  %v1498_v53 = vld [vmem:[%s1822_s10] ss:$0 sm:$0xff] }
 0x1ab   : > { %v627_v55 = vmul.f32 2.1237322e-06, %v626_v54  ;;  %v638_v56 = vmul.f32 3.8918573e-05, %v626_v54 }
 0x1ad   : > { %v628_v57 = vadd.f32 0.00028619796, %v627_v55  ;;  %v639_v58 = vadd.f32 0.001143296, %v638_v56 }
 0x1af   : > { %v629_v59 = vmul.f32 %v628_v57, %v626_v54  ;;  %v640_v60 = vmul.f32 %v639_v58, %v626_v54 }
 0x1b1   : > { %v641_v61 = vadd.f32 0.014752088, %v640_v60  ;;  %v630_v62 = vadd.f32 0.0036580483, %v629_v59  ;;  %v1499_v59 = vld [vmem:[%s1818_s6] ss:$0 sm:$0xff] }
 0x1b3   : > { %v642_v2 = vmul.f32 %v641_v61, %v626_v54  ;;  %v631_v5 = vmul.f32 %v630_v62, %v626_v54  ;;  %v1500_v61 = vld [vmem:[%s1818_s6 + $0x1] ss:$0 sm:$0xff] }
 0x1b5   : > { %v643_v4 = vadd.f32 0.112945676, %v642_v2  ;;  %v632_v12 = vadd.f32 0.05243302, %v631_v5 }
 0x1b7   : > { %v644_v9 = vmul.f32 %v643_v4, %v626_v54  ;;  %v633_v21 = vmul.f32 %v632_v12, %v626_v54 }
 0x1b9   : > { %v645_v11 = vadd.f32 0.4994258, %v644_v9  ;;  %v634_v24 = vadd.f32 0.18741608, %v633_v21 }
 0x1bb   : > { %v646_v13 = vmul.f32 %v645_v11, %v626_v54  ;;  %v635_v26 = vmul.f32 %v634_v24, %v626_v54 }
 0x1bd   : > { %v647_v18 = vadd.f32 1.0, %v646_v13  ;;  %v636_v30 = vadd.f32 1.1283791, %v635_v26  ;;  %v1505_v26 = vld [vmem:[%s1818_s6 + $0x3] ss:$0 sm:$0xff] }
 0x1bf   : > { %1513 = vrcp.f32 %v647_v18  ;;  %v659_v29 = vand.u32 2147483648, %v647_v18  ;;  %v657_v32 = vand.u32 2147483647, %v647_v18  ;;  %vm653_vm8 = vweird.f32 %v647_v18 }
 0x1c0   : > { %v637_v35 = vmul.f32 %v636_v30, %v1643_v52  ;;  %v1497_v52 = vld [vmem:[%s1820_s8] ss:$0 sm:$0xff] }
 0x1c1   : > { %v660_v34 = vor.u32 1.1754944e-38, %v659_v29  ;;  %vm658_vm10 = vcmp.eq.f32.partialorder %v657_v32, 8.507059e+37 }
 0x1c5   : > { %v1514_v25 = vpop.eup %1513 }
 0x1c6   : > { %v649_v27 = vmul.f32 %v1514_v25, %v647_v18  ;;  %vm654_vm7 = vweird.f32 %v1514_v25 }
 0x1c7   : > { %vm655_vm9 = vmor %vm653_vm8, %vm654_vm7 }
 0x1c8   : > { %v650_v28 = vsub.f32 1.0, %v649_v27 }
 0x1ca   : > { %v651_v31 = vmul.f32 %v1514_v25, %v650_v28  ;;  %v1506_v28 = vld [vmem:[%s1820_s8 + $0x3] ss:$0 sm:$0xff] }
 0x1cc   : > { %v652_v33 = vadd.f32 %v1514_v25, %v651_v31 }
 0x1ce   : > { %v656_v36 = vsel %vm655_vm9, %v1514_v25, %v652_v33 }
 0x1cf   : > { %v661_v37 = vsel %vm658_vm10, %v660_v34, %v656_v36 }
 0x1d0   : > { %v662_v38 = vmul.f32 %v661_v37, %v637_v35  ;;  %v1507_v35 = vld [vmem:[%s1822_s10 + $0x2] ss:$0 sm:$0xff]  ;;  %v1508_v37 = vld [vmem:[%s1822_s10 + $0x3] ss:$0 sm:$0xff] }
 0x1d2   : > { %v1287_v39 = vclamps-f32 %v662_v38, 1.0 }
 0x1d4   : > { %v665_v41 = vadd.f32 1.0, %v1287_v39 }
 0x1d6   : > { %v666_v42 = vmul.f32 %v665_v41, %v623_v40 }
 0x1d8   : > { %v667_v43 = vpack.c.bf16 %v666_v42, %v666_v42 }
 0x1da   : > { %1296 = vmatmul.msk.bf16.vlgmr.msra.gmra.mxu3 %vm492_vm0, %v667_v43  ;;  %1305 = vmatmul.msk.bf16.vlgmr.msrb.gmra.mxu0 %vm492_vm0, %v667_v43 }
 0x1db   : > { %1314 = vmatmul.msk.bf16.vlgmr.msrb.gmra.mxu1 %vm492_vm0, %v667_v43  ;;  %1328 = vmatmul.msk.bf16.vlgmr.msrb.gmra.mxu2 %vm492_vm0, %v667_v43 }
 0x1dc   : > { %995 = vmatpush.bf16.msra.mxu3 %v1478_v44  ;;  %1109 = vmatpush.bf16.msrb.mxu2 %v1484_v45 }
 0x1dd   : > { %1033 = vmatpush.bf16.msrb.mxu0 %v1480_v46  ;;  %1071 = vmatpush.bf16.msrb.mxu1 %v1482_v47 }
 0x1e0   : > { %996 = vmatpush.bf16.msra.mxu3 %v1477_v48  ;;  %1110 = vmatpush.bf16.msrb.mxu2 %v1483_v49 }
 0x1e1   : > { %1034 = vmatpush.bf16.msrb.mxu0 %v1479_v50  ;;  %1072 = vmatpush.bf16.msrb.mxu1 %v1481_v51 }
 0x1ea   : > { %1343 = vmatmul.msk.bf16.vlgmr.msrb.gmra.mxu3 %vm492_vm0, %v667_v43  ;;  %1358 = vmatmul.msk.bf16.vlgmr.msra.gmra.mxu0 %vm492_vm0, %v667_v43 }
 0x1eb   : > { %1373 = vmatmul.msk.bf16.vlgmr.msra.gmra.mxu1 %vm492_vm0, %v667_v43  ;;  %1388 = vmatmul.msk.bf16.vlgmr.msra.gmra.mxu2 %vm492_vm0, %v667_v43 }
 0x1fa   : > { %1403 = vmatmul.msk.bf16.vlgmr.msra.gmra.mxu3 %vm492_vm0, %v667_v43  ;;  %1418 = vmatmul.msk.bf16.vlgmr.msrb.gmra.mxu0 %vm492_vm0, %v667_v43 }
 0x1fb   : > { %1433 = vmatmul.msk.bf16.vlgmr.msrb.gmra.mxu1 %vm492_vm0, %v667_v43  ;;  %1448 = vmatmul.msk.bf16.vlgmr.msrb.gmra.mxu2 %vm492_vm0, %v667_v43 }
 0x257   : > { %v736_v54 = vpop.f32.mrf.mxu0 }
 0x258   : > { %v737_v55 = vadd.f32 %v1497_v52, %v736_v54  ;;  %v771_v56 = vpop.f32.mrf.mxu1 }
 0x259   : > { %v772_v57 = vadd.f32 %v1498_v53, %v771_v56 }
 0x25a   : > { %v740_v58 = vpack.c.bf16 %v737_v55, %v737_v55 }
 0x25b   : > { %v775_v60 = vpack.c.bf16 %v772_v57, %v772_v57 }
 0x25c   : > { %741 = vst.msk [vmem:[%s1743_s29] sm:$0xf] %vm705_vm11, %v740_v58 }
 0x25d   : > { %776 = vst.msk [vmem:[%s1748_s15] sm:$0xf] %vm705_vm11, %v775_v60  ;;  %v700_v62 = vpop.f32.mrf.mxu3 }
 0x25e   : > { %v701_v63 = vadd.f32 %v1499_v59, %v700_v62  ;;  %v808_v0 = vpop.f32.mrf.mxu2 }
 0x25f   : > { %v809_v1 = vadd.f32 %v1500_v61, %v808_v0  ;;  %v738_v2 = vpop.f32.mrf.mxu0 }
 0x260   : > { %v704_v3 = vpack.c.bf16 %v701_v63, %v701_v63  ;;  %v773_v4 = vpop.f32.mrf.mxu1 }
 0x261   : > { %v812_v5 = vpack.c.bf16 %v809_v1, %v809_v1 }
 0x262   : > { %706 = vst.msk [vmem:[%s1763_s21] sm:$0xf] %vm705_vm11, %v704_v3 }
 0x263   : > { %1329 = vst.msk [vmem:[%s1763_s21 + $0x4] sm:$0xf] %vm705_vm11, %v812_v5 }
 0x265   : > { %v702_v7 = vpop.f32.mrf.mxu3 }
 0x266   : > { %v810_v9 = vpop.f32.mrf.mxu2 }
 0x267   : > { %v884_v10 = vpop.f32.mrf.mxu0 }
 0x268   : > { %v885_v11 = vadd.f32 %v1501_v6, %v884_v10  ;;  %v922_v12 = vpop.f32.mrf.mxu1 }
 0x269   : > { %v923_v13 = vadd.f32 %v1502_v8, %v922_v12 }
 0x26a   : > { %v888_v14 = vpack.c.bf16 %v885_v11, %v885_v11 }
 0x26b   : > { %v926_v16 = vpack.c.bf16 %v923_v13, %v923_v13 }
 0x26c   : > { %1359 = vst.msk [vmem:[%s1748_s15 + $0x4] sm:$0xf] %vm705_vm11, %v888_v14 }
 0x26d   : > { %1374 = vst.msk [vmem:[%s1763_s21 + $0x8] sm:$0xf] %vm705_vm11, %v926_v16  ;;  %v846_v18 = vpop.f32.mrf.mxu3 }
 0x26e   : > { %v847_v19 = vadd.f32 %v1503_v15, %v846_v18  ;;  %v960_v20 = vpop.f32.mrf.mxu2 }
 0x26f   : > { %v961_v21 = vadd.f32 %v1504_v17, %v960_v20  ;;  %v886_v22 = vpop.f32.mrf.mxu0 }
 0x270   : > { %v850_v23 = vpack.c.bf16 %v847_v19, %v847_v19  ;;  %v924_v24 = vpop.f32.mrf.mxu1 }
 0x271   : > { %v964_v25 = vpack.c.bf16 %v961_v21, %v961_v21 }
 0x272   : > { %1344 = vst.msk [vmem:[%s1743_s29 + $0x4] sm:$0xf] %vm705_vm11, %v850_v23 }
 0x273   : > { %1389 = vst.msk [vmem:[%s1743_s29 + $0x8] sm:$0xf] %vm705_vm11, %v964_v25 }
 0x275   : > { %v848_v27 = vpop.f32.mrf.mxu3 }
 0x276   : > { %v962_v29 = vpop.f32.mrf.mxu2 }
 0x277   : > { %v1036_v30 = vpop.f32.mrf.mxu0 }
 0x278   : > { %v1037_v31 = vadd.f32 %v1505_v26, %v1036_v30  ;;  %v1074_v32 = vpop.f32.mrf.mxu1 }
 0x279   : > { %v1075_v33 = vadd.f32 %v1506_v28, %v1074_v32 }
 0x27a   : > { %v1040_v34 = vpack.c.bf16 %v1037_v31, %v1037_v31 }
 0x27b   : > { %v1078_v36 = vpack.c.bf16 %v1075_v33, %v1075_v33 }
 0x27c   : > { %1419 = vst.msk [vmem:[%s1763_s21 + $0xc] sm:$0xf] %vm705_vm11, %v1040_v34 }
 0x27d   : > { %1434 = vst.msk [vmem:[%s1743_s29 + $0xc] sm:$0xf] %vm705_vm11, %v1078_v36  ;;  %v998_v38 = vpop.f32.mrf.mxu3 }
 0x27e   : > { %v999_v39 = vadd.f32 %v1507_v35, %v998_v38  ;;  %v1112_v40 = vpop.f32.mrf.mxu2 }
 0x27f   : > { %v1113_v41 = vadd.f32 %v1508_v37, %v1112_v40  ;;  %v1038_v42 = vpop.f32.mrf.mxu0 }
 0x280   : > { %v1002_v43 = vpack.c.bf16 %v999_v39, %v999_v39  ;;  %v1076_v44 = vpop.f32.mrf.mxu1 }
 0x281   : > { %v1116_v45 = vpack.c.bf16 %v1113_v41, %v1113_v41 }
 0x282   : > { %1404 = vst.msk [vmem:[%s1748_s15 + $0x8] sm:$0xf] %vm705_vm11, %v1002_v43 }
 0x283   : > { %1449 = vst.msk [vmem:[%s1748_s15 + $0xc] sm:$0xf] %vm705_vm11, %v1116_v45 }
 0x285   : > { %v1000_v46 = vpop.f32.mrf.mxu3 }
 0x286   : > { %v1114_v47 = vpop.f32.mrf.mxu2 }
 0x287 PF: > { %s24_s25 = sadd.s32 1, %s1521_s25  }
 0x288   : > { %p21_p4 = scmp.ge.s32.totalorder %s24_s25, 4  }
 0x28a   :  { %23 = sbr.rel (!%p21_p4) target bundleno = 1 (0x1), region = 147 }

// kernel: hierarchical_block_forward.13
= control target key start
LH: loop header
LB: loop body
LE: loop exit
PB: predicated region body
PF: predicated region fallthrough
CT: control target
= control target key end

     0   :  { %s1545_s25 = smov 0   ;;  %s1756_s0 = inlined_call_operand.vmem [shape: f32[2,8,32], index: 0, kind: input, shape index: {}]   ;;  %s1757_s1 = inlined_call_operand.vmem [shape: bf16[3,32,32], index: 1, kind: input, shape index: {}]   ;;  %s1758_s2 = inlined_call_operand.vmem [shape: f32[1,32], index: 2, kind: input, shape index: {}]   ;;  %s1759_s3 = inlined_call_operand.vmem [shape: f32[1,32], index: 3, kind: input, shape index: {}]   ;;  %s1760_s4 = inlined_call_operand.vmem [shape: f32[1,32], index: 4, kind: input, shape index: {}]   ;;  %s1761_s5 = inlined_call_operand.vmem [shape: bf16[4,32,16], index: 5, kind: input, shape index: {}]   ;;  %s1762_s6 = inlined_call_operand.vmem [shape: f32[4,1,16], index: 6, kind: input, shape index: {}]   ;;  %s1763_s7 = inlined_call_operand.vmem [shape: bf16[4,32,16], index: 7, kind: input, shape index: {}]   ;;  %s1764_s8 = inlined_call_operand.vmem [shape: f32[4,1,16], index: 8, kind: input, shape index: {}]   ;;  %s1765_s9 = inlined_call_operand.vmem [shape: bf16[4,32,16], index: 9, kind: input, shape index: {}]   ;;  %s1766_s10 = inlined_call_operand.vmem [shape: f32[4,1,16], index: 10, kind: input, shape index: {}]   ;;  %s1767_s11 = inlined_call_operand.vmem [shape: bf16[2,4,8,16], index: 11, kind: output, shape index: {0}]   ;;  %s1768_s12 = inlined_call_operand.vmem [shape: bf16[2,4,8,16], index: 12, kind: output, shape index: {1}]   ;;  %s1769_s13 = inlined_call_operand.vmem [shape: bf16[2,4,8,16], index: 13, kind: output, shape index: {2}]  }
   0x1 LB: > { %s1202_s26 = sadd.s32 4294967295, %s1472_s25   ;;  %p1206_p0 = scmp.ge.s32.totalorder %s1472_s25, 1  ;;  %s1472_s25 = sphi %s1545_s25, %s24_s25  }
   0x2   : > { %p391_p1 = scmp.lt.s32.totalorder %s1472_s25, 3 }
   0x4   : > { %p392_p2 = pnand %p1206_p0, %p391_p1 }
   0x5   : > { %p444_p3 = scmp.lt.s32.totalorder (!%p392_p2), %s1202_s26, 1 }
   0x6   : > { %395 = sbr.rel (%p392_p2) target bundleno = 643 (0x283), region = 64 }
   0xb   : > { %v1411_v0 = vld [vmem:[%s1757_s1 + $0x28] sm:$0xff]  ;;  %v1409_v1 = vld [vmem:[%s1757_s1 + $0x18] sm:$0xff]  ;;  %v1410_v2 = vld [vmem:[%s1757_s1 + $0x20] sm:$0xff]  ;;  %s1771_s26 = smov (!%p444_p3, %s1202_s26), 1  ;;  %vm493_vm0 = vcmask 261120   ;;  %vm473_vm1 = vcmask 1043456  }
   0xc   : > { %538 = vmatpush.bf16.msra.mxu1 %v1411_v0  ;;  %503 = vmatpush.bf16.msra.mxu0 %v1409_v1  ;;  %v1408_v3 = vld [vmem:[%s1757_s1 + $0x10] sm:$0xff]  ;;  %s1207_s18 = sshll.u32 %s1771_s26, 3  ;;  %v1445_v10 = vld [vmem:[%s1758_s2] ss:$0 sm:$0xff]  ;;  %v1474_v17 = vmov 32.0   ;;  %v1417_v55 = vld [vmem:[%s1765_s9 + $0x8] sm:$0xff] }
   0xd   : > { %s447_s21 = scalar_lea.vmem %s1756_s0, %s1207_s18  ;;  %1460 = vrcp.f32 %v1474_v17  ;;  %v1446_v38 = vld [vmem:[%s1759_s3] ss:$0 sm:$0xff]  ;;  %v1419_v56 = vld [vmem:[%s1761_s5 + $0x18] sm:$0xff]  ;;  %v1413_v57 = vld [vmem:[%s1761_s5 + $0x8] sm:$0xff]  ;;  %s1405_s20 = sshll.u32 %s1771_s26, 4  ;;  %vm667_vm10 = vcmask 125952  }
   0xe   : > { %v464_v4 = vld [vmem:[%s447_s21] sm:$0xff]  ;;  %v1415_v59 = vld [vmem:[%s1763_s7 + $0x8] sm:$0xff]  ;;  %659 = vmatpush.bf16.msra.mxu2 %v1413_v57  ;;  %s1687_s23 = scalar_lea.vmem %s1769_s13, %s1405_s20  ;;  %s1698_s14 = scalar_lea.vmem %s1767_s11, %s1405_s20 }
   0xf   : > { %v471_v5 = vrot.slane %v464_v4, 4  ;;  %v511_v6 = vpack.c.bf16 %v464_v4, %v464_v4  ;;  %v1447_v40 = vld [vmem:[%s1760_s4] ss:$0 sm:$0xff]  ;;  %695 = vmatpush.bf16.msra.mxu3 %v1415_v59  ;;  %s1707_s17 = scalar_lea.vmem %s1768_s12, %s1405_s20 }
  0x10   : > { %539 = vmatpush.bf16.msra.mxu1 %v1410_v2  ;;  %504 = vmatpush.bf16.msra.mxu0 %v1408_v3  ;;  %v1412_v62 = vld [vmem:[%s1761_s5] sm:$0xff]  ;;  %v1418_v2 = vld [vmem:[%s1761_s5 + $0x10] sm:$0xff] }
  0x11   : > { %v474_v7 = vsel %vm473_vm1, 0.0, %v471_v5  ;;  %v1414_v63 = vld [vmem:[%s1763_s7] sm:$0xff] }
  0x12   : > { %v475_v8 = vpack.c.bf16 %v474_v7, %v474_v7  ;;  %v1416_v0 = vld [vmem:[%s1765_s9] sm:$0xff]  ;;  %660 = vmatpush.bf16.msra.mxu2 %v1412_v62  ;;  %v1423_v7 = vld [vmem:[%s1765_s9 + $0x18] sm:$0xff] }
  0x13   : > { %1239 = vmatmul.msk.bf16.vlgmr.msra.gmra.mxu1 %vm493_vm0, %v511_v6  ;;  %v1461_v18 = vpop.eup %1460  ;;  %696 = vmatpush.bf16.msra.mxu3 %v1414_v63  ;;  %v1421_v6 = vld [vmem:[%s1763_s7 + $0x18] sm:$0xff] }
  0x14   : > { %1226 = vmatmul.msk.bf16.vlgmr.msra.gmra.mxu0 %vm493_vm0, %v475_v8  ;;  %v550_v19 = vmul.f32 32.0, %v1461_v18  ;;  %vm554_vm2 = vweird.f32 %v1461_v18  ;;  %767 = vmatpush.bf16.msrb.mxu1 %v1419_v56  ;;  %v1425_v8 = vld [vmem:[%s1761_s5 + $0x28] sm:$0xff] }
  0x15   : > { %730 = vmatpush.bf16.msrb.mxu0 %v1417_v55 }
  0x16   : > { %v551_v20 = vsub.f32 1.0, %v550_v19  ;;  %805 = vmatpush.bf16.msrb.mxu2 %v1421_v6  ;;  %v1454_v6 = vld [vmem:[%s1764_s8 + $0x1] ss:$0 sm:$0xff] }
  0x17   : > { %843 = vmatpush.bf16.msrb.mxu3 %v1423_v7  ;;  %v1455_v7 = vld [vmem:[%s1766_s10 + $0x1] ss:$0 sm:$0xff] }
  0x18   : > { %v552_v21 = vmul.f32 %v1461_v18, %v551_v20  ;;  %768 = vmatpush.bf16.msrb.mxu1 %v1418_v2 }
  0x19   : > { %731 = vmatpush.bf16.msrb.mxu0 %v1416_v0  ;;  %v1452_v0 = vld [vmem:[%s1762_s6 + $0x2] ss:$0 sm:$0xff] }
  0x1a   : > { %v553_v22 = vadd.f32 %v1461_v18, %v552_v21 }
  0x1c   : > { %v555_v23 = vsel %vm554_vm2, %v1461_v18, %v553_v22 }
  0x1d   : > { %881 = vmatpush.bf16.msra.mxu0 %v1425_v8 }
  0x90   : > { %v541_v9 = vpop.f32.mrf.mxu1 }
  0x91   : > { %v506_v11 = vpop.f32.mrf.mxu0 }
  0x92   : > { %v510_v12 = vadd.f32 %v1445_v10, %v506_v11  ;;  %v1420_v11 = vld [vmem:[%s1763_s7 + $0x10] sm:$0xff] }
  0x93   : > { %806 = vmatpush.bf16.msrb.mxu2 %v1420_v11 }
  0x94   : > { %v545_v13 = vadd.f32 %v541_v9, %v510_v12  ;;  %v1427_v9 = vld [vmem:[%s1763_s7 + $0x28] sm:$0xff]  ;;  %v1422_v12 = vld [vmem:[%s1765_s9 + $0x10] sm:$0xff] }
  0x95   : > { %919 = vmatpush.bf16.msra.mxu1 %v1427_v9  ;;  %844 = vmatpush.bf16.msrb.mxu3 %v1422_v12 }
  0x96   : > { %v546_v15 = vsel %vm493_vm0, %v545_v13, 0.0 }
  0x97   : > { %547 = vadd.xlane.f32.xlu0 %v546_v15  ;;  %v1426_v15 = vld [vmem:[%s1763_s7 + $0x20] sm:$0xff] }
  0x98   : > { %v543_v14 = vpop.f32.mrf.mxu1 }
  0x99   : > { %v508_v16 = vpop.f32.mrf.mxu0  ;;  %v1424_v14 = vld [vmem:[%s1761_s5 + $0x20] sm:$0xff]  ;;  %920 = vmatpush.bf16.msra.mxu1 %v1426_v15 }
  0x9a   : > { %882 = vmatpush.bf16.msra.mxu0 %v1424_v14 }
 0x10a   : > { %v548_v24 = vpop.xlane.xlu0 %547 }
 0x10b   : > { %v556_v25 = vmul.f32 %v555_v23, %v548_v24 }
 0x10d   : > { %v557_v26 = vsub.f32 %v545_v13, %v556_v25 }
 0x10f   : > { %v558_v27 = vmul.f32 %v557_v26, %v557_v26 }
 0x111   : > { %v559_v28 = vsel %vm493_vm0, %v558_v27, 0.0 }
 0x112   : > { %560 = vadd.xlane.f32.xlu0 %v559_v28 }
 0x185   : > { %v561_v29 = vpop.xlane.xlu0 %560 }
 0x186   : > { %v562_v30 = vmul.f32 %v561_v29, %v555_v23 }
 0x188   : > { %v563_v31 = vadd.f32 1e-05, %v562_v30 }
 0x18a   : > { %1462 = vrsqrt.f32 %v563_v31  ;;  %vm570_vm4 = vweird.f32 %v563_v31 }
 0x190   : > { %v1463_v32 = vpop.eup %1462 }
 0x191   : > { %v565_v33 = vmul.f32 %v1463_v32, %v563_v31  ;;  %vm571_vm3 = vweird.f32 %v1463_v32 }
 0x192   : > { %vm572_vm5 = vmor %vm570_vm4, %vm571_vm3 }
 0x193   : > { %v566_v34 = vmul.f32 %v1463_v32, %v565_v33 }
 0x195   : > { %v567_v35 = vmul.f32 0.5, %v566_v34 }
 0x197   : > { %v568_v36 = vsub.f32 1.5, %v567_v35 }
 0x199   : > { %v569_v37 = vmul.f32 %v1463_v32, %v568_v36  ;;  %v1429_v36 = vld [vmem:[%s1765_s9 + $0x28] sm:$0xff] }
 0x19b   : > { %v573_v39 = vsel %vm572_vm5, %v1463_v32, %v569_v37  ;;  %v1431_v37 = vld [vmem:[%s1761_s5 + $0x38] sm:$0xff] }
 0x19c   : > { %v574_v41 = vmul.f32 %v573_v39, %v557_v26  ;;  %v1435_v39 = vld [vmem:[%s1765_s9 + $0x38] sm:$0xff] }
 0x19e   : > { %v579_v42 = vmul.f32 %v1446_v38, %v574_v41  ;;  %v1433_v38 = vld [vmem:[%s1763_s7 + $0x38] sm:$0xff]  ;;  %v1430_v41 = vld [vmem:[%s1761_s5 + $0x30] sm:$0xff] }
 0x1a0   : > { %v1584_v43 = vadd.f32 %v1447_v40, %v579_v42  ;;  %v1428_v40 = vld [vmem:[%s1765_s9 + $0x20] sm:$0xff]  ;;  %v1432_v42 = vld [vmem:[%s1763_s7 + $0x30] sm:$0xff] }
 0x1a2   : > { %v1587_v44 = vmul.f32 0.70710677, %v1584_v43  ;;  %v585_v32 = vmul.f32 0.5, %v1584_v43  ;;  %v1434_v43 = vld [vmem:[%s1765_s9 + $0x30] sm:$0xff] }
 0x1a4   : > { %v587_v45 = vmul.f32 %v1587_v44, %v1587_v44 }
 0x1a6   : > { %v588_v46 = vmin.f32 %v587_v45, 16.0  ;;  %v1449_v45 = vld [vmem:[%s1762_s6 + $0x1] ss:$0 sm:$0xff] }
 0x1a8   : > { %v589_v47 = vmul.f32 2.1237322e-06, %v588_v46  ;;  %v600_v48 = vmul.f32 3.8918573e-05, %v588_v46 }
 0x1aa   : > { %v590_v49 = vadd.f32 0.00028619796, %v589_v47  ;;  %v601_v50 = vadd.f32 0.001143296, %v600_v48 }
 0x1ac   : > { %v591_v51 = vmul.f32 %v590_v49, %v588_v46  ;;  %v602_v52 = vmul.f32 %v601_v50, %v588_v46  ;;  %v1450_v50 = vld [vmem:[%s1762_s6] ss:$0 sm:$0xff] }
 0x1ae   : > { %v603_v53 = vadd.f32 0.014752088, %v602_v52  ;;  %v592_v54 = vadd.f32 0.0036580483, %v591_v51  ;;  %v1451_v51 = vld [vmem:[%s1764_s8] ss:$0 sm:$0xff] }
 0x1b0   : > { %v604_v58 = vmul.f32 %v603_v53, %v588_v46  ;;  %v593_v61 = vmul.f32 %v592_v54, %v588_v46 }
 0x1b2   : > { %v605_v60 = vadd.f32 0.112945676, %v604_v58  ;;  %v594_v4 = vadd.f32 0.05243302, %v593_v61 }
 0x1b4   : > { %v606_v1 = vmul.f32 %v605_v60, %v588_v46  ;;  %v595_v13 = vmul.f32 %v594_v4, %v588_v46 }
 0x1b6   : > { %v607_v3 = vadd.f32 0.4994258, %v606_v1  ;;  %v596_v16 = vadd.f32 0.18741608, %v595_v13  ;;  %v1453_v1 = vld [vmem:[%s1764_s8 + $0x2] ss:$0 sm:$0xff] }
 0x1b8   : > { %v608_v5 = vmul.f32 %v607_v3, %v588_v46  ;;  %v597_v18 = vmul.f32 %v596_v16, %v588_v46 }
 0x1ba   : > { %v609_v10 = vadd.f32 1.0, %v608_v5  ;;  %v598_v22 = vadd.f32 1.1283791, %v597_v18 }
 0x1bc   : > { %1464 = vrcp.f32 %v609_v10  ;;  %v621_v21 = vand.u32 2147483648, %v609_v10  ;;  %v619_v24 = vand.u32 2147483647, %v609_v10  ;;  %vm615_vm7 = vweird.f32 %v609_v10 }
 0x1bd   : > { %v599_v27 = vmul.f32 %v598_v22, %v1587_v44  ;;  %v1448_v44 = vld [vmem:[%s1766_s10] ss:$0 sm:$0xff] }
 0x1be   : > { %v622_v26 = vor.u32 1.1754944e-38, %v621_v21  ;;  %vm620_vm9 = vcmp.eq.f32.partialorder %v619_v24, 8.507059e+37  ;;  %v1457_v21 = vld [vmem:[%s1766_s10 + $0x3] ss:$0 sm:$0xff] }
 0x1c2   : > { %v1465_v17 = vpop.eup %1464 }
 0x1c3   : > { %v611_v19 = vmul.f32 %v1465_v17, %v609_v10  ;;  %vm616_vm6 = vweird.f32 %v1465_v17 }
 0x1c4   : > { %vm617_vm8 = vmor %vm615_vm7, %vm616_vm6 }
 0x1c5   : > { %v612_v20 = vsub.f32 1.0, %v611_v19 }
 0x1c7   : > { %v613_v23 = vmul.f32 %v1465_v17, %v612_v20  ;;  %v1456_v20 = vld [vmem:[%s1764_s8 + $0x3] ss:$0 sm:$0xff] }
 0x1c9   : > { %v614_v25 = vadd.f32 %v1465_v17, %v613_v23 }
 0x1cb   : > { %v618_v28 = vsel %vm617_vm8, %v1465_v17, %v614_v25 }
 0x1cc   : > { %v623_v29 = vsel %vm620_vm9, %v622_v26, %v618_v28  ;;  %v1458_v26 = vld [vmem:[%s1766_s10 + $0x2] ss:$0 sm:$0xff] }
 0x1cd   : > { %v624_v30 = vmul.f32 %v623_v29, %v599_v27  ;;  %v1459_v27 = vld [vmem:[%s1762_s6 + $0x3] ss:$0 sm:$0xff] }
 0x1cf   : > { %v1240_v31 = vclamps-f32 %v624_v30, 1.0 }
 0x1d1   : > { %v627_v33 = vadd.f32 1.0, %v1240_v31 }
 0x1d3   : > { %v628_v34 = vmul.f32 %v627_v33, %v585_v32 }
 0x1d5   : > { %v629_v35 = vpack.c.bf16 %v628_v34, %v628_v34 }
 0x1d7   : > { %1249 = vmatmul.msk.bf16.vlgmr.msra.gmra.mxu2 %vm493_vm0, %v629_v35  ;;  %1258 = vmatmul.msk.bf16.vlgmr.msra.gmra.mxu3 %vm493_vm0, %v629_v35 }
 0x1d8   : > { %1267 = vmatmul.msk.bf16.vlgmr.msrb.gmra.mxu0 %vm493_vm0, %v629_v35  ;;  %1281 = vmatmul.msk.bf16.vlgmr.msrb.gmra.mxu1 %vm493_vm0, %v629_v35 }
 0x1d9   : > { %957 = vmatpush.bf16.msra.mxu2 %v1429_v36  ;;  %995 = vmatpush.bf16.msra.mxu3 %v1431_v37 }
 0x1da   : > { %1033 = vmatpush.bf16.msrb.mxu0 %v1433_v38  ;;  %1071 = vmatpush.bf16.msrb.mxu1 %v1435_v39 }
 0x1dd   : > { %958 = vmatpush.bf16.msra.mxu2 %v1428_v40  ;;  %996 = vmatpush.bf16.msra.mxu3 %v1430_v41 }
 0x1de   : > { %1034 = vmatpush.bf16.msrb.mxu0 %v1432_v42  ;;  %1072 = vmatpush.bf16.msrb.mxu1 %v1434_v43 }
 0x1e7   : > { %1296 = vmatmul.msk.bf16.vlgmr.msrb.gmra.mxu2 %vm493_vm0, %v629_v35  ;;  %1311 = vmatmul.msk.bf16.vlgmr.msrb.gmra.mxu3 %vm493_vm0, %v629_v35 }
 0x1e8   : > { %1326 = vmatmul.msk.bf16.vlgmr.msra.gmra.mxu0 %vm493_vm0, %v629_v35  ;;  %1341 = vmatmul.msk.bf16.vlgmr.msra.gmra.mxu1 %vm493_vm0, %v629_v35 }
 0x1f7   : > { %1356 = vmatmul.msk.bf16.vlgmr.msra.gmra.mxu2 %vm493_vm0, %v629_v35  ;;  %1371 = vmatmul.msk.bf16.vlgmr.msra.gmra.mxu3 %vm493_vm0, %v629_v35 }
 0x1f8   : > { %1386 = vmatmul.msk.bf16.vlgmr.msrb.gmra.mxu0 %vm493_vm0, %v629_v35  ;;  %1401 = vmatmul.msk.bf16.vlgmr.msrb.gmra.mxu1 %vm493_vm0, %v629_v35 }
 0x255   : > { %v733_v46 = vpop.f32.mrf.mxu0  ;;  %v770_v47 = vpop.f32.mrf.mxu1 }
 0x256   : > { %v734_v48 = vadd.f32 %v1448_v44, %v733_v46  ;;  %v771_v49 = vadd.f32 %v1449_v45, %v770_v47 }
 0x258   : > { %v737_v52 = vpack.c.bf16 %v734_v48, %v734_v48  ;;  %v774_v53 = vpack.c.bf16 %v771_v49, %v771_v49 }
 0x25a   : > { %738 = vst.msk [vmem:[%s1687_s23] sm:$0xf] %vm667_vm10, %v737_v52  ;;  %v662_v54 = vpop.f32.mrf.mxu2  ;;  %v698_v55 = vpop.f32.mrf.mxu3 }
 0x25b   : > { %1282 = vst.msk [vmem:[%s1698_s14 + $0x4] sm:$0xf] %vm667_vm10, %v774_v53  ;;  %v663_v56 = vadd.f32 %v1450_v50, %v662_v54  ;;  %v699_v57 = vadd.f32 %v1451_v51, %v698_v55 }
 0x25d   : > { %v666_v58 = vpack.c.bf16 %v663_v56, %v663_v56  ;;  %v702_v59 = vpack.c.bf16 %v699_v57, %v699_v57  ;;  %v735_v60 = vpop.f32.mrf.mxu0  ;;  %v772_v61 = vpop.f32.mrf.mxu1 }
 0x25f   : > { %668 = vst.msk [vmem:[%s1698_s14] sm:$0xf] %vm667_vm10, %v666_v58 }
 0x260   : > { %703 = vst.msk [vmem:[%s1707_s17] sm:$0xf] %vm667_vm10, %v702_v59 }
 0x262   : > { %v664_v62 = vpop.f32.mrf.mxu2  ;;  %v700_v63 = vpop.f32.mrf.mxu3 }
 0x265   : > { %v884_v2 = vpop.f32.mrf.mxu0  ;;  %v922_v3 = vpop.f32.mrf.mxu1 }
 0x266   : > { %v885_v4 = vadd.f32 %v1452_v0, %v884_v2  ;;  %v923_v5 = vadd.f32 %v1453_v1, %v922_v3 }
 0x268   : > { %v888_v8 = vpack.c.bf16 %v885_v4, %v885_v4  ;;  %v926_v9 = vpack.c.bf16 %v923_v5, %v923_v5 }
 0x26a   : > { %1327 = vst.msk [vmem:[%s1698_s14 + $0x8] sm:$0xf] %vm667_vm10, %v888_v8  ;;  %v808_v10 = vpop.f32.mrf.mxu2  ;;  %v846_v11 = vpop.f32.mrf.mxu3 }
 0x26b   : > { %1342 = vst.msk [vmem:[%s1707_s17 + $0x8] sm:$0xf] %vm667_vm10, %v926_v9  ;;  %v809_v12 = vadd.f32 %v1454_v6, %v808_v10  ;;  %v847_v13 = vadd.f32 %v1455_v7, %v846_v11 }
 0x26d   : > { %v812_v14 = vpack.c.bf16 %v809_v12, %v809_v12  ;;  %v850_v15 = vpack.c.bf16 %v847_v13, %v847_v13  ;;  %v886_v16 = vpop.f32.mrf.mxu0  ;;  %v924_v17 = vpop.f32.mrf.mxu1 }
 0x26f   : > { %1297 = vst.msk [vmem:[%s1707_s17 + $0x4] sm:$0xf] %vm667_vm10, %v812_v14 }
 0x270   : > { %1312 = vst.msk [vmem:[%s1687_s23 + $0x4] sm:$0xf] %vm667_vm10, %v850_v15 }
 0x272   : > { %v810_v18 = vpop.f32.mrf.mxu2  ;;  %v848_v19 = vpop.f32.mrf.mxu3 }
 0x275   : > { %v1036_v22 = vpop.f32.mrf.mxu0  ;;  %v1074_v23 = vpop.f32.mrf.mxu1 }
 0x276   : > { %v1037_v24 = vadd.f32 %v1456_v20, %v1036_v22  ;;  %v1075_v25 = vadd.f32 %v1457_v21, %v1074_v23 }
 0x278   : > { %v1040_v28 = vpack.c.bf16 %v1037_v24, %v1037_v24  ;;  %v1078_v29 = vpack.c.bf16 %v1075_v25, %v1075_v25 }
 0x27a   : > { %1387 = vst.msk [vmem:[%s1707_s17 + $0xc] sm:$0xf] %vm667_vm10, %v1040_v28  ;;  %v960_v30 = vpop.f32.mrf.mxu2  ;;  %v998_v31 = vpop.f32.mrf.mxu3 }
 0x27b   : > { %1402 = vst.msk [vmem:[%s1687_s23 + $0xc] sm:$0xf] %vm667_vm10, %v1078_v29  ;;  %v961_v32 = vadd.f32 %v1458_v26, %v960_v30  ;;  %v999_v33 = vadd.f32 %v1459_v27, %v998_v31 }
 0x27d   : > { %v964_v34 = vpack.c.bf16 %v961_v32, %v961_v32  ;;  %v1002_v35 = vpack.c.bf16 %v999_v33, %v999_v33  ;;  %v1038_v36 = vpop.f32.mrf.mxu0  ;;  %v1076_v37 = vpop.f32.mrf.mxu1 }
 0x27f   : > { %1357 = vst.msk [vmem:[%s1687_s23 + $0x8] sm:$0xf] %vm667_vm10, %v964_v34 }
 0x280   : > { %1372 = vst.msk [vmem:[%s1698_s14 + $0xc] sm:$0xf] %vm667_vm10, %v1002_v35 }
 0x282   : > { %v962_v38 = vpop.f32.mrf.mxu2  ;;  %v1000_v39 = vpop.f32.mrf.mxu3 }
 0x283 PF: > { %s24_s25 = sadd.s32 1, %s1472_s25  }
 0x284   : > { %p21_p4 = scmp.ge.s32.totalorder %s24_s25, 4  }
 0x286   :  { %23 = sbr.rel (!%p21_p4) target bundleno = 1 (0x1), region = 147 }

// kernel: hierarchical_block_forward.14
= control target key start
LH: loop header
LB: loop body
LE: loop exit
PB: predicated region body
PF: predicated region fallthrough
CT: control target
= control target key end

     0   :  { %s1645_s0 = inlined_call_operand.vmem [shape: bf16[2,4,8,16], index: 0, kind: input, shape index: {}]   ;;  %s1646_s1 = inlined_call_operand.vmem [shape: bf16[2,4,8,16], index: 1, kind: input, shape index: {}]   ;;  %s1647_s2 = inlined_call_operand.vmem [shape: bf16[2,4,8,16], index: 2, kind: input, shape index: {}]   ;;  %s1648_s3 = inlined_call_operand.vmem [shape: f32[2,8,32], index: 3, kind: input, shape index: {}]   ;;  %s1649_s4 = inlined_call_operand.vmem [shape: bf16[4,16,32], index: 4, kind: input, shape index: {}]   ;;  %s1650_s5 = inlined_call_operand.vmem [shape: f32[1,32], index: 5, kind: input, shape index: {}]   ;;  %s1651_s6 = inlined_call_operand.vmem [shape: bf16[32,32], index: 6, kind: input, shape index: {}]   ;;  %s1652_s7 = inlined_call_operand.vmem [shape: f32[1,32], index: 7, kind: input, shape index: {}]   ;;  %s1653_s8 = inlined_call_operand.vmem [shape: bf16[64,32], index: 8, kind: input, shape index: {}]   ;;  %s1654_s9 = inlined_call_operand.vmem [shape: f32[1,32], index: 9, kind: input, shape index: {}]   ;;  %s1655_s10 = inlined_call_operand.vmem [shape: f32[1,32], index: 10, kind: input, shape index: {}]   ;;  %s1656_s11 = inlined_call_operand.vmem [shape: f32[1,32], index: 11, kind: input, shape index: {}]   ;;  %s1657_s12 = inlined_call_operand.vmem [shape: bf16[32,32], index: 12, kind: input, shape index: {}]   ;;  %s1658_s13 = inlined_call_operand.vmem [shape: f32[1,32], index: 13, kind: input, shape index: {}]   ;;  %s1659_s14 = inlined_call_operand.hbm [shape: f32[2,8,32], index: 14, kind: output, shape index: {0}]   ;;  %s1660_s15 = inlined_call_operand.vmem [shape: bf16[2,8,32], index: 15, kind: output, shape index: {1}]  }
   0x1   :  { %1675 = sst [smem:[#allocation16_spill]] %s1655_s10 }
   0x2   :  { %1676 = sst [smem:[#allocation17_spill]] %s1656_s11 }
   0x3   :  { %1677 = sst [smem:[#allocation18_spill]] %s1657_s12 }
   0x4   :  { %1678 = sst [smem:[#allocation19_spill]] %s1658_s13 }
   0x5   :  { %1679 = sst [smem:[#allocation20_spill]] %s1659_s14 }
   0x6   :  { %21 = vsyncpa [#allocation4], 0 }
   0x7   :  { %23 = vsyncpa [#allocation4 + $0x1], 0  ;;  %s1430_s18 = smov 0   ;;  %s1432_s19 = smov 0  }
   0x8   :  { %s1434_s20 = smov 0   ;;  %s1436_s21 = smov 0  }
   0x9   :  { %s1438_s22 = smov 0   ;;  %s1440_s23 = smov 0  }
   0xa LB: > { %1680 = sst [smem:[#allocation6_spill]] %s1321_s18  ;;  %s1096_s24 = sadd.s32 4294967295, %s1341_s23   ;;  %s1341_s23 = sphi %s1440_s23, %s29_s23   ;;  %s1337_s22 = sphi %s1438_s22, %s1708_s22   ;;  %s1333_s21 = sphi %s1436_s21, %s1707_s21   ;;  %s1329_s20 = sphi %s1434_s20, %s1706_s20   ;;  %s1325_s19 = sphi %s1432_s19, %s1705_s19   ;;  %s1321_s18 = sphi %s1430_s18, %s1704_s18  }
   0xb   : > { %1681 = sst [smem:[#allocation7_spill]] %s1325_s19  ;;  %s1097_s25 = sadd.s32 4294967294, %s1341_s23  }
   0xc   : > { %1682 = sst [smem:[#allocation8_spill]] %s1329_s20  ;;  %s41_s26 = sadd.s32 1, %s1337_s22 }
   0xd   : > { %1683 = sst [smem:[#allocation9_spill]] %s1333_s21  ;;  %s368_s27 = sadd.s32 1, %s1329_s20 }
   0xe   : > { %1684 = sst [smem:[#allocation10_spill]] %s1337_s22  ;;  %p43_p0 = scmp.ge.s32.totalorder %s41_s26, 2 }
   0xf   : > { %1685 = sst [smem:[#allocation11_spill]] %s1341_s23  ;;  %p378_p1 = scmp.ne.s32.totalorder %s1329_s20, %s1325_s19 }
  0x10   : > { %p379_p2 = scmp.eq.s32.totalorder %s1096_s24, 1  ;;  %p384_p3 = scmp.ne.s32.totalorder %s1325_s19, %s1321_s18 }
  0x11   : > { %s1710_s26 = smov (%p43_p0, %s41_s26), 0  ;;  %p385_p5 = scmp.eq.s32.totalorder %s1097_s25, 1 }
  0x12   : > { %1686 = sst [smem:[#allocation12_spill]] %s1710_s26  ;;  %p1470_p4 = por %p379_p2, %p378_p1 }
  0x13   : > { %s363_s29 = ssub.s32 %s1337_s22, %s1710_s26  ;;  %p1100_p6 = scmp.ge.s32.totalorder %s1341_s23, 1 }
  0x14   : > { %s1687_s28 = scalar_select %p1470_p4, 1, 0 }
  0x15   : > { %p366_p7 = scmp.eq.s32.totalorder %s363_s29, 0  ;;  %p1477_p8 = por %p385_p5, %p384_p3 }
  0x16   : > { %1688 = sst [smem:[#allocation13_spill]] %s1687_s28  ;;  %p498_p9 = scmp.lt.s32.totalorder %s1341_s23, 3 }
  0x17   : > { %s1689_s30 = scalar_select %p1477_p8, 1, 0 }
  0x18   : > { %s1483_s16 = scalar_select %p366_p7, %s1329_s20, %s368_s27  }
  0x19   : > { %1690 = sst [smem:[#allocation14_spill]] %s1689_s30  ;;  %p499_p10 = pnand %p1100_p6, %p498_p9 }
  0x1a   : > { %1691 = sst [smem:[#allocation15_spill]] %s1483_s16  ;;  %s1665_s17 = sand.u32 (!%p499_p10), 1, %s1325_s19  }
  0x1b   : > { %502 = sbr.rel (%p499_p10) target bundleno = 1524 (0x5f4), region = 76  ;;  %p573_p11 = scmp.lt.s32.totalorder (!%p499_p10), %s1333_s21, 1 }
  0x1c   : > { %s1489_s24 = sshll.u32 (!%p499_p10), %s1665_s17, 3  ;;  %s1518_s26 = smov (!%p499_p10), 0  }
  0x1d   : > { %s563_s22 = scalar_lea.vmem (!%p499_p10), [#allocation3], %s1489_s24 }
  0x20   : > { %vm606_vm0 = vcmask 261120   ;;  %v1347_v0 = vmov 0.0   ;;  %s574_s25 = scalar_select %p573_p11, %s1333_s21, 1 }
  0x21   : > { %607 = vst.msk [vmem:[#allocation2] sm:$0xff] %vm606_vm0, %v1347_v0 }
  0x22   : > { %s1493_s29 = sshll.u32 %s574_s25, 4  ;;  %s1108_s27 = sshll.u32 %s574_s25, 3 }
  0x23   : > { %s580_s16 = scalar_lea.vmem %s1645_s0, %s1493_s29  ;;  %s585_s17 = scalar_lea.vmem %s1646_s1, %s1493_s29 }
  0x24   : > { %s590_s13 = scalar_lea.vmem %s1647_s2, %s1493_s29  ;;  %s1510_s11 = scalar_lea.vmem %s1648_s3, %s1108_s27 }
  0x25   : > { %s1109_s19 = sshll.u32 %s574_s25, 2 }
  0x26   : > { %s1515_s12 = scalar_lea.vmem %s1660_s15, %s1109_s19 }
  0x27 LB: >> { %s1110_s14 = sshll.u32 %s1345_s26, 2  ;;  %vm623_vm1 = vcmask 130048   ;;  %vm644_vm2 = vcmask 64512   ;;  %vm660_vm3 = vcmask 1043456   ;;  %s1165_s27 = sshll.u32 %s1345_s26, 3  ;;  %s1345_s26 = sphi %s1518_s26, %s613_s26  }
  0x28   : >> { %s618_s10 = scalar_lea.vmem %s585_s17, %s1110_s14  ;;  %s615_s23 = scalar_lea.vmem %s580_s16, %s1110_s14  ;;  %v677_v23 = vld [vmem:[#allocation2] sm:$0xff] }
  0x29   : >> { %v619_v1 = vld [vmem:[%s618_s10] sm:$0xf]  ;;  %s621_s25 = scalar_lea.vmem %s590_s13, %s1110_s14  ;;  %s681_s10 = scalar_lea.vmem %s1649_s4, %s1165_s27 }
  0x2a   : >> { %v628_v2 = vsel %vm623_vm1, %v619_v1, 0  ;;  %v616_v3 = vld [vmem:[%s615_s23] sm:$0xf]  ;;  %s613_s26 = sadd.s32 1, %s1345_s26  }
  0x2b   : >> { %637 = vmatpush.bf16.xpose.msra.mxu0 %v628_v2  ;;  %v622_v13 = vld [vmem:[%s621_s25] sm:$0xf]  ;;  %p610_p12 = scmp.ge.s32.totalorder %s613_s26, 4  }
  0x2c   : >> { %v662_v14 = vsel %vm660_vm3, %v622_v13, 0  ;;  %v1166_v19 = vld [vmem:[%s681_s10] sm:$0xff]  ;;  %v1168_v27 = vld [vmem:[%s1651_s6 + $0x8] sm:$0xff] (%p610_p12)  ;;  %v1172_v33 = vld [vmem:[%s1653_s8 + $0x18] sm:$0xff] (%p610_p12)  ;;  %s1348_s20 = smov (%p610_p12), 32   ;;  %vm794_vm4 = vcmask (%p610_p12), 523264  }
  0x2d   : >> { %671 = vmatpush.bf16.msra.mxu1 %v662_v14  ;;  %700 = vmatpush.bf16.msra.mxu2 %v1166_v19  ;;  %v1245_v29 = vld [vmem:[%s1650_s5] ss:$0 sm:$0xff] (%p610_p12)  ;;  %v1171_v34 = vld [vmem:[%s1653_s8 + $0x10] sm:$0xff] (%p610_p12)  ;;  %v1170_v35 = vld [vmem:[%s1653_s8 + $0x8] sm:$0xff] (%p610_p12)  ;;  %v1349_v1 = vmov (%p610_p12), 32.0   ;;  %s1692_s28 = sld [smem:[#allocation18_spill]] (%p610_p12) }
  0x2e   : > { %v1167_v30 = vld [vmem:[%s1651_s6] sm:$0xff] (%p610_p12)  ;;  %s1693_s16 = sld [smem:[#allocation9_spill]] (%p610_p12)  ;;  %s933_s30 = sshll.u32 (%p610_p12), %s563_s22, 4  ;;  %s934_s30 = int_to_ptr.vmem [resolvable:$true] %s933_s30 }
  0x2f   : > { %v1246_v36 = vld [vmem:[%s1652_s7] ss:$0 sm:$0xff] (%p610_p12)  ;;  %s1694_s26 = sld [smem:[#allocation16_spill]] (%p610_p12) }
  0x30   : > { %v1169_v40 = vld [vmem:[%s1653_s8] sm:$0xff] (%p610_p12)  ;;  %s1695_s25 = sld [smem:[#allocation7_spill]] (%p610_p12) }
  0x31   : > { %v708_v41 = vld [vmem:[%s1510_s11] sm:$0xff] (%p610_p12)  ;;  %s1698_s11 = sld [smem:[#allocation20_spill]] (%p610_p12) }
  0x32   : >> { %1113 = vmatmul.msk.bf16.vlgmr.msra.gmra.mxu0 %vm623_vm1, %v616_v3  ;;  %v1247_v45 = vld [vmem:[%s1654_s9] ss:$0 sm:$0xff] (%p610_p12) }
  0x33   : > { %745 = vmatpush.bf16.msra.mxu0 (%p610_p12), %v1168_v27  ;;  %v1174_v13 = vld [vmem:[%s1692_s28 + $0x8] sm:$0xff] (%p610_p12)  ;;  %v1173_v14 = vld [vmem:[%s1692_s28] sm:$0xff] (%p610_p12) }
  0x34   : > { %s1159_s14 = sshll.u32 (%p610_p12), %s1693_s16, 3 }
  0x36   : > { %s1699_s17 = sand.u32 (%p610_p12), 1, %s1695_s25  }
  0x37   : > { %746 = vmatpush.bf16.msra.mxu0 (%p610_p12), %v1167_v30  ;;  %s931_s23 = scalar_lea.hbm (%p610_p12), %s1698_s11, %s1159_s14  ;;  %s913_s29 = scalar_lea.sflag (%p610_p12), [#allocation4], %s1699_s17 }
  0x38   : > { %s935_s13 = sshll.u32 (%p610_p12), %s931_s23, 4  ;;  %s936_s13 = int_to_ptr.hbm [resolvable:$true] %s935_s13 }
  0xaf   : >> { %v639_v4 = vpop.f32.mrf.mxu0 }
  0xb0   : >> { %v643_v5 = vmul.f32 0.25, %v639_v4 }
  0xb2   : >> { %v645_v6 = vsel %vm644_vm2, %v643_v5, -inf }
  0xb3   : >> { %646 = vmax.xlane.f32.xlu0 %v645_v6 }
  0xb7   : >> { %v641_v7 = vpop.f32.mrf.mxu0 }
 0x126   : >> { %v647_v8 = vpop.xlane.xlu0 %646 }
 0x127   : >> { %v648_v9 = vsub.f32 %v643_v5, %v647_v8 }
 0x129   : >> { %v649_v10 = vmul.f32 1.442695, %v648_v9 }
 0x12b   : >> { %1241 = vpow2.f32 %v649_v10 }
 0x131   : >> { %v1242_v11 = vpop.eup %1241 }
 0x132   : >> { %v651_v12 = vsel %vm644_vm2, %v1242_v11, 0.0 }
 0x133   : >> { %652 = vadd.xlane.f32.xlu0 %v651_v12 }
 0x1a6   : >> { %v653_v15 = vpop.xlane.xlu0 %652 }
 0x1a7   : >> { %1243 = vrcp.f32 %v653_v15 }
 0x1ad   : >> { %v1244_v16 = vpop.eup %1243 }
 0x1ae   : >> { %v655_v17 = vmul.f32 %v1244_v16, %v1242_v11 }
 0x1b0   : >> { %v656_v18 = vpack.c.bf16 %v655_v17, %v655_v17 }
 0x1b2   : >> { %1114 = vmatmul.msk.bf16.vlgmr.msra.gmra.mxu1 %vm644_vm2, %v656_v18 }
 0x1b3   : > { %802 = vmatpush.bf16.msra.mxu1 (%p610_p12), %v1172_v33 }
 0x1b7   : > { %803 = vmatpush.bf16.msra.mxu1 (%p610_p12), %v1171_v34 }
 0x1bb   : > { %804 = vmatpush.bf16.msra.mxu1 (%p610_p12), %v1170_v35 }
 0x1bf   : > { %805 = vmatpush.bf16.msra.mxu1 (%p610_p12), %v1169_v40 }
 0x22f   : >> { %v673_v20 = vpop.f32.mrf.mxu1 }
 0x230   : >> { %v678_v21 = vpack.c.bf16 %v673_v20, %v673_v20 }
 0x232   : >> { %1121 = vmatmul.msk.bf16.vlgmr.msra.gmra.mxu2 %vm623_vm1, %v678_v21 }
 0x233   : > { %902 = vmatpush.bf16.msra.mxu2 (%p610_p12), %v1174_v13 }
 0x237   : >> { %v675_v22 = vpop.f32.mrf.mxu1  ;;  %903 = vmatpush.bf16.msra.mxu2 (%p610_p12), %v1173_v14 }
 0x2b5   : >> { %v702_v24 = vpop.f32.mrf.mxu2 }
 0x2b6   : >> { %v706_v25 = vadd.f32 %v702_v24, %v677_v23  ;;  %v1248_v24 = vld [vmem:[%s1694_s26] ss:$0 sm:$0xff] (%p610_p12)  ;;  %s1273_s26 = sshra.s32 (%p610_p12), %s936_s13, 4  ;;  %s1274_s26 = int_to_ptr.hbm [resolvable:$true] %s1273_s26 }
 0x2b7   : > { %s1275_s27 = scalar_lea.hbm (%p610_p12), %s1274_s26, 8  ;;  %p1280_p2 = scmp.lt.s32.totalorder (%p610_p12), %s1274_s26, %s1698_s11 }
 0x2b8   : >> { %707 = vst.msk [vmem:[#allocation2] sm:$0xff] %vm606_vm0, %v706_v25  ;;  %p1276_p13 = scmp.ne.s32.totalorder (%p610_p12), %s1274_s26, %s1275_s27 }
 0x2ba   : > { %p1277_p0 = pnand (%p610_p12), %p1276_p13, %p1470_p4 }
 0x2bc   : > { %612 = sbr.rel (!%p610_p12) target bundleno = 39 (0x27), region = 143  ;;  %p1278_p1 = pneg (%p610_p12), %p1277_p0 }
 0x2bd   : >> { %v704_v26 = vpop.f32.mrf.mxu2 }
 0x2bf   : > { %v709_v28 = vld [vmem:[#allocation2] sm:$0xff] (%p610_p12) }
 0x2c0   : > { %v714_v31 = vadd.f32 (%p610_p12), %v1245_v29, %v709_v28 }
 0x2c2   : > { %v719_v32 = vpack.c.bf16 %v714_v31, %v714_v31 }
 0x2c4   : > { %1130 = vmatmul.msk.bf16.vlgmr.msra.gmra.mxu0 %vm606_vm0, %v719_v32 }
 0x341   : > { %v748_v37 = vpop.f32.mrf.mxu0 }
 0x342   : > { %v749_v38 = vadd.f32 %v1246_v36, %v748_v37 }
 0x344   : > { %753 = vrot.lane.b32.xlu0 %v749_v38, %s1348_s20  ;;  %s1696_s20 = sld [smem:[#allocation17_spill]] }
 0x349   : > { %v750_v39 = vpop.f32.mrf.mxu0 }
 0x34a   : > { %v1249_v27 = vld [vmem:[%s1696_s20] ss:$0 sm:$0xff]  ;;  %s1279_s20 = scalar_lea.hbm %s1698_s11, 16 }
 0x34b   : > { %p1281_p3 = scmp.lt.s32.totalorder %s1279_s20, %s1275_s27 }
 0x34d   : > { %p1282_p5 = por %p1281_p3, %p1280_p2 }
 0x34f   : > { %p1283_p6 = pnand %p1282_p5, %p1278_p1 }
 0x3b6   : > { %v754_v42 = vpop.permute.xlu0 %753 }
 0x3b7   : > { %v756_v43 = vsel %vm606_vm0, %v708_v41, %v754_v42 }
 0x3b8   : > { %v765_v44 = vpack.c.bf16 %v756_v43, %v756_v43 }
 0x3ba   : > { %1147 = vmatmul.msk.bf16.vlgmr.msra.gmra.mxu1 %vm794_vm4, %v765_v44 }
 0x437   : > { %v807_v46 = vpop.f32.mrf.mxu1 }
 0x438   : > { %v808_v47 = vadd.f32 %v1247_v45, %v807_v46 }
 0x43a   : > { %v1148_v48 = vmul.f32 -1.442695, %v808_v47 }
 0x43c   : > { %1251 = vpow2.f32 %v1148_v48 }
 0x43f   : > { %v809_v49 = vpop.f32.mrf.mxu1 }
 0x442   : > { %v1252_v50 = vpop.eup %1251 }
 0x443   : > { %v814_v51 = vadd.f32 1.0, %v1252_v50 }
 0x445   : > { %1253 = vrcp.f32 %v814_v51  ;;  %v826_v55 = vand.u32 2147483648, %v814_v51  ;;  %v824_v57 = vand.u32 2147483647, %v814_v51  ;;  %vm820_vm6 = vweird.f32 %v814_v51 }
 0x446   : > { %1255 = vrcp.f32 %v1349_v1 }
 0x447   : > { %v827_v59 = vor.u32 1.1754944e-38, %v826_v55  ;;  %vm825_vm8 = vcmp.eq.f32.partialorder %v824_v57, 8.507059e+37 }
 0x44b   : > { %v1254_v52 = vpop.eup %1253 }
 0x44c   : > { %v816_v53 = vmul.f32 %v1254_v52, %v814_v51  ;;  %vm821_vm5 = vweird.f32 %v1254_v52  ;;  %v1256_v2 = vpop.eup %1255 }
 0x44d   : > { %vm822_vm7 = vmor %vm820_vm6, %vm821_vm5  ;;  %v836_v3 = vmul.f32 32.0, %v1256_v2  ;;  %vm840_vm9 = vweird.f32 %v1256_v2 }
 0x44e   : > { %v817_v54 = vsub.f32 1.0, %v816_v53 }
 0x44f   : > { %v837_v4 = vsub.f32 1.0, %v836_v3 }
 0x450   : > { %v818_v56 = vmul.f32 %v1254_v52, %v817_v54 }
 0x451   : > { %v838_v5 = vmul.f32 %v1256_v2, %v837_v4 }
 0x452   : > { %v819_v58 = vadd.f32 %v1254_v52, %v818_v56 }
 0x453   : > { %v839_v6 = vadd.f32 %v1256_v2, %v838_v5 }
 0x454   : > { %v823_v60 = vsel %vm822_vm7, %v1254_v52, %v819_v58 }
 0x455   : > { %v828_v61 = vsel %vm825_vm8, %v827_v59, %v823_v60  ;;  %v841_v7 = vsel %vm840_vm9, %v1256_v2, %v839_v6 }
 0x456   : > { %v830_v62 = vmul.f32 %v828_v61, %v749_v38 }
 0x458   : > { %v831_v63 = vadd.f32 %v830_v62, %v708_v41 }
 0x45a   : > { %v832_v0 = vsel %vm606_vm0, %v831_v63, 0.0 }
 0x45b   : > { %833 = vadd.xlane.f32.xlu0 %v832_v0 }
 0x4ce   : > { %v834_v8 = vpop.xlane.xlu0 %833 }
 0x4cf   : > { %v842_v9 = vmul.f32 %v841_v7, %v834_v8 }
 0x4d1   : > { %v843_v10 = vsub.f32 %v831_v63, %v842_v9 }
 0x4d3   : > { %v844_v11 = vmul.f32 %v843_v10, %v843_v10 }
 0x4d5   : > { %v845_v12 = vsel %vm606_vm0, %v844_v11, 0.0 }
 0x4d6   : > { %846 = vadd.xlane.f32.xlu1 %v845_v12 }
 0x549   : > { %v847_v15 = vpop.xlane.xlu1 %846 }
 0x54a   : > { %v848_v16 = vmul.f32 %v847_v15, %v841_v7 }
 0x54c   : > { %v849_v17 = vadd.f32 1e-05, %v848_v16 }
 0x54e   : > { %1257 = vrsqrt.f32 %v849_v17  ;;  %vm856_vm11 = vweird.f32 %v849_v17 }
 0x554   : > { %v1258_v18 = vpop.eup %1257 }
 0x555   : > { %v851_v19 = vmul.f32 %v1258_v18, %v849_v17  ;;  %vm857_vm10 = vweird.f32 %v1258_v18 }
 0x556   : > { %vm858_vm12 = vmor %vm856_vm11, %vm857_vm10 }
 0x557   : > { %v852_v20 = vmul.f32 %v1258_v18, %v851_v19 }
 0x559   : > { %v853_v21 = vmul.f32 0.5, %v852_v20 }
 0x55b   : > { %v854_v22 = vsub.f32 1.5, %v853_v21 }
 0x55d   : > { %v855_v23 = vmul.f32 %v1258_v18, %v854_v22 }
 0x55f   : > { %v859_v25 = vsel %vm858_vm12, %v1258_v18, %v855_v23 }
 0x560   : > { %v860_v26 = vmul.f32 %v859_v25, %v843_v10 }
 0x562   : > { %v865_v28 = vmul.f32 %v1248_v24, %v860_v26 }
 0x564   : > { %v870_v29 = vadd.f32 %v1249_v27, %v865_v28 }
 0x566   : > { %v876_v30 = vpack.c.bf16 %v870_v29, %v870_v29  ;;  %871 = vst.msk [vmem:[%s563_s22] sm:$0xff] %vm606_vm0, %v870_v29 }
 0x568   : > { %1157 = vmatmul.msk.bf16.vlgmr.msra.gmra.mxu2 %vm606_vm0, %v876_v30 }
 0x569   : > { %1286 = shalt.err (!%p1283_p6)
}
 0x56a   : > { %1175 = dma.vmem_to_hbm [thread:$0]  (%p1470_p4), %s934_s30, 128, %s936_s13, %s913_s29   ;;  %vm910_vm13 = vcmask 257024  }
 0x56b   : > { %s1700_s25 = sld [smem:[#allocation19_spill]] }
 0x571   : > { %v1250_v31 = vld [vmem:[%s1700_s25] ss:$0 sm:$0xff] }
 0x5eb   : > { %v905_v32 = vpop.f32.mrf.mxu2 }
 0x5ec   : > { %v906_v33 = vadd.f32 %v1250_v31, %v905_v32 }
 0x5ee   : > { %v909_v34 = vpack.c.bf16 %v906_v33, %v906_v33 }
 0x5f0   : > { %911 = vst.msk [vmem:[%s1515_s12] sm:$0xf] %vm910_vm13, %v909_v34 }
 0x5f3   : > { %v907_v35 = vpop.f32.mrf.mxu2 }
 0x5f4 PF: > { %s1701_s21 = sld [smem:[#allocation11_spill]] }
 0x5f5   : > { %s1702_s23 = sld [smem:[#allocation6_spill]] }
 0x5fa   : > { %p1181_p7 = scmp.ge.s32.totalorder %s1701_s21, 2 }
 0x5fb   : > { %s950_s26 = sand.u32 1, %s1702_s23  }
 0x5fc   : > { %p1178_p9 = pnand %p1181_p7, %p1477_p8  ;;  %s951_s10 = scalar_lea.sflag [#allocation4], %s950_s26 }
 0x5fe   : > { %p1179_p10 = pneg %p1178_p9 }
 0x600   : > { %1316 = dma.done.wait (%p1179_p10), %s951_s10, 128  }
 0x601   : > { %1318 = vsyncadd (%p1179_p10), %s951_s10, 4294967168  ;;  %s29_s23 = sadd.s32 1, %s1701_s21   ;;  %s1704_s18 = sld [smem:[#allocation7_spill]] }
 0x602   : > { %p26_p4 = scmp.ge.s32.totalorder %s29_s23, 4   ;;  %s1705_s19 = sld [smem:[#allocation8_spill]] }
 0x603   : > { %s1706_s20 = sld [smem:[#allocation15_spill]] }
 0x604   : > { %s1707_s21 = sld [smem:[#allocation10_spill]]  ;;  %28 = sbr.rel (!%p26_p4) target bundleno = 10 (0xa), region = 154 }
 0x605   : > { %s1708_s22 = sld [smem:[#allocation12_spill]] }
 0x609   :  { %967 = vsyncpa [#allocation4], 1 }
 0x60a   :  { %969 = vsyncpa [#allocation4 + $0x1], 1 }

// kernel: hierarchical_block_forward.15
= control target key start
LH: loop header
LB: loop body
LE: loop exit
PB: predicated region body
PF: predicated region fallthrough
CT: control target
= control target key end

     0   :  { %vm74_vm0 = vcmask 261120   ;;  %vm118_vm1 = vcmask 64512   ;;  %vm163_vm2 = vcmask 7168   ;;  %vm166_vm3 = vcmask 15360   ;;  %s1728_s20 = smov 64   ;;  %s2709_s3 = inlined_call_operand.vmem [shape: bf16[32,96], index: 3, kind: input, shape index: {}]   ;;  %s2710_s4 = inlined_call_operand.vmem [shape: f32[1,96], index: 4, kind: input, shape index: {}]   ;;  %s2711_s0 = inlined_call_operand.vmem [shape: bf16[16,32], index: 0, kind: input, shape index: {}]   ;;  %s2712_s1 = inlined_call_operand.vmem [shape: bf16[16,32], index: 1, kind: input, shape index: {}]   ;;  %s2713_s2 = inlined_call_operand.vmem [shape: bf16[16,32], index: 2, kind: input, shape index: {}]   ;;  %s2714_s6 = inlined_call_operand.vmem [shape: f32[1,32], index: 6, kind: input, shape index: {}]   ;;  %s2715_s5 = inlined_call_operand.vmem [shape: bf16[32,32], index: 5, kind: input, shape index: {}]   ;;  %s2716_s8 = inlined_call_operand.vmem [shape: f32[1,24], index: 8, kind: input, shape index: {}]   ;;  %s2717_s7 = inlined_call_operand.vmem [shape: bf16[32,24], index: 7, kind: input, shape index: {}]   ;;  %s2718_s9 = inlined_call_operand.vmem [shape: f32[16,24], index: 9, kind: output, shape index: {}]  }
   0x1   :  { %v1583_v0 = vld [vmem:[%s2709_s3 + $0x8] sm:$0xff]  ;;  %v1582_v1 = vld [vmem:[%s2709_s3] sm:$0xff]  ;;  %vm169_vm4 = vcmask 23552   ;;  %vm1448_vm5 = vcmask 130048   ;;  %vm1451_vm6 = vcmask 195584  }
   0x2   :  { %90 = vmatpush.bf16.msra.mxu0 %v1583_v0  ;;  %1588 = vmatpush.bf16.msra.mxu3 %v1583_v0  ;;  %v1579_v2 = vld [vmem:[%s2711_s0] sm:$0xff]  ;;  %s1721_s0 = smov 96  }
   0x3   :  { %v1580_v3 = vld [vmem:[%s2712_s1] sm:$0xff]  ;;  %s1722_s1 = smov 120  }
   0x4   :  { %v1581_v4 = vld [vmem:[%s2713_s2] sm:$0xff]  ;;  %s1723_s2 = smov 112  }
   0x5   :  { %v1622_v5 = vld [vmem:[%s2710_s4] ss:$0 sm:$0xff]  ;;  %s1725_s4 = smov 104  }
   0x6   :  { %91 = vmatpush.bf16.msra.mxu0 %v1582_v1  ;;  %1589 = vmatpush.bf16.msra.mxu3 %v1582_v1 }
   0x9   :  { %1558 = vmatmul.msk.bf16.vlgmr.msra.gmra.mxu0 %vm74_vm0, %v1579_v2  ;;  %1559 = vmatmul.msk.bf16.vlgmr.msra.gmra.mxu3 %vm74_vm0, %v1580_v3 }
  0x19   :  { %1560 = vmatmul.msk.bf16.gmra.mxu3 %vm74_vm0, %v1581_v4 }
  0x86   :  { %v93_v6 = vpop.f32.mrf.mxu0 }
  0x87   :  { %v1800_v7 = vadd.f32 %v1622_v5, %v93_v6 }
  0x89   :  { %110 = vrot.lane.b32.xlu0 %v1800_v7, %s1721_s0 }
  0x8c   :  { %v98_v8 = vpop.f32.mrf.mxu3 }
  0x8d   :  { %v1803_v9 = vadd.f32 %v1622_v5, %v98_v8 }
  0x8e   :  { %v95_v10 = vpop.f32.mrf.mxu0 }
  0x8f   :  { %v1805_v11 = vadd.f32 %v1622_v5, %v95_v10  ;;  %129 = vrot.lane.b32.xlu2 %v1803_v9, %s1721_s0 }
  0x91   :  { %112 = vrot.lane.b32.xlu0 %v1805_v11, %s1721_s0 }
  0x94   :  { %v100_v12 = vpop.f32.mrf.mxu3 }
  0x95   :  { %v1809_v13 = vadd.f32 %v1622_v5, %v100_v12 }
  0x97   :  { %131 = vrot.lane.b32.xlu2 %v1809_v13, %s1721_s0 }
  0x9c   :  { %v103_v14 = vpop.f32.mrf.mxu3 }
  0x9d   :  { %v1812_v15 = vadd.f32 %v1622_v5, %v103_v14 }
  0x9f   :  { %147 = vrot.lane.b32.xlu2 %v1812_v15, %s1721_s0 }
  0xa4   :  { %v105_v16 = vpop.f32.mrf.mxu3 }
  0xa5   :  { %v1815_v17 = vadd.f32 %v1622_v5, %v105_v16 }
  0xa7   :  { %149 = vrot.lane.b32.xlu1 %v1815_v17, %s1721_s0 }
  0xe9   :  { %v130_v24 = vpop.permute.xlu2 %129 }
  0xea   :  { %v1838_v25 = vmul.f32 %v130_v24, %v1800_v7  ;;  %v1843_v26 = vmul.f32 %v130_v24, %v1803_v9  ;;  %v1879_v42 = vmul.f32 %v130_v24, %v1812_v15 }
  0xec   :  { %v137_v27 = vsel %vm118_vm1, %v1838_v25, 0.0  ;;  %v244_v30 = vsel %vm118_vm1, %v1843_v26, 0.0  ;;  %v340_v44 = vsel %vm118_vm1, %v1879_v42, 0.0 }
  0xf1   :  { %v132_v33 = vpop.permute.xlu2 %131 }
  0xf2   :  { %v1864_v36 = vmul.f32 %v132_v33, %v1815_v17  ;;  %v1924_v59 = vmul.f32 %v132_v33, %v1805_v11  ;;  %v1931_v62 = vmul.f32 %v132_v33, %v1809_v13 }
  0xf4   :  { %v343_v37 = vsel %vm118_vm1, %v1864_v36, 0.0 }
  0xf9   :  { %v148_v38 = vpop.permute.xlu2 %147 }
  0xfa   :  { %v1869_v39 = vmul.f32 %v148_v38, %v1800_v7  ;;  %v1874_v41 = vmul.f32 %v148_v38, %v1803_v9  ;;  %v1909_v49 = vmul.f32 %v148_v38, %v1812_v15 }
  0xfb   :  { %v111_v18 = vpop.permute.xlu0 %110 }
  0xfc   :  { %v1819_v19 = vmul.f32 %v111_v18, %v1800_v7  ;;  %v1822_v20 = vmul.f32 %v111_v18, %v1803_v9  ;;  %v1831_v22 = vmul.f32 %v111_v18, %v1812_v15  ;;  %v155_v40 = vsel %vm118_vm1, %v1869_v39, 0.0 }
  0xfd   :  { %v254_v43 = vsel %vm118_vm1, %v1874_v41, 0.0  ;;  %v350_v50 = vsel %vm118_vm1, %v1909_v49, 0.0 }
  0xfe   :  { %540 = vrot.lane.b32.xlu2 %v1822_v20, %s1722_s1  ;;  %426 = vrot.lane.b32.xlu0 %v1819_v19, %s1722_s1  ;;  %v119_v21 = vsel %vm118_vm1, %v1819_v19, 0.0  ;;  %v234_v23 = vsel %vm118_vm1, %v1822_v20, 0.0  ;;  %v330_v28 = vsel %vm118_vm1, %v1831_v22, 0.0 }
  0xff   :  { %120 = vadd.xlane.f32.xlu1 %v119_v21 }
 0x103   :  { %v113_v29 = vpop.permute.xlu0 %112 }
 0x104   :  { %v1854_v31 = vmul.f32 %v113_v29, %v1809_v13  ;;  %v1857_v32 = vmul.f32 %v113_v29, %v1815_v17  ;;  %v1896_v47 = vmul.f32 %v113_v29, %v1805_v11 }
 0x106   :  { %654 = vrot.lane.b32.xlu2 %v1831_v22, %s1722_s1  ;;  %v237_v34 = vsel %vm118_vm1, %v1854_v31, 0.0  ;;  %v333_v35 = vsel %vm118_vm1, %v1857_v32, 0.0  ;;  %v122_v55 = vsel %vm118_vm1, %v1896_v47, 0.0 }
 0x107   :  { %235 = vadd.xlane.f32.xlu1 %v234_v23 }
 0x119   :  { %v1887_v45 = vpop.permute.xlu1 %149 }
 0x11a   :  { %v1891_v46 = vmul.f32 %v1887_v45, %v1805_v11  ;;  %v1902_v48 = vmul.f32 %v1887_v45, %v1809_v13  ;;  %v1961_v38 = vmul.f32 %v1887_v45, %v1815_v17 }
 0x120   :  { %442 = vrot.lane.b32.xlu1 %v1838_v25, %s1722_s1 }
 0x128   :  { %556 = vrot.lane.b32.xlu1 %v1843_v26, %s1722_s1  ;;  %138 = vadd.xlane.f32.xlu0 %v137_v27  ;;  %v140_v27 = vsel %vm118_vm1, %v1924_v59, 0.0 }
 0x12f   :  { %331 = vadd.xlane.f32.xlu2 %v330_v28 }
 0x130   :  { %245 = vadd.xlane.f32.xlu0 %v244_v30  ;;  %v247_v30 = vsel %vm118_vm1, %v1931_v62, 0.0 }
 0x137   :  { %238 = vadd.xlane.f32.xlu2 %v237_v34 }
 0x138   :  { %334 = vadd.xlane.f32.xlu0 %v333_v35  ;;  %v158_v35 = vsel %vm118_vm1, %v1891_v46, 0.0 }
 0x13f   :  { %344 = vadd.xlane.f32.xlu2 %v343_v37  ;;  %v257_v37 = vsel %vm118_vm1, %v1902_v48, 0.0 }
 0x147   :  { %156 = vadd.xlane.f32.xlu2 %v155_v40  ;;  %v353_v40 = vsel %vm118_vm1, %v1961_v38, 0.0 }
 0x14c   :  { %458 = vrot.lane.b32.xlu0 %v1869_v39, %s1722_s1 }
 0x14f   :  { %255 = vadd.xlane.f32.xlu2 %v254_v43 }
 0x152   :  { %341 = vadd.xlane.f32.xlu1 %v340_v44 }
 0x154   :  { %572 = vrot.lane.b32.xlu0 %v1874_v41, %s1722_s1 }
 0x158   :  { %v541_v53 = vpop.permute.xlu2 %540 }
 0x159   :  { %v546_v54 = vsel %vm118_vm1, %v541_v53, 0.0 }
 0x160   :  { %v1919_v57 = vpop.permute.xlu2 %654 }
 0x167   :  { %460 = vrot.lane.b32.xlu2 %v1891_v46, %s1722_s1 }
 0x16b   :  { %428 = vrot.lane.b32.xlu1 %v1896_v47, %s1722_s1 }
 0x16f   :  { %574 = vrot.lane.b32.xlu2 %v1902_v48, %s1722_s1 }
 0x170   :  { %v427_v51 = vpop.permute.xlu0 %426 }
 0x171   :  { %v432_v52 = vsel %vm118_vm1, %v427_v51, 0.0 }
 0x172   :  { %v121_v56 = vpop.xlane.xlu1 %120 }
 0x173   :  { %542 = vrot.lane.b32.xlu1 %v1854_v31, %s1722_s1  ;;  %v125_v18 = vmul.f32 0.35355338, %v121_v56 }
 0x17a   :  { %v1921_v58 = vpop.xlane.xlu1 %235 }
 0x17b   :  { %656 = vrot.lane.b32.xlu1 %v1857_v32, %s1722_s1 }
 0x17e   :  { %351 = vadd.xlane.f32.xlu0 %v350_v50 }
 0x192   :  { %v443_v61 = vpop.permute.xlu1 %442 }
 0x193   :  { %v448_v44 = vsel %vm118_vm1, %v443_v61, 0.0 }
 0x198   :  { %433 = vadd.xlane.f32.xlu2 %v432_v52 }
 0x19a   :  { %v557_v0 = vpop.permute.xlu1 %556 }
 0x19b   :  { %v139_v6 = vpop.xlane.xlu0 %138  ;;  %v562_v51 = vsel %vm118_vm1, %v557_v0, 0.0 }
 0x19c   :  { %v143_v10 = vmul.f32 0.35355338, %v139_v6 }
 0x19e   :  { %v164_v21 = vsel %vm163_vm2, %v125_v18, %v143_v10 }
 0x1a0   :  { %547 = vadd.xlane.f32.xlu2 %v546_v54 }
 0x1a2   :  { %v1928_v60 = vpop.xlane.xlu2 %331 }
 0x1a3   :  { %v246_v43 = vpop.xlane.xlu0 %245 }
 0x1a5   :  { %123 = vadd.xlane.f32.xlu1 %v122_v55 }
 0x1aa   :  { %v1935_v63 = vpop.xlane.xlu2 %238 }
 0x1ab   :  { %v335_v50 = vpop.xlane.xlu0 %334 }
 0x1b2   :  { %v1937_v1 = vpop.xlane.xlu2 %344 }
 0x1ba   :  { %v157_v3 = vpop.xlane.xlu2 %156 }
 0x1bb   :  { %v161_v14 = vmul.f32 0.35355338, %v157_v3 }
 0x1bd   :  { %v1945_v23 = vsel %vm166_vm3, %v164_v21, %v161_v14 }
 0x1be   :  { %444 = vrot.lane.b32.xlu1 %v1924_v59, %s1722_s1  ;;  %v170_v24 = vsel %vm169_vm4, %v1945_v23, -inf  ;;  %v459_v53 = vpop.permute.xlu0 %458 }
 0x1bf   :  { %v464_v54 = vsel %vm118_vm1, %v459_v53, 0.0 }
 0x1c2   :  { %v256_v16 = vpop.xlane.xlu2 %255 }
 0x1c3   :  { %v260_v0 = vmul.f32 0.35355338, %v256_v16 }
 0x1c5   :  { %v1939_v2 = vpop.xlane.xlu1 %341 }
 0x1c6   :  { %558 = vrot.lane.b32.xlu1 %v1931_v62, %s1722_s1  ;;  %v573_v45 = vpop.permute.xlu0 %572  ;;  %v346_v18 = vmul.f32 0.35355338, %v1939_v2 }
 0x1c7   :  { %v578_v56 = vsel %vm118_vm1, %v573_v45, 0.0 }
 0x1ca   :  { %v461_v28 = vpop.permute.xlu2 %460 }
 0x1cb   :  { %v467_v29 = vsel %vm118_vm1, %v461_v28, 0.0 }
 0x1d2   :  { %v575_v33 = vpop.permute.xlu2 %574 }
 0x1d3   :  { %v581_v34 = vsel %vm118_vm1, %v575_v33, 0.0 }
 0x1dd   :  { %v429_v4 = vpop.permute.xlu1 %428 }
 0x1de   :  { %v435_v5 = vsel %vm118_vm1, %v429_v4, 0.0 }
 0x1df   :  { %436 = vadd.xlane.f32.xlu0 %v435_v5  ;;  %v250_v5 = vmul.f32 0.35355338, %v246_v43 }
 0x1e5   :  { %v543_v8 = vpop.permute.xlu1 %542 }
 0x1e6   :  { %v549_v12 = vsel %vm118_vm1, %v543_v8, 0.0  ;;  %v240_v8 = vmul.f32 0.35355338, %v1921_v58 }
 0x1e7   :  { %550 = vadd.xlane.f32.xlu0 %v549_v12 }
 0x1e8   :  { %v262_v10 = vsel %vm163_vm2, %v240_v8, %v250_v5  ;;  %v660_v8 = vsel %vm118_vm1, %v1919_v57, 0.0 }
 0x1e9   :  { %v1974_v12 = vsel %vm166_vm3, %v262_v10, %v260_v0 }
 0x1ea   :  { %v266_v21 = vsel %vm169_vm4, %v1974_v12, -inf }
 0x1ed   :  { %v657_v52 = vpop.permute.xlu1 %656 }
 0x1ef   :  { %171 = vmax.xlane.f32.xlu0 %v170_v24 }
 0x1f0   :  { %141 = vadd.xlane.f32.xlu1 %v140_v27  ;;  %v336_v27 = vmul.f32 0.35355338, %v1928_v60 }
 0x1f1   :  { %v352_v14 = vpop.xlane.xlu0 %351 }
 0x1f2   :  { %v356_v24 = vmul.f32 0.35355338, %v352_v14  ;;  %v358_v16 = vsel %vm163_vm2, %v336_v27, %v346_v18 }
 0x1f4   :  { %v1982_v28 = vsel %vm166_vm3, %v358_v16, %v356_v24 }
 0x1f5   :  { %v362_v58 = vsel %vm169_vm4, %v1982_v28, -inf }
 0x1f7   :  { %468 = vadd.xlane.f32.xlu0 %v467_v29 }
 0x1f8   :  { %248 = vadd.xlane.f32.xlu1 %v247_v30 }
 0x1ff   :  { %582 = vadd.xlane.f32.xlu0 %v581_v34 }
 0x200   :  { %159 = vadd.xlane.f32.xlu1 %v158_v35 }
 0x208   :  { %258 = vadd.xlane.f32.xlu1 %v257_v37 }
 0x20b   :  { %v434_v10 = vpop.xlane.xlu2 %433 }
 0x210   :  { %354 = vadd.xlane.f32.xlu1 %v353_v40 }
 0x218   :  { %449 = vadd.xlane.f32.xlu1 %v448_v44  ;;  %v124_v55 = vpop.xlane.xlu1 %123  ;;  %v241_v44 = vmul.f32 0.35355338, %v1935_v63 }
 0x219   :  { %v126_v33 = vmul.f32 0.35355338, %v124_v55 }
 0x220   :  { %563 = vadd.xlane.f32.xlu1 %v562_v51 }
 0x228   :  { %465 = vadd.xlane.f32.xlu1 %v464_v54 }
 0x230   :  { %v445_v3 = vpop.permute.xlu1 %444  ;;  %579 = vadd.xlane.f32.xlu1 %v578_v56  ;;  %v663_v56 = vsel %vm118_vm1, %v657_v52, 0.0 }
 0x231   :  { %v451_v4 = vsel %vm118_vm1, %v445_v3, 0.0  ;;  %v347_v3 = vmul.f32 0.35355338, %v1937_v1 }
 0x232   :  { %452 = vadd.xlane.f32.xlu2 %v451_v4  ;;  %v337_v4 = vmul.f32 0.35355338, %v335_v50 }
 0x238   :  { %v559_v61 = vpop.permute.xlu1 %558 }
 0x239   :  { %v565_v6 = vsel %vm118_vm1, %v559_v61, 0.0 }
 0x23a   :  { %566 = vadd.xlane.f32.xlu2 %v565_v6  ;;  %v359_v6 = vsel %vm163_vm2, %v337_v4, %v347_v3 }
 0x242   :  { %267 = vmax.xlane.f32.xlu2 %v266_v21  ;;  %v548_v21 = vpop.xlane.xlu2 %547 }
 0x249   :  { %670 = vrot.lane.b32.xlu1 %v1879_v42, %s1722_s1 }
 0x24a   :  { %363 = vmax.xlane.f32.xlu2 %v362_v58 }
 0x251   :  { %672 = vrot.lane.b32.xlu1 %v1864_v36, %s1722_s1 }
 0x252   :  { %v437_v50 = vpop.xlane.xlu0 %436 }
 0x25a   :  { %v2009_v18 = vpop.xlane.xlu0 %550 }
 0x262   :  { %v172_v27 = vpop.xlane.xlu0 %171 }
 0x263   :  { %v142_v2 = vpop.xlane.xlu1 %141 }
 0x264   :  { %v144_v30 = vmul.f32 0.35355338, %v142_v2  ;;  %v552_v2 = vmul.f32 0.35355338, %v548_v21 }
 0x266   :  { %v165_v35 = vsel %vm163_vm2, %v126_v33, %v144_v30 }
 0x26b   :  { %v249_v29 = vpop.xlane.xlu1 %248 }
 0x26c   :  { %v251_v43 = vmul.f32 0.35355338, %v249_v29 }
 0x26e   :  { %v263_v54 = vsel %vm163_vm2, %v241_v44, %v251_v43 }
 0x273   :  { %v160_v60 = vpop.xlane.xlu1 %159 }
 0x274   :  { %v162_v34 = vmul.f32 0.35355338, %v160_v60 }
 0x276   :  { %v168_v37 = vsel %vm166_vm3, %v165_v35, %v162_v34  ;;  %v439_v35 = vmul.f32 0.35355338, %v437_v50 }
 0x277   :  { %v173_v40 = vsel %vm169_vm4, %v168_v37, -inf }
 0x278   :  { %174 = vmax.xlane.f32.xlu2 %v173_v40  ;;  %v469_v40 = vpop.xlane.xlu0 %468 }
 0x27b   :  { %v259_v51 = vpop.xlane.xlu1 %258 }
 0x27c   :  { %v261_v53 = vmul.f32 0.35355338, %v259_v51  ;;  %v471_v51 = vmul.f32 0.35355338, %v469_v40 }
 0x27e   :  { %v265_v45 = vsel %vm166_vm3, %v263_v54, %v261_v53 }
 0x27f   :  { %v269_v55 = vsel %vm169_vm4, %v265_v45, -inf }
 0x280   :  { %270 = vmax.xlane.f32.xlu0 %v269_v55  ;;  %664 = vadd.xlane.f32.xlu2 %v663_v56 }
 0x283   :  { %v355_v61 = vpop.xlane.xlu1 %354 }
 0x284   :  { %v357_v5 = vmul.f32 0.35355338, %v355_v61 }
 0x286   :  { %v2001_v63 = vsel %vm166_vm3, %v359_v6, %v357_v5  ;;  %v583_v5 = vpop.xlane.xlu0 %582 }
 0x287   :  { %v365_v0 = vsel %vm169_vm4, %v2001_v63, -inf }
 0x288   :  { %366 = vmax.xlane.f32.xlu0 %v365_v0 }
 0x28b   :  { %v450_v52 = vpop.xlane.xlu1 %449 }
 0x290   :  { %661 = vadd.xlane.f32.xlu0 %v660_v8 }
 0x293   :  { %v564_v1 = vpop.xlane.xlu1 %563 }
 0x294   :  { %v568_v16 = vmul.f32 0.35355338, %v564_v1  ;;  %v176_v1 = vsub.f32 %v1945_v23, %v172_v27 }
 0x296   :  { %v586_v33 = vsel %vm163_vm2, %v552_v2, %v568_v16  ;;  %v178_v16 = vmul.f32 1.442695, %v176_v1 }
 0x298   :  { %686 = vrot.lane.b32.xlu2 %v1909_v49, %s1722_s1 }
 0x29b   :  { %v466_v14 = vpop.xlane.xlu1 %465 }
 0x29c   :  { %v470_v27 = vmul.f32 0.35355338, %v466_v14 }
 0x2a3   :  { %v580_v24 = vpop.xlane.xlu1 %579 }
 0x2a4   :  { %v584_v58 = vmul.f32 0.35355338, %v580_v24 }
 0x2a5   :  { %v453_v29 = vpop.xlane.xlu2 %452 }
 0x2a6   :  { %v2014_v60 = vsel %vm166_vm3, %v586_v33, %v584_v58  ;;  %v455_v34 = vmul.f32 0.35355338, %v453_v29 }
 0x2a7   :  { %v590_v43 = vsel %vm169_vm4, %v2014_v60, -inf }
 0x2a8   :  { %v473_v44 = vsel %vm163_vm2, %v439_v35, %v455_v34  ;;  %v438_v34 = vmul.f32 0.35355338, %v434_v10  ;;  %v553_v10 = vmul.f32 0.35355338, %v2009_v18 }
 0x2a9   :  { %v2021_v55 = vsel %vm166_vm3, %v473_v44, %v471_v51 }
 0x2aa   :  { %v479_v56 = vsel %vm169_vm4, %v2021_v55, -inf }
 0x2ad   :  { %v567_v3 = vpop.xlane.xlu2 %566 }
 0x2b5   :  { %v268_v4 = vpop.xlane.xlu2 %267 }
 0x2b6   :  { %v272_v51 = vsub.f32 %v1974_v12, %v268_v4 }
 0x2bb   :  { %v671_v30 = vpop.permute.xlu1 %670 }
 0x2bc   :  { %v676_v57 = vsel %vm118_vm1, %v671_v30, 0.0 }
 0x2bd   :  { %677 = vadd.xlane.f32.xlu1 %v676_v57  ;;  %v364_v61 = vpop.xlane.xlu2 %363  ;;  %v454_v57 = vmul.f32 0.35355338, %v450_v52 }
 0x2be   :  { %v368_v12 = vsub.f32 %v1982_v28, %v364_v61 }
 0x2bf   :  { %v472_v44 = vsel %vm163_vm2, %v438_v34, %v454_v57 }
 0x2c0   :  { %v2044_v52 = vsel %vm166_vm3, %v472_v44, %v470_v27  ;;  %v370_v4 = vmul.f32 1.442695, %v368_v12 }
 0x2c1   :  { %591 = vmax.xlane.f32.xlu2 %v590_v43 }
 0x2c3   :  { %v673_v53 = vpop.permute.xlu1 %672 }
 0x2c4   :  { %v679_v54 = vsel %vm118_vm1, %v673_v53, 0.0  ;;  %v476_v53 = vsel %vm169_vm4, %v2044_v52, -inf }
 0x2c5   :  { %680 = vadd.xlane.f32.xlu0 %v679_v54 }
 0x2c9   :  { %480 = vmax.xlane.f32.xlu2 %v479_v56 }
 0x2d9   :  { %688 = vrot.lane.b32.xlu0 %v1961_v38, %s1722_s1 }
 0x2eb   :  { %v175_v6 = vpop.xlane.xlu2 %174 }
 0x2ec   :  { %v177_v0 = vsub.f32 %v168_v37, %v175_v6  ;;  %v585_v6 = vmul.f32 0.35355338, %v583_v5 }
 0x2ee   :  { %v180_v8 = vmul.f32 1.442695, %v177_v0  ;;  %v274_v0 = vmul.f32 1.442695, %v272_v51 }
 0x2f0   :  { %1625 = vpow2.f32 %v180_v8 }
 0x2f3   :  { %v2028_v50 = vpop.xlane.xlu2 %664  ;;  %v271_v21 = vpop.xlane.xlu0 %270 }
 0x2f4   :  { %v273_v24 = vsub.f32 %v265_v45, %v271_v21 }
 0x2f6   :  { %v2030_v58 = vpop.eup %1625  ;;  %v276_v2 = vmul.f32 1.442695, %v273_v24 }
 0x2f7   :  { %v185_v29 = vsel %vm169_vm4, %v2030_v58, 0.0 }
 0x2f8   :  { %1627 = vpow2.f32 %v276_v2  ;;  %186 = vadd.xlane.f32.xlu2 %v185_v29 }
 0x2f9   :  { %1629 = vpow2.f32 %v178_v16 }
 0x2fb   :  { %v687_v30 = vpop.permute.xlu2 %686  ;;  %v367_v37 = vpop.xlane.xlu0 %366 }
 0x2fc   :  { %v369_v33 = vsub.f32 %v2001_v63, %v367_v37  ;;  %v692_v23 = vsel %vm118_vm1, %v687_v30, 0.0  ;;  %v569_v63 = vmul.f32 0.35355338, %v567_v3 }
 0x2fd   :  { %693 = vadd.xlane.f32.xlu1 %v692_v23 }
 0x2fe   :  { %v2036_v45 = vpop.eup %1627  ;;  %v372_v35 = vmul.f32 1.442695, %v369_v33  ;;  %v587_v56 = vsel %vm163_vm2, %v553_v10, %v569_v63  ;;  %v667_v10 = vmul.f32 0.35355338, %v2028_v50 }
 0x2ff   :  { %v2038_v40 = vpop.eup %1629  ;;  %v281_v43 = vsel %vm169_vm4, %v2036_v45, 0.0  ;;  %v2058_v8 = vsel %vm166_vm3, %v587_v56, %v585_v6 }
 0x300   :  { %1631 = vpow2.f32 %v372_v35  ;;  %282 = vadd.xlane.f32.xlu2 %v281_v43  ;;  %v182_v14 = vsel %vm169_vm4, %v2038_v40, 0.0  ;;  %v593_v18 = vsel %vm169_vm4, %v2058_v8, -inf }
 0x301   :  { %1633 = vpow2.f32 %v274_v0 }
 0x302   :  { %1635 = vpow2.f32 %v370_v4 }
 0x303   :  { %183 = vadd.xlane.f32.xlu0 %v182_v14  ;;  %v662_v16 = vpop.xlane.xlu0 %661 }
 0x304   :  { %v666_v37 = vmul.f32 0.35355338, %v662_v16 }
 0x305   :  { %477 = vmax.xlane.f32.xlu1 %v476_v53 }
 0x306   :  { %v2052_v54 = vpop.eup %1631 }
 0x307   :  { %v377_v3 = vsel %vm169_vm4, %v2052_v54, 0.0  ;;  %v2063_v1 = vpop.eup %1633 }
 0x308   :  { %378 = vadd.xlane.f32.xlu2 %v377_v3  ;;  %v278_v5 = vsel %vm169_vm4, %v2063_v1, 0.0  ;;  %v2067_v21 = vpop.eup %1635 }
 0x309   :  { %v374_v24 = vsel %vm169_vm4, %v2067_v21, 0.0 }
 0x30d   :  { %594 = vmax.xlane.f32.xlu1 %v593_v18 }
 0x315   :  { %279 = vadd.xlane.f32.xlu1 %v278_v5 }
 0x31d   :  { %375 = vadd.xlane.f32.xlu1 %v374_v24 }
 0x330   :  { %v678_v29 = vpop.xlane.xlu1 %677 }
 0x331   :  { %v682_v30 = vmul.f32 0.35355338, %v678_v29 }
 0x333   :  { %v700_v23 = vsel %vm163_vm2, %v666_v37, %v682_v30 }
 0x334   :  { %v592_v35 = vpop.xlane.xlu2 %591 }
 0x338   :  { %v681_v28 = vpop.xlane.xlu0 %680 }
 0x339   :  { %v683_v51 = vmul.f32 0.35355338, %v681_v28 }
 0x33b   :  { %v701_v6 = vsel %vm163_vm2, %v667_v10, %v683_v51 }
 0x33c   :  { %v2082_v43 = vpop.xlane.xlu2 %480 }
 0x34b   :  { %v689_v61 = vpop.permute.xlu0 %688 }
 0x34c   :  { %v695_v2 = vsel %vm118_vm1, %v689_v61, 0.0 }
 0x34d   :  { %696 = vadd.xlane.f32.xlu2 %v695_v2 }
 0x365   :  { %768 = vrot.lane.b32.xlu2 %v1896_v47, %s1723_s2 }
 0x36b   :  { %v2084_v44 = vpop.xlane.xlu2 %186 }
 0x370   :  { %v694_v57 = vpop.xlane.xlu1 %693 }
 0x371   :  { %v698_v33 = vmul.f32 0.35355338, %v694_v57 }
 0x373   :  { %v2076_v27 = vsel %vm166_vm3, %v700_v23, %v698_v33  ;;  %v2086_v63 = vpop.xlane.xlu2 %282 }
 0x374   :  { %v704_v34 = vsel %vm169_vm4, %v2076_v27, -inf }
 0x375   :  { %705 = vmax.xlane.f32.xlu1 %v704_v34 }
 0x376   :  { %v2109_v2 = vpop.xlane.xlu0 %183 }
 0x378   :  { %v478_v4 = vpop.xlane.xlu1 %477 }
 0x37b   :  { %v2088_v14 = vpop.xlane.xlu2 %378 }
 0x380   :  { %v595_v50 = vpop.xlane.xlu1 %594 }
 0x388   :  { %v2104_v5 = vpop.xlane.xlu1 %279 }
 0x38e   :  { %766 = vrot.lane.b32.xlu1 %v1819_v19, %s1723_s2 }
 0x390   :  { %v2106_v24 = vpop.xlane.xlu1 %375 }
 0x3c0   :  { %v697_v53 = vpop.xlane.xlu2 %696 }
 0x3c1   :  { %v699_v56 = vmul.f32 0.35355338, %v697_v53 }
 0x3c3   :  { %v2093_v0 = vsel %vm166_vm3, %v701_v6, %v699_v56 }
 0x3c4   :  { %v707_v3 = vsel %vm169_vm4, %v2093_v0, -inf }
 0x3c5   :  { %708 = vmax.xlane.f32.xlu0 %v707_v3 }
 0x3c8   :  { %v769_v12 = vpop.permute.xlu2 %768 }
 0x3c9   :  { %v775_v18 = vsel %vm118_vm1, %v769_v12, 0.0 }
 0x3ca   :  { %776 = vadd.xlane.f32.xlu2 %v775_v18 }
 0x3d9   :  { %780 = vrot.lane.b32.xlu0 %v1838_v25, %s1723_s2 }
 0x3e1   :  { %782 = vrot.lane.b32.xlu0 %v1924_v59, %s1723_s2 }
 0x3e2   :  { %794 = vrot.lane.b32.xlu2 %v1869_v39, %s1723_s2 }
 0x3e8   :  { %v706_v16 = vpop.xlane.xlu1 %705 }
 0x400   :  { %v767_v28 = vpop.permute.xlu1 %766 }
 0x401   :  { %v772_v61 = vsel %vm118_vm1, %v767_v28, 0.0 }
 0x402   :  { %773 = vadd.xlane.f32.xlu1 %v772_v61 }
 0x438   :  { %v709_v29 = vpop.xlane.xlu0 %708 }
 0x43d   :  { %v2111_v30 = vpop.xlane.xlu2 %776 }
 0x445   :  { %v795_v33 = vpop.permute.xlu2 %794 }
 0x446   :  { %v800_v34 = vsel %vm118_vm1, %v795_v33, 0.0 }
 0x44b   :  { %v781_v37 = vpop.permute.xlu0 %780 }
 0x44c   :  { %v786_v57 = vsel %vm118_vm1, %v781_v37, 0.0 }
 0x44d   :  { %787 = vadd.xlane.f32.xlu0 %v786_v57 }
 0x453   :  { %v783_v23 = vpop.permute.xlu0 %782 }
 0x454   :  { %v789_v51 = vsel %vm118_vm1, %v783_v23, 0.0  ;;  %v482_v23 = vsub.f32 %v2044_v52, %v478_v4  ;;  %v483_v52 = vsub.f32 %v2021_v55, %v2082_v43  ;;  %v711_v55 = vsub.f32 %v2093_v0, %v709_v29 }
 0x455   :  { %801 = vadd.xlane.f32.xlu0 %v800_v34  ;;  %790 = vadd.xlane.f32.xlu1 %v789_v51  ;;  %v596_v51 = vsub.f32 %v2014_v60, %v592_v35 }
 0x456   :  { %v484_v34 = vmul.f32 1.442695, %v482_v23  ;;  %v486_v35 = vmul.f32 1.442695, %v483_v52 }
 0x458   :  { %1637 = vpow2.f32 %v484_v34  ;;  %v2719_v34 = vmov 2  }
 0x459   :  { %1598 = vset.pattern.permute.xlu2 %v2719_v34  ;;  %1600 = vset.pattern.permute.xlu1 %v2719_v34 }
 0x46e   :  { %796 = vrot.lane.b32.xlu1 %v1891_v46, %s1723_s2 }
 0x475   :  { %v774_v53 = vpop.xlane.xlu1 %773 }
 0x476   :  { %v778_v6 = vmul.f32 0.35355338, %v774_v53  ;;  %v2132_v53 = vpop.eup %1637 }
 0x4c0   :  { %v788_v10 = vpop.xlane.xlu0 %787 }
 0x4c1   :  { %v792_v56 = vmul.f32 0.35355338, %v788_v10  ;;  %v598_v10 = vmul.f32 1.442695, %v596_v51  ;;  %v779_v51 = vmul.f32 0.35355338, %v2111_v30 }
 0x4c3   :  { %v808_v18 = vsel %vm163_vm2, %v778_v6, %v792_v56  ;;  %1639 = vpow2.f32 %v598_v10  ;;  %v710_v56 = vsub.f32 %v2076_v27, %v706_v16  ;;  %v488_v6 = vsel %vm169_vm4, %v2132_v53, 0.0 }
 0x4c4   :  { %v597_v27 = vsub.f32 %v2058_v8, %v595_v50 }
 0x4c8   :  { %v802_v3 = vpop.xlane.xlu0 %801  ;;  %v791_v37 = vpop.xlane.xlu1 %790 }
 0x4c9   :  { %v806_v12 = vmul.f32 0.35355338, %v802_v3  ;;  %v712_v3 = vmul.f32 1.442695, %v710_v56  ;;  %v793_v29 = vmul.f32 0.35355338, %v791_v37 }
 0x4cb   :  { %v810_v28 = vsel %vm166_vm3, %v808_v18, %v806_v12  ;;  %v2137_v12 = vpop.eup %1639  ;;  %1641 = vpow2.f32 %v712_v3  ;;  %v600_v18 = vmul.f32 1.442695, %v597_v27 }
 0x4cc   :  { %v812_v61 = vsel %vm169_vm4, %v810_v28, -inf  ;;  %v602_v60 = vsel %vm169_vm4, %v2137_v12, 0.0  ;;  %1643 = vpow2.f32 %v486_v35 }
 0x4cd   :  { %813 = vmax.xlane.f32.xlu1 %v812_v61  ;;  %1645 = vpow2.f32 %v600_v18 }
 0x4d1   :  { %v2143_v4 = vpop.eup %1641 }
 0x4d2   :  { %v716_v16 = vsel %vm169_vm4, %v2143_v4, 0.0  ;;  %v2148_v61 = vpop.eup %1643 }
 0x4d3   :  { %v491_v43 = vsel %vm169_vm4, %v2148_v61, 0.0 }
 0x4e0   :  { %v797_v57 = vpop.permute.xlu1 %796 }
 0x4e1   :  { %v803_v33 = vsel %vm118_vm1, %v797_v57, 0.0  ;;  %v714_v57 = vmul.f32 1.442695, %v711_v55 }
 0x4e2   :  { %804 = vadd.xlane.f32.xlu2 %v803_v33  ;;  %v2153_v33 = vpop.eup %1645 }
 0x4e3   :  { %1647 = vpow2.f32 %v714_v57  ;;  %v605_v8 = vsel %vm169_vm4, %v2153_v33, 0.0 }
 0x4e6   :  { %876 = vrot.lane.b32.xlu1 %v1854_v31, %s1723_s2 }
 0x4e9   :  { %v1648_v50 = vpop.eup %1647 }
 0x4ea   :  { %v719_v23 = vsel %vm169_vm4, %v1648_v50, 0.0 }
 0x4ee   :  { %888 = vrot.lane.b32.xlu1 %v1843_v26, %s1723_s2 }
 0x4f6   :  { %890 = vrot.lane.b32.xlu1 %v1931_v62, %s1723_s2 }
 0x4fa   :  { %874 = vrot.lane.b32.xlu2 %v1822_v20, %s1723_s2 }
 0x520   :  { %489 = vadd.xlane.f32.xlu1 %v488_v6  ;;  %v809_v6 = vsel %vm163_vm2, %v779_v51, %v793_v29 }
 0x528   :  { %603 = vadd.xlane.f32.xlu1 %v602_v60 }
 0x530   :  { %717 = vadd.xlane.f32.xlu1 %v716_v16 }
 0x538   :  { %492 = vadd.xlane.f32.xlu1 %v491_v43 }
 0x540   :  { %606 = vadd.xlane.f32.xlu1 %v605_v8  ;;  %v814_v0 = vpop.xlane.xlu1 %813 }
 0x541   :  { %v818_v3 = vsub.f32 %v810_v28, %v814_v0 }
 0x543   :  { %v820_v27 = vmul.f32 1.442695, %v818_v3 }
 0x545   :  { %1649 = vpow2.f32 %v820_v27 }
 0x546   :  { %1651 = vrcp.f32 %v2109_v2 }
 0x547   :  { %1653 = vrcp.f32 %v2104_v5 }
 0x548   :  { %720 = vadd.xlane.f32.xlu1 %v719_v23  ;;  %1655 = vrcp.f32 %v2088_v14 }
 0x54b   :  { %v2167_v28 = vpop.eup %1649 }
 0x54c   :  { %v824_v57 = vsel %vm169_vm4, %v2167_v28, 0.0  ;;  %v1652_v23 = vpop.eup %1651 }
 0x54d   :  { %v2175_v0 = vmul.f32 %v1652_v23, %v2038_v40  ;;  %v1654_v29 = vpop.eup %1653 }
 0x54e   :  { %v2180_v51 = vmul.f32 %v1654_v29, %v2063_v1 }
 0x555   :  { %v805_v10 = vpop.xlane.xlu2 %804 }
 0x556   :  { %v807_v56 = vmul.f32 0.35355338, %v805_v10  ;;  %v1656_v10 = vpop.eup %1655 }
 0x558   :  { %v877_v52 = vpop.permute.xlu1 %876  ;;  %v811_v60 = vsel %vm166_vm3, %v809_v6, %v807_v56  ;;  %v2184_v56 = vmul.f32 %v1656_v10, %v2052_v54 }
 0x559   :  { %v815_v35 = vsel %vm169_vm4, %v811_v60, -inf  ;;  %v883_v30 = vsel %vm118_vm1, %v877_v52, 0.0 }
 0x55a   :  { %816 = vmax.xlane.f32.xlu0 %v815_v35 }
 0x55d   :  { %v875_v16 = vpop.permute.xlu2 %874 }
 0x55e   :  { %v880_v18 = vsel %vm118_vm1, %v875_v16, 0.0 }
 0x55f   :  { %881 = vadd.xlane.f32.xlu2 %v880_v18 }
 0x560   :  { %v889_v37 = vpop.permute.xlu1 %888 }
 0x561   :  { %v894_v55 = vsel %vm118_vm1, %v889_v37, 0.0 }
 0x562   :  { %884 = vadd.xlane.f32.xlu0 %v883_v30  ;;  %895 = vadd.xlane.f32.xlu1 %v894_v55 }
 0x568   :  { %v891_v43 = vpop.permute.xlu1 %890 }
 0x569   :  { %v897_v8 = vsel %vm118_vm1, %v891_v43, 0.0 }
 0x56a   :  { %825 = vadd.xlane.f32.xlu0 %v824_v57  ;;  %898 = vadd.xlane.f32.xlu2 %v897_v8 }
 0x582   :  { %219 = vperm.xlu2 %1598, %v2175_v0  }
 0x58a   :  { %315 = vperm.xlu2 %1598, %v2180_v51  }
 0x592   :  { %415 = vperm.xlu2 %1598, %v2184_v56  }
 0x593   :  { %v490_v5 = vpop.xlane.xlu1 %489 }
 0x59b   :  { %v604_v2 = vpop.xlane.xlu1 %603 }
 0x5a3   :  { %v2187_v40 = vpop.xlane.xlu1 %717 }
 0x5ab   :  { %v2189_v6 = vpop.xlane.xlu1 %492 }
 0x5b3   :  { %v2191_v3 = vpop.xlane.xlu1 %606 }
 0x5bb   :  { %v721_v14 = vpop.xlane.xlu1 %720 }
 0x5bc   :  { %1657 = vrcp.f32 %v721_v14 }
 0x5c2   :  { %v1658_v1 = vpop.eup %1657 }
 0x5c3   :  { %v2193_v52 = vmul.f32 %v1658_v1, %v1648_v50 }
 0x5c5   :  { %757 = vperm.xlu2 %1598, %v2193_v52  }
 0x5cd   :  { %904 = vrot.lane.b32.xlu2 %v1902_v48, %s1723_s2  ;;  %v817_v54 = vpop.xlane.xlu0 %816 }
 0x5ce   :  { %v819_v35 = vsub.f32 %v811_v60, %v817_v54 }
 0x5d0   :  { %v822_v27 = vmul.f32 1.442695, %v819_v35 }
 0x5d2   :  { %1659 = vpow2.f32 %v822_v27  ;;  %v882_v50 = vpop.xlane.xlu2 %881 }
 0x5d3   :  { %1661 = vrcp.f32 %v2084_v44 }
 0x5d4   :  { %1663 = vrcp.f32 %v2106_v24  ;;  %v886_v24 = vmul.f32 0.35355338, %v882_v50 }
 0x5d5   :  { %v885_v23 = vpop.xlane.xlu0 %884  ;;  %1665 = vrcp.f32 %v490_v5 }
 0x5d6   :  { %v887_v54 = vmul.f32 0.35355338, %v885_v23  ;;  %1667 = vrcp.f32 %v604_v2 }
 0x5d8   :  { %v2198_v16 = vpop.eup %1659 }
 0x5d9   :  { %v827_v18 = vsel %vm169_vm4, %v2198_v16, 0.0 }
 0x5da   :  { %828 = vadd.xlane.f32.xlu0 %v827_v18 }
 0x5dd   :  { %v899_v37 = vpop.xlane.xlu2 %898  ;;  %v2219_v29 = vpop.xlane.xlu0 %825 }
 0x5e5   :  { %v2204_v30 = vpop.permute.xlu2 %219 }
 0x5ed   :  { %v2206_v55 = vpop.permute.xlu2 %315 }
 0x5ee   :  { %902 = vrot.lane.b32.xlu0 %v1874_v41, %s1723_s2 }
 0x5f5   :  { %v2208_v43 = vpop.permute.xlu2 %415 }
 0x5f6   :  { %2723 = vst [vmem:[#allocation2_spill] sm:$0xff] %v2208_v43 }
 0x61f   :  { %v2210_v60 = vpop.permute.xlu2 %757 }
 0x627   :  { %v905_v57 = vpop.permute.xlu2 %904 }
 0x628   :  { %v911_v8 = vsel %vm118_vm1, %v905_v57, 0.0  ;;  %v1662_v57 = vpop.eup %1661 }
 0x629   :  { %912 = vadd.xlane.f32.xlu0 %v911_v8  ;;  %v2236_v8 = vmul.f32 %v1662_v57, %v2030_v58 }
 0x63d   :  { %1106 = vrot.lane.b32.xlu0 %v1924_v59, %s1725_s4  ;;  %v901_v59 = vmul.f32 0.35355338, %v899_v37  ;;  %v1664_v37 = vpop.eup %1663 }
 0x63e   :  { %v2242_v23 = vmul.f32 %v1664_v37, %v2067_v21 }
 0x63f   :  { %v917_v27 = vsel %vm163_vm2, %v887_v54, %v901_v59 }
 0x645   :  { %1212 = vrot.lane.b32.xlu0 %v1843_v26, %s1725_s4  ;;  %v2721_v26 = vmov 1  }
 0x646   :  { %1599 = vset.pattern.permute.xlu2 %v2721_v26 }
 0x64d   :  { %984 = vrot.lane.b32.xlu0 %v1857_v32, %s1723_s2  ;;  %v829_v10 = vpop.xlane.xlu0 %828 }
 0x64e   :  { %1669 = vrcp.f32 %v829_v10 }
 0x655   :  { %1118 = vrot.lane.b32.xlu0 %v1869_v39, %s1725_s4 }
 0x65d   :  { %1228 = vrot.lane.b32.xlu0 %v1902_v48, %s1725_s4 }
 0x660   :  { %v903_v14 = vpop.permute.xlu0 %902 }
 0x661   :  { %v908_v1 = vsel %vm118_vm1, %v903_v14, 0.0  ;;  %v1666_v14 = vpop.eup %1665 }
 0x662   :  { %909 = vadd.xlane.f32.xlu1 %v908_v1  ;;  %v896_v1 = vpop.xlane.xlu1 %895  ;;  %v2246_v44 = vmul.f32 %v1666_v14, %v2132_v53  ;;  %v1668_v59 = vpop.eup %1667 }
 0x663   :  { %v900_v58 = vmul.f32 0.35355338, %v896_v1  ;;  %v2250_v5 = vmul.f32 %v1668_v59, %v2137_v12  ;;  %v1670_v2 = vpop.eup %1669 }
 0x665   :  { %1306 = vrot.lane.b32.xlu0 %v1831_v22, %s1725_s4  ;;  %v916_v21 = vsel %vm163_vm2, %v886_v24, %v900_v58 }
 0x66d   :  { %1322 = vrot.lane.b32.xlu0 %v1864_v36, %s1725_s4 }
 0x69c   :  { %v913_v39 = vpop.xlane.xlu0 %912 }
 0x69d   :  { %v915_v35 = vmul.f32 0.35355338, %v913_v39 }
 0x69f   :  { %v919_v48 = vsel %vm166_vm3, %v917_v27, %v915_v35  ;;  %v2257_v27 = vmul.f32 %v1670_v2, %v2198_v16 }
 0x6a0   :  { %v923_v18 = vsel %vm169_vm4, %v919_v48, -inf }
 0x6a1   :  { %924 = vmax.xlane.f32.xlu2 %v923_v18 }
 0x6b9   :  { %211 = vperm.xlu2 %1599, %v2236_v8  }
 0x6c1   :  { %303 = vperm.xlu2 %1599, %v2180_v51  }
 0x6c9   :  { %399 = vperm.xlu2 %1599, %v2242_v23  }
 0x6d1   :  { %513 = vperm.xlu2 %1599, %v2246_v44  }
 0x6d5   :  { %v910_v54 = vpop.xlane.xlu1 %909 }
 0x6d6   :  { %v914_v39 = vmul.f32 0.35355338, %v910_v54 }
 0x6d8   :  { %v918_v35 = vsel %vm166_vm3, %v916_v21, %v914_v39 }
 0x6d9   :  { %627 = vperm.xlu2 %1599, %v2250_v5   ;;  %v920_v53 = vsel %vm169_vm4, %v918_v35, -inf }
 0x6da   :  { %921 = vmax.xlane.f32.xlu1 %v920_v53 }
 0x6e1   :  { %853 = vperm.xlu2 %1599, %v2257_v27  }
 0x74d   :  { %v922_v50 = vpop.xlane.xlu1 %921 }
 0x74e   :  { %v926_v10 = vsub.f32 %v918_v35, %v922_v50 }
 0x750   :  { %v928_v18 = vmul.f32 1.442695, %v926_v10  ;;  %v1107_v10 = vpop.permute.xlu0 %1106 }
 0x752   :  { %1671 = vpow2.f32 %v928_v18 }
 0x753   :  { %1673 = vrcp.f32 %v2086_v63 }
 0x754   :  { %1675 = vrcp.f32 %v2189_v6 }
 0x755   :  { %1677 = vrcp.f32 %v2191_v3 }
 0x756   :  { %1679 = vrcp.f32 %v2187_v40 }
 0x758   :  { %v1672_v12 = vpop.eup %1671 }
 0x759   :  { %v932_v57 = vsel %vm169_vm4, %v1672_v12, 0.0  ;;  %v1674_v37 = vpop.eup %1673 }
 0x75a   :  { %933 = vadd.xlane.f32.xlu1 %v932_v57  ;;  %v2263_v14 = vmul.f32 %v1674_v37, %v2036_v45  ;;  %v1676_v16 = vpop.eup %1675  ;;  %v1213_v37 = vpop.permute.xlu0 %1212 }
 0x75b   :  { %v2271_v1 = vmul.f32 %v1676_v16, %v2148_v61  ;;  %v1678_v63 = vpop.eup %1677  ;;  %v925_v61 = vpop.xlane.xlu2 %924 }
 0x75c   :  { %v2276_v45 = vmul.f32 %v1678_v63, %v2153_v33  ;;  %v1680_v58 = vpop.eup %1679  ;;  %v927_v3 = vsub.f32 %v919_v48, %v925_v61 }
 0x75d   :  { %v2280_v6 = vmul.f32 %v1680_v58, %v2143_v4 }
 0x75e   :  { %v930_v59 = vmul.f32 1.442695, %v927_v3 }
 0x760   :  { %1681 = vpow2.f32 %v930_v59 }
 0x762   :  { %v985_v61 = vpop.permute.xlu0 %984 }
 0x763   :  { %v2298_v4 = vpop.permute.xlu2 %211 }
 0x766   :  { %v1682_v40 = vpop.eup %1681 }
 0x767   :  { %v935_v33 = vsel %vm169_vm4, %v1682_v40, 0.0 }
 0x773   :  { %319 = vperm.xlu1 %1600, %v2263_v14  }
 0x77b   :  { %411 = vperm.xlu1 %1600, %v2242_v23  }
 0x783   :  { %525 = vperm.xlu1 %1600, %v2246_v44  }
 0x78b   :  { %529 = vperm.xlu1 %1600, %v2271_v1  }
 0x793   :  { %643 = vperm.xlu1 %1600, %v2276_v45  }
 0x79b   :  { %753 = vperm.xlu1 %1600, %v2280_v6  }
 0x7a3   :  { %865 = vperm.xlu1 %1600, %v2257_v27  }
 0x7ab   :  { %1601 = vset.pattern.permute.xlu1 %v2721_v26 }
 0x7cd   :  { %v934_v24 = vpop.xlane.xlu1 %933  ;;  %936 = vadd.xlane.f32.xlu1 %v935_v33 }
 0x7ce   :  { %1683 = vrcp.f32 %v934_v24  ;;  %v1218_v24 = vsel %vm118_vm1, %v1213_v37, 0.0 }
 0x7cf   :  { %1685 = vrcp.f32 %v2219_v29 }
 0x7d4   :  { %v1684_v54 = vpop.eup %1683 }
 0x7d5   :  { %v2286_v39 = vmul.f32 %v1684_v54, %v1672_v12 }
 0x7d7   :  { %957 = vperm.xlu2 %1599, %v2286_v39  }
 0x7df   :  { %1090 = vrot.lane.b32.xlu2 %v1819_v19, %s1725_s4  ;;  %v2307_v19 = vpop.permute.xlu2 %303 }
 0x7e5   :  { %v2302_v48 = vpop.permute.xlu1 %319 }
 0x7e6   :  { %207 = vperm.xlu1 %1601, %v2175_v0   ;;  %2724 = vst [vmem:[#allocation3_spill] sm:$0xff] %v2302_v48 }
 0x7e7   :  { %1104 = vrot.lane.b32.xlu2 %v1838_v25, %s1725_s4 }
 0x7ed   :  { %v2310_v25 = vpop.permute.xlu1 %411 }
 0x7ee   :  { %307 = vperm.xlu1 %1601, %v2263_v14   ;;  %2725 = vst [vmem:[#allocation4_spill] sm:$0xff] %v2310_v25 }
 0x7ef   :  { %1200 = vrot.lane.b32.xlu2 %v1854_v31, %s1725_s4  ;;  %v1686_v31 = vpop.eup %1685 }
 0x7f0   :  { %v2318_v21 = vmul.f32 %v1686_v31, %v2167_v28  ;;  %v1119_v31 = vpop.permute.xlu0 %1118 }
 0x7f6   :  { %517 = vperm.xlu1 %1601, %v2271_v1  }
 0x7f7   :  { %982 = vrot.lane.b32.xlu2 %v1831_v22, %s1723_s2  ;;  %v2315_v22 = vpop.permute.xlu2 %399 }
 0x7f8   :  { %v1229_v37 = vpop.permute.xlu0 %1228 }
 0x7fe   :  { %631 = vperm.xlu1 %1601, %v2276_v45  }
 0x7ff   :  { %998 = vrot.lane.b32.xlu2 %v1864_v36, %s1723_s2  ;;  %v2323_v36 = vpop.permute.xlu1 %525  ;;  %v2325_v29 = vpop.permute.xlu2 %513 }
 0x800   :  { %2726 = vst [vmem:[#allocation5_spill] sm:$0xff] %v2323_v36 }
 0x806   :  { %745 = vperm.xlu1 %1601, %v2193_v52  }
 0x807   :  { %1226 = vrot.lane.b32.xlu2 %v1874_v41, %s1725_s4  ;;  %v2329_v35 = vpop.permute.xlu1 %529  ;;  %v2331_v41 = vpop.permute.xlu2 %627 }
 0x808   :  { %2727 = vst [vmem:[#allocation6_spill] sm:$0xff] %v2329_v35 }
 0x80e   :  { %849 = vperm.xlu1 %1601, %v2318_v21  }
 0x80f   :  { %1012 = vrot.lane.b32.xlu2 %v1961_v38, %s1723_s2  ;;  %v2335_v28 = vpop.permute.xlu1 %643  ;;  %v2337_v53 = vpop.permute.xlu2 %853 }
 0x810   :  { %2728 = vst [vmem:[#allocation7_spill] sm:$0xff] %v2335_v28 }
 0x811   :  { %2729 = vst [vmem:[#allocation8_spill] sm:$0xff] %v2337_v53 }
 0x817   :  { %1320 = vrot.lane.b32.xlu2 %v1879_v42, %s1725_s4  ;;  %v2339_v2 = vpop.permute.xlu1 %753 }
 0x818   :  { %2730 = vst [vmem:[#allocation9_spill] sm:$0xff] %v2339_v2 }
 0x81f   :  { %1336 = vrot.lane.b32.xlu2 %v1961_v38, %s1725_s4  ;;  %v2343_v18 = vpop.permute.xlu1 %865  ;;  %v1113_v38 = vsel %vm118_vm1, %v1107_v10, 0.0  ;;  %v991_v10 = vsel %vm118_vm1, %v985_v61, 0.0  ;;  %v1307_v61 = vpop.permute.xlu0 %1306 }
 0x820   :  { %2731 = vst [vmem:[#allocation10_spill] sm:$0xff] %v2343_v18 }
 0x831   :  { %v2341_v50 = vpop.permute.xlu2 %957 }
 0x839   :  { %v1091_v12 = vpop.permute.xlu2 %1090 }
 0x83a   :  { %v1096_v57 = vsel %vm118_vm1, %v1091_v12, 0.0 }
 0x83b   :  { %1097 = vadd.xlane.f32.xlu0 %v1096_v57 }
 0x840   :  { %v937_v16 = vpop.xlane.xlu1 %936 }
 0x841   :  { %1687 = vrcp.f32 %v937_v16  ;;  %v1105_v63 = vpop.permute.xlu2 %1104  ;;  %v1124_v16 = vsel %vm118_vm1, %v1119_v31, 0.0 }
 0x842   :  { %v1110_v3 = vsel %vm118_vm1, %v1105_v63, 0.0 }
 0x843   :  { %1114 = vadd.xlane.f32.xlu0 %v1113_v38 }
 0x847   :  { %v1688_v58 = vpop.eup %1687 }
 0x848   :  { %1111 = vadd.xlane.f32.xlu2 %v1110_v3  ;;  %v2348_v59 = vmul.f32 %v1688_v58, %v1682_v40  ;;  %v1235_v58 = vsel %vm118_vm1, %v1229_v37, 0.0 }
 0x849   :  { %v1201_v33 = vpop.permute.xlu2 %1200 }
 0x84a   :  { %961 = vperm.xlu1 %1601, %v2348_v59   ;;  %v1207_v54 = vsel %vm118_vm1, %v1201_v33, 0.0 }
 0x84b   :  { %1219 = vadd.xlane.f32.xlu0 %v1218_v24  ;;  %v1312_v24 = vsel %vm118_vm1, %v1307_v61, 0.0 }
 0x850   :  { %1208 = vadd.xlane.f32.xlu2 %v1207_v54  ;;  %v1323_v54 = vpop.permute.xlu0 %1322 }
 0x851   :  { %v983_v12 = vpop.permute.xlu2 %982 }
 0x852   :  { %1602 = vset.pattern.permute.xlu1 %v2719_v34  ;;  %v988_v40 = vsel %vm118_vm1, %v983_v12, 0.0 }
 0x853   :  { %969 = vperm.xlu1 %1602, %v2286_v39   ;;  %992 = vadd.xlane.f32.xlu0 %v991_v10  ;;  %v1329_v10 = vsel %vm118_vm1, %v1323_v54, 0.0 }
 0x858   :  { %989 = vadd.xlane.f32.xlu2 %v988_v40 }
 0x859   :  { %v999_v57 = vpop.permute.xlu2 %998 }
 0x85a   :  { %v1005_v63 = vsel %vm118_vm1, %v999_v57, 0.0  ;;  %v2375_v57 = vpop.permute.xlu1 %207 }
 0x85b   :  { %973 = vperm.xlu1 %1602, %v2348_v59   ;;  %1125 = vadd.xlane.f32.xlu0 %v1124_v16 }
 0x860   :  { %1006 = vadd.xlane.f32.xlu2 %v1005_v63 }
 0x861   :  { %v1227_v38 = vpop.permute.xlu2 %1226 }
 0x862   :  { %v1232_v3 = vsel %vm118_vm1, %v1227_v38, 0.0 }
 0x863   :  { %1092 = vrot.lane.b32.xlu1 %v1896_v47, %s1725_s4  ;;  %1236 = vadd.xlane.f32.xlu0 %v1235_v58 }
 0x868   :  { %1233 = vadd.xlane.f32.xlu2 %v1232_v3 }
 0x869   :  { %v1013_v33 = vpop.permute.xlu2 %1012 }
 0x86a   :  { %v1019_v31 = vsel %vm118_vm1, %v1013_v33, 0.0 }
 0x86b   :  { %1198 = vrot.lane.b32.xlu1 %v1822_v20, %s1725_s4  ;;  %1313 = vadd.xlane.f32.xlu0 %v1312_v24 }
 0x870   :  { %1020 = vadd.xlane.f32.xlu2 %v1019_v31 }
 0x871   :  { %v1321_v12 = vpop.permute.xlu2 %1320 }
 0x872   :  { %v1326_v47 = vsel %vm118_vm1, %v1321_v12, 0.0 }
 0x873   :  { %1214 = vrot.lane.b32.xlu1 %v1931_v62, %s1725_s4  ;;  %1330 = vadd.xlane.f32.xlu0 %v1329_v10  ;;  %v2381_v62 = vpop.permute.xlu1 %307 }
 0x878   :  { %1327 = vadd.xlane.f32.xlu2 %v1326_v47 }
 0x879   :  { %v1337_v40 = vpop.permute.xlu2 %1336 }
 0x87a   :  { %v1343_v20 = vsel %vm118_vm1, %v1337_v40, 0.0 }
 0x87b   :  { %996 = vrot.lane.b32.xlu1 %v1879_v42, %s1723_s2  ;;  %v2385_v16 = vpop.permute.xlu1 %517 }
 0x87c   :  { %2732 = vst [vmem:[#allocation11_spill] sm:$0xff] %v2385_v16 }
 0x880   :  { %1344 = vadd.xlane.f32.xlu2 %v1343_v20 }
 0x883   :  { %1120 = vrot.lane.b32.xlu1 %v1891_v46, %s1725_s4  ;;  %v2389_v42 = vpop.permute.xlu1 %631 }
 0x884   :  { %2733 = vst [vmem:[#allocation12_spill] sm:$0xff] %v2389_v42 }
 0x88b   :  { %1010 = vrot.lane.b32.xlu1 %v1909_v49, %s1723_s2  ;;  %v2391_v37 = vpop.permute.xlu1 %745 }
 0x893   :  { %1308 = vrot.lane.b32.xlu1 %v1857_v32, %s1725_s4  ;;  %v2393_v38 = vpop.permute.xlu1 %849 }
 0x894   :  { %2734 = vst [vmem:[#allocation13_spill] sm:$0xff] %v2393_v38 }
 0x89b   :  { %1334 = vrot.lane.b32.xlu1 %v1909_v49, %s1725_s4 }
 0x8ae   :  { %v1098_v63 = vpop.xlane.xlu0 %1097 }
 0x8af   :  { %v1102_v49 = vmul.f32 0.35355338, %v1098_v63 }
 0x8b6   :  { %v2395_v46 = vpop.xlane.xlu0 %1114 }
 0x8bb   :  { %v1112_v33 = vpop.xlane.xlu2 %1111 }
 0x8bc   :  { %v2397_v58 = vpop.permute.xlu1 %961  ;;  %v1116_v24 = vmul.f32 0.35355338, %v1112_v33 }
 0x8bd   :  { %2735 = vst [vmem:[#allocation14_spill] sm:$0xff] %v2397_v58 }
 0x8be   :  { %v1220_v61 = vpop.xlane.xlu0 %1219  ;;  %v1132_v10 = vsel %vm163_vm2, %v1102_v49, %v1116_v24 }
 0x8c5   :  { %v2399_v3 = vpop.permute.xlu1 %969 }
 0x8c6   :  { %v993_v32 = vpop.xlane.xlu0 %992 }
 0x8c7   :  { %v995_v28 = vmul.f32 0.35355338, %v993_v32 }
 0x8cd   :  { %v2401_v54 = vpop.permute.xlu1 %973 }
 0x8ce   :  { %2736 = vst [vmem:[#allocation15_spill] sm:$0xff] %v2401_v54  ;;  %v1126_v31 = vpop.xlane.xlu0 %1125  ;;  %v1224_v54 = vmul.f32 0.35355338, %v1220_v61 }
 0x8cf   :  { %v1130_v12 = vmul.f32 0.35355338, %v1126_v31 }
 0x8d1   :  { %v1134_v47 = vsel %vm166_vm3, %v1132_v10, %v1130_v12 }
 0x8d2   :  { %v1136_v40 = vsel %vm169_vm4, %v1134_v47, -inf }
 0x8d3   :  { %1137 = vmax.xlane.f32.xlu0 %v1136_v40 }
 0x8d5   :  { %v1093_v20 = vpop.permute.xlu1 %1092 }
 0x8d6   :  { %v1099_v34 = vsel %vm118_vm1, %v1093_v20, 0.0 }
 0x8d7   :  { %1100 = vadd.xlane.f32.xlu1 %v1099_v34 }
 0x8dd   :  { %v1199_v26 = vpop.permute.xlu1 %1198 }
 0x8de   :  { %v1204_v2 = vsel %vm118_vm1, %v1199_v26, 0.0 }
 0x8df   :  { %1205 = vadd.xlane.f32.xlu1 %v1204_v2 }
 0x8e5   :  { %v1215_v33 = vpop.permute.xlu1 %1214 }
 0x8e6   :  { %v1221_v63 = vsel %vm118_vm1, %v1215_v33, 0.0  ;;  %v1209_v33 = vpop.xlane.xlu2 %1208 }
 0x8e7   :  { %1222 = vadd.xlane.f32.xlu1 %v1221_v63  ;;  %v1211_v16 = vmul.f32 0.35355338, %v1209_v33 }
 0x8ed   :  { %v997_v31 = vpop.permute.xlu1 %996 }
 0x8ee   :  { %v1002_v24 = vsel %vm118_vm1, %v997_v31, 0.0  ;;  %v990_v63 = vpop.xlane.xlu2 %989  ;;  %v1237_v31 = vpop.xlane.xlu0 %1236 }
 0x8ef   :  { %1003 = vadd.xlane.f32.xlu1 %v1002_v24 }
 0x8f5   :  { %v1121_v49 = vpop.permute.xlu1 %1120 }
 0x8f6   :  { %v1127_v12 = vsel %vm118_vm1, %v1121_v49, 0.0  ;;  %v1007_v24 = vpop.xlane.xlu2 %1006  ;;  %v1314_v43 = vpop.xlane.xlu0 %1313 }
 0x8f7   :  { %1128 = vadd.xlane.f32.xlu1 %v1127_v12 }
 0x8fd   :  { %v1011_v10 = vpop.permute.xlu1 %1010 }
 0x8fe   :  { %v1016_v40 = vsel %vm118_vm1, %v1011_v10, 0.0  ;;  %v1234_v49 = vpop.xlane.xlu2 %1233  ;;  %v1331_v12 = vpop.xlane.xlu0 %1330 }
 0x8ff   :  { %1017 = vadd.xlane.f32.xlu1 %v1016_v40  ;;  %v1238_v18 = vmul.f32 0.35355338, %v1234_v49 }
 0x905   :  { %v1309_v34 = vpop.permute.xlu1 %1308 }
 0x906   :  { %v1315_v26 = vsel %vm118_vm1, %v1309_v34, 0.0  ;;  %v1021_v58 = vpop.xlane.xlu2 %1020 }
 0x907   :  { %1316 = vadd.xlane.f32.xlu1 %v1315_v26  ;;  %v1023_v38 = vmul.f32 0.35355338, %v1021_v58 }
 0x90d   :  { %v1335_v2 = vpop.permute.xlu1 %1334 }
 0x90e   :  { %v1340_v20 = vsel %vm118_vm1, %v1335_v2, 0.0 }
 0x90f   :  { %1341 = vadd.xlane.f32.xlu1 %v1340_v20  ;;  %v1009_v20 = vmul.f32 0.35355338, %v1007_v24  ;;  %v1328_v24 = vpop.xlane.xlu2 %1327 }
 0x911   :  { %v1025_v61 = vsel %vm163_vm2, %v995_v28, %v1009_v20 }
 0x912   :  { %v1027_v49 = vsel %vm166_vm3, %v1025_v61, %v1023_v38  ;;  %v1117_v38 = vmul.f32 0.35355338, %v2395_v46 }
 0x917   :  { %v1345_v61 = vpop.xlane.xlu2 %1344 }
 0x946   :  { %v1138_v10 = vpop.xlane.xlu0 %1137 }
 0x947   :  { %v1142_v26 = vsub.f32 %v1134_v47, %v1138_v10  ;;  %v1031_v47 = vsel %vm169_vm4, %v1027_v49, -inf }
 0x949   :  { %v1144_v35 = vmul.f32 1.442695, %v1142_v26 }
 0x94a   :  { %v1101_v36 = vpop.xlane.xlu1 %1100 }
 0x94b   :  { %1689 = vpow2.f32 %v1144_v35 }
 0x951   :  { %v2423_v32 = vpop.eup %1689 }
 0x952   :  { %v1206_v48 = vpop.xlane.xlu1 %1205  ;;  %v1148_v28 = vsel %vm169_vm4, %v2423_v32, 0.0 }
 0x953   :  { %v1210_v40 = vmul.f32 0.35355338, %v1206_v48  ;;  %v1239_v48 = vmul.f32 0.35355338, %v1237_v31 }
 0x955   :  { %v1240_v34 = vsel %vm163_vm2, %v1210_v40, %v1224_v54  ;;  %v994_v40 = vmul.f32 0.35355338, %v990_v63 }
 0x956   :  { %v1242_v2 = vsel %vm166_vm3, %v1240_v34, %v1238_v18 }
 0x957   :  { %v1244_v53 = vsel %vm169_vm4, %v1242_v2, -inf }
 0x958   :  { %1245 = vmax.xlane.f32.xlu2 %v1244_v53 }
 0x95a   :  { %v1223_v42 = vpop.xlane.xlu1 %1222 }
 0x95b   :  { %v1225_v25 = vmul.f32 0.35355338, %v1223_v42  ;;  %v1103_v42 = vmul.f32 0.35355338, %v1101_v36 }
 0x95d   :  { %v1241_v54 = vsel %vm163_vm2, %v1211_v16, %v1225_v25  ;;  %v1133_v16 = vsel %vm163_vm2, %v1103_v42, %v1117_v38  ;;  %v1318_v38 = vmul.f32 0.35355338, %v1314_v43 }
 0x95e   :  { %v1243_v18 = vsel %vm166_vm3, %v1241_v54, %v1239_v48  ;;  %v1333_v54 = vmul.f32 0.35355338, %v1331_v12 }
 0x95f   :  { %v1247_v58 = vsel %vm169_vm4, %v1243_v18, -inf }
 0x960   :  { %1032 = vmax.xlane.f32.xlu2 %v1031_v47  ;;  %1248 = vmax.xlane.f32.xlu0 %v1247_v58  ;;  %v1347_v58 = vmul.f32 0.35355338, %v1345_v61 }
 0x962   :  { %v1004_v53 = vpop.xlane.xlu1 %1003 }
 0x963   :  { %v1008_v10 = vmul.f32 0.35355338, %v1004_v53  ;;  %v1332_v53 = vmul.f32 0.35355338, %v1328_v24 }
 0x965   :  { %v1024_v20 = vsel %vm163_vm2, %v994_v40, %v1008_v10 }
 0x968   :  { %1149 = vadd.xlane.f32.xlu2 %v1148_v28 }
 0x96a   :  { %v1129_v25 = vpop.xlane.xlu1 %1128 }
 0x96b   :  { %v1131_v35 = vmul.f32 0.35355338, %v1129_v25 }
 0x96d   :  { %v1135_v33 = vsel %vm166_vm3, %v1133_v16, %v1131_v35  ;;  %v1348_v16 = vsel %vm163_vm2, %v1318_v38, %v1332_v53 }
 0x96e   :  { %v1139_v31 = vsel %vm169_vm4, %v1135_v33, -inf }
 0x96f   :  { %1140 = vmax.xlane.f32.xlu1 %v1139_v31 }
 0x972   :  { %v1018_v34 = vpop.xlane.xlu1 %1017 }
 0x973   :  { %v1022_v26 = vmul.f32 0.35355338, %v1018_v34 }
 0x975   :  { %v1026_v36 = vsel %vm166_vm3, %v1024_v20, %v1022_v26 }
 0x976   :  { %v1028_v46 = vsel %vm169_vm4, %v1026_v36, -inf }
 0x977   :  { %1029 = vmax.xlane.f32.xlu1 %v1028_v46 }
 0x97a   :  { %v1317_v48 = vpop.xlane.xlu1 %1316 }
 0x97b   :  { %v1319_v47 = vmul.f32 0.35355338, %v1317_v48 }
 0x97d   :  { %v1349_v28 = vsel %vm163_vm2, %v1319_v47, %v1333_v54  ;;  %v1727_v47 = vmov 0  }
 0x97e   :  { %v1351_v42 = vsel %vm166_vm3, %v1349_v28, %v1347_v58  ;;  %1603 = vset.pattern.permute.xlu1 %v1727_v47  ;;  %1605 = vset.pattern.permute.xlu0 %v1727_v47 }
 0x97f   :  { %v1355_v63 = vsel %vm169_vm4, %v1351_v42, -inf  ;;  %1604 = vset.pattern.permute.xlu2 %v1727_v47 }
 0x980   :  { %1356 = vmax.xlane.f32.xlu1 %v1355_v63 }
 0x982   :  { %v1342_v25 = vpop.xlane.xlu1 %1341 }
 0x983   :  { %v1346_v35 = vmul.f32 0.35355338, %v1342_v25 }
 0x985   :  { %v1350_v31 = vsel %vm166_vm3, %v1348_v16, %v1346_v35 }
 0x986   :  { %v1352_v10 = vsel %vm169_vm4, %v1350_v31, -inf }
 0x987   :  { %1353 = vmax.xlane.f32.xlu0 %v1352_v10 }
 0x9cb   :  { %v1246_v12 = vpop.xlane.xlu2 %1245 }
 0x9cc   :  { %v1250_v40 = vsub.f32 %v1242_v2, %v1246_v12 }
 0x9ce   :  { %v1252_v34 = vmul.f32 1.442695, %v1250_v40 }
 0x9d0   :  { %1691 = vpow2.f32 %v1252_v34 }
 0x9d3   :  { %v1033_v26 = vpop.xlane.xlu2 %1032  ;;  %v1249_v20 = vpop.xlane.xlu0 %1248 }
 0x9d4   :  { %v1035_v46 = vsub.f32 %v1027_v49, %v1033_v26  ;;  %v1251_v61 = vsub.f32 %v1243_v18, %v1249_v20 }
 0x9d6   :  { %v2440_v24 = vpop.eup %1691  ;;  %v1038_v43 = vmul.f32 1.442695, %v1035_v46  ;;  %v1254_v48 = vmul.f32 1.442695, %v1251_v61 }
 0x9d7   :  { %v1256_v54 = vsel %vm169_vm4, %v2440_v24, 0.0 }
 0x9d8   :  { %1693 = vpow2.f32 %v1038_v43  ;;  %1257 = vadd.xlane.f32.xlu1 %v1256_v54 }
 0x9d9   :  { %1695 = vpow2.f32 %v1254_v48 }
 0x9de   :  { %v2447_v2 = vpop.eup %1693 }
 0x9df   :  { %v2449_v49 = vpop.eup %1695  ;;  %v1043_v18 = vsel %vm169_vm4, %v2447_v2, 0.0 }
 0x9e0   :  { %1044 = vadd.xlane.f32.xlu1 %v1043_v18  ;;  %v1259_v58 = vsel %vm169_vm4, %v2449_v49, 0.0 }
 0x9e1   :  { %1260 = vadd.xlane.f32.xlu2 %v1259_v58 }
 0x9e2   :  { %v1141_v28 = vpop.xlane.xlu1 %1140 }
 0x9e3   :  { %v1143_v63 = vsub.f32 %v1135_v33, %v1141_v28 }
 0x9e5   :  { %v1146_v53 = vmul.f32 1.442695, %v1143_v63 }
 0x9e7   :  { %1697 = vpow2.f32 %v1146_v53 }
 0x9ea   :  { %v1030_v38 = vpop.xlane.xlu1 %1029 }
 0x9eb   :  { %v1034_v25 = vsub.f32 %v1026_v36, %v1030_v38 }
 0x9ed   :  { %v1698_v35 = vpop.eup %1697  ;;  %v1036_v16 = vmul.f32 1.442695, %v1034_v25 }
 0x9ee   :  { %v1151_v10 = vsel %vm169_vm4, %v1698_v35, 0.0 }
 0x9ef   :  { %1699 = vpow2.f32 %v1036_v16  ;;  %1152 = vadd.xlane.f32.xlu0 %v1151_v10 }
 0x9f3   :  { %v1357_v12 = vpop.xlane.xlu1 %1356 }
 0x9f4   :  { %v1359_v40 = vsub.f32 %v1351_v42, %v1357_v12 }
 0x9f5   :  { %v2456_v34 = vpop.eup %1699 }
 0x9f6   :  { %v1362_v26 = vmul.f32 1.442695, %v1359_v40  ;;  %v1040_v20 = vsel %vm169_vm4, %v2456_v34, 0.0 }
 0x9f7   :  { %1041 = vadd.xlane.f32.xlu0 %v1040_v20 }
 0x9f8   :  { %1701 = vpow2.f32 %v1362_v26 }
 0x9f9   :  { %295 = vperm.xlu1 %1603, %v2263_v14   ;;  %v1150_v14 = vpop.xlane.xlu2 %1149 }
 0x9fa   :  { %v1354_v33 = vpop.xlane.xlu0 %1353 }
 0x9fb   :  { %v1358_v36 = vsub.f32 %v1350_v31, %v1354_v33 }
 0x9fd   :  { %v1360_v46 = vmul.f32 1.442695, %v1358_v36 }
 0x9fe   :  { %v2461_v61 = vpop.eup %1701 }
 0x9ff   :  { %1703 = vpow2.f32 %v1360_v46  ;;  %v1367_v43 = vsel %vm169_vm4, %v2461_v61, 0.0 }
 0xa00   :  { %1368 = vadd.xlane.f32.xlu0 %v1367_v43  ;;  %1705 = vrcp.f32 %v1150_v14  ;;  %v749_v43 = vmul.f32 %v2391_v37, %v1809_v13 }
 0xa01   :  { %391 = vperm.xlu1 %1603, %v2184_v56  }
 0xa05   :  { %v2466_v42 = vpop.eup %1703 }
 0xa06   :  { %v1364_v48 = vsel %vm169_vm4, %v2466_v42, 0.0  ;;  %v1706_v31 = vpop.eup %1705 }
 0xa07   :  { %1365 = vadd.xlane.f32.xlu2 %v1364_v48 }
 0xa09   :  { %500 = vperm.xlu1 %1603, %v2246_v44   ;;  %v2480_v44 = vmul.f32 %v1706_v31, %v2423_v32 }
 0xa11   :  { %614 = vperm.xlu1 %1603, %v2250_v5  }
 0xa14   :  { %194 = vperm.xlu0 %1605, %v2175_v0  }
 0xa19   :  { %728 = vperm.xlu1 %1603, %v2280_v6  }
 0xa1c   :  { %290 = vperm.xlu0 %1605, %v2180_v51  }
 0xa1f   :  { %199 = vperm.xlu2 %1604, %v2236_v8  }
 0xa21   :  { %944 = vperm.xlu1 %1603, %v2286_v39  }
 0xa24   :  { %386 = vperm.xlu0 %1605, %v2242_v23  }
 0xa27   :  { %733 = vperm.xlu2 %1604, %v2193_v52  }
 0xa29   :  { %1160 = vperm.xlu1 %1603, %v2480_v44  }
 0xa2c   :  { %505 = vperm.xlu0 %1605, %v2271_v1  }
 0xa2f   :  { %841 = vperm.xlu2 %1604, %v2257_v27   ;;  %v2737_v27 = vmov 1  }
 0xa34   :  { %619 = vperm.xlu0 %1605, %v2276_v45   ;;  %v2738_v45 = vmov 2  }
 0xa3c   :  { %836 = vperm.xlu0 %1605, %v2318_v21  }
 0xa44   :  { %949 = vperm.xlu0 %1605, %v2348_v59  }
 0xa4b   :  { %v1258_v0 = vpop.xlane.xlu1 %1257 }
 0xa4c   :  { %1707 = vrcp.f32 %v1258_v0  ;;  %v761_v0 = vmul.f32 %v2210_v60, %v1815_v17  ;;  %v226_v60 = vmul.f32 %v2204_v30, %v1812_v15  ;;  %v406_v30 = vmul.f32 %v2315_v22, %v1803_v9 }
 0xa52   :  { %v1708_v51 = vpop.eup %1707 }
 0xa53   :  { %v1045_v23 = vpop.xlane.xlu1 %1044  ;;  %v1264_v52 = vmul.f32 %v1708_v51, %v2440_v24  ;;  %v214_v51 = vmul.f32 %v2375_v57, %v1803_v9 }
 0xa54   :  { %1709 = vrcp.f32 %v1045_v23  ;;  %v1261_v63 = vpop.xlane.xlu2 %1260  ;;  %v310_v23 = vmul.f32 %v2307_v19, %v1803_v9  ;;  %v322_v19 = vmul.f32 %v2206_v55, %v1812_v15 }
 0xa55   :  { %1268 = vperm.xlu1 %1603, %v1264_v52  }
 0xa5a   :  { %v1710_v39 = vpop.eup %1709 }
 0xa5b   :  { %v2490_v32 = vmul.f32 %v1710_v39, %v2447_v2  ;;  %v311_v2 = vmul.f32 %v2381_v62, %v1809_v13 }
 0xa5d   :  { %1057 = vperm.xlu0 %1605, %v2490_v32   ;;  %1608 = vset.pattern.permute.xlu1 %v2737_v27 }
 0xa5e   :  { %1281 = vperm.xlu1 %1608, %v1264_v52  }
 0xa62   :  { %v1153_v1 = vpop.xlane.xlu0 %1152 }
 0xa63   :  { %1711 = vrcp.f32 %v1153_v1 }
 0xa65   :  { %1611 = vset.pattern.permute.xlu0 %v2738_v45 }
 0xa66   :  { %223 = vperm.xlu0 %1611, %v2236_v8   ;;  %1610 = vset.pattern.permute.xlu1 %v1727_v47 }
 0xa69   :  { %v1712_v59 = vpop.eup %1711 }
 0xa6a   :  { %v1042_v24 = vpop.xlane.xlu0 %1041  ;;  %v1157_v54 = vmul.f32 %v1712_v59, %v1698_v35 }
 0xa6b   :  { %1713 = vrcp.f32 %v1042_v24  ;;  %v296_v18 = vpop.permute.xlu1 %295 }
 0xa6c   :  { %v299_v58 = vmul.f32 %v296_v18, %v1805_v11  ;;  %1165 = vperm.xlu2 %1604, %v1157_v54   ;;  %1715 = vrcp.f32 %v1261_v63  ;;  %v964_v18 = vmul.f32 %v2341_v50, %v1803_v9  ;;  %v2739_v50 = vld [vmem:[#allocation4_spill] sm:$0xff] }
 0xa6e   :  { %v2500_v28 = vadd.f32 %v311_v2, %v299_v58  ;;  %639 = vperm.xlu0 %1611, %v2250_v5   ;;  %v520_v5 = vmul.f32 %v2325_v29, %v1803_v9  ;;  %v215_v29 = vmul.f32 %v2298_v4, %v1809_v13  ;;  %v976_v58 = vmul.f32 %v2399_v3, %v1812_v15 }
 0xa71   :  { %v1714_v53 = vpop.eup %1713 }
 0xa72   :  { %v2504_v8 = vmul.f32 %v1714_v53, %v2456_v34  ;;  %v1716_v62 = vpop.eup %1715 }
 0xa73   :  { %v2506_v38 = vpop.permute.xlu1 %391  ;;  %v2516_v10 = vmul.f32 %v1716_v62, %v2449_v49  ;;  %v1369_v12 = vpop.xlane.xlu0 %1368  ;;  %v634_v49 = vmul.f32 %v2331_v41, %v1803_v9 }
 0xa74   :  { %1606 = vset.pattern.permute.xlu2 %v2737_v27  ;;  %1052 = vperm.xlu1 %1610, %v2504_v8  }
 0xa75   :  { %1177 = vperm.xlu2 %1606, %v1157_v54  }
 0xa76   :  { %861 = vperm.xlu0 %1611, %v2318_v21  }
 0xa7a   :  { %v1366_v25 = vpop.xlane.xlu2 %1365 }
 0xa7b   :  { %v501_v35 = vpop.permute.xlu1 %500  ;;  %1717 = vrcp.f32 %v1366_v25  ;;  %v418_v25 = vmul.f32 %v2739_v50, %v1812_v15 }
 0xa7c   :  { %v508_v16 = vmul.f32 %v501_v35, %v1800_v7  ;;  %1612 = vset.pattern.permute.xlu1 %v2737_v27  ;;  %1719 = vrcp.f32 %v1369_v12 }
 0xa7d   :  { %1607 = vset.pattern.permute.xlu2 %v1727_v47  ;;  %1069 = vperm.xlu1 %1612, %v2490_v32  }
 0xa7e   :  { %v2520_v40 = vadd.f32 %v520_v5, %v508_v16  ;;  %1293 = vperm.xlu0 %1611, %v1264_v52   ;;  %1273 = vperm.xlu2 %1607, %v2516_v10  }
 0xa81   :  { %v1718_v46 = vpop.eup %1717 }
 0xa82   :  { %v200_v21 = vpop.permute.xlu2 %199  ;;  %v2551_v39 = vmul.f32 %v1718_v46, %v2466_v42  ;;  %v1720_v3 = vpop.eup %1719 }
 0xa83   :  { %v203_v34 = vmul.f32 %v200_v21, %v1805_v11  ;;  %v615_v26 = vpop.permute.xlu1 %614  ;;  %v1373_v16 = vmul.f32 %v1720_v3, %v2461_v61  ;;  %v2740_v21 = vld [vmem:[#allocation11_spill] sm:$0xff] }
 0xa84   :  { %v622_v20 = vmul.f32 %v615_v26, %v1800_v7 }
 0xa85   :  { %v2529_v33 = vadd.f32 %v215_v29, %v203_v34  ;;  %1614 = vset.pattern.permute.xlu1 %v2738_v45  ;;  %v2741_v34 = vld [vmem:[#allocation12_spill] sm:$0xff] }
 0xa86   :  { %v2532_v36 = vadd.f32 %v634_v49, %v622_v20  ;;  %1615 = vset.pattern.permute.xlu0 %v2737_v27  ;;  %1609 = vset.pattern.permute.xlu2 %v2737_v27  ;;  %v195_v4 = vpop.permute.xlu0 %194  ;;  %v635_v26 = vmul.f32 %v2741_v34, %v1809_v13  ;;  %v2743_v20 = vld [vmem:[#allocation7_spill] sm:$0xff] }
 0xa87   :  { %1189 = vperm.xlu1 %1614, %v1157_v54   ;;  %403 = vperm.xlu0 %1615, %v2184_v56   ;;  %v202_v48 = vmul.f32 %v195_v4, %v1800_v7  ;;  %v647_v4 = vmul.f32 %v2743_v20, %v1815_v17 }
 0xa88   :  { %1285 = vperm.xlu2 %1609, %v2516_v10  }
 0xa89   :  { %v216_v37 = vadd.f32 %v214_v51, %v202_v48 }
 0xa8a   :  { %v734_v41 = vpop.permute.xlu2 %733 }
 0xa8b   :  { %v737_v14 = vmul.f32 %v734_v41, %v1805_v11  ;;  %v2542_v31 = vpop.permute.xlu1 %728  ;;  %v228_v42 = vadd.f32 %v226_v60, %v216_v37 }
 0xa8d   :  { %v751_v56 = vadd.f32 %v749_v43, %v737_v14 }
 0xa8e   :  { %v291_v52 = vpop.permute.xlu0 %290 }
 0xa8f   :  { %v763_v1 = vadd.f32 %v761_v0, %v751_v56  ;;  %1616 = vset.pattern.permute.xlu1 %v1727_v47  ;;  %v298_v59 = vmul.f32 %v291_v52, %v1800_v7  ;;  %741 = vperm.xlu0 %1615, %v2280_v6   ;;  %v2744_v0 = vld [vmem:[#allocation13_spill] sm:$0xff] }
 0xa90   :  { %1065 = vperm.xlu2 %1609, %v2504_v8   ;;  %1376 = vperm.xlu1 %1616, %v2551_v39   ;;  %v856_v51 = vmul.f32 %v2744_v0, %v1803_v9 }
 0xa91   :  { %v312_v57 = vadd.f32 %v310_v23, %v298_v59  ;;  %v2745_v59 = vld [vmem:[#allocation8_spill] sm:$0xff] }
 0xa92   :  { %v842_v52 = vpop.permute.xlu2 %841  ;;  %v857_v60 = vmul.f32 %v2745_v59, %v1809_v13  ;;  %v2751_v59 = vld [vmem:[#allocation2_spill] sm:$0xff] }
 0xa93   :  { %v324_v24 = vadd.f32 %v322_v19, %v312_v57  ;;  %v945_v54 = vpop.permute.xlu1 %944  ;;  %v2746_v57 = vld [vmem:[#allocation14_spill] sm:$0xff] }
 0xa94   :  { %v952_v6 = vmul.f32 %v945_v54, %v1800_v7  ;;  %v2747_v54 = vld [vmem:[#allocation10_spill] sm:$0xff] }
 0xa95   :  { %v326_v2 = vadd.f32 %v324_v24, %v228_v42  ;;  %v965_v42 = vmul.f32 %v2746_v57, %v1809_v13 }
 0xa96   :  { %v966_v63 = vadd.f32 %v964_v18, %v952_v6  ;;  %v387_v53 = vpop.permute.xlu0 %386  ;;  %v869_v18 = vmul.f32 %v2747_v54, %v1815_v17  ;;  %v2748_v6 = vld [vmem:[#allocation15_spill] sm:$0xff] }
 0xa97   :  { %v394_v55 = vmul.f32 %v387_v53, %v1800_v7  ;;  %1173 = vperm.xlu0 %1615, %v2480_v44  }
 0xa98   :  { %v2571_v62 = vadd.f32 %v976_v58, %v966_v63  ;;  %1613 = vset.pattern.permute.xlu2 %v2738_v45  ;;  %1618 = vset.pattern.permute.xlu1 %v2737_v27 }
 0xa99   :  { %v408_v35 = vadd.f32 %v406_v30, %v394_v55  ;;  %1185 = vperm.xlu2 %1613, %v2480_v44   ;;  %1389 = vperm.xlu1 %1618, %v2551_v39   ;;  %v521_v44 = vmul.f32 %v2740_v21, %v1809_v13 }
 0xa9b   :  { %v420_v22 = vadd.f32 %v418_v25, %v408_v35  ;;  %v1161_v30 = vpop.permute.xlu1 %1160 }
 0xa9d   :  { %v422_v5 = vadd.f32 %v420_v22, %v326_v2 }
 0xa9e   :  { %v506_v12 = vpop.permute.xlu0 %505 }
 0xa9f   :  { %1393 = vperm.xlu0 %1615, %v1373_v16   ;;  %v509_v27 = vmul.f32 %v506_v12, %v1805_v11  ;;  %v2749_v12 = vld [vmem:[#allocation3_spill] sm:$0xff] }
 0xaa1   :  { %1297 = vperm.xlu2 %1613, %v2516_v10   ;;  %1620 = vset.pattern.permute.xlu1 %v2738_v45  ;;  %v523_v49 = vadd.f32 %v521_v44, %v509_v27  ;;  %v2742_v10 = vld [vmem:[#allocation6_spill] sm:$0xff] }
 0xaa2   :  { %1081 = vperm.xlu1 %1620, %v2490_v32   ;;  %v533_v32 = vmul.f32 %v2742_v10, %v1815_v17 }
 0xaa4   :  { %v535_v46 = vadd.f32 %v533_v32, %v523_v49  ;;  %v2750_v49 = vld [vmem:[#allocation5_spill] sm:$0xff] }
 0xaa6   :  { %v620_v29 = vpop.permute.xlu0 %619 }
 0xaa7   :  { %v623_v61 = vmul.f32 %v620_v29, %v1805_v11  ;;  %1416 = vrot.lane.b32.xlu0 %v422_v5, %s1728_s20 }
 0xaa8   :  { %1621 = vset.pattern.permute.xlu0 %v2738_v45 }
 0xaa9   :  { %v637_v41 = vadd.f32 %v635_v26, %v623_v61  ;;  %1617 = vset.pattern.permute.xlu2 %v1727_v47  ;;  %v845_v47 = vmul.f32 %v842_v52, %v1805_v11  ;;  %v532_v61 = vmul.f32 %v2750_v49, %v1812_v15 }
 0xaaa   :  { %1405 = vperm.xlu1 %1620, %v1373_v16   ;;  %1381 = vperm.xlu2 %1617, %v1373_v16  }
 0xaab   :  { %v649_v43 = vadd.f32 %v647_v4, %v637_v41  ;;  %v859_v24 = vadd.f32 %v857_v60, %v845_v47  ;;  %v534_v20 = vadd.f32 %v532_v61, %v2520_v40  ;;  %v395_v47 = vmul.f32 %v2506_v38, %v1805_v11  ;;  %v2752_v38 = vld [vmem:[#allocation9_spill] sm:$0xff] }
 0xaac   :  { %v419_v60 = vmul.f32 %v2751_v59, %v1815_v17  ;;  %v760_v54 = vmul.f32 %v2752_v38, %v1812_v15 }
 0xaad   :  { %v651_v48 = vadd.f32 %v649_v43, %v535_v46  ;;  %v871_v58 = vadd.f32 %v869_v18, %v859_v24 }
 0xaae   :  { %v837_v14 = vpop.permute.xlu0 %836 }
 0xaaf   :  { %v844_v56 = vmul.f32 %v837_v14, %v1800_v7  ;;  %v765_v23 = vadd.f32 %v763_v1, %v651_v48 }
 0xab1   :  { %v858_v37 = vadd.f32 %v856_v51, %v844_v56  ;;  %1426 = vrot.lane.b32.xlu0 %v765_v23, %s1728_s20 }
 0xab2   :  { %1619 = vset.pattern.permute.xlu2 %v2738_v45  ;;  %v977_v45 = vmul.f32 %v2748_v6, %v1815_v17 }
 0xab3   :  { %1077 = vperm.xlu2 %1619, %v2504_v8  }
 0xab6   :  { %v950_v19 = vpop.permute.xlu0 %949 }
 0xab7   :  { %v953_v1 = vmul.f32 %v950_v19, %v1805_v11 }
 0xab9   :  { %v967_v2 = vadd.f32 %v965_v42, %v953_v1 }
 0xabb   :  { %v979_v63 = vadd.f32 %v977_v45, %v967_v2  ;;  %1401 = vperm.xlu2 %1619, %v2551_v39   ;;  %v323_v39 = vmul.f32 %v2749_v12, %v1815_v17 }
 0xabd   :  { %v2613_v8 = vadd.f32 %v979_v63, %v871_v58  ;;  %v325_v21 = vadd.f32 %v323_v39, %v2500_v28 }
 0xac6   :  { %v1166_v53 = vpop.permute.xlu2 %1165 }
 0xac7   :  { %v1169_v25 = vmul.f32 %v1166_v53, %v1805_v11  ;;  %v1269_v22 = vpop.permute.xlu1 %1268 }
 0xacf   :  { %v1178_v55 = vpop.permute.xlu2 %1177  ;;  %v2615_v50 = vpop.permute.xlu0 %1057 }
 0xad0   :  { %v1181_v35 = vmul.f32 %v1178_v55, %v1809_v13  ;;  %v1282_v34 = vpop.permute.xlu1 %1281 }
 0xad1   :  { %v1288_v39 = vmul.f32 %v1282_v34, %v1803_v9 }
 0xad2   :  { %v2619_v3 = vadd.f32 %v1181_v35, %v1169_v25  ;;  %v1168_v35 = vmul.f32 %v1161_v30, %v1800_v7  ;;  %v1061_v30 = vmul.f32 %v2615_v50, %v1805_v11 }
 0xad8   :  { %v2621_v5 = vpop.permute.xlu2 %1273  ;;  %v224_v16 = vpop.permute.xlu0 %223 }
 0xad9   :  { %v227_v27 = vmul.f32 %v224_v16, %v1815_v17  ;;  %v1277_v50 = vmul.f32 %v2621_v5, %v1805_v11 }
 0xadb   :  { %v229_v44 = vadd.f32 %v227_v27, %v2529_v33 }
 0xadd   :  { %v327_v29 = vadd.f32 %v325_v21, %v229_v44  ;;  %v1276_v44 = vmul.f32 %v1269_v22, %v1800_v7 }
 0xae0   :  { %v640_v26 = vpop.permute.xlu0 %639 }
 0xae1   :  { %v646_v10 = vmul.f32 %v640_v26, %v1812_v15 }
 0xae2   :  { %v1286_v32 = vpop.permute.xlu2 %1285 }
 0xae3   :  { %v648_v4 = vadd.f32 %v646_v10, %v2532_v36  ;;  %v1289_v22 = vmul.f32 %v1286_v32, %v1809_v13 }
 0xae5   :  { %v650_v41 = vadd.f32 %v648_v4, %v534_v20  ;;  %v1290_v20 = vadd.f32 %v1288_v39, %v1276_v44 }
 0xae6   :  { %v1053_v46 = vpop.permute.xlu1 %1052 }
 0xae8   :  { %v862_v43 = vpop.permute.xlu0 %861 }
 0xae9   :  { %v868_v28 = vmul.f32 %v862_v43, %v1812_v15 }
 0xaea   :  { %v1066_v48 = vpop.permute.xlu2 %1065 }
 0xaeb   :  { %v870_v33 = vadd.f32 %v868_v28, %v858_v37  ;;  %v1072_v63 = vmul.f32 %v1066_v48, %v1803_v9 }
 0xaed   :  { %v980_v14 = vadd.f32 %v2571_v62, %v870_v33  ;;  %v736_v62 = vmul.f32 %v2542_v31, %v1800_v7  ;;  %v1060_v31 = vmul.f32 %v1053_v46, %v1800_v7 }
 0xaef   :  { %v1070_v0 = vpop.permute.xlu1 %1069  ;;  %v1074_v16 = vadd.f32 %v1072_v63, %v1060_v31 }
 0xaf0   :  { %v1294_v51 = vpop.permute.xlu0 %1293 }
 0xaf1   :  { %v1300_v26 = vmul.f32 %v1294_v51, %v1812_v15 }
 0xaf3   :  { %v1186_v56 = vpop.permute.xlu2 %1185  ;;  %v1302_v48 = vadd.f32 %v1300_v26, %v1290_v20 }
 0xaf4   :  { %v1192_v49 = vmul.f32 %v1186_v56, %v1812_v15 }
 0xaf9   :  { %v1190_v23 = vpop.permute.xlu1 %1189  ;;  %v404_v52 = vpop.permute.xlu0 %403 }
 0xafa   :  { %v407_v40 = vmul.f32 %v404_v52, %v1809_v13  ;;  %v1291_v52 = vadd.f32 %v1289_v22, %v1277_v50  ;;  %v1193_v32 = vmul.f32 %v1190_v23, %v1815_v17 }
 0xafb   :  { %v1298_v36 = vpop.permute.xlu2 %1297 }
 0xafc   :  { %v409_v19 = vadd.f32 %v407_v40, %v395_v47  ;;  %v1195_v5 = vadd.f32 %v1193_v32, %v2619_v3 }
 0xafe   :  { %v421_v57 = vadd.f32 %v419_v60, %v409_v19 }
 0xb00   :  { %v423_v42 = vadd.f32 %v421_v57, %v327_v29  ;;  %v1073_v29 = vmul.f32 %v1070_v0, %v1809_v13 }
 0xb01   :  { %v742_v37 = vpop.permute.xlu0 %741 }
 0xb02   :  { %v1377_v24 = vpop.permute.xlu1 %1376  ;;  %v748_v1 = vmul.f32 %v742_v37, %v1803_v9  ;;  %1418 = vrot.lane.b32.xlu2 %v423_v42, %s1728_s20  ;;  %v1075_v46 = vadd.f32 %v1073_v29, %v1061_v30  ;;  %v1624_v29 = vld [vmem:[%s2716_s8] ss:$0 sm:$0xff] }
 0xb03   :  { %v1384_v4 = vmul.f32 %v1377_v24, %v1800_v7  ;;  %v1301_v7 = vmul.f32 %v1298_v36, %v1815_v17 }
 0xb04   :  { %v750_v18 = vadd.f32 %v748_v1, %v736_v62  ;;  %v1382_v6 = vpop.permute.xlu2 %1381 }
 0xb05   :  { %v1303_v60 = vadd.f32 %v1301_v7, %v1291_v52  ;;  %v1385_v19 = vmul.f32 %v1382_v6, %v1805_v11  ;;  %v1584_v11 = vld [vmem:[%s2715_s5] sm:$0xff] }
 0xb06   :  { %v762_v45 = vadd.f32 %v760_v54, %v750_v18 }
 0xb07   :  { %v1305_v42 = vadd.f32 %v1303_v60, %v1195_v5 }
 0xb08   :  { %v764_v2 = vadd.f32 %v762_v45, %v650_v41 }
 0xb09   :  { %v1174_v58 = vpop.permute.xlu0 %1173 }
 0xb0a   :  { %1424 = vrot.lane.b32.xlu1 %v764_v2, %s1728_s20  ;;  %v1180_v55 = vmul.f32 %v1174_v58, %v1803_v9 }
 0xb0b   :  { %v1390_v53 = vpop.permute.xlu1 %1389 }
 0xb0c   :  { %v1182_v27 = vadd.f32 %v1180_v55, %v1168_v35  ;;  %v1396_v61 = vmul.f32 %v1390_v53, %v1803_v9  ;;  %v1586_v35 = vld [vmem:[%s2717_s7] sm:$0xff] }
 0xb0d   :  { %v1078_v25 = vpop.permute.xlu2 %1077 }
 0xb0e   :  { %v1084_v12 = vmul.f32 %v1078_v25, %v1812_v15  ;;  %v1194_v34 = vadd.f32 %v1192_v49, %v1182_v27  ;;  %v1398_v33 = vadd.f32 %v1396_v61, %v1384_v4  ;;  %v1587_v25 = vld [vmem:[%s2717_s7 + $0x8] sm:$0xff] }
 0xb0f   :  { %1524 = vmatpush.bf16.msra.mxu2 %v1587_v25 }
 0xb10   :  { %v1086_v21 = vadd.f32 %v1084_v12, %v1074_v16  ;;  %v1304_v51 = vadd.f32 %v1302_v48, %v1194_v34  ;;  %v1623_v12 = vld [vmem:[%s2714_s6] ss:$0 sm:$0xff] }
 0xb11   :  { %v1394_v9 = vpop.permute.xlu0 %1393 }
 0xb12   :  { %v1088_v10 = vadd.f32 %v1086_v21, %v980_v14  ;;  %v1397_v47 = vmul.f32 %v1394_v9, %v1809_v13  ;;  %v1585_v13 = vld [vmem:[%s2715_s5 + $0x8] sm:$0xff] }
 0xb13   :  { %1486 = vmatpush.bf16.msra.mxu1 %v1585_v13  ;;  %1525 = vmatpush.bf16.msra.mxu2 %v1586_v35 }
 0xb14   :  { %v1082_v41 = vpop.permute.xlu1 %1081  ;;  %1432 = vrot.lane.b32.xlu2 %v1088_v10, %s1728_s20  ;;  %v1399_v36 = vadd.f32 %v1397_v47, %v1385_v19 }
 0xb15   :  { %v1085_v43 = vmul.f32 %v1082_v41, %v1815_v17  ;;  %v1402_v28 = vpop.permute.xlu2 %1401 }
 0xb16   :  { %v1408_v14 = vmul.f32 %v1402_v28, %v1812_v15 }
 0xb17   :  { %v1087_v0 = vadd.f32 %v1085_v43, %v1075_v46  ;;  %1487 = vmatpush.bf16.msra.mxu1 %v1584_v11 }
 0xb18   :  { %v1410_v56 = vadd.f32 %v1408_v14, %v1398_v33 }
 0xb19   :  { %v1089_v40 = vadd.f32 %v1087_v0, %v2613_v8  ;;  %v1417_v8 = vpop.permute.xlu0 %1416 }
 0xb1a   :  { %v1412_v59 = vadd.f32 %v1410_v56, %v1304_v51 }
 0xb1b   :  { %1434 = vrot.lane.b32.xlu1 %v1089_v40, %s1728_s20 }
 0xb1c   :  { %v1406_v15 = vpop.permute.xlu1 %1405  ;;  %1440 = vrot.lane.b32.xlu0 %v1412_v59, %s1728_s20 }
 0xb1d   :  { %v1409_v57 = vmul.f32 %v1406_v15, %v1815_v17 }
 0xb1f   :  { %v1411_v23 = vadd.f32 %v1409_v57, %v1399_v36 }
 0xb21   :  { %v1413_v37 = vadd.f32 %v1411_v23, %v1305_v42 }
 0xb23   :  { %1442 = vrot.lane.b32.xlu2 %v1413_v37, %s1728_s20  ;;  %v1427_v24 = vpop.permute.xlu0 %1426 }
 0xb5c   :  { %v1419_v3 = vpop.permute.xlu2 %1418 }
 0xb5d   :  { %v1447_v38 = vsel %vm118_vm1, %v1419_v3, %v1427_v24 }
 0xb6e   :  { %v1433_v17 = vpop.permute.xlu2 %1432 }
 0xb7c   :  { %v1425_v62 = vpop.permute.xlu1 %1424 }
 0xb7d   :  { %v1446_v1 = vsel %vm118_vm1, %v1417_v8, %v1425_v62  ;;  %v1443_v18 = vpop.permute.xlu2 %1442 }
 0xb7e   :  { %v1449_v45 = vsel %vm1448_vm5, %v1446_v1, %v1433_v17 }
 0xb8d   :  { %v1435_v54 = vpop.permute.xlu1 %1434 }
 0xb8e   :  { %v1450_v6 = vsel %vm1448_vm5, %v1447_v38, %v1435_v54  ;;  %v1441_v2 = vpop.permute.xlu0 %1440 }
 0xb8f   :  { %v1453_v58 = vsel %vm1451_vm6, %v1450_v6, %v1443_v18  ;;  %v1452_v63 = vsel %vm1451_vm6, %v1449_v45, %v1441_v2 }
 0xb90   :  { %v1455_v53 = vmul.f32 0.33333334, %v1453_v58  ;;  %v1454_v31 = vmul.f32 0.33333334, %v1452_v63 }
 0xb92   :  { %v1460_v55 = vpack.c.bf16 %v1455_v53, %v1454_v31 }
 0xb94   :  { %1569 = vmatmul.msk.bf16.vlgmr.msra.gmra.mxu1 %vm74_vm0, %v1460_v55 }
 0xc11   :  { %v1489_v16 = vpop.f32.mrf.mxu1 }
 0xc12   :  { %v1490_v27 = vadd.f32 %v1623_v12, %v1489_v16 }
 0xc19   :  { %v1491_v39 = vpop.f32.mrf.mxu1 }
 0xc1a   :  { %v1492_v21 = vadd.f32 %v1623_v12, %v1491_v39 }
 0xc1c   :  { %v1498_v44 = vpack.c.bf16 %v1492_v21, %v1490_v27 }
 0xc1e   :  { %1578 = vmatmul.msk.bf16.vlgmr.msra.gmra.mxu2 %vm74_vm0, %v1498_v44 }
 0xca1   :  { %v1527_v26 = vpop.f32.mrf.mxu2 }
 0xca2   :  { %v1528_v49 = vadd.f32 %v1624_v29, %v1527_v26 }
 0xca4   :  { %1532 = vst.msk [vmem:[%s2718_s9] sm:$0xff] %vm1451_vm6, %v1528_v49 }
 0xca9   :  { %v1529_v61 = vpop.f32.mrf.mxu2 }
 0xcaa   :  { %v1530_v10 = vadd.f32 %v1624_v29, %v1529_v61 }
 0xcac   :  { %1533 = vst.msk [vmem:[%s2718_s9 + $0x8] sm:$0xff] %vm1451_vm6, %v1530_v10 }

</bundles_post_ra>
